<compile_context>
chip_gen: v6e
topology: v6e:2x2x1
jax: 0.10.0
libtpu: 0.0.40
codegen_flags: <defaults>
</compile_context>

<pallas_src>
import math

import jax
import jax.numpy as jnp
from jax.experimental import pallas as pl
from jax.experimental.pallas import tpu as pltpu

# ---------------- model hyper-parameters (module defaults) ----------------
TOKEN_DIM = 64
HEADS = 4
ENC_DEPTH = 4
DEC_DEPTH = 4
NUM_EMBEDDINGS = 512
FFN_DIM = 2048          # nn.TransformerEncoderLayer default dim_feedforward
BETA = 0.25
LN_EPS = 1e-5
MASK_NEG = -1e9
FF_CHUNK = 512          # FFN hidden-dim tile

_WEIGHT_ORDER = ("wqkv", "bqkv", "wo", "bo", "ln1g", "ln1b",
                 "w1", "b1", "w2", "b2", "ln2g", "ln2b")


def _layernorm(x, g, b):
    mu = jnp.mean(x, axis=-1, keepdims=True)
    xc = x - mu
    var = jnp.mean(xc * xc, axis=-1, keepdims=True)
    return xc * jax.lax.rsqrt(var + LN_EPS) * g + b


# ============================================================================
# Fused stack of L post-norm transformer encoder layers (optionally + VQ on
# the last layer).  grid=(L,); the output ref (constant index map) is the
# VMEM-resident activation across layers.
# ============================================================================
def transformer_stack(x_flat, mask_bias, sp, B, S_pad, vq=None, heads=HEADS):
    """x_flat: (B*S_pad, D) f32; mask_bias: (B, S_pad, S_pad) f32 (0 valid / -1e9 masked keys)."""
    M, D = x_flat.shape
    L = sp["wqkv"].shape[0]
    FF = sp["w1"].shape[-1]
    hd = D // heads
    NW = len(_WEIGHT_ORDER)
    with_vq = vq is not None
    K = vq["embedding"].shape[0] if with_vq else 0

    def kernel(*refs):
        x_ref, maskb_ref = refs[0], refs[1]
        w = dict(zip(_WEIGHT_ORDER, refs[2:2 + NW]))
        pos = 2 + NW
        if with_vq:
            emb_ref, e2_ref, valid_ref = refs[pos:pos + 3]
            pos += 3
        z_ref = refs[pos]
        pos += 1
        if with_vq:
            zq_ref, idx_ref, ssd_ref = refs[pos:pos + 3]

        l = pl.program_id(0)

        @pl.when(l == 0)
        def _():
            z_ref[...] = x_ref[...]

        x = z_ref[...]                               # (M, D) f32, resident activation
        xb = x.astype(jnp.bfloat16)

        # ---- fused Q/K/V projection: one (M,D)x(D,3D) bf16 matmul ----
        qkv = jnp.dot(xb, w["wqkv"][0], preferred_element_type=jnp.float32) + w["bqkv"][0]
        qkv3 = qkv.astype(jnp.bfloat16).reshape(B, S_pad, 3 * D)
        maskb = maskb_ref[...]                       # (B, S_pad, S_pad) f32
        wo_full = w["wo"][0]                         # (D, D) bf16

        # ---- attention: batched over B per head; scale folded into wq ----
        acc = jnp.zeros((M, D), jnp.float32)
        for hh in range(heads):
            c0 = hh * hd
            qh = qkv3[:, :, c0:c0 + hd]
            kh = qkv3[:, :, D + c0:D + c0 + hd]
            vh = qkv3[:, :, 2 * D + c0:2 * D + c0 + hd]
            s = jnp.einsum("bqd,bkd->bqk", qh, kh,
                           preferred_element_type=jnp.float32) + maskb
            s = s - jnp.max(s, axis=-1, keepdims=True)
            p = jnp.exp(s)
            p = p * pl.reciprocal(jnp.sum(p, axis=-1, keepdims=True), approx=True)
            oh = jnp.einsum("bqk,bkd->bqd", p.astype(jnp.bfloat16), vh,
                            preferred_element_type=jnp.float32)          # (B, S_pad, hd)
            # accumulate through head-block of W_o (avoids lane concat of head outputs)
            acc = acc + jnp.dot(oh.reshape(M, hd).astype(jnp.bfloat16),
                                wo_full[c0:c0 + hd, :],
                                preferred_element_type=jnp.float32)
        attn = acc + w["bo"][0]                      # (M, D) f32

        # ---- residual + LayerNorm 1 ----
        x1 = _layernorm(x + attn, w["ln1g"][0], w["ln1b"][0])

        # ---- feed-forward, chunked over the hidden dim (no (M,FF) intermediate) ----
        x1b = x1.astype(jnp.bfloat16)
        ffacc = jnp.zeros((M, D), jnp.float32)
        for ci in range(FF // FF_CHUNK):
            c0 = ci * FF_CHUNK
            h1c = jnp.dot(x1b, w["w1"][0, :, c0:c0 + FF_CHUNK],
                          preferred_element_type=jnp.float32)
            h1c = h1c + w["b1"][0, :, c0:c0 + FF_CHUNK]
            h1c = jnp.maximum(h1c, 0.0).astype(jnp.bfloat16)
            ffacc = ffacc + jnp.dot(h1c, w["w2"][0, c0:c0 + FF_CHUNK, :],
                                    preferred_element_type=jnp.float32)
        ff = ffacc + w["b2"][0]

        # ---- residual + LayerNorm 2 ----
        y = _layernorm(x1 + ff, w["ln2g"][0], w["ln2b"][0])
        z_ref[...] = y

        # ---- vector quantizer fused into the last layer of the encoder call ----
        if with_vq:
            @pl.when(l == L - 1)
            def _():
                z = y                                # (M, D) f32
                emb = emb_ref[...]                   # (K, D) f32
                e2 = e2_ref[...]                     # (1, K) f32
                zdote = jax.lax.dot_general(z, emb, (((1,), (1,)), ((), ())),
                                            preferred_element_type=jnp.float32)  # (M, K)
                # ||z||^2 is constant per row -> omit; argmin unaffected.
                dist = e2 - 2.0 * zdote
                min_d = jnp.min(dist, axis=1, keepdims=True)
                iota = jax.lax.broadcasted_iota(jnp.int32, (M, K), 1)
                cand = jnp.where(dist <= min_d, iota, jnp.int32(K))
                idx_col = jnp.min(cand, axis=1, keepdims=True)           # (M, 1) int32
                onehot = (iota == idx_col).astype(jnp.float32)           # exact gather
                zq = jnp.dot(onehot, emb, preferred_element_type=jnp.float32)
                zq_ref[...] = zq
                idx_ref[...] = idx_col
                diff = zq - z
                ssd_rows = jnp.sum(diff * diff, axis=1, keepdims=True) * valid_ref[...]
                ssd_ref[...] = jnp.sum(ssd_rows, axis=0, keepdims=True)  # (1, 1)

    weight_specs = {
        "wqkv": pl.BlockSpec((1, D, 3 * D), lambda l: (l, 0, 0)),
        "bqkv": pl.BlockSpec((1, 1, 3 * D), lambda l: (l, 0, 0)),
        "wo":   pl.BlockSpec((1, D, D), lambda l: (l, 0, 0)),
        "bo":   pl.BlockSpec((1, 1, D), lambda l: (l, 0, 0)),
        "ln1g": pl.BlockSpec((1, 1, D), lambda l: (l, 0, 0)),
        "ln1b": pl.BlockSpec((1, 1, D), lambda l: (l, 0, 0)),
        "w1":   pl.BlockSpec((1, D, FF), lambda l: (l, 0, 0)),
        "b1":   pl.BlockSpec((1, 1, FF), lambda l: (l, 0, 0)),
        "w2":   pl.BlockSpec((1, FF, D), lambda l: (l, 0, 0)),
        "b2":   pl.BlockSpec((1, 1, D), lambda l: (l, 0, 0)),
        "ln2g": pl.BlockSpec((1, 1, D), lambda l: (l, 0, 0)),
        "ln2b": pl.BlockSpec((1, 1, D), lambda l: (l, 0, 0)),
    }
    in_specs = [pl.BlockSpec((M, D), lambda l: (0, 0)),
                pl.BlockSpec((B, S_pad, S_pad), lambda l: (0, 0, 0))]
    in_specs += [weight_specs[n] for n in _WEIGHT_ORDER]
    inputs = [x_flat, mask_bias] + [sp[n] for n in _WEIGHT_ORDER]

    out_shapes = [jax.ShapeDtypeStruct((M, D), jnp.float32)]
    out_specs = [pl.BlockSpec((M, D), lambda l: (0, 0))]
    if with_vq:
        in_specs += [pl.BlockSpec((K, D), lambda l: (0, 0)),
                     pl.BlockSpec((1, K), lambda l: (0, 0)),
                     pl.BlockSpec((M, 1), lambda l: (0, 0))]
        inputs += [vq["embedding"], vq["e2"], vq["valid"]]
        out_shapes += [jax.ShapeDtypeStruct((M, D), jnp.float32),
                       jax.ShapeDtypeStruct((M, 1), jnp.int32),
                       jax.ShapeDtypeStruct((1, 1), jnp.float32)]
        out_specs += [pl.BlockSpec((M, D), lambda l: (0, 0)),
                      pl.BlockSpec((M, 1), lambda l: (0, 0)),
                      pl.BlockSpec((1, 1), lambda l: (0, 0))]

    return pl.pallas_call(
        kernel,
        out_shape=tuple(out_shapes) if with_vq else out_shapes[0],
        grid=(L,),
        in_specs=in_specs,
        out_specs=tuple(out_specs) if with_vq else out_specs[0],
        compiler_params=pltpu.CompilerParams(dimension_semantics=("arbitrary",)),
        # TODO(synk): on v7x (2 TensorCores) a leading "parallel" batch axis could split the
        # slab across cores; omitted here to keep a single code path for v5e/v6e/v7x.
    )(*inputs)


# ============================================================================
# Parameter initialization (deterministic, synthetic).  Q/K/V weights are
# fused into one (D,3D) bf16 matrix per layer with 1/sqrt(hd) folded into the
# Q block; biases / LayerNorm affines stay f32.
# ============================================================================
def init_stack_params(key, L, D=TOKEN_DIM, FF=FFN_DIM, heads=HEADS):
    hd = D // heads
    scale = 1.0 / math.sqrt(hd)

    def one(k):
        ks = jax.random.split(k, 6)
        s = 0.05
        wq = jax.random.normal(ks[0], (D, D), jnp.float32) * s
        wk = jax.random.normal(ks[1], (D, D), jnp.float32) * s
        wv = jax.random.normal(ks[2], (D, D), jnp.float32) * s
        bq = jnp.zeros((1, D), jnp.float32)
        bk = jnp.zeros((1, D), jnp.float32)
        bv = jnp.zeros((1, D), jnp.float32)
        return dict(
            wqkv=jnp.concatenate([wq * scale, wk, wv], axis=1).astype(jnp.bfloat16),
            bqkv=jnp.concatenate([bq * scale, bk, bv], axis=1),
            wo=(jax.random.normal(ks[3], (D, D), jnp.float32) * s).astype(jnp.bfloat16),
            bo=jnp.zeros((1, D), jnp.float32),
            ln1g=jnp.ones((1, D), jnp.float32),
            ln1b=jnp.zeros((1, D), jnp.float32),
            w1=(jax.random.normal(ks[4], (D, FF), jnp.float32) * s).astype(jnp.bfloat16),
            b1=jnp.zeros((1, FF), jnp.float32),
            w2=(jax.random.normal(ks[5], (FF, D), jnp.float32) * s).astype(jnp.bfloat16),
            b2=jnp.zeros((1, D), jnp.float32),
            ln2g=jnp.ones((1, D), jnp.float32),
            ln2b=jnp.zeros((1, D), jnp.float32),
        )

    layers = [one(k) for k in jax.random.split(key, L)]
    return jax.tree_util.tree_map(lambda *xs: jnp.stack(xs, axis=0), *layers)


def init_params(key):
    k_root, k_emb, k_enc, k_dec = jax.random.split(key, 4)
    return {
        "root_token": jax.random.normal(k_root, (1, 1, TOKEN_DIM), jnp.float32),
        "embedding": jax.random.uniform(k_emb, (NUM_EMBEDDINGS, TOKEN_DIM), jnp.float32,
                                        minval=-1.0 / NUM_EMBEDDINGS,
                                        maxval=1.0 / NUM_EMBEDDINGS),
        "enc": init_stack_params(k_enc, ENC_DEPTH),
        "dec": init_stack_params(k_dec, DEC_DEPTH),
    }


# ============================================================================
# Full RoomLayoutVQVAE forward: 2 pallas_call launches (encoder+VQ, decoder)
# ============================================================================
@jax.jit
def roomlayout_vqvae_forward(x, padding_mask, params):
    """x: (B, N, D) f32; padding_mask: (B, N) bool (True = padded token)."""
    B, N, D = x.shape
    S = N + 1                                   # root token prepended
    S_pad = ((S + 7) // 8) * 8                  # sublane-friendly sequence padding
    M = B * S_pad

    # ---- encoder input: prepend root token, extend mask, pad, flatten ----
    root = jnp.broadcast_to(params["root_token"], (B, 1, D))
    x_cat = jnp.concatenate([root, x], axis=1)                           # (B, S, D)
    x_p = jnp.pad(x_cat, ((0, 0), (0, S_pad - S), (0, 0)))
    x_flat = x_p.reshape(M, D)

    mask_cat = jnp.concatenate([jnp.zeros((B, 1), dtype=bool), padding_mask], axis=1)
    mask_p = jnp.concatenate([mask_cat, jnp.ones((B, S_pad - S), dtype=bool)], axis=1)
    key_bias = jnp.where(mask_p, MASK_NEG, 0.0).astype(jnp.float32)      # (B, S_pad)
    mask_bias = jnp.broadcast_to(key_bias[:, None, :], (B, S_pad, S_pad))

    valid_rows = jnp.tile(jnp.arange(S_pad) < S, (B,)).astype(jnp.float32)[:, None]
    e2 = jnp.sum(params["embedding"] ** 2, axis=1)[None, :]              # (1, K)

    # ---- encoder (4 fused layers) + vector quantizer in one pallas_call ----
    z_flat, zq_flat, idx_flat, ssd = transformer_stack(
        x_flat, mask_bias, params["enc"], B, S_pad,
        vq=dict(embedding=params["embedding"], e2=e2, valid=valid_rows))

    mse = ssd[0, 0] / (B * S * D)
    vq_loss = (1.0 + BETA) * mse                 # mse(sg(zq), z) + beta*mse(zq, sg(z)) forward value
    zq_st = z_flat + jax.lax.stop_gradient(zq_flat - z_flat)             # straight-through
    indices = idx_flat.reshape(B, S_pad)[:, :S]

    # ---- decoder (4 fused layers) in one pallas_call ----
    recon_flat = transformer_stack(zq_st, mask_bias, params["dec"], B, S_pad)
    recon = recon_flat.reshape(B, S_pad, D)[:, :S, :]
    return recon, vq_loss, indices


# ============================================================================
if __name__ == "__main__":
    key = jax.random.PRNGKey(0)
    k_param, k_x = jax.random.split(key)

    params = init_params(k_param)

    B, N = 2, 8
    x = jax.random.normal(k_x, (B, N, TOKEN_DIM), jnp.float32)
    # batch 0: no padding, batch 1: last 3 tokens padded
    padding_mask = jnp.zeros((B, N), dtype=bool).at[1, N - 3:].set(True)

    recon, vq_loss, indices = roomlayout_vqvae_forward(x, padding_mask, params)
    jax.block_until_ready((recon, vq_loss, indices))

    assert recon.shape == (B, N + 1, TOKEN_DIM)
    assert indices.shape == (B, N + 1)
    assert vq_loss.shape == ()
    assert bool(jnp.all(jnp.isfinite(recon)))
    assert bool(jnp.isfinite(vq_loss))
    print("KERNEL_OK")
</pallas_src>

<mosaic_0001>
module attributes {stable_mosaic.version = 11 : i64} {
  func.func @kernel(%arg0: i32, %arg1: memref<32x64xf32, #tpu.memory_space<vmem>>, %arg2: memref<2x16x16xf32, #tpu.memory_space<vmem>>, %arg3: memref<1x64x192xbf16, #tpu.memory_space<vmem>>, %arg4: memref<1x1x192xf32, #tpu.memory_space<vmem>>, %arg5: memref<1x64x64xbf16, #tpu.memory_space<vmem>>, %arg6: memref<1x1x64xf32, #tpu.memory_space<vmem>>, %arg7: memref<1x1x64xf32, #tpu.memory_space<vmem>>, %arg8: memref<1x1x64xf32, #tpu.memory_space<vmem>>, %arg9: memref<1x64x2048xbf16, #tpu.memory_space<vmem>>, %arg10: memref<1x1x2048xf32, #tpu.memory_space<vmem>>, %arg11: memref<1x2048x64xbf16, #tpu.memory_space<vmem>>, %arg12: memref<1x1x64xf32, #tpu.memory_space<vmem>>, %arg13: memref<1x1x64xf32, #tpu.memory_space<vmem>>, %arg14: memref<1x1x64xf32, #tpu.memory_space<vmem>>, %arg15: memref<512x64xf32, #tpu.memory_space<vmem>>, %arg16: memref<1x512xf32, #tpu.memory_space<vmem>>, %arg17: memref<32x1xf32, #tpu.memory_space<vmem>>, %arg18: memref<32x64xf32, #tpu.memory_space<vmem>>, %arg19: memref<32x64xf32, #tpu.memory_space<vmem>>, %arg20: memref<32x1xi32, #tpu.memory_space<vmem>>, %arg21: memref<1x1xf32, #tpu.memory_space<vmem>>) attributes {dimension_semantics = [#tpu.dimension_semantics<arbitrary>], iteration_bounds = array<i64: 4>, scalar_prefetch = 0 : i64, scratch_operands = 0 : i64, tpu.core_type = #tpu.core_type<tc>, window_params = [{pipeline_mode = #tpu.pipeline_mode<synchronous>, transform_indices = @transform_0, window_bounds = array<i64: 32, 64>}, {pipeline_mode = #tpu.pipeline_mode<synchronous>, transform_indices = @transform_1, window_bounds = array<i64: 2, 16, 16>}, {transform_indices = @transform_2, window_bounds = array<i64: 1, 64, 192>}, {transform_indices = @transform_3, window_bounds = array<i64: 1, 1, 192>}, {transform_indices = @transform_4, window_bounds = array<i64: 1, 64, 64>}, {transform_indices = @transform_5, window_bounds = array<i64: 1, 1, 64>}, {transform_indices = @transform_6, window_bounds = array<i64: 1, 1, 64>}, {transform_indices = @transform_7, window_bounds = array<i64: 1, 1, 64>}, {transform_indices = @transform_8, window_bounds = array<i64: 1, 64, 2048>}, {transform_indices = @transform_9, window_bounds = array<i64: 1, 1, 2048>}, {transform_indices = @transform_10, window_bounds = array<i64: 1, 2048, 64>}, {transform_indices = @transform_11, window_bounds = array<i64: 1, 1, 64>}, {transform_indices = @transform_12, window_bounds = array<i64: 1, 1, 64>}, {transform_indices = @transform_13, window_bounds = array<i64: 1, 1, 64>}, {pipeline_mode = #tpu.pipeline_mode<synchronous>, transform_indices = @transform_14, window_bounds = array<i64: 512, 64>}, {pipeline_mode = #tpu.pipeline_mode<synchronous>, transform_indices = @transform_15, window_bounds = array<i64: 1, 512>}, {pipeline_mode = #tpu.pipeline_mode<synchronous>, transform_indices = @transform_16, window_bounds = array<i64: 32, 1>}, {pipeline_mode = #tpu.pipeline_mode<synchronous>, transform_indices = @transform_17, window_bounds = array<i64: 32, 64>}, {pipeline_mode = #tpu.pipeline_mode<synchronous>, transform_indices = @transform_18, window_bounds = array<i64: 32, 64>}, {pipeline_mode = #tpu.pipeline_mode<synchronous>, transform_indices = @transform_19, window_bounds = array<i64: 32, 1>}, {pipeline_mode = #tpu.pipeline_mode<synchronous>, transform_indices = @transform_20, window_bounds = array<i64: 1, 1>}]} {
    %c0_i32 = arith.constant 0 : i32
    %0 = arith.cmpi eq, %arg0, %c0_i32 : i32
    %1 = arith.extui %0 : i1 to i32
    %c0_i32_0 = arith.constant 0 : i32
    %2 = arith.cmpi ne, %1, %c0_i32_0 : i32
    scf.if %2 {
      %c0_112 = arith.constant 0 : index
      %c0_113 = arith.constant 0 : index
      %226 = vector.load %arg1[%c0_112, %c0_113] : memref<32x64xf32, #tpu.memory_space<vmem>>, vector<32x64xf32>
      %c0_114 = arith.constant 0 : index
      %c0_115 = arith.constant 0 : index
      %227 = vector.load %arg18[%c0_114, %c0_115] : memref<32x64xf32, #tpu.memory_space<vmem>>, vector<32x64xf32>
      tpu.vector_store %arg18[%c0_114, %c0_115], %226 {strides = array<i32>} : memref<32x64xf32, #tpu.memory_space<vmem>>, vector<32x64xf32>,
    } else {
    }
    %c0 = arith.constant 0 : index
    %c0_1 = arith.constant 0 : index
    %3 = vector.load %arg18[%c0, %c0_1] : memref<32x64xf32, #tpu.memory_space<vmem>>, vector<32x64xf32>
    %4 = arith.truncf %3 : vector<32x64xf32> to vector<32x64xbf16>
    %c0_2 = arith.constant 0 : index
    %c0_3 = arith.constant 0 : index
    %c0_4 = arith.constant 0 : index
    %5 = vector.load %arg3[%c0_2, %c0_3, %c0_4] : memref<1x64x192xbf16, #tpu.memory_space<vmem>>, vector<1x64x192xbf16>
    %6 = vector.shape_cast %5 : vector<1x64x192xbf16> to vector<64x192xbf16>
    %cst = arith.constant dense<0.000000e+00> : vector<32x192xf32>
    %7 = tpu.matmul %4, %6, %cst {dimension_numbers = #tpu.dot_dimension_numbers<[1], [0], [0], [1], [0, 0, 1, 1], [], []>} : vector<32x64xbf16>, vector<64x192xbf16>, vector<32x192xf32> -> vector<32x192xf32>
    %c0_5 = arith.constant 0 : index
    %c0_6 = arith.constant 0 : index
    %c0_7 = arith.constant 0 : index
    %8 = vector.load %arg4[%c0_5, %c0_6, %c0_7] : memref<1x1x192xf32, #tpu.memory_space<vmem>>, vector<1x1x192xf32>
    %9 = vector.shape_cast %8 : vector<1x1x192xf32> to vector<1x192xf32>
    %10 = vector.broadcast %9 : vector<1x192xf32> to vector<32x192xf32>
    %11 = arith.addf %7, %10 : vector<32x192xf32>
    %12 = arith.truncf %11 : vector<32x192xf32> to vector<32x192xbf16>
    %13 = vector.shape_cast %12 : vector<32x192xbf16> to vector<2x16x192xbf16>
    %c0_8 = arith.constant 0 : index
    %c0_9 = arith.constant 0 : index
    %c0_10 = arith.constant 0 : index
    %14 = vector.load %arg2[%c0_8, %c0_9, %c0_10] : memref<2x16x16xf32, #tpu.memory_space<vmem>>, vector<2x16x16xf32>
    %c0_11 = arith.constant 0 : index
    %c0_12 = arith.constant 0 : index
    %c0_13 = arith.constant 0 : index
    %15 = vector.load %arg5[%c0_11, %c0_12, %c0_13] : memref<1x64x64xbf16, #tpu.memory_space<vmem>>, vector<1x64x64xbf16>
    %16 = vector.shape_cast %15 : vector<1x64x64xbf16> to vector<64x64xbf16>
    %cst_14 = arith.constant 0.000000e+00 : f32
    %17 = vector.broadcast %cst_14 : f32 to vector<32x64xf32>
    %18 = vector.extract_strided_slice %13 {offsets = [0, 0, 0], sizes = [2, 16, 16], strides = [1, 1, 1]} : vector<2x16x192xbf16> to vector<2x16x16xbf16>
    %19 = vector.extract_strided_slice %13 {offsets = [0, 0, 64], sizes = [2, 16, 16], strides = [1, 1, 1]} : vector<2x16x192xbf16> to vector<2x16x16xbf16>
    %20 = vector.extract_strided_slice %13 {offsets = [0, 0, 128], sizes = [2, 16, 16], strides = [1, 1, 1]} : vector<2x16x192xbf16> to vector<2x16x16xbf16>
    "tpu.trace_start"() <{level = 10 : i32, message = "bqd,bkd->bqk"}> : () -> ()
    %cst_15 = arith.constant dense<0.000000e+00> : vector<2x16x16xf32>
    %21 = tpu.matmul %18, %19, %cst_15 {dimension_numbers = #tpu.dot_dimension_numbers<[2], [2], [1], [1], [0, 0, 0, 1, 1, 1], [0], [0]>} : vector<2x16x16xbf16>, vector<2x16x16xbf16>, vector<2x16x16xf32> -> vector<2x16x16xf32>
    "tpu.trace_stop"() : () -> ()
    %22 = arith.addf %21, %14 : vector<2x16x16xf32>
    %cst_16 = arith.constant dense<0xFF800000> : vector<2x16xf32>
    %23 = vector.multi_reduction <maximumf>, %22, %cst_16 [2] : vector<2x16x16xf32> to vector<2x16xf32>
    %24 = vector.shape_cast %23 : vector<2x16xf32> to vector<2x16x1xf32>
    %25 = vector.broadcast %24 : vector<2x16x1xf32> to vector<2x16x16xf32>
    %26 = arith.subf %22, %25 : vector<2x16x16xf32>
    %27 = math.exp %26 : vector<2x16x16xf32>
    %cst_17 = arith.constant dense<0.000000e+00> : vector<2x16xf32>
    %28 = vector.multi_reduction <add>, %27, %cst_17 [2] : vector<2x16x16xf32> to vector<2x16xf32>
    %29 = vector.shape_cast %28 : vector<2x16xf32> to vector<2x16x1xf32>
    %30 = tpu.reciprocal %29 {approx = true} : vector<2x16x1xf32> -> vector<2x16x1xf32>
    %31 = vector.broadcast %30 : vector<2x16x1xf32> to vector<2x16x16xf32>
    %32 = arith.mulf %27, %31 : vector<2x16x16xf32>
    %33 = arith.truncf %32 : vector<2x16x16xf32> to vector<2x16x16xbf16>
    "tpu.trace_start"() <{level = 10 : i32, message = "bqk,bkd->bqd"}> : () -> ()
    %cst_18 = arith.constant dense<0.000000e+00> : vector<2x16x16xf32>
    %34 = tpu.matmul %33, %20, %cst_18 {dimension_numbers = #tpu.dot_dimension_numbers<[2], [1], [1], [2], [0, 0, 0, 1, 1, 2], [0], [0]>} : vector<2x16x16xbf16>, vector<2x16x16xbf16>, vector<2x16x16xf32> -> vector<2x16x16xf32>
    "tpu.trace_stop"() : () -> ()
    %35 = vector.shape_cast %34 : vector<2x16x16xf32> to vector<32x16xf32>
    %36 = arith.truncf %35 : vector<32x16xf32> to vector<32x16xbf16>
    %37 = vector.extract_strided_slice %16 {offsets = [0, 0], sizes = [16, 64], strides = [1, 1]} : vector<64x64xbf16> to vector<16x64xbf16>
    %cst_19 = arith.constant dense<0.000000e+00> : vector<32x64xf32>
    %38 = tpu.matmul %36, %37, %cst_19 {dimension_numbers = #tpu.dot_dimension_numbers<[1], [0], [0], [1], [0, 0, 1, 1], [], []>} : vector<32x16xbf16>, vector<16x64xbf16>, vector<32x64xf32> -> vector<32x64xf32>
    %39 = arith.addf %17, %38 : vector<32x64xf32>
    %40 = vector.extract_strided_slice %13 {offsets = [0, 0, 16], sizes = [2, 16, 16], strides = [1, 1, 1]} : vector<2x16x192xbf16> to vector<2x16x16xbf16>
    %41 = vector.extract_strided_slice %13 {offsets = [0, 0, 80], sizes = [2, 16, 16], strides = [1, 1, 1]} : vector<2x16x192xbf16> to vector<2x16x16xbf16>
    %42 = vector.extract_strided_slice %13 {offsets = [0, 0, 144], sizes = [2, 16, 16], strides = [1, 1, 1]} : vector<2x16x192xbf16> to vector<2x16x16xbf16>
    "tpu.trace_start"() <{level = 10 : i32, message = "bqd,bkd->bqk"}> : () -> ()
    %cst_20 = arith.constant dense<0.000000e+00> : vector<2x16x16xf32>
    %43 = tpu.matmul %40, %41, %cst_20 {dimension_numbers = #tpu.dot_dimension_numbers<[2], [2], [1], [1], [0, 0, 0, 1, 1, 1], [0], [0]>} : vector<2x16x16xbf16>, vector<2x16x16xbf16>, vector<2x16x16xf32> -> vector<2x16x16xf32>
    "tpu.trace_stop"() : () -> ()
    %44 = arith.addf %43, %14 : vector<2x16x16xf32>
    %cst_21 = arith.constant dense<0xFF800000> : vector<2x16xf32>
    %45 = vector.multi_reduction <maximumf>, %44, %cst_21 [2] : vector<2x16x16xf32> to vector<2x16xf32>
    %46 = vector.shape_cast %45 : vector<2x16xf32> to vector<2x16x1xf32>
    %47 = vector.broadcast %46 : vector<2x16x1xf32> to vector<2x16x16xf32>
    %48 = arith.subf %44, %47 : vector<2x16x16xf32>
    %49 = math.exp %48 : vector<2x16x16xf32>
    %cst_22 = arith.constant dense<0.000000e+00> : vector<2x16xf32>
    %50 = vector.multi_reduction <add>, %49, %cst_22 [2] : vector<2x16x16xf32> to vector<2x16xf32>
    %51 = vector.shape_cast %50 : vector<2x16xf32> to vector<2x16x1xf32>
    %52 = tpu.reciprocal %51 {approx = true} : vector<2x16x1xf32> -> vector<2x16x1xf32>
    %53 = vector.broadcast %52 : vector<2x16x1xf32> to vector<2x16x16xf32>
    %54 = arith.mulf %49, %53 : vector<2x16x16xf32>
    %55 = arith.truncf %54 : vector<2x16x16xf32> to vector<2x16x16xbf16>
    "tpu.trace_start"() <{level = 10 : i32, message = "bqk,bkd->bqd"}> : () -> ()
    %cst_23 = arith.constant dense<0.000000e+00> : vector<2x16x16xf32>
    %56 = tpu.matmul %55, %42, %cst_23 {dimension_numbers = #tpu.dot_dimension_numbers<[2], [1], [1], [2], [0, 0, 0, 1, 1, 2], [0], [0]>} : vector<2x16x16xbf16>, vector<2x16x16xbf16>, vector<2x16x16xf32> -> vector<2x16x16xf32>
    "tpu.trace_stop"() : () -> ()
    %57 = vector.shape_cast %56 : vector<2x16x16xf32> to vector<32x16xf32>
    %58 = arith.truncf %57 : vector<32x16xf32> to vector<32x16xbf16>
    %59 = vector.extract_strided_slice %16 {offsets = [16, 0], sizes = [16, 64], strides = [1, 1]} : vector<64x64xbf16> to vector<16x64xbf16>
    %cst_24 = arith.constant dense<0.000000e+00> : vector<32x64xf32>
    %60 = tpu.matmul %58, %59, %cst_24 {dimension_numbers = #tpu.dot_dimension_numbers<[1], [0], [0], [1], [0, 0, 1, 1], [], []>} : vector<32x16xbf16>, vector<16x64xbf16>, vector<32x64xf32> -> vector<32x64xf32>
    %61 = arith.addf %39, %60 : vector<32x64xf32>
    %62 = vector.extract_strided_slice %13 {offsets = [0, 0, 32], sizes = [2, 16, 16], strides = [1, 1, 1]} : vector<2x16x192xbf16> to vector<2x16x16xbf16>
    %63 = vector.extract_strided_slice %13 {offsets = [0, 0, 96], sizes = [2, 16, 16], strides = [1, 1, 1]} : vector<2x16x192xbf16> to vector<2x16x16xbf16>
    %64 = vector.extract_strided_slice %13 {offsets = [0, 0, 160], sizes = [2, 16, 16], strides = [1, 1, 1]} : vector<2x16x192xbf16> to vector<2x16x16xbf16>
    "tpu.trace_start"() <{level = 10 : i32, message = "bqd,bkd->bqk"}> : () -> ()
    %cst_25 = arith.constant dense<0.000000e+00> : vector<2x16x16xf32>
    %65 = tpu.matmul %62, %63, %cst_25 {dimension_numbers = #tpu.dot_dimension_numbers<[2], [2], [1], [1], [0, 0, 0, 1, 1, 1], [0], [0]>} : vector<2x16x16xbf16>, vector<2x16x16xbf16>, vector<2x16x16xf32> -> vector<2x16x16xf32>
    "tpu.trace_stop"() : () -> ()
    %66 = arith.addf %65, %14 : vector<2x16x16xf32>
    %cst_26 = arith.constant dense<0xFF800000> : vector<2x16xf32>
    %67 = vector.multi_reduction <maximumf>, %66, %cst_26 [2] : vector<2x16x16xf32> to vector<2x16xf32>
    %68 = vector.shape_cast %67 : vector<2x16xf32> to vector<2x16x1xf32>
    %69 = vector.broadcast %68 : vector<2x16x1xf32> to vector<2x16x16xf32>
    %70 = arith.subf %66, %69 : vector<2x16x16xf32>
    %71 = math.exp %70 : vector<2x16x16xf32>
    %cst_27 = arith.constant dense<0.000000e+00> : vector<2x16xf32>
    %72 = vector.multi_reduction <add>, %71, %cst_27 [2] : vector<2x16x16xf32> to vector<2x16xf32>
    %73 = vector.shape_cast %72 : vector<2x16xf32> to vector<2x16x1xf32>
    %74 = tpu.reciprocal %73 {approx = true} : vector<2x16x1xf32> -> vector<2x16x1xf32>
    %75 = vector.broadcast %74 : vector<2x16x1xf32> to vector<2x16x16xf32>
    %76 = arith.mulf %71, %75 : vector<2x16x16xf32>
    %77 = arith.truncf %76 : vector<2x16x16xf32> to vector<2x16x16xbf16>
    "tpu.trace_start"() <{level = 10 : i32, message = "bqk,bkd->bqd"}> : () -> ()
    %cst_28 = arith.constant dense<0.000000e+00> : vector<2x16x16xf32>
    %78 = tpu.matmul %77, %64, %cst_28 {dimension_numbers = #tpu.dot_dimension_numbers<[2], [1], [1], [2], [0, 0, 0, 1, 1, 2], [0], [0]>} : vector<2x16x16xbf16>, vector<2x16x16xbf16>, vector<2x16x16xf32> -> vector<2x16x16xf32>
    "tpu.trace_stop"() : () -> ()
    %79 = vector.shape_cast %78 : vector<2x16x16xf32> to vector<32x16xf32>
    %80 = arith.truncf %79 : vector<32x16xf32> to vector<32x16xbf16>
    %81 = vector.extract_strided_slice %16 {offsets = [32, 0], sizes = [16, 64], strides = [1, 1]} : vector<64x64xbf16> to vector<16x64xbf16>
    %cst_29 = arith.constant dense<0.000000e+00> : vector<32x64xf32>
    %82 = tpu.matmul %80, %81, %cst_29 {dimension_numbers = #tpu.dot_dimension_numbers<[1], [0], [0], [1], [0, 0, 1, 1], [], []>} : vector<32x16xbf16>, vector<16x64xbf16>, vector<32x64xf32> -> vector<32x64xf32>
    %83 = arith.addf %61, %82 : vector<32x64xf32>
    %84 = vector.extract_strided_slice %13 {offsets = [0, 0, 48], sizes = [2, 16, 16], strides = [1, 1, 1]} : vector<2x16x192xbf16> to vector<2x16x16xbf16>
    %85 = vector.extract_strided_slice %13 {offsets = [0, 0, 112], sizes = [2, 16, 16], strides = [1, 1, 1]} : vector<2x16x192xbf16> to vector<2x16x16xbf16>
    %86 = vector.extract_strided_slice %13 {offsets = [0, 0, 176], sizes = [2, 16, 16], strides = [1, 1, 1]} : vector<2x16x192xbf16> to vector<2x16x16xbf16>
    "tpu.trace_start"() <{level = 10 : i32, message = "bqd,bkd->bqk"}> : () -> ()
    %cst_30 = arith.constant dense<0.000000e+00> : vector<2x16x16xf32>
    %87 = tpu.matmul %84, %85, %cst_30 {dimension_numbers = #tpu.dot_dimension_numbers<[2], [2], [1], [1], [0, 0, 0, 1, 1, 1], [0], [0]>} : vector<2x16x16xbf16>, vector<2x16x16xbf16>, vector<2x16x16xf32> -> vector<2x16x16xf32>
    "tpu.trace_stop"() : () -> ()
    %88 = arith.addf %87, %14 : vector<2x16x16xf32>
    %cst_31 = arith.constant dense<0xFF800000> : vector<2x16xf32>
    %89 = vector.multi_reduction <maximumf>, %88, %cst_31 [2] : vector<2x16x16xf32> to vector<2x16xf32>
    %90 = vector.shape_cast %89 : vector<2x16xf32> to vector<2x16x1xf32>
    %91 = vector.broadcast %90 : vector<2x16x1xf32> to vector<2x16x16xf32>
    %92 = arith.subf %88, %91 : vector<2x16x16xf32>
    %93 = math.exp %92 : vector<2x16x16xf32>
    %cst_32 = arith.constant dense<0.000000e+00> : vector<2x16xf32>
    %94 = vector.multi_reduction <add>, %93, %cst_32 [2] : vector<2x16x16xf32> to vector<2x16xf32>
    %95 = vector.shape_cast %94 : vector<2x16xf32> to vector<2x16x1xf32>
    %96 = tpu.reciprocal %95 {approx = true} : vector<2x16x1xf32> -> vector<2x16x1xf32>
    %97 = vector.broadcast %96 : vector<2x16x1xf32> to vector<2x16x16xf32>
    %98 = arith.mulf %93, %97 : vector<2x16x16xf32>
    %99 = arith.truncf %98 : vector<2x16x16xf32> to vector<2x16x16xbf16>
    "tpu.trace_start"() <{level = 10 : i32, message = "bqk,bkd->bqd"}> : () -> ()
    %cst_33 = arith.constant dense<0.000000e+00> : vector<2x16x16xf32>
    %100 = tpu.matmul %99, %86, %cst_33 {dimension_numbers = #tpu.dot_dimension_numbers<[2], [1], [1], [2], [0, 0, 0, 1, 1, 2], [0], [0]>} : vector<2x16x16xbf16>, vector<2x16x16xbf16>, vector<2x16x16xf32> -> vector<2x16x16xf32>
    "tpu.trace_stop"() : () -> ()
    %101 = vector.shape_cast %100 : vector<2x16x16xf32> to vector<32x16xf32>
    %102 = arith.truncf %101 : vector<32x16xf32> to vector<32x16xbf16>
    %103 = vector.extract_strided_slice %16 {offsets = [48, 0], sizes = [16, 64], strides = [1, 1]} : vector<64x64xbf16> to vector<16x64xbf16>
    %cst_34 = arith.constant dense<0.000000e+00> : vector<32x64xf32>
    %104 = tpu.matmul %102, %103, %cst_34 {dimension_numbers = #tpu.dot_dimension_numbers<[1], [0], [0], [1], [0, 0, 1, 1], [], []>} : vector<32x16xbf16>, vector<16x64xbf16>, vector<32x64xf32> -> vector<32x64xf32>
    %105 = arith.addf %83, %104 : vector<32x64xf32>
    %c0_35 = arith.constant 0 : index
    %c0_36 = arith.constant 0 : index
    %c0_37 = arith.constant 0 : index
    %106 = vector.load %arg6[%c0_35, %c0_36, %c0_37] : memref<1x1x64xf32, #tpu.memory_space<vmem>>, vector<1x1x64xf32>
    %107 = vector.shape_cast %106 : vector<1x1x64xf32> to vector<1x64xf32>
    %108 = vector.broadcast %107 : vector<1x64xf32> to vector<32x64xf32>
    %109 = arith.addf %105, %108 : vector<32x64xf32>
    %110 = arith.addf %3, %109 : vector<32x64xf32>
    %c0_38 = arith.constant 0 : index
    %c0_39 = arith.constant 0 : index
    %c0_40 = arith.constant 0 : index
    %111 = vector.load %arg7[%c0_38, %c0_39, %c0_40] : memref<1x1x64xf32, #tpu.memory_space<vmem>>, vector<1x1x64xf32>
    %112 = vector.shape_cast %111 : vector<1x1x64xf32> to vector<1x64xf32>
    %c0_41 = arith.constant 0 : index
    %c0_42 = arith.constant 0 : index
    %c0_43 = arith.constant 0 : index
    %113 = vector.load %arg8[%c0_41, %c0_42, %c0_43] : memref<1x1x64xf32, #tpu.memory_space<vmem>>, vector<1x1x64xf32>
    %114 = vector.shape_cast %113 : vector<1x1x64xf32> to vector<1x64xf32>
    %cst_44 = arith.constant dense<0.000000e+00> : vector<32xf32>
    %115 = vector.multi_reduction <add>, %110, %cst_44 [1] : vector<32x64xf32> to vector<32xf32>
    %116 = vector.shape_cast %115 : vector<32xf32> to vector<32x1xf32>
    %cst_45 = arith.constant 6.400000e+01 : f32
    %117 = vector.broadcast %cst_45 : f32 to vector<32x1xf32>
    %118 = arith.divf %116, %117 : vector<32x1xf32>
    %119 = vector.broadcast %118 : vector<32x1xf32> to vector<32x64xf32>
    %120 = arith.subf %110, %119 : vector<32x64xf32>
    %121 = arith.mulf %120, %120 : vector<32x64xf32>
    %cst_46 = arith.constant dense<0.000000e+00> : vector<32xf32>
    %122 = vector.multi_reduction <add>, %121, %cst_46 [1] : vector<32x64xf32> to vector<32xf32>
    %123 = vector.shape_cast %122 : vector<32xf32> to vector<32x1xf32>
    %cst_47 = arith.constant 6.400000e+01 : f32
    %124 = vector.broadcast %cst_47 : f32 to vector<32x1xf32>
    %125 = arith.divf %123, %124 : vector<32x1xf32>
    %cst_48 = arith.constant 9.99999974E-6 : f32
    %126 = vector.broadcast %cst_48 : f32 to vector<32x1xf32>
    %127 = arith.addf %125, %126 : vector<32x1xf32>
    %128 = math.rsqrt %127 : vector<32x1xf32>
    %129 = vector.broadcast %128 : vector<32x1xf32> to vector<32x64xf32>
    %130 = arith.mulf %120, %129 : vector<32x64xf32>
    %131 = vector.broadcast %112 : vector<1x64xf32> to vector<32x64xf32>
    %132 = arith.mulf %130, %131 : vector<32x64xf32>
    %133 = vector.broadcast %114 : vector<1x64xf32> to vector<32x64xf32>
    %134 = arith.addf %132, %133 : vector<32x64xf32>
    %135 = arith.truncf %134 : vector<32x64xf32> to vector<32x64xbf16>
    %cst_49 = arith.constant 0.000000e+00 : f32
    %136 = vector.broadcast %cst_49 : f32 to vector<32x64xf32>
    %c0_50 = arith.constant 0 : index
    %c0_51 = arith.constant 0 : index
    %c0_52 = arith.constant 0 : index
    %137 = vector.load %arg9[%c0_50, %c0_51, %c0_52] : memref<1x64x2048xbf16, #tpu.memory_space<vmem>>, vector<1x64x512xbf16>
    %138 = vector.shape_cast %137 : vector<1x64x512xbf16> to vector<64x512xbf16>
    %cst_53 = arith.constant dense<0.000000e+00> : vector<32x512xf32>
    %139 = tpu.matmul %135, %138, %cst_53 {dimension_numbers = #tpu.dot_dimension_numbers<[1], [0], [0], [1], [0, 0, 1, 1], [], []>} : vector<32x64xbf16>, vector<64x512xbf16>, vector<32x512xf32> -> vector<32x512xf32>
    %c0_54 = arith.constant 0 : index
    %c0_55 = arith.constant 0 : index
    %c0_56 = arith.constant 0 : index
    %140 = vector.load %arg10[%c0_54, %c0_55, %c0_56] : memref<1x1x2048xf32, #tpu.memory_space<vmem>>, vector<1x1x512xf32>
    %141 = vector.shape_cast %140 : vector<1x1x512xf32> to vector<1x512xf32>
    %142 = vector.broadcast %141 : vector<1x512xf32> to vector<32x512xf32>
    %143 = arith.addf %139, %142 : vector<32x512xf32>
    %cst_57 = arith.constant 0.000000e+00 : f32
    %144 = vector.broadcast %cst_57 : f32 to vector<32x512xf32>
    %145 = arith.maximumf %143, %144 : vector<32x512xf32>
    %146 = arith.truncf %145 : vector<32x512xf32> to vector<32x512xbf16>
    %c0_58 = arith.constant 0 : index
    %c0_59 = arith.constant 0 : index
    %c0_60 = arith.constant 0 : index
    %147 = vector.load %arg11[%c0_58, %c0_59, %c0_60] : memref<1x2048x64xbf16, #tpu.memory_space<vmem>>, vector<1x512x64xbf16>
    %148 = vector.shape_cast %147 : vector<1x512x64xbf16> to vector<512x64xbf16>
    %cst_61 = arith.constant dense<0.000000e+00> : vector<32x64xf32>
    %149 = tpu.matmul %146, %148, %cst_61 {dimension_numbers = #tpu.dot_dimension_numbers<[1], [0], [0], [1], [0, 0, 1, 1], [], []>} : vector<32x512xbf16>, vector<512x64xbf16>, vector<32x64xf32> -> vector<32x64xf32>
    %150 = arith.addf %136, %149 : vector<32x64xf32>
    %c0_62 = arith.constant 0 : index
    %c0_63 = arith.constant 0 : index
    %c512 = arith.constant 512 : index
    %151 = vector.load %arg9[%c0_62, %c0_63, %c512] : memref<1x64x2048xbf16, #tpu.memory_space<vmem>>, vector<1x64x512xbf16>
    %152 = vector.shape_cast %151 : vector<1x64x512xbf16> to vector<64x512xbf16>
    %cst_64 = arith.constant dense<0.000000e+00> : vector<32x512xf32>
    %153 = tpu.matmul %135, %152, %cst_64 {dimension_numbers = #tpu.dot_dimension_numbers<[1], [0], [0], [1], [0, 0, 1, 1], [], []>} : vector<32x64xbf16>, vector<64x512xbf16>, vector<32x512xf32> -> vector<32x512xf32>
    %c0_65 = arith.constant 0 : index
    %c0_66 = arith.constant 0 : index
    %c512_67 = arith.constant 512 : index
    %154 = vector.load %arg10[%c0_65, %c0_66, %c512_67] : memref<1x1x2048xf32, #tpu.memory_space<vmem>>, vector<1x1x512xf32>
    %155 = vector.shape_cast %154 : vector<1x1x512xf32> to vector<1x512xf32>
    %156 = vector.broadcast %155 : vector<1x512xf32> to vector<32x512xf32>
    %157 = arith.addf %153, %156 : vector<32x512xf32>
    %cst_68 = arith.constant 0.000000e+00 : f32
    %158 = vector.broadcast %cst_68 : f32 to vector<32x512xf32>
    %159 = arith.maximumf %157, %158 : vector<32x512xf32>
    %160 = arith.truncf %159 : vector<32x512xf32> to vector<32x512xbf16>
    %c0_69 = arith.constant 0 : index
    %c512_70 = arith.constant 512 : index
    %c0_71 = arith.constant 0 : index
    %161 = vector.load %arg11[%c0_69, %c512_70, %c0_71] : memref<1x2048x64xbf16, #tpu.memory_space<vmem>>, vector<1x512x64xbf16>
    %162 = vector.shape_cast %161 : vector<1x512x64xbf16> to vector<512x64xbf16>
    %cst_72 = arith.constant dense<0.000000e+00> : vector<32x64xf32>
    %163 = tpu.matmul %160, %162, %cst_72 {dimension_numbers = #tpu.dot_dimension_numbers<[1], [0], [0], [1], [0, 0, 1, 1], [], []>} : vector<32x512xbf16>, vector<512x64xbf16>, vector<32x64xf32> -> vector<32x64xf32>
    %164 = arith.addf %150, %163 : vector<32x64xf32>
    %c0_73 = arith.constant 0 : index
    %c0_74 = arith.constant 0 : index
    %c1024 = arith.constant 1024 : index
    %165 = vector.load %arg9[%c0_73, %c0_74, %c1024] : memref<1x64x2048xbf16, #tpu.memory_space<vmem>>, vector<1x64x512xbf16>
    %166 = vector.shape_cast %165 : vector<1x64x512xbf16> to vector<64x512xbf16>
    %cst_75 = arith.constant dense<0.000000e+00> : vector<32x512xf32>
    %167 = tpu.matmul %135, %166, %cst_75 {dimension_numbers = #tpu.dot_dimension_numbers<[1], [0], [0], [1], [0, 0, 1, 1], [], []>} : vector<32x64xbf16>, vector<64x512xbf16>, vector<32x512xf32> -> vector<32x512xf32>
    %c0_76 = arith.constant 0 : index
    %c0_77 = arith.constant 0 : index
    %c1024_78 = arith.constant 1024 : index
    %168 = vector.load %arg10[%c0_76, %c0_77, %c1024_78] : memref<1x1x2048xf32, #tpu.memory_space<vmem>>, vector<1x1x512xf32>
    %169 = vector.shape_cast %168 : vector<1x1x512xf32> to vector<1x512xf32>
    %170 = vector.broadcast %169 : vector<1x512xf32> to vector<32x512xf32>
    %171 = arith.addf %167, %170 : vector<32x512xf32>
    %cst_79 = arith.constant 0.000000e+00 : f32
    %172 = vector.broadcast %cst_79 : f32 to vector<32x512xf32>
    %173 = arith.maximumf %171, %172 : vector<32x512xf32>
    %174 = arith.truncf %173 : vector<32x512xf32> to vector<32x512xbf16>
    %c0_80 = arith.constant 0 : index
    %c1024_81 = arith.constant 1024 : index
    %c0_82 = arith.constant 0 : index
    %175 = vector.load %arg11[%c0_80, %c1024_81, %c0_82] : memref<1x2048x64xbf16, #tpu.memory_space<vmem>>, vector<1x512x64xbf16>
    %176 = vector.shape_cast %175 : vector<1x512x64xbf16> to vector<512x64xbf16>
    %cst_83 = arith.constant dense<0.000000e+00> : vector<32x64xf32>
    %177 = tpu.matmul %174, %176, %cst_83 {dimension_numbers = #tpu.dot_dimension_numbers<[1], [0], [0], [1], [0, 0, 1, 1], [], []>} : vector<32x512xbf16>, vector<512x64xbf16>, vector<32x64xf32> -> vector<32x64xf32>
    %178 = arith.addf %164, %177 : vector<32x64xf32>
    %c0_84 = arith.constant 0 : index
    %c0_85 = arith.constant 0 : index
    %c1536 = arith.constant 1536 : index
    %179 = vector.load %arg9[%c0_84, %c0_85, %c1536] : memref<1x64x2048xbf16, #tpu.memory_space<vmem>>, vector<1x64x512xbf16>
    %180 = vector.shape_cast %179 : vector<1x64x512xbf16> to vector<64x512xbf16>
    %cst_86 = arith.constant dense<0.000000e+00> : vector<32x512xf32>
    %181 = tpu.matmul %135, %180, %cst_86 {dimension_numbers = #tpu.dot_dimension_numbers<[1], [0], [0], [1], [0, 0, 1, 1], [], []>} : vector<32x64xbf16>, vector<64x512xbf16>, vector<32x512xf32> -> vector<32x512xf32>
    %c0_87 = arith.constant 0 : index
    %c0_88 = arith.constant 0 : index
    %c1536_89 = arith.constant 1536 : index
    %182 = vector.load %arg10[%c0_87, %c0_88, %c1536_89] : memref<1x1x2048xf32, #tpu.memory_space<vmem>>, vector<1x1x512xf32>
    %183 = vector.shape_cast %182 : vector<1x1x512xf32> to vector<1x512xf32>
    %184 = vector.broadcast %183 : vector<1x512xf32> to vector<32x512xf32>
    %185 = arith.addf %181, %184 : vector<32x512xf32>
    %cst_90 = arith.constant 0.000000e+00 : f32
    %186 = vector.broadcast %cst_90 : f32 to vector<32x512xf32>
    %187 = arith.maximumf %185, %186 : vector<32x512xf32>
    %188 = arith.truncf %187 : vector<32x512xf32> to vector<32x512xbf16>
    %c0_91 = arith.constant 0 : index
    %c1536_92 = arith.constant 1536 : index
    %c0_93 = arith.constant 0 : index
    %189 = vector.load %arg11[%c0_91, %c1536_92, %c0_93] : memref<1x2048x64xbf16, #tpu.memory_space<vmem>>, vector<1x512x64xbf16>
    %190 = vector.shape_cast %189 : vector<1x512x64xbf16> to vector<512x64xbf16>
    %cst_94 = arith.constant dense<0.000000e+00> : vector<32x64xf32>
    %191 = tpu.matmul %188, %190, %cst_94 {dimension_numbers = #tpu.dot_dimension_numbers<[1], [0], [0], [1], [0, 0, 1, 1], [], []>} : vector<32x512xbf16>, vector<512x64xbf16>, vector<32x64xf32> -> vector<32x64xf32>
    %192 = arith.addf %178, %191 : vector<32x64xf32>
    %c0_95 = arith.constant 0 : index
    %c0_96 = arith.constant 0 : index
    %c0_97 = arith.constant 0 : index
    %193 = vector.load %arg12[%c0_95, %c0_96, %c0_97] : memref<1x1x64xf32, #tpu.memory_space<vmem>>, vector<1x1x64xf32>
    %194 = vector.shape_cast %193 : vector<1x1x64xf32> to vector<1x64xf32>
    %195 = vector.broadcast %194 : vector<1x64xf32> to vector<32x64xf32>
    %196 = arith.addf %192, %195 : vector<32x64xf32>
    %197 = arith.addf %134, %196 : vector<32x64xf32>
    %c0_98 = arith.constant 0 : index
    %c0_99 = arith.constant 0 : index
    %c0_100 = arith.constant 0 : index
    %198 = vector.load %arg13[%c0_98, %c0_99, %c0_100] : memref<1x1x64xf32, #tpu.memory_space<vmem>>, vector<1x1x64xf32>
    %199 = vector.shape_cast %198 : vector<1x1x64xf32> to vector<1x64xf32>
    %c0_101 = arith.constant 0 : index
    %c0_102 = arith.constant 0 : index
    %c0_103 = arith.constant 0 : index
    %200 = vector.load %arg14[%c0_101, %c0_102, %c0_103] : memref<1x1x64xf32, #tpu.memory_space<vmem>>, vector<1x1x64xf32>
    %201 = vector.shape_cast %200 : vector<1x1x64xf32> to vector<1x64xf32>
    %cst_104 = arith.constant dense<0.000000e+00> : vector<32xf32>
    %202 = vector.multi_reduction <add>, %197, %cst_104 [1] : vector<32x64xf32> to vector<32xf32>
    %203 = vector.shape_cast %202 : vector<32xf32> to vector<32x1xf32>
    %cst_105 = arith.constant 6.400000e+01 : f32
    %204 = vector.broadcast %cst_105 : f32 to vector<32x1xf32>
    %205 = arith.divf %203, %204 : vector<32x1xf32>
    %206 = vector.broadcast %205 : vector<32x1xf32> to vector<32x64xf32>
    %207 = arith.subf %197, %206 : vector<32x64xf32>
    %208 = arith.mulf %207, %207 : vector<32x64xf32>
    %cst_106 = arith.constant dense<0.000000e+00> : vector<32xf32>
    %209 = vector.multi_reduction <add>, %208, %cst_106 [1] : vector<32x64xf32> to vector<32xf32>
    %210 = vector.shape_cast %209 : vector<32xf32> to vector<32x1xf32>
    %cst_107 = arith.constant 6.400000e+01 : f32
    %211 = vector.broadcast %cst_107 : f32 to vector<32x1xf32>
    %212 = arith.divf %210, %211 : vector<32x1xf32>
    %cst_108 = arith.constant 9.99999974E-6 : f32
    %213 = vector.broadcast %cst_108 : f32 to vector<32x1xf32>
    %214 = arith.addf %212, %213 : vector<32x1xf32>
    %215 = math.rsqrt %214 : vector<32x1xf32>
    %216 = vector.broadcast %215 : vector<32x1xf32> to vector<32x64xf32>
    %217 = arith.mulf %207, %216 : vector<32x64xf32>
    %218 = vector.broadcast %199 : vector<1x64xf32> to vector<32x64xf32>
    %219 = arith.mulf %217, %218 : vector<32x64xf32>
    %220 = vector.broadcast %201 : vector<1x64xf32> to vector<32x64xf32>
    %221 = arith.addf %219, %220 : vector<32x64xf32>
    %c0_109 = arith.constant 0 : index
    %c0_110 = arith.constant 0 : index
    %222 = vector.load %arg18[%c0_109, %c0_110] : memref<32x64xf32, #tpu.memory_space<vmem>>, vector<32x64xf32>
    tpu.vector_store %arg18[%c0_109, %c0_110], %221 {strides = array<i32>} : memref<32x64xf32, #tpu.memory_space<vmem>>, vector<32x64xf32>,
    %c3_i32 = arith.constant 3 : i32
    %223 = arith.cmpi eq, %arg0, %c3_i32 : i32
    %224 = arith.extui %223 : i1 to i32
    %c0_i32_111 = arith.constant 0 : i32
    %225 = arith.cmpi ne, %224, %c0_i32_111 : i32
    scf.if %225 {
      %c0_112 = arith.constant 0 : index
      %c0_113 = arith.constant 0 : index
      %226 = vector.load %arg15[%c0_112, %c0_113] : memref<512x64xf32, #tpu.memory_space<vmem>>, vector<512x64xf32>
      %c0_114 = arith.constant 0 : index
      %c0_115 = arith.constant 0 : index
      %227 = vector.load %arg16[%c0_114, %c0_115] : memref<1x512xf32, #tpu.memory_space<vmem>>, vector<1x512xf32>
      %cst_116 = arith.constant dense<0.000000e+00> : vector<32x512xf32>
      %228 = tpu.matmul %221, %226, %cst_116 {dimension_numbers = #tpu.dot_dimension_numbers<[1], [1], [0], [0], [0, 0, 1, 0], [], []>} : vector<32x64xf32>, vector<512x64xf32>, vector<32x512xf32> -> vector<32x512xf32>
      %cst_117 = arith.constant 2.000000e+00 : f32
      %229 = vector.broadcast %cst_117 : f32 to vector<32x512xf32>
      %230 = arith.mulf %229, %228 : vector<32x512xf32>
      %231 = vector.broadcast %227 : vector<1x512xf32> to vector<32x512xf32>
      %232 = arith.subf %231, %230 : vector<32x512xf32>
      %cst_118 = arith.constant dense<0x7F800000> : vector<32xf32>
      %233 = vector.multi_reduction <minimumf>, %232, %cst_118 [1] : vector<32x512xf32> to vector<32xf32>
      %234 = vector.shape_cast %233 : vector<32xf32> to vector<32x1xf32>
      %235 = tpu.iota {dimensions = array<i32: 1>} : vector<32x512xi32>
      %236 = vector.broadcast %234 : vector<32x1xf32> to vector<32x512xf32>
      %237 = arith.cmpf ole, %232, %236 : vector<32x512xf32>
      %c512_i32 = arith.constant 512 : i32
      %238 = vector.broadcast %c512_i32 : i32 to vector<32x512xi32>
      %239 = arith.select %237, %235, %238 : vector<32x512xi1>, vector<32x512xi32>
      %cst_119 = arith.constant dense<2147483647> : vector<32xi32>
      %240 = vector.multi_reduction <minsi>, %239, %cst_119 [1] : vector<32x512xi32> to vector<32xi32>
      %241 = vector.shape_cast %240 : vector<32xi32> to vector<32x1xi32>
      %242 = vector.broadcast %241 : vector<32x1xi32> to vector<32x512xi32>
      %243 = arith.cmpi eq, %235, %242 : vector<32x512xi32>
      %244 = arith.extui %243 : vector<32x512xi1> to vector<32x512xi32>
      %245 = arith.sitofp %244 : vector<32x512xi32> to vector<32x512xf32>
      %cst_120 = arith.constant dense<0.000000e+00> : vector<32x64xf32>
      %246 = tpu.matmul %245, %226, %cst_120 {dimension_numbers = #tpu.dot_dimension_numbers<[1], [0], [0], [1], [0, 0, 1, 1], [], []>} : vector<32x512xf32>, vector<512x64xf32>, vector<32x64xf32> -> vector<32x64xf32>
      %c0_121 = arith.constant 0 : index
      %c0_122 = arith.constant 0 : index
      %247 = vector.load %arg19[%c0_121, %c0_122] : memref<32x64xf32, #tpu.memory_space<vmem>>, vector<32x64xf32>
      tpu.vector_store %arg19[%c0_121, %c0_122], %246 {strides = array<i32>} : memref<32x64xf32, #tpu.memory_space<vmem>>, vector<32x64xf32>,
      %c0_123 = arith.constant 0 : index
      %c0_124 = arith.constant 0 : index
      %248 = vector.load %arg20[%c0_123, %c0_124] : memref<32x1xi32, #tpu.memory_space<vmem>>, vector<32x1xi32>
      tpu.vector_store %arg20[%c0_123, %c0_124], %241 {strides = array<i32>} : memref<32x1xi32, #tpu.memory_space<vmem>>, vector<32x1xi32>,
      %249 = arith.subf %246, %221 : vector<32x64xf32>
      %250 = arith.mulf %249, %249 : vector<32x64xf32>
      %cst_125 = arith.constant dense<0.000000e+00> : vector<32xf32>
      %251 = vector.multi_reduction <add>, %250, %cst_125 [1] : vector<32x64xf32> to vector<32xf32>
      %252 = vector.shape_cast %251 : vector<32xf32> to vector<32x1xf32>
      %c0_126 = arith.constant 0 : index
      %c0_127 = arith.constant 0 : index
      %253 = vector.load %arg17[%c0_126, %c0_127] : memref<32x1xf32, #tpu.memory_space<vmem>>, vector<32x1xf32>
      %254 = arith.mulf %252, %253 : vector<32x1xf32>
      %cst_128 = arith.constant dense<0.000000e+00> : vector<1xf32>
      %255 = vector.multi_reduction <add>, %254, %cst_128 [0] : vector<32x1xf32> to vector<1xf32>
      %256 = vector.shape_cast %255 : vector<1xf32> to vector<1x1xf32>
      %c0_129 = arith.constant 0 : index
      %c0_130 = arith.constant 0 : index
      %257 = vector.load %arg21[%c0_129, %c0_130] : memref<1x1xf32, #tpu.memory_space<vmem>>, vector<1x1xf32>
      tpu.vector_store %arg21[%c0_129, %c0_130], %256 {strides = array<i32>} : memref<1x1xf32, #tpu.memory_space<vmem>>, vector<1x1xf32>,
    } else {
    }
    return
  }
  func.func @transform_0(%arg0: i32) -> (i32, i32) {
    %c0_i32 = arith.constant 0 : i32
    %c0_i32_0 = arith.constant 0 : i32
    %c0_i32_1 = arith.constant 0 : i32
    return %c0_i32, %c0_i32_0 : i32, i32
  }
  func.func @transform_1(%arg0: i32) -> (i32, i32, i32) {
    %c0_i32 = arith.constant 0 : i32
    %c0_i32_0 = arith.constant 0 : i32
    %c0_i32_1 = arith.constant 0 : i32
    %c0_i32_2 = arith.constant 0 : i32
    return %c0_i32, %c0_i32_0, %c0_i32_1 : i32, i32, i32
  }
  func.func @transform_2(%arg0: i32) -> (i32, i32, i32) {
    %c0_i32 = arith.constant 0 : i32
    %c0_i32_0 = arith.constant 0 : i32
    %c0_i32_1 = arith.constant 0 : i32
    return %arg0, %c0_i32, %c0_i32_0 : i32, i32, i32
  }
  func.func @transform_3(%arg0: i32) -> (i32, i32, i32) {
    %c0_i32 = arith.constant 0 : i32
    %c0_i32_0 = arith.constant 0 : i32
    %c0_i32_1 = arith.constant 0 : i32
    return %arg0, %c0_i32, %c0_i32_0 : i32, i32, i32
  }
  func.func @transform_4(%arg0: i32) -> (i32, i32, i32) {
    %c0_i32 = arith.constant 0 : i32
    %c0_i32_0 = arith.constant 0 : i32
    %c0_i32_1 = arith.constant 0 : i32
    return %arg0, %c0_i32, %c0_i32_0 : i32, i32, i32
  }
  func.func @transform_5(%arg0: i32) -> (i32, i32, i32) {
    %c0_i32 = arith.constant 0 : i32
    %c0_i32_0 = arith.constant 0 : i32
    %c0_i32_1 = arith.constant 0 : i32
    return %arg0, %c0_i32, %c0_i32_0 : i32, i32, i32
  }
  func.func @transform_6(%arg0: i32) -> (i32, i32, i32) {
    %c0_i32 = arith.constant 0 : i32
    %c0_i32_0 = arith.constant 0 : i32
    %c0_i32_1 = arith.constant 0 : i32
    return %arg0, %c0_i32, %c0_i32_0 : i32, i32, i32
  }
  func.func @transform_7(%arg0: i32) -> (i32, i32, i32) {
    %c0_i32 = arith.constant 0 : i32
    %c0_i32_0 = arith.constant 0 : i32
    %c0_i32_1 = arith.constant 0 : i32
    return %arg0, %c0_i32, %c0_i32_0 : i32, i32, i32
  }
  func.func @transform_8(%arg0: i32) -> (i32, i32, i32) {
    %c0_i32 = arith.constant 0 : i32
    %c0_i32_0 = arith.constant 0 : i32
    %c0_i32_1 = arith.constant 0 : i32
    return %arg0, %c0_i32, %c0_i32_0 : i32, i32, i32
  }
  func.func @transform_9(%arg0: i32) -> (i32, i32, i32) {
    %c0_i32 = arith.constant 0 : i32
    %c0_i32_0 = arith.constant 0 : i32
    %c0_i32_1 = arith.constant 0 : i32
    return %arg0, %c0_i32, %c0_i32_0 : i32, i32, i32
  }
  func.func @transform_10(%arg0: i32) -> (i32, i32, i32) {
    %c0_i32 = arith.constant 0 : i32
    %c0_i32_0 = arith.constant 0 : i32
    %c0_i32_1 = arith.constant 0 : i32
    return %arg0, %c0_i32, %c0_i32_0 : i32, i32, i32
  }
  func.func @transform_11(%arg0: i32) -> (i32, i32, i32) {
    %c0_i32 = arith.constant 0 : i32
    %c0_i32_0 = arith.constant 0 : i32
    %c0_i32_1 = arith.constant 0 : i32
    return %arg0, %c0_i32, %c0_i32_0 : i32, i32, i32
  }
  func.func @transform_12(%arg0: i32) -> (i32, i32, i32) {
    %c0_i32 = arith.constant 0 : i32
    %c0_i32_0 = arith.constant 0 : i32
    %c0_i32_1 = arith.constant 0 : i32
    return %arg0, %c0_i32, %c0_i32_0 : i32, i32, i32
  }
  func.func @transform_13(%arg0: i32) -> (i32, i32, i32) {
    %c0_i32 = arith.constant 0 : i32
    %c0_i32_0 = arith.constant 0 : i32
    %c0_i32_1 = arith.constant 0 : i32
    return %arg0, %c0_i32, %c0_i32_0 : i32, i32, i32
  }
  func.func @transform_14(%arg0: i32) -> (i32, i32) {
    %c0_i32 = arith.constant 0 : i32
    %c0_i32_0 = arith.constant 0 : i32
    %c0_i32_1 = arith.constant 0 : i32
    return %c0_i32, %c0_i32_0 : i32, i32
  }
  func.func @transform_15(%arg0: i32) -> (i32, i32) {
    %c0_i32 = arith.constant 0 : i32
    %c0_i32_0 = arith.constant 0 : i32
    %c0_i32_1 = arith.constant 0 : i32
    return %c0_i32, %c0_i32_0 : i32, i32
  }
  func.func @transform_16(%arg0: i32) -> (i32, i32) {
    %c0_i32 = arith.constant 0 : i32
    %c0_i32_0 = arith.constant 0 : i32
    %c0_i32_1 = arith.constant 0 : i32
    return %c0_i32, %c0_i32_0 : i32, i32
  }
  func.func @transform_17(%arg0: i32) -> (i32, i32) {
    %c0_i32 = arith.constant 0 : i32
    %c0_i32_0 = arith.constant 0 : i32
    %c0_i32_1 = arith.constant 0 : i32
    return %c0_i32, %c0_i32_0 : i32, i32
  }
  func.func @transform_18(%arg0: i32) -> (i32, i32) {
    %c0_i32 = arith.constant 0 : i32
    %c0_i32_0 = arith.constant 0 : i32
    %c0_i32_1 = arith.constant 0 : i32
    return %c0_i32, %c0_i32_0 : i32, i32
  }
  func.func @transform_19(%arg0: i32) -> (i32, i32) {
    %c0_i32 = arith.constant 0 : i32
    %c0_i32_0 = arith.constant 0 : i32
    %c0_i32_1 = arith.constant 0 : i32
    return %c0_i32, %c0_i32_0 : i32, i32
  }
  func.func @transform_20(%arg0: i32) -> (i32, i32) {
    %c0_i32 = arith.constant 0 : i32
    %c0_i32_0 = arith.constant 0 : i32
    %c0_i32_1 = arith.constant 0 : i32
    return %c0_i32, %c0_i32_0 : i32, i32
  }
}

module attributes {stable_mosaic.version = 11 : i64} {
  func.func @kernel(%arg0: i32, %arg1: memref<32x64xf32, #tpu.memory_space<vmem>>, %arg2: memref<2x16x16xf32, #tpu.memory_space<vmem>>, %arg3: memref<1x64x192xbf16, #tpu.memory_space<vmem>>, %arg4: memref<1x1x192xf32, #tpu.memory_space<vmem>>, %arg5: memref<1x64x64xbf16, #tpu.memory_space<vmem>>, %arg6: memref<1x1x64xf32, #tpu.memory_space<vmem>>, %arg7: memref<1x1x64xf32, #tpu.memory_space<vmem>>, %arg8: memref<1x1x64xf32, #tpu.memory_space<vmem>>, %arg9: memref<1x64x2048xbf16, #tpu.memory_space<vmem>>, %arg10: memref<1x1x2048xf32, #tpu.memory_space<vmem>>, %arg11: memref<1x2048x64xbf16, #tpu.memory_space<vmem>>, %arg12: memref<1x1x64xf32, #tpu.memory_space<vmem>>, %arg13: memref<1x1x64xf32, #tpu.memory_space<vmem>>, %arg14: memref<1x1x64xf32, #tpu.memory_space<vmem>>, %arg15: memref<32x64xf32, #tpu.memory_space<vmem>>) attributes {dimension_semantics = [#tpu.dimension_semantics<arbitrary>], iteration_bounds = array<i64: 4>, scalar_prefetch = 0 : i64, scratch_operands = 0 : i64, tpu.core_type = #tpu.core_type<tc>, window_params = [{pipeline_mode = #tpu.pipeline_mode<synchronous>, transform_indices = @transform_0, window_bounds = array<i64: 32, 64>}, {pipeline_mode = #tpu.pipeline_mode<synchronous>, transform_indices = @transform_1, window_bounds = array<i64: 2, 16, 16>}, {transform_indices = @transform_2, window_bounds = array<i64: 1, 64, 192>}, {transform_indices = @transform_3, window_bounds = array<i64: 1, 1, 192>}, {transform_indices = @transform_4, window_bounds = array<i64: 1, 64, 64>}, {transform_indices = @transform_5, window_bounds = array<i64: 1, 1, 64>}, {transform_indices = @transform_6, window_bounds = array<i64: 1, 1, 64>}, {transform_indices = @transform_7, window_bounds = array<i64: 1, 1, 64>}, {transform_indices = @transform_8, window_bounds = array<i64: 1, 64, 2048>}, {transform_indices = @transform_9, window_bounds = array<i64: 1, 1, 2048>}, {transform_indices = @transform_10, window_bounds = array<i64: 1, 2048, 64>}, {transform_indices = @transform_11, window_bounds = array<i64: 1, 1, 64>}, {transform_indices = @transform_12, window_bounds = array<i64: 1, 1, 64>}, {transform_indices = @transform_13, window_bounds = array<i64: 1, 1, 64>}, {pipeline_mode = #tpu.pipeline_mode<synchronous>, transform_indices = @transform_14, window_bounds = array<i64: 32, 64>}]} {
    %c0_i32 = arith.constant 0 : i32
    %0 = arith.cmpi eq, %arg0, %c0_i32 : i32
    %1 = arith.extui %0 : i1 to i32
    %c0_i32_0 = arith.constant 0 : i32
    %2 = arith.cmpi ne, %1, %c0_i32_0 : i32
    scf.if %2 {
      %c0_111 = arith.constant 0 : index
      %c0_112 = arith.constant 0 : index
      %223 = vector.load %arg1[%c0_111, %c0_112] : memref<32x64xf32, #tpu.memory_space<vmem>>, vector<32x64xf32>
      %c0_113 = arith.constant 0 : index
      %c0_114 = arith.constant 0 : index
      %224 = vector.load %arg15[%c0_113, %c0_114] : memref<32x64xf32, #tpu.memory_space<vmem>>, vector<32x64xf32>
      tpu.vector_store %arg15[%c0_113, %c0_114], %223 {strides = array<i32>} : memref<32x64xf32, #tpu.memory_space<vmem>>, vector<32x64xf32>,
    } else {
    }
    %c0 = arith.constant 0 : index
    %c0_1 = arith.constant 0 : index
    %3 = vector.load %arg15[%c0, %c0_1] : memref<32x64xf32, #tpu.memory_space<vmem>>, vector<32x64xf32>
    %4 = arith.truncf %3 : vector<32x64xf32> to vector<32x64xbf16>
    %c0_2 = arith.constant 0 : index
    %c0_3 = arith.constant 0 : index
    %c0_4 = arith.constant 0 : index
    %5 = vector.load %arg3[%c0_2, %c0_3, %c0_4] : memref<1x64x192xbf16, #tpu.memory_space<vmem>>, vector<1x64x192xbf16>
    %6 = vector.shape_cast %5 : vector<1x64x192xbf16> to vector<64x192xbf16>
    %cst = arith.constant dense<0.000000e+00> : vector<32x192xf32>
    %7 = tpu.matmul %4, %6, %cst {dimension_numbers = #tpu.dot_dimension_numbers<[1], [0], [0], [1], [0, 0, 1, 1], [], []>} : vector<32x64xbf16>, vector<64x192xbf16>, vector<32x192xf32> -> vector<32x192xf32>
    %c0_5 = arith.constant 0 : index
    %c0_6 = arith.constant 0 : index
    %c0_7 = arith.constant 0 : index
    %8 = vector.load %arg4[%c0_5, %c0_6, %c0_7] : memref<1x1x192xf32, #tpu.memory_space<vmem>>, vector<1x1x192xf32>
    %9 = vector.shape_cast %8 : vector<1x1x192xf32> to vector<1x192xf32>
    %10 = vector.broadcast %9 : vector<1x192xf32> to vector<32x192xf32>
    %11 = arith.addf %7, %10 : vector<32x192xf32>
    %12 = arith.truncf %11 : vector<32x192xf32> to vector<32x192xbf16>
    %13 = vector.shape_cast %12 : vector<32x192xbf16> to vector<2x16x192xbf16>
    %c0_8 = arith.constant 0 : index
    %c0_9 = arith.constant 0 : index
    %c0_10 = arith.constant 0 : index
    %14 = vector.load %arg2[%c0_8, %c0_9, %c0_10] : memref<2x16x16xf32, #tpu.memory_space<vmem>>, vector<2x16x16xf32>
    %c0_11 = arith.constant 0 : index
    %c0_12 = arith.constant 0 : index
    %c0_13 = arith.constant 0 : index
    %15 = vector.load %arg5[%c0_11, %c0_12, %c0_13] : memref<1x64x64xbf16, #tpu.memory_space<vmem>>, vector<1x64x64xbf16>
    %16 = vector.shape_cast %15 : vector<1x64x64xbf16> to vector<64x64xbf16>
    %cst_14 = arith.constant 0.000000e+00 : f32
    %17 = vector.broadcast %cst_14 : f32 to vector<32x64xf32>
    %18 = vector.extract_strided_slice %13 {offsets = [0, 0, 0], sizes = [2, 16, 16], strides = [1, 1, 1]} : vector<2x16x192xbf16> to vector<2x16x16xbf16>
    %19 = vector.extract_strided_slice %13 {offsets = [0, 0, 64], sizes = [2, 16, 16], strides = [1, 1, 1]} : vector<2x16x192xbf16> to vector<2x16x16xbf16>
    %20 = vector.extract_strided_slice %13 {offsets = [0, 0, 128], sizes = [2, 16, 16], strides = [1, 1, 1]} : vector<2x16x192xbf16> to vector<2x16x16xbf16>
    "tpu.trace_start"() <{level = 10 : i32, message = "bqd,bkd->bqk"}> : () -> ()
    %cst_15 = arith.constant dense<0.000000e+00> : vector<2x16x16xf32>
    %21 = tpu.matmul %18, %19, %cst_15 {dimension_numbers = #tpu.dot_dimension_numbers<[2], [2], [1], [1], [0, 0, 0, 1, 1, 1], [0], [0]>} : vector<2x16x16xbf16>, vector<2x16x16xbf16>, vector<2x16x16xf32> -> vector<2x16x16xf32>
    "tpu.trace_stop"() : () -> ()
    %22 = arith.addf %21, %14 : vector<2x16x16xf32>
    %cst_16 = arith.constant dense<0xFF800000> : vector<2x16xf32>
    %23 = vector.multi_reduction <maximumf>, %22, %cst_16 [2] : vector<2x16x16xf32> to vector<2x16xf32>
    %24 = vector.shape_cast %23 : vector<2x16xf32> to vector<2x16x1xf32>
    %25 = vector.broadcast %24 : vector<2x16x1xf32> to vector<2x16x16xf32>
    %26 = arith.subf %22, %25 : vector<2x16x16xf32>
    %27 = math.exp %26 : vector<2x16x16xf32>
    %cst_17 = arith.constant dense<0.000000e+00> : vector<2x16xf32>
    %28 = vector.multi_reduction <add>, %27, %cst_17 [2] : vector<2x16x16xf32> to vector<2x16xf32>
    %29 = vector.shape_cast %28 : vector<2x16xf32> to vector<2x16x1xf32>
    %30 = tpu.reciprocal %29 {approx = true} : vector<2x16x1xf32> -> vector<2x16x1xf32>
    %31 = vector.broadcast %30 : vector<2x16x1xf32> to vector<2x16x16xf32>
    %32 = arith.mulf %27, %31 : vector<2x16x16xf32>
    %33 = arith.truncf %32 : vector<2x16x16xf32> to vector<2x16x16xbf16>
    "tpu.trace_start"() <{level = 10 : i32, message = "bqk,bkd->bqd"}> : () -> ()
    %cst_18 = arith.constant dense<0.000000e+00> : vector<2x16x16xf32>
    %34 = tpu.matmul %33, %20, %cst_18 {dimension_numbers = #tpu.dot_dimension_numbers<[2], [1], [1], [2], [0, 0, 0, 1, 1, 2], [0], [0]>} : vector<2x16x16xbf16>, vector<2x16x16xbf16>, vector<2x16x16xf32> -> vector<2x16x16xf32>
    "tpu.trace_stop"() : () -> ()
    %35 = vector.shape_cast %34 : vector<2x16x16xf32> to vector<32x16xf32>
    %36 = arith.truncf %35 : vector<32x16xf32> to vector<32x16xbf16>
    %37 = vector.extract_strided_slice %16 {offsets = [0, 0], sizes = [16, 64], strides = [1, 1]} : vector<64x64xbf16> to vector<16x64xbf16>
    %cst_19 = arith.constant dense<0.000000e+00> : vector<32x64xf32>
    %38 = tpu.matmul %36, %37, %cst_19 {dimension_numbers = #tpu.dot_dimension_numbers<[1], [0], [0], [1], [0, 0, 1, 1], [], []>} : vector<32x16xbf16>, vector<16x64xbf16>, vector<32x64xf32> -> vector<32x64xf32>
    %39 = arith.addf %17, %38 : vector<32x64xf32>
    %40 = vector.extract_strided_slice %13 {offsets = [0, 0, 16], sizes = [2, 16, 16], strides = [1, 1, 1]} : vector<2x16x192xbf16> to vector<2x16x16xbf16>
    %41 = vector.extract_strided_slice %13 {offsets = [0, 0, 80], sizes = [2, 16, 16], strides = [1, 1, 1]} : vector<2x16x192xbf16> to vector<2x16x16xbf16>
    %42 = vector.extract_strided_slice %13 {offsets = [0, 0, 144], sizes = [2, 16, 16], strides = [1, 1, 1]} : vector<2x16x192xbf16> to vector<2x16x16xbf16>
    "tpu.trace_start"() <{level = 10 : i32, message = "bqd,bkd->bqk"}> : () -> ()
    %cst_20 = arith.constant dense<0.000000e+00> : vector<2x16x16xf32>
    %43 = tpu.matmul %40, %41, %cst_20 {dimension_numbers = #tpu.dot_dimension_numbers<[2], [2], [1], [1], [0, 0, 0, 1, 1, 1], [0], [0]>} : vector<2x16x16xbf16>, vector<2x16x16xbf16>, vector<2x16x16xf32> -> vector<2x16x16xf32>
    "tpu.trace_stop"() : () -> ()
    %44 = arith.addf %43, %14 : vector<2x16x16xf32>
    %cst_21 = arith.constant dense<0xFF800000> : vector<2x16xf32>
    %45 = vector.multi_reduction <maximumf>, %44, %cst_21 [2] : vector<2x16x16xf32> to vector<2x16xf32>
    %46 = vector.shape_cast %45 : vector<2x16xf32> to vector<2x16x1xf32>
    %47 = vector.broadcast %46 : vector<2x16x1xf32> to vector<2x16x16xf32>
    %48 = arith.subf %44, %47 : vector<2x16x16xf32>
    %49 = math.exp %48 : vector<2x16x16xf32>
    %cst_22 = arith.constant dense<0.000000e+00> : vector<2x16xf32>
    %50 = vector.multi_reduction <add>, %49, %cst_22 [2] : vector<2x16x16xf32> to vector<2x16xf32>
    %51 = vector.shape_cast %50 : vector<2x16xf32> to vector<2x16x1xf32>
    %52 = tpu.reciprocal %51 {approx = true} : vector<2x16x1xf32> -> vector<2x16x1xf32>
    %53 = vector.broadcast %52 : vector<2x16x1xf32> to vector<2x16x16xf32>
    %54 = arith.mulf %49, %53 : vector<2x16x16xf32>
    %55 = arith.truncf %54 : vector<2x16x16xf32> to vector<2x16x16xbf16>
    "tpu.trace_start"() <{level = 10 : i32, message = "bqk,bkd->bqd"}> : () -> ()
    %cst_23 = arith.constant dense<0.000000e+00> : vector<2x16x16xf32>
    %56 = tpu.matmul %55, %42, %cst_23 {dimension_numbers = #tpu.dot_dimension_numbers<[2], [1], [1], [2], [0, 0, 0, 1, 1, 2], [0], [0]>} : vector<2x16x16xbf16>, vector<2x16x16xbf16>, vector<2x16x16xf32> -> vector<2x16x16xf32>
    "tpu.trace_stop"() : () -> ()
    %57 = vector.shape_cast %56 : vector<2x16x16xf32> to vector<32x16xf32>
    %58 = arith.truncf %57 : vector<32x16xf32> to vector<32x16xbf16>
    %59 = vector.extract_strided_slice %16 {offsets = [16, 0], sizes = [16, 64], strides = [1, 1]} : vector<64x64xbf16> to vector<16x64xbf16>
    %cst_24 = arith.constant dense<0.000000e+00> : vector<32x64xf32>
    %60 = tpu.matmul %58, %59, %cst_24 {dimension_numbers = #tpu.dot_dimension_numbers<[1], [0], [0], [1], [0, 0, 1, 1], [], []>} : vector<32x16xbf16>, vector<16x64xbf16>, vector<32x64xf32> -> vector<32x64xf32>
    %61 = arith.addf %39, %60 : vector<32x64xf32>
    %62 = vector.extract_strided_slice %13 {offsets = [0, 0, 32], sizes = [2, 16, 16], strides = [1, 1, 1]} : vector<2x16x192xbf16> to vector<2x16x16xbf16>
    %63 = vector.extract_strided_slice %13 {offsets = [0, 0, 96], sizes = [2, 16, 16], strides = [1, 1, 1]} : vector<2x16x192xbf16> to vector<2x16x16xbf16>
    %64 = vector.extract_strided_slice %13 {offsets = [0, 0, 160], sizes = [2, 16, 16], strides = [1, 1, 1]} : vector<2x16x192xbf16> to vector<2x16x16xbf16>
    "tpu.trace_start"() <{level = 10 : i32, message = "bqd,bkd->bqk"}> : () -> ()
    %cst_25 = arith.constant dense<0.000000e+00> : vector<2x16x16xf32>
    %65 = tpu.matmul %62, %63, %cst_25 {dimension_numbers = #tpu.dot_dimension_numbers<[2], [2], [1], [1], [0, 0, 0, 1, 1, 1], [0], [0]>} : vector<2x16x16xbf16>, vector<2x16x16xbf16>, vector<2x16x16xf32> -> vector<2x16x16xf32>
    "tpu.trace_stop"() : () -> ()
    %66 = arith.addf %65, %14 : vector<2x16x16xf32>
    %cst_26 = arith.constant dense<0xFF800000> : vector<2x16xf32>
    %67 = vector.multi_reduction <maximumf>, %66, %cst_26 [2] : vector<2x16x16xf32> to vector<2x16xf32>
    %68 = vector.shape_cast %67 : vector<2x16xf32> to vector<2x16x1xf32>
    %69 = vector.broadcast %68 : vector<2x16x1xf32> to vector<2x16x16xf32>
    %70 = arith.subf %66, %69 : vector<2x16x16xf32>
    %71 = math.exp %70 : vector<2x16x16xf32>
    %cst_27 = arith.constant dense<0.000000e+00> : vector<2x16xf32>
    %72 = vector.multi_reduction <add>, %71, %cst_27 [2] : vector<2x16x16xf32> to vector<2x16xf32>
    %73 = vector.shape_cast %72 : vector<2x16xf32> to vector<2x16x1xf32>
    %74 = tpu.reciprocal %73 {approx = true} : vector<2x16x1xf32> -> vector<2x16x1xf32>
    %75 = vector.broadcast %74 : vector<2x16x1xf32> to vector<2x16x16xf32>
    %76 = arith.mulf %71, %75 : vector<2x16x16xf32>
    %77 = arith.truncf %76 : vector<2x16x16xf32> to vector<2x16x16xbf16>
    "tpu.trace_start"() <{level = 10 : i32, message = "bqk,bkd->bqd"}> : () -> ()
    %cst_28 = arith.constant dense<0.000000e+00> : vector<2x16x16xf32>
    %78 = tpu.matmul %77, %64, %cst_28 {dimension_numbers = #tpu.dot_dimension_numbers<[2], [1], [1], [2], [0, 0, 0, 1, 1, 2], [0], [0]>} : vector<2x16x16xbf16>, vector<2x16x16xbf16>, vector<2x16x16xf32> -> vector<2x16x16xf32>
    "tpu.trace_stop"() : () -> ()
    %79 = vector.shape_cast %78 : vector<2x16x16xf32> to vector<32x16xf32>
    %80 = arith.truncf %79 : vector<32x16xf32> to vector<32x16xbf16>
    %81 = vector.extract_strided_slice %16 {offsets = [32, 0], sizes = [16, 64], strides = [1, 1]} : vector<64x64xbf16> to vector<16x64xbf16>
    %cst_29 = arith.constant dense<0.000000e+00> : vector<32x64xf32>
    %82 = tpu.matmul %80, %81, %cst_29 {dimension_numbers = #tpu.dot_dimension_numbers<[1], [0], [0], [1], [0, 0, 1, 1], [], []>} : vector<32x16xbf16>, vector<16x64xbf16>, vector<32x64xf32> -> vector<32x64xf32>
    %83 = arith.addf %61, %82 : vector<32x64xf32>
    %84 = vector.extract_strided_slice %13 {offsets = [0, 0, 48], sizes = [2, 16, 16], strides = [1, 1, 1]} : vector<2x16x192xbf16> to vector<2x16x16xbf16>
    %85 = vector.extract_strided_slice %13 {offsets = [0, 0, 112], sizes = [2, 16, 16], strides = [1, 1, 1]} : vector<2x16x192xbf16> to vector<2x16x16xbf16>
    %86 = vector.extract_strided_slice %13 {offsets = [0, 0, 176], sizes = [2, 16, 16], strides = [1, 1, 1]} : vector<2x16x192xbf16> to vector<2x16x16xbf16>
    "tpu.trace_start"() <{level = 10 : i32, message = "bqd,bkd->bqk"}> : () -> ()
    %cst_30 = arith.constant dense<0.000000e+00> : vector<2x16x16xf32>
    %87 = tpu.matmul %84, %85, %cst_30 {dimension_numbers = #tpu.dot_dimension_numbers<[2], [2], [1], [1], [0, 0, 0, 1, 1, 1], [0], [0]>} : vector<2x16x16xbf16>, vector<2x16x16xbf16>, vector<2x16x16xf32> -> vector<2x16x16xf32>
    "tpu.trace_stop"() : () -> ()
    %88 = arith.addf %87, %14 : vector<2x16x16xf32>
    %cst_31 = arith.constant dense<0xFF800000> : vector<2x16xf32>
    %89 = vector.multi_reduction <maximumf>, %88, %cst_31 [2] : vector<2x16x16xf32> to vector<2x16xf32>
    %90 = vector.shape_cast %89 : vector<2x16xf32> to vector<2x16x1xf32>
    %91 = vector.broadcast %90 : vector<2x16x1xf32> to vector<2x16x16xf32>
    %92 = arith.subf %88, %91 : vector<2x16x16xf32>
    %93 = math.exp %92 : vector<2x16x16xf32>
    %cst_32 = arith.constant dense<0.000000e+00> : vector<2x16xf32>
    %94 = vector.multi_reduction <add>, %93, %cst_32 [2] : vector<2x16x16xf32> to vector<2x16xf32>
    %95 = vector.shape_cast %94 : vector<2x16xf32> to vector<2x16x1xf32>
    %96 = tpu.reciprocal %95 {approx = true} : vector<2x16x1xf32> -> vector<2x16x1xf32>
    %97 = vector.broadcast %96 : vector<2x16x1xf32> to vector<2x16x16xf32>
    %98 = arith.mulf %93, %97 : vector<2x16x16xf32>
    %99 = arith.truncf %98 : vector<2x16x16xf32> to vector<2x16x16xbf16>
    "tpu.trace_start"() <{level = 10 : i32, message = "bqk,bkd->bqd"}> : () -> ()
    %cst_33 = arith.constant dense<0.000000e+00> : vector<2x16x16xf32>
    %100 = tpu.matmul %99, %86, %cst_33 {dimension_numbers = #tpu.dot_dimension_numbers<[2], [1], [1], [2], [0, 0, 0, 1, 1, 2], [0], [0]>} : vector<2x16x16xbf16>, vector<2x16x16xbf16>, vector<2x16x16xf32> -> vector<2x16x16xf32>
    "tpu.trace_stop"() : () -> ()
    %101 = vector.shape_cast %100 : vector<2x16x16xf32> to vector<32x16xf32>
    %102 = arith.truncf %101 : vector<32x16xf32> to vector<32x16xbf16>
    %103 = vector.extract_strided_slice %16 {offsets = [48, 0], sizes = [16, 64], strides = [1, 1]} : vector<64x64xbf16> to vector<16x64xbf16>
    %cst_34 = arith.constant dense<0.000000e+00> : vector<32x64xf32>
    %104 = tpu.matmul %102, %103, %cst_34 {dimension_numbers = #tpu.dot_dimension_numbers<[1], [0], [0], [1], [0, 0, 1, 1], [], []>} : vector<32x16xbf16>, vector<16x64xbf16>, vector<32x64xf32> -> vector<32x64xf32>
    %105 = arith.addf %83, %104 : vector<32x64xf32>
    %c0_35 = arith.constant 0 : index
    %c0_36 = arith.constant 0 : index
    %c0_37 = arith.constant 0 : index
    %106 = vector.load %arg6[%c0_35, %c0_36, %c0_37] : memref<1x1x64xf32, #tpu.memory_space<vmem>>, vector<1x1x64xf32>
    %107 = vector.shape_cast %106 : vector<1x1x64xf32> to vector<1x64xf32>
    %108 = vector.broadcast %107 : vector<1x64xf32> to vector<32x64xf32>
    %109 = arith.addf %105, %108 : vector<32x64xf32>
    %110 = arith.addf %3, %109 : vector<32x64xf32>
    %c0_38 = arith.constant 0 : index
    %c0_39 = arith.constant 0 : index
    %c0_40 = arith.constant 0 : index
    %111 = vector.load %arg7[%c0_38, %c0_39, %c0_40] : memref<1x1x64xf32, #tpu.memory_space<vmem>>, vector<1x1x64xf32>
    %112 = vector.shape_cast %111 : vector<1x1x64xf32> to vector<1x64xf32>
    %c0_41 = arith.constant 0 : index
    %c0_42 = arith.constant 0 : index
    %c0_43 = arith.constant 0 : index
    %113 = vector.load %arg8[%c0_41, %c0_42, %c0_43] : memref<1x1x64xf32, #tpu.memory_space<vmem>>, vector<1x1x64xf32>
    %114 = vector.shape_cast %113 : vector<1x1x64xf32> to vector<1x64xf32>
    %cst_44 = arith.constant dense<0.000000e+00> : vector<32xf32>
    %115 = vector.multi_reduction <add>, %110, %cst_44 [1] : vector<32x64xf32> to vector<32xf32>
    %116 = vector.shape_cast %115 : vector<32xf32> to vector<32x1xf32>
    %cst_45 = arith.constant 6.400000e+01 : f32
    %117 = vector.broadcast %cst_45 : f32 to vector<32x1xf32>
    %118 = arith.divf %116, %117 : vector<32x1xf32>
    %119 = vector.broadcast %118 : vector<32x1xf32> to vector<32x64xf32>
    %120 = arith.subf %110, %119 : vector<32x64xf32>
    %121 = arith.mulf %120, %120 : vector<32x64xf32>
    %cst_46 = arith.constant dense<0.000000e+00> : vector<32xf32>
    %122 = vector.multi_reduction <add>, %121, %cst_46 [1] : vector<32x64xf32> to vector<32xf32>
    %123 = vector.shape_cast %122 : vector<32xf32> to vector<32x1xf32>
    %cst_47 = arith.constant 6.400000e+01 : f32
    %124 = vector.broadcast %cst_47 : f32 to vector<32x1xf32>
    %125 = arith.divf %123, %124 : vector<32x1xf32>
    %cst_48 = arith.constant 9.99999974E-6 : f32
    %126 = vector.broadcast %cst_48 : f32 to vector<32x1xf32>
    %127 = arith.addf %125, %126 : vector<32x1xf32>
    %128 = math.rsqrt %127 : vector<32x1xf32>
    %129 = vector.broadcast %128 : vector<32x1xf32> to vector<32x64xf32>
    %130 = arith.mulf %120, %129 : vector<32x64xf32>
    %131 = vector.broadcast %112 : vector<1x64xf32> to vector<32x64xf32>
    %132 = arith.mulf %130, %131 : vector<32x64xf32>
    %133 = vector.broadcast %114 : vector<1x64xf32> to vector<32x64xf32>
    %134 = arith.addf %132, %133 : vector<32x64xf32>
    %135 = arith.truncf %134 : vector<32x64xf32> to vector<32x64xbf16>
    %cst_49 = arith.constant 0.000000e+00 : f32
    %136 = vector.broadcast %cst_49 : f32 to vector<32x64xf32>
    %c0_50 = arith.constant 0 : index
    %c0_51 = arith.constant 0 : index
    %c0_52 = arith.constant 0 : index
    %137 = vector.load %arg9[%c0_50, %c0_51, %c0_52] : memref<1x64x2048xbf16, #tpu.memory_space<vmem>>, vector<1x64x512xbf16>
    %138 = vector.shape_cast %137 : vector<1x64x512xbf16> to vector<64x512xbf16>
    %cst_53 = arith.constant dense<0.000000e+00> : vector<32x512xf32>
    %139 = tpu.matmul %135, %138, %cst_53 {dimension_numbers = #tpu.dot_dimension_numbers<[1], [0], [0], [1], [0, 0, 1, 1], [], []>} : vector<32x64xbf16>, vector<64x512xbf16>, vector<32x512xf32> -> vector<32x512xf32>
    %c0_54 = arith.constant 0 : index
    %c0_55 = arith.constant 0 : index
    %c0_56 = arith.constant 0 : index
    %140 = vector.load %arg10[%c0_54, %c0_55, %c0_56] : memref<1x1x2048xf32, #tpu.memory_space<vmem>>, vector<1x1x512xf32>
    %141 = vector.shape_cast %140 : vector<1x1x512xf32> to vector<1x512xf32>
    %142 = vector.broadcast %141 : vector<1x512xf32> to vector<32x512xf32>
    %143 = arith.addf %139, %142 : vector<32x512xf32>
    %cst_57 = arith.constant 0.000000e+00 : f32
    %144 = vector.broadcast %cst_57 : f32 to vector<32x512xf32>
    %145 = arith.maximumf %143, %144 : vector<32x512xf32>
    %146 = arith.truncf %145 : vector<32x512xf32> to vector<32x512xbf16>
    %c0_58 = arith.constant 0 : index
    %c0_59 = arith.constant 0 : index
    %c0_60 = arith.constant 0 : index
    %147 = vector.load %arg11[%c0_58, %c0_59, %c0_60] : memref<1x2048x64xbf16, #tpu.memory_space<vmem>>, vector<1x512x64xbf16>
    %148 = vector.shape_cast %147 : vector<1x512x64xbf16> to vector<512x64xbf16>
    %cst_61 = arith.constant dense<0.000000e+00> : vector<32x64xf32>
    %149 = tpu.matmul %146, %148, %cst_61 {dimension_numbers = #tpu.dot_dimension_numbers<[1], [0], [0], [1], [0, 0, 1, 1], [], []>} : vector<32x512xbf16>, vector<512x64xbf16>, vector<32x64xf32> -> vector<32x64xf32>
    %150 = arith.addf %136, %149 : vector<32x64xf32>
    %c0_62 = arith.constant 0 : index
    %c0_63 = arith.constant 0 : index
    %c512 = arith.constant 512 : index
    %151 = vector.load %arg9[%c0_62, %c0_63, %c512] : memref<1x64x2048xbf16, #tpu.memory_space<vmem>>, vector<1x64x512xbf16>
    %152 = vector.shape_cast %151 : vector<1x64x512xbf16> to vector<64x512xbf16>
    %cst_64 = arith.constant dense<0.000000e+00> : vector<32x512xf32>
    %153 = tpu.matmul %135, %152, %cst_64 {dimension_numbers = #tpu.dot_dimension_numbers<[1], [0], [0], [1], [0, 0, 1, 1], [], []>} : vector<32x64xbf16>, vector<64x512xbf16>, vector<32x512xf32> -> vector<32x512xf32>
    %c0_65 = arith.constant 0 : index
    %c0_66 = arith.constant 0 : index
    %c512_67 = arith.constant 512 : index
    %154 = vector.load %arg10[%c0_65, %c0_66, %c512_67] : memref<1x1x2048xf32, #tpu.memory_space<vmem>>, vector<1x1x512xf32>
    %155 = vector.shape_cast %154 : vector<1x1x512xf32> to vector<1x512xf32>
    %156 = vector.broadcast %155 : vector<1x512xf32> to vector<32x512xf32>
    %157 = arith.addf %153, %156 : vector<32x512xf32>
    %cst_68 = arith.constant 0.000000e+00 : f32
    %158 = vector.broadcast %cst_68 : f32 to vector<32x512xf32>
    %159 = arith.maximumf %157, %158 : vector<32x512xf32>
    %160 = arith.truncf %159 : vector<32x512xf32> to vector<32x512xbf16>
    %c0_69 = arith.constant 0 : index
    %c512_70 = arith.constant 512 : index
    %c0_71 = arith.constant 0 : index
    %161 = vector.load %arg11[%c0_69, %c512_70, %c0_71] : memref<1x2048x64xbf16, #tpu.memory_space<vmem>>, vector<1x512x64xbf16>
    %162 = vector.shape_cast %161 : vector<1x512x64xbf16> to vector<512x64xbf16>
    %cst_72 = arith.constant dense<0.000000e+00> : vector<32x64xf32>
    %163 = tpu.matmul %160, %162, %cst_72 {dimension_numbers = #tpu.dot_dimension_numbers<[1], [0], [0], [1], [0, 0, 1, 1], [], []>} : vector<32x512xbf16>, vector<512x64xbf16>, vector<32x64xf32> -> vector<32x64xf32>
    %164 = arith.addf %150, %163 : vector<32x64xf32>
    %c0_73 = arith.constant 0 : index
    %c0_74 = arith.constant 0 : index
    %c1024 = arith.constant 1024 : index
    %165 = vector.load %arg9[%c0_73, %c0_74, %c1024] : memref<1x64x2048xbf16, #tpu.memory_space<vmem>>, vector<1x64x512xbf16>
    %166 = vector.shape_cast %165 : vector<1x64x512xbf16> to vector<64x512xbf16>
    %cst_75 = arith.constant dense<0.000000e+00> : vector<32x512xf32>
    %167 = tpu.matmul %135, %166, %cst_75 {dimension_numbers = #tpu.dot_dimension_numbers<[1], [0], [0], [1], [0, 0, 1, 1], [], []>} : vector<32x64xbf16>, vector<64x512xbf16>, vector<32x512xf32> -> vector<32x512xf32>
    %c0_76 = arith.constant 0 : index
    %c0_77 = arith.constant 0 : index
    %c1024_78 = arith.constant 1024 : index
    %168 = vector.load %arg10[%c0_76, %c0_77, %c1024_78] : memref<1x1x2048xf32, #tpu.memory_space<vmem>>, vector<1x1x512xf32>
    %169 = vector.shape_cast %168 : vector<1x1x512xf32> to vector<1x512xf32>
    %170 = vector.broadcast %169 : vector<1x512xf32> to vector<32x512xf32>
    %171 = arith.addf %167, %170 : vector<32x512xf32>
    %cst_79 = arith.constant 0.000000e+00 : f32
    %172 = vector.broadcast %cst_79 : f32 to vector<32x512xf32>
    %173 = arith.maximumf %171, %172 : vector<32x512xf32>
    %174 = arith.truncf %173 : vector<32x512xf32> to vector<32x512xbf16>
    %c0_80 = arith.constant 0 : index
    %c1024_81 = arith.constant 1024 : index
    %c0_82 = arith.constant 0 : index
    %175 = vector.load %arg11[%c0_80, %c1024_81, %c0_82] : memref<1x2048x64xbf16, #tpu.memory_space<vmem>>, vector<1x512x64xbf16>
    %176 = vector.shape_cast %175 : vector<1x512x64xbf16> to vector<512x64xbf16>
    %cst_83 = arith.constant dense<0.000000e+00> : vector<32x64xf32>
    %177 = tpu.matmul %174, %176, %cst_83 {dimension_numbers = #tpu.dot_dimension_numbers<[1], [0], [0], [1], [0, 0, 1, 1], [], []>} : vector<32x512xbf16>, vector<512x64xbf16>, vector<32x64xf32> -> vector<32x64xf32>
    %178 = arith.addf %164, %177 : vector<32x64xf32>
    %c0_84 = arith.constant 0 : index
    %c0_85 = arith.constant 0 : index
    %c1536 = arith.constant 1536 : index
    %179 = vector.load %arg9[%c0_84, %c0_85, %c1536] : memref<1x64x2048xbf16, #tpu.memory_space<vmem>>, vector<1x64x512xbf16>
    %180 = vector.shape_cast %179 : vector<1x64x512xbf16> to vector<64x512xbf16>
    %cst_86 = arith.constant dense<0.000000e+00> : vector<32x512xf32>
    %181 = tpu.matmul %135, %180, %cst_86 {dimension_numbers = #tpu.dot_dimension_numbers<[1], [0], [0], [1], [0, 0, 1, 1], [], []>} : vector<32x64xbf16>, vector<64x512xbf16>, vector<32x512xf32> -> vector<32x512xf32>
    %c0_87 = arith.constant 0 : index
    %c0_88 = arith.constant 0 : index
    %c1536_89 = arith.constant 1536 : index
    %182 = vector.load %arg10[%c0_87, %c0_88, %c1536_89] : memref<1x1x2048xf32, #tpu.memory_space<vmem>>, vector<1x1x512xf32>
    %183 = vector.shape_cast %182 : vector<1x1x512xf32> to vector<1x512xf32>
    %184 = vector.broadcast %183 : vector<1x512xf32> to vector<32x512xf32>
    %185 = arith.addf %181, %184 : vector<32x512xf32>
    %cst_90 = arith.constant 0.000000e+00 : f32
    %186 = vector.broadcast %cst_90 : f32 to vector<32x512xf32>
    %187 = arith.maximumf %185, %186 : vector<32x512xf32>
    %188 = arith.truncf %187 : vector<32x512xf32> to vector<32x512xbf16>
    %c0_91 = arith.constant 0 : index
    %c1536_92 = arith.constant 1536 : index
    %c0_93 = arith.constant 0 : index
    %189 = vector.load %arg11[%c0_91, %c1536_92, %c0_93] : memref<1x2048x64xbf16, #tpu.memory_space<vmem>>, vector<1x512x64xbf16>
    %190 = vector.shape_cast %189 : vector<1x512x64xbf16> to vector<512x64xbf16>
    %cst_94 = arith.constant dense<0.000000e+00> : vector<32x64xf32>
    %191 = tpu.matmul %188, %190, %cst_94 {dimension_numbers = #tpu.dot_dimension_numbers<[1], [0], [0], [1], [0, 0, 1, 1], [], []>} : vector<32x512xbf16>, vector<512x64xbf16>, vector<32x64xf32> -> vector<32x64xf32>
    %192 = arith.addf %178, %191 : vector<32x64xf32>
    %c0_95 = arith.constant 0 : index
    %c0_96 = arith.constant 0 : index
    %c0_97 = arith.constant 0 : index
    %193 = vector.load %arg12[%c0_95, %c0_96, %c0_97] : memref<1x1x64xf32, #tpu.memory_space<vmem>>, vector<1x1x64xf32>
    %194 = vector.shape_cast %193 : vector<1x1x64xf32> to vector<1x64xf32>
    %195 = vector.broadcast %194 : vector<1x64xf32> to vector<32x64xf32>
    %196 = arith.addf %192, %195 : vector<32x64xf32>
    %197 = arith.addf %134, %196 : vector<32x64xf32>
    %c0_98 = arith.constant 0 : index
    %c0_99 = arith.constant 0 : index
    %c0_100 = arith.constant 0 : index
    %198 = vector.load %arg13[%c0_98, %c0_99, %c0_100] : memref<1x1x64xf32, #tpu.memory_space<vmem>>, vector<1x1x64xf32>
    %199 = vector.shape_cast %198 : vector<1x1x64xf32> to vector<1x64xf32>
    %c0_101 = arith.constant 0 : index
    %c0_102 = arith.constant 0 : index
    %c0_103 = arith.constant 0 : index
    %200 = vector.load %arg14[%c0_101, %c0_102, %c0_103] : memref<1x1x64xf32, #tpu.memory_space<vmem>>, vector<1x1x64xf32>
    %201 = vector.shape_cast %200 : vector<1x1x64xf32> to vector<1x64xf32>
    %cst_104 = arith.constant dense<0.000000e+00> : vector<32xf32>
    %202 = vector.multi_reduction <add>, %197, %cst_104 [1] : vector<32x64xf32> to vector<32xf32>
    %203 = vector.shape_cast %202 : vector<32xf32> to vector<32x1xf32>
    %cst_105 = arith.constant 6.400000e+01 : f32
    %204 = vector.broadcast %cst_105 : f32 to vector<32x1xf32>
    %205 = arith.divf %203, %204 : vector<32x1xf32>
    %206 = vector.broadcast %205 : vector<32x1xf32> to vector<32x64xf32>
    %207 = arith.subf %197, %206 : vector<32x64xf32>
    %208 = arith.mulf %207, %207 : vector<32x64xf32>
    %cst_106 = arith.constant dense<0.000000e+00> : vector<32xf32>
    %209 = vector.multi_reduction <add>, %208, %cst_106 [1] : vector<32x64xf32> to vector<32xf32>
    %210 = vector.shape_cast %209 : vector<32xf32> to vector<32x1xf32>
    %cst_107 = arith.constant 6.400000e+01 : f32
    %211 = vector.broadcast %cst_107 : f32 to vector<32x1xf32>
    %212 = arith.divf %210, %211 : vector<32x1xf32>
    %cst_108 = arith.constant 9.99999974E-6 : f32
    %213 = vector.broadcast %cst_108 : f32 to vector<32x1xf32>
    %214 = arith.addf %212, %213 : vector<32x1xf32>
    %215 = math.rsqrt %214 : vector<32x1xf32>
    %216 = vector.broadcast %215 : vector<32x1xf32> to vector<32x64xf32>
    %217 = arith.mulf %207, %216 : vector<32x64xf32>
    %218 = vector.broadcast %199 : vector<1x64xf32> to vector<32x64xf32>
    %219 = arith.mulf %217, %218 : vector<32x64xf32>
    %220 = vector.broadcast %201 : vector<1x64xf32> to vector<32x64xf32>
    %221 = arith.addf %219, %220 : vector<32x64xf32>
    %c0_109 = arith.constant 0 : index
    %c0_110 = arith.constant 0 : index
    %222 = vector.load %arg15[%c0_109, %c0_110] : memref<32x64xf32, #tpu.memory_space<vmem>>, vector<32x64xf32>
    tpu.vector_store %arg15[%c0_109, %c0_110], %221 {strides = array<i32>} : memref<32x64xf32, #tpu.memory_space<vmem>>, vector<32x64xf32>,
    return
  }
  func.func @transform_0(%arg0: i32) -> (i32, i32) {
    %c0_i32 = arith.constant 0 : i32
    %c0_i32_0 = arith.constant 0 : i32
    %c0_i32_1 = arith.constant 0 : i32
    return %c0_i32, %c0_i32_0 : i32, i32
  }
  func.func @transform_1(%arg0: i32) -> (i32, i32, i32) {
    %c0_i32 = arith.constant 0 : i32
    %c0_i32_0 = arith.constant 0 : i32
    %c0_i32_1 = arith.constant 0 : i32
    %c0_i32_2 = arith.constant 0 : i32
    return %c0_i32, %c0_i32_0, %c0_i32_1 : i32, i32, i32
  }
  func.func @transform_2(%arg0: i32) -> (i32, i32, i32) {
    %c0_i32 = arith.constant 0 : i32
    %c0_i32_0 = arith.constant 0 : i32
    %c0_i32_1 = arith.constant 0 : i32
    return %arg0, %c0_i32, %c0_i32_0 : i32, i32, i32
  }
  func.func @transform_3(%arg0: i32) -> (i32, i32, i32) {
    %c0_i32 = arith.constant 0 : i32
    %c0_i32_0 = arith.constant 0 : i32
    %c0_i32_1 = arith.constant 0 : i32
    return %arg0, %c0_i32, %c0_i32_0 : i32, i32, i32
  }
  func.func @transform_4(%arg0: i32) -> (i32, i32, i32) {
    %c0_i32 = arith.constant 0 : i32
    %c0_i32_0 = arith.constant 0 : i32
    %c0_i32_1 = arith.constant 0 : i32
    return %arg0, %c0_i32, %c0_i32_0 : i32, i32, i32
  }
  func.func @transform_5(%arg0: i32) -> (i32, i32, i32) {
    %c0_i32 = arith.constant 0 : i32
    %c0_i32_0 = arith.constant 0 : i32
    %c0_i32_1 = arith.constant 0 : i32
    return %arg0, %c0_i32, %c0_i32_0 : i32, i32, i32
  }
  func.func @transform_6(%arg0: i32) -> (i32, i32, i32) {
    %c0_i32 = arith.constant 0 : i32
    %c0_i32_0 = arith.constant 0 : i32
    %c0_i32_1 = arith.constant 0 : i32
    return %arg0, %c0_i32, %c0_i32_0 : i32, i32, i32
  }
  func.func @transform_7(%arg0: i32) -> (i32, i32, i32) {
    %c0_i32 = arith.constant 0 : i32
    %c0_i32_0 = arith.constant 0 : i32
    %c0_i32_1 = arith.constant 0 : i32
    return %arg0, %c0_i32, %c0_i32_0 : i32, i32, i32
  }
  func.func @transform_8(%arg0: i32) -> (i32, i32, i32) {
    %c0_i32 = arith.constant 0 : i32
    %c0_i32_0 = arith.constant 0 : i32
    %c0_i32_1 = arith.constant 0 : i32
    return %arg0, %c0_i32, %c0_i32_0 : i32, i32, i32
  }
  func.func @transform_9(%arg0: i32) -> (i32, i32, i32) {
    %c0_i32 = arith.constant 0 : i32
    %c0_i32_0 = arith.constant 0 : i32
    %c0_i32_1 = arith.constant 0 : i32
    return %arg0, %c0_i32, %c0_i32_0 : i32, i32, i32
  }
  func.func @transform_10(%arg0: i32) -> (i32, i32, i32) {
    %c0_i32 = arith.constant 0 : i32
    %c0_i32_0 = arith.constant 0 : i32
    %c0_i32_1 = arith.constant 0 : i32
    return %arg0, %c0_i32, %c0_i32_0 : i32, i32, i32
  }
  func.func @transform_11(%arg0: i32) -> (i32, i32, i32) {
    %c0_i32 = arith.constant 0 : i32
    %c0_i32_0 = arith.constant 0 : i32
    %c0_i32_1 = arith.constant 0 : i32
    return %arg0, %c0_i32, %c0_i32_0 : i32, i32, i32
  }
  func.func @transform_12(%arg0: i32) -> (i32, i32, i32) {
    %c0_i32 = arith.constant 0 : i32
    %c0_i32_0 = arith.constant 0 : i32
    %c0_i32_1 = arith.constant 0 : i32
    return %arg0, %c0_i32, %c0_i32_0 : i32, i32, i32
  }
  func.func @transform_13(%arg0: i32) -> (i32, i32, i32) {
    %c0_i32 = arith.constant 0 : i32
    %c0_i32_0 = arith.constant 0 : i32
    %c0_i32_1 = arith.constant 0 : i32
    return %arg0, %c0_i32, %c0_i32_0 : i32, i32, i32
  }
  func.func @transform_14(%arg0: i32) -> (i32, i32) {
    %c0_i32 = arith.constant 0 : i32
    %c0_i32_0 = arith.constant 0 : i32
    %c0_i32_1 = arith.constant 0 : i32
    return %c0_i32, %c0_i32_0 : i32, i32
  }
}

</mosaic_0001>

<bundles_post_ra>
// kernel: roomlayout_vqvae_forward.3
= control target key start
LH: loop header
LB: loop body
LE: loop exit
PB: predicated region body
PF: predicated region fallthrough
CT: control target
= control target key end

     0   :  { %s5759_s29 = smov 0   ;;  %s6630_s0 = inlined_call_operand.vmem [shape: f32[32,64], index: 0, kind: input, shape index: {}]   ;;  %s6631_s1 = inlined_call_operand.vmem [shape: f32[2,16,16], index: 1, kind: input, shape index: {}]   ;;  %s6632_s2 = inlined_call_operand.vmem [shape: bf16[4,64,192], index: 2, kind: input, shape index: {}]   ;;  %s6633_s3 = inlined_call_operand.vmem [shape: f32[4,1,192], index: 3, kind: input, shape index: {}]   ;;  %s6634_s4 = inlined_call_operand.vmem [shape: bf16[4,64,64], index: 4, kind: input, shape index: {}]   ;;  %s6635_s5 = inlined_call_operand.vmem [shape: f32[4,1,64], index: 5, kind: input, shape index: {}]   ;;  %s6636_s6 = inlined_call_operand.vmem [shape: f32[4,1,64], index: 6, kind: input, shape index: {}]   ;;  %s6637_s7 = inlined_call_operand.vmem [shape: f32[4,1,64], index: 7, kind: input, shape index: {}]   ;;  %s6638_s8 = inlined_call_operand.vmem [shape: bf16[4,64,2048], index: 8, kind: input, shape index: {}]   ;;  %s6639_s9 = inlined_call_operand.vmem [shape: f32[4,1,2048], index: 9, kind: input, shape index: {}]   ;;  %s6640_s10 = inlined_call_operand.vmem [shape: bf16[4,2048,64], index: 10, kind: input, shape index: {}]   ;;  %s6641_s11 = inlined_call_operand.vmem [shape: f32[4,1,64], index: 11, kind: input, shape index: {}]   ;;  %s6642_s12 = inlined_call_operand.vmem [shape: f32[4,1,64], index: 12, kind: input, shape index: {}]   ;;  %s6643_s13 = inlined_call_operand.vmem [shape: f32[4,1,64], index: 13, kind: input, shape index: {}]   ;;  %s6644_s14 = inlined_call_operand.vmem [shape: f32[32,64], index: 14, kind: output, shape index: {}]  }
   0x1   :  { %6649 = sst [smem:[#allocation4_spill]] %s6631_s1 }
   0x2   :  { %6650 = sst [smem:[#allocation5_spill]] %s6632_s2 }
   0x3   :  { %6651 = sst [smem:[#allocation6_spill]] %s6633_s3 }
   0x4   :  { %6652 = sst [smem:[#allocation7_spill]] %s6634_s4 }
   0x5   :  { %6653 = sst [smem:[#allocation8_spill]] %s6644_s14 }
   0x6 LB: > { %6654 = sst [smem:[#allocation2_spill]] %s5672_s29  ;;  %s4759_s30 = sadd.s32 4294967295, %s5672_s29   ;;  %s5672_s29 = sphi %s5759_s29, %s24_s29  }
   0x7   : > { %p4762_p0 = scmp.ge.s32.totalorder %s5672_s29, 1  ;;  %p503_p1 = scmp.lt.s32.totalorder %s5672_s29, 5 }
   0x9   : > { %p504_p2 = pnand %p4762_p0, %p503_p1 }
   0xb   : > { %507 = sbr.rel (%p504_p2) target bundleno = 4807 (0x12c7), region = 76 }
  0x10   : > { %p585_p3 = scmp.lt.s32.totalorder %s4759_s30, 3  ;;  %s6655_s2 = sld [smem:[#allocation5_spill]] }
  0x11   : > { %s6656_s3 = sld [smem:[#allocation6_spill]]  ;;  %p4773_p4 = scmp.ne.s32.totalorder %s4759_s30, 0 }
  0x12   : > { %s5767_s15 = scalar_select %p585_p3, %s4759_s30, 3 }
  0x13   : > { %s6658_s4 = sld [smem:[#allocation7_spill]] }
  0x14   : > { %s5028_s16 = sshll.u32 %s5767_s15, 6  ;;  %s4765_s17 = sshll.u32 %s5767_s15, 1 }
  0x15   : > { %s5029_s24 = sshll.u32 %s5767_s15, 5  ;;  %s4770_s25 = sshll.u32 %s5767_s15, 4 }
  0x16   : > { %s5774_s20 = scalar_lea.vmem %s6655_s2, %s5028_s16  ;;  %s5809_s29 = scalar_lea.vmem %s6639_s9, %s4770_s25 }
  0x17   : > { %s5779_s23 = scalar_lea.vmem %s6656_s3, %s4765_s17  ;;  %s5030_s17 = sshll.u32 %s5767_s15, 9 }
  0x18   : > { %6657 = sst [smem:[#allocation3_spill]] %s5779_s23  ;;  %s5803_s23 = scalar_lea.vmem %s6638_s8, %s5030_s17 }
  0x19   : > { %s5789_s1 = scalar_lea.vmem %s6658_s4, %s5029_s24  ;;  %s5031_s24 = sshll.u32 %s5767_s15, 10 }
  0x1a   : > { %s5815_s18 = scalar_lea.vmem %s6640_s10, %s5031_s24  ;;  %s624_s21 = scalar_lea.vmem %s6641_s11, %s5767_s15 }
  0x1b   : > { %s627_s17 = scalar_lea.vmem %s6642_s12, %s5767_s15  ;;  %635 = sbr.rel (%p4773_p4) target bundleno = 36 (0x24), region = 80 }
  0x1c   : > { %s6659_s3 = sld [smem:[#allocation8_spill]] (!%p4773_p4) }
  0x20   : > { %v636_v0 = vld [vmem:[%s6630_s0] sm:$0xff]  ;;  %vm640_vm0 = vcmask 523264   ;;  %v637_v1 = vld [vmem:[%s6630_s0 + $0x8] sm:$0xff]  ;;  %v638_v2 = vld [vmem:[%s6630_s0 + $0x10] sm:$0xff] }
  0x21   : > { %v639_v3 = vld [vmem:[%s6630_s0 + $0x18] sm:$0xff] }
  0x22   : > { %641 = vst.msk [vmem:[%s6659_s3] sm:$0xff] %vm640_vm0, %v636_v0  ;;  %642 = vst.msk [vmem:[%s6659_s3 + $0x8] sm:$0xff] %vm640_vm0, %v637_v1 }
  0x23   : > { %643 = vst.msk [vmem:[%s6659_s3 + $0x10] sm:$0xff] %vm640_vm0, %v638_v2  ;;  %644 = vst.msk [vmem:[%s6659_s3 + $0x18] sm:$0xff] %vm640_vm0, %v639_v3 }
  0x24 PF: > { %v5438_v4 = vld [vmem:[%s5774_s20 + $0x34] ss:$8 sps:$4 sm:$0xff]   ;;  %v5440_v5 = vld [vmem:[%s5774_s20 + $0x30] ss:$8 sps:$4 sm:$0xff]   ;;  %v5674_v6 = vmov 0   ;;  %vm711_vm1 = vcmask 523264   ;;  %v661_v20 = vlaneseq  ;;  %s6663_s14 = scalar_lea.vmem %s6635_s5, %s5767_s15  ;;  %s6665_s16 = scalar_lea.vmem %s6637_s7, %s5767_s15 }
  0x25   : > { %750 = vmatprep.mubr.bf16.mxu0 %v5674_v6  ;;  %726 = vmatprep.subr.bf16.mxu0 %v5438_v4  ;;  %v5441_v7 = vld [vmem:[%s5774_s20 + $0x24] ss:$8 sps:$4 sm:$0xff]   ;;  %v5443_v8 = vld [vmem:[%s5774_s20 + $0x20] ss:$8 sps:$4 sm:$0xff]   ;;  %v5444_v9 = vld [vmem:[%s5774_s20 + $0x14] ss:$8 sps:$4 sm:$0xff]   ;;  %s6666_s4 = scalar_lea.vmem %s6643_s13, %s5767_s15 }
  0x26   : > { %727 = vmatpush1.bf16.msra.mxu0 %v5440_v5  ;;  %v5446_v10 = vld [vmem:[%s5774_s20 + $0x10] ss:$8 sps:$4 sm:$0xff]   ;;  %v5447_v11 = vld [vmem:[%s5774_s20 + $0x4] ss:$8 sps:$4 sm:$0xff]   ;;  %v5449_v12 = vld [vmem:[%s5774_s20] ss:$8 sps:$4 sm:$0xff]  }
  0x27   : > { %728 = vmatprep.subr.bf16.mxu0 %v5441_v7  ;;  %s6660_s2 = sld [smem:[#allocation8_spill]]  ;;  %v5675_v19 = vmov 0.0   ;;  %v5879_v21 = vshrl.u32 %v661_v20, 7  ;;  %vm5676_vm2 = vmmov 0   ;;  %s5677_s20 = smov 64   ;;  %vm790_vm3 = vcmask 130048  }
  0x28   : > { %s6661_s3 = sld [smem:[#allocation3_spill]]  ;;  %5300 = vmatprep.subr.bf16.mxu1 %v5675_v19  ;;  %5302 = vmatprep.mubr.msk.bf16.mxu1 %vm5676_vm2, %v5675_v19  ;;  %s5678_s30 = smov 48  }
  0x29   : > { %v5882_v22 = vsub.s32 1, %v5879_v21  ;;  %v5885_v23 = vsub.s32 0, %v5879_v21  ;;  %s6662_s28 = sld [smem:[#allocation4_spill]]  ;;  %s5679_s22 = smov 112  }
  0x2a   : > { %729 = vmatpush1.bf16.msra.mxu0 %v5443_v8  ;;  %s5680_s25 = smov 32   ;;  %s5682_s26 = smov 16  }
  0x2b   : > { %730 = vmatprep.subr.bf16.mxu0 %v5444_v9  ;;  %s5683_s24 = smov 80  }
  0x2d   : > { %v645_v13 = vld [vmem:[%s6660_s2] sm:$0xff]  ;;  %v646_v14 = vld [vmem:[%s6660_s2 + $0x8] sm:$0xff]  ;;  %v647_v16 = vld [vmem:[%s6660_s2 + $0x10] sm:$0xff] }
  0x2e   : > { %731 = vmatpush1.bf16.msra.mxu0 %v5446_v10  ;;  %v649_v15 = vpack.c.bf16 %v646_v14, %v645_v13  ;;  %v648_v17 = vld [vmem:[%s6660_s2 + $0x18] sm:$0xff]  ;;  %v659_v24 = vld [vmem:[%s6661_s3] sm:$0x3] }
  0x2f   : > { %732 = vmatprep.subr.bf16.mxu0 %v5447_v11  ;;  %v650_v18 = vpack.c.bf16 %v648_v17, %v647_v16  ;;  %v668_v25 = vrot.slane %v659_v24, %v5882_v22  ;;  %v664_v27 = vrot.slane %v659_v24, %v5885_v23  ;;  %v5923_v51 = vld [vmem:[%s6662_s28] sm:$0xff]  ;;  %v5929_v55 = vld [vmem:[%s6662_s28 + $0x8] sm:$0xff]  ;;  %v5936_v60 = vld [vmem:[%s6662_s28 + $0x10] sm:$0xff] }
  0x30   : > { %v5943_v1 = vld [vmem:[%s6662_s28 + $0x18] sm:$0xff] }
  0x32   : > { %733 = vmatpush1.bf16.msra.mxu0 %v5449_v12 }
  0x33   : > { %5318 = vmatprep.subr.bf16.mxu0 %v5675_v19 }
  0x35   : > { %4782 = vmatmul.mubr.msk.bf16.vlgmr.msra.gmra.mxu0 %vm711_vm1, %v649_v15 }
  0x36   : > { %760 = vmatprep.mubr.bf16.mxu0 %v5674_v6 }
  0x3d   : > { %4783 = vmatmul.mubr.msk.bf16.gmra.mxu0 %vm711_vm1, %v650_v18 }
  0x3e   : > { %5320 = vmatprep.mubr.msk.bf16.mxu0 %vm5676_vm2, %v5675_v19 }
  0xf5   : > { %v752_v26 = vpop.f32.mrf.mxu0 }
  0xf6   : > { %v753_v31 = vadd.f32 %v752_v26, %v664_v27 }
  0xf7   : > { %v754_v28 = vpop.f32.mrf.mxu0 }
  0xf8   : > { %v755_v29 = vadd.f32 %v754_v28, %v668_v25 }
  0xf9   : > { %v756_v30 = vpop.f32.mrf.mxu0 }
  0xfa   : > { %v757_v32 = vadd.f32 %v756_v30, %v664_v27 }
  0xfb   : > { %v758_v33 = vpop.f32.mrf.mxu0 }
  0xfc   : > { %v5894_v34 = vpack.c.bf16 %v757_v32, %v753_v31  ;;  %v759_v35 = vadd.f32 %v758_v33, %v668_v25 }
  0xfd   : > { %v762_v36 = vpop.f32.mrf.mxu0 }
  0xfe   : > { %v5896_v37 = vpack.c.bf16 %v759_v35, %v755_v29  ;;  %788 = vrot.lane.b32.xlu0 %v5894_v34, %s5677_s20  ;;  %v763_v40 = vadd.f32 %v762_v36, %v664_v27 }
  0xff   : > { %v764_v38 = vpop.f32.mrf.mxu0 }
 0x100   : > { %v765_v43 = vadd.f32 %v764_v38, %v668_v25 }
 0x101   : > { %v766_v39 = vpop.f32.mrf.mxu0 }
 0x102   : > { %v767_v41 = vadd.f32 %v766_v39, %v664_v27 }
 0x103   : > { %v768_v42 = vpop.f32.mrf.mxu0 }
 0x104   : > { %v5899_v44 = vpack.c.bf16 %v767_v41, %v763_v40  ;;  %v769_v45 = vadd.f32 %v768_v42, %v668_v25 }
 0x106   : > { %v5901_v46 = vpack.c.bf16 %v769_v45, %v765_v43  ;;  %839 = vrot.lane.b32.xlu0 %v5899_v44, %s5677_s20  ;;  %s5681_s20 = smov 96  }
 0x108   : > { %5319 = vmatpush3.bf16.msra.mxu0 %v5901_v46 }
 0x109   : > { %5330 = vmatprep.subr.bf16.mxu0 %v5675_v19 }
 0x170   : > { %v789_v47 = vpop.permute.xlu0 %788 }
 0x171   : > { %v795_v48 = vsel %vm790_vm3, %v789_v47, 0 }
 0x172   : > { %5301 = vmatpush3.bf16.xpose.msra.mxu1 %v795_v48 }
 0x173   : > { %5306 = vmatprep.subr.bf16.mxu1 %v5675_v19 }
 0x178   : > { %v840_v49 = vpop.permute.xlu0 %839 }
 0x179   : > { %v845_v50 = vsel %vm790_vm3, %v840_v49, 0  ;;  %5303 = vmatmul.mubr.msk.bf16.vlgmr.msra.gmra.mxu1 %vm790_vm3, %v5894_v34 }
 0x17a   : > { %5307 = vmatpush3.bf16.xpose.msra.mxu1 %v845_v50  ;;  %5308 = vmatprep.mubr.msk.bf16.mxu1 %vm5676_vm2, %v5675_v19 }
 0x17b   : > { %5312 = vmatprep.subr.bf16.mxu1 %v5675_v19 }
 0x181   : > { %5309 = vmatmul.mubr.msk.bf16.vlgmr.msra.gmra.mxu1 %vm790_vm3, %v5899_v44 }
 0x182   : > { %5313 = vmatpush3.bf16.msra.mxu1 %v5896_v37  ;;  %5314 = vmatprep.mubr.msk.bf16.mxu1 %vm5676_vm2, %v5675_v19 }
 0x183   : > { %5324 = vmatprep.subr.bf16.mxu1 %v5675_v19 }
 0x239   : > { %v831_v52 = vpop.f32.mrf.mxu1 }
 0x23a   : > { %v832_v53 = vadd.f32 %v831_v52, %v5923_v51 }
 0x23b   : > { %v5304_v54 = vpop.f32.mrf.mxu1 }
 0x23c   : > { %v888_v56 = vsel %vm790_vm3, %v832_v53, -inf }
 0x23d   : > { %889 = vmax.xlane.f32.xlu1 %v888_v56  ;;  %v834_v57 = vpop.f32.mrf.mxu1 }
 0x23e   : > { %v835_v58 = vadd.f32 %v834_v57, %v5929_v55 }
 0x23f   : > { %v5305_v59 = vpop.f32.mrf.mxu1 }
 0x240   : > { %v891_v61 = vsel %vm790_vm3, %v835_v58, -inf }
 0x241   : > { %892 = vmax.xlane.f32.xlu1 %v891_v61  ;;  %v881_v62 = vpop.f32.mrf.mxu1 }
 0x242   : > { %v882_v63 = vadd.f32 %v881_v62, %v5936_v60 }
 0x243   : > { %v5310_v0 = vpop.f32.mrf.mxu1 }
 0x244   : > { %v894_v2 = vsel %vm790_vm3, %v882_v63, -inf }
 0x245   : > { %895 = vmax.xlane.f32.xlu0 %v894_v2  ;;  %v884_v3 = vpop.f32.mrf.mxu1 }
 0x246   : > { %v885_v4 = vadd.f32 %v884_v3, %v5943_v1 }
 0x247   : > { %v5311_v5 = vpop.f32.mrf.mxu1 }
 0x248   : > { %v897_v7 = vsel %vm790_vm3, %v885_v4, -inf }
 0x249   : > { %898 = vmax.xlane.f32.xlu1 %v897_v7 }
 0x25a   : > { %1026 = vrot.lane.b32.xlu1 %v5894_v34, %s5678_s30 }
 0x25b   : > { %1077 = vrot.lane.b32.xlu0 %v5899_v44, %s5678_s30 }
 0x2c6   : > { %v890_v8 = vpop.xlane.xlu1 %889 }
 0x2c7   : > { %v900_v9 = vsub.f32 %v832_v53, %v890_v8 }
 0x2c9   : > { %v904_v10 = vmul.f32 1.442695, %v900_v9 }
 0x2ca   : > { %v893_v11 = vpop.xlane.xlu1 %892 }
 0x2cb   : > { %5582 = vpow2.f32 %v904_v10  ;;  %v901_v12 = vsub.f32 %v835_v58, %v893_v11 }
 0x2cd   : > { %v906_v13 = vmul.f32 1.442695, %v901_v12 }
 0x2ce   : > { %v896_v14 = vpop.xlane.xlu0 %895 }
 0x2cf   : > { %5584 = vpow2.f32 %v906_v13  ;;  %v902_v15 = vsub.f32 %v882_v63, %v896_v14 }
 0x2d1   : > { %v908_v16 = vmul.f32 1.442695, %v902_v15 }
 0x2d2   : > { %v899_v17 = vpop.xlane.xlu1 %898  ;;  %v1078_v52 = vpop.permute.xlu0 %1077 }
 0x2d3   : > { %5586 = vpow2.f32 %v908_v16  ;;  %v903_v18 = vsub.f32 %v885_v4, %v899_v17  ;;  %v1083_v56 = vsel %vm790_vm3, %v1078_v52, 0 }
 0x2d5   : > { %v910_v20 = vmul.f32 1.442695, %v903_v18 }
 0x2d6   : > { %v1027_v32 = vpop.permute.xlu1 %1026 }
 0x2d7   : > { %5588 = vpow2.f32 %v910_v20  ;;  %v1032_v45 = vsel %vm790_vm3, %v1027_v32, 0 }
 0x2d8   : > { %v5583_v24 = vpop.eup %5582 }
 0x2d9   : > { %v912_v25 = vsel %vm790_vm3, %v5583_v24, 0.0 }
 0x2da   : > { %913 = vadd.xlane.f32.xlu1 %v912_v25 }
 0x2dc   : > { %v5585_v26 = vpop.eup %5584 }
 0x2dd   : > { %v915_v27 = vsel %vm790_vm3, %v5585_v26, 0.0 }
 0x2de   : > { %916 = vadd.xlane.f32.xlu1 %v915_v27 }
 0x2e0   : > { %v5587_v28 = vpop.eup %5586 }
 0x2e1   : > { %v918_v29 = vsel %vm790_vm3, %v5587_v28, 0.0 }
 0x2e2   : > { %919 = vadd.xlane.f32.xlu1 %v918_v29 }
 0x2e4   : > { %v5589_v30 = vpop.eup %5588 }
 0x2e5   : > { %v921_v31 = vsel %vm790_vm3, %v5589_v30, 0.0 }
 0x2e6   : > { %922 = vadd.xlane.f32.xlu1 %v921_v31 }
 0x2f7   : > { %1024 = vrot.lane.b32.xlu1 %v5894_v34, %s5679_s22 }
 0x2fb   : > { %1075 = vrot.lane.b32.xlu1 %v5899_v44, %s5679_s22 }
 0x363   : > { %v914_v33 = vpop.xlane.xlu1 %913 }
 0x364   : > { %5590 = vrcp.f32 %v914_v33 }
 0x367   : > { %v917_v35 = vpop.xlane.xlu1 %916 }
 0x368   : > { %5592 = vrcp.f32 %v917_v35 }
 0x36b   : > { %v920_v36 = vpop.xlane.xlu1 %919 }
 0x36c   : > { %5594 = vrcp.f32 %v920_v36 }
 0x36f   : > { %v923_v38 = vpop.xlane.xlu1 %922 }
 0x370   : > { %5596 = vrcp.f32 %v923_v38 }
 0x371   : > { %v5591_v39 = vpop.eup %5590 }
 0x372   : > { %v928_v41 = vmul.f32 %v5591_v39, %v5583_v24 }
 0x373   : > { %v1025_v54 = vpop.permute.xlu1 %1024 }
 0x375   : > { %v5593_v40 = vpop.eup %5592 }
 0x376   : > { %v929_v42 = vmul.f32 %v5593_v40, %v5585_v26 }
 0x377   : > { %v1076_v57 = vpop.permute.xlu1 %1075 }
 0x378   : > { %v932_v43 = vpack.c.bf16 %v929_v42, %v928_v41 }
 0x379   : > { %v5595_v47 = vpop.eup %5594 }
 0x37a   : > { %5315 = vmatmul.mubr.msk.bf16.vlgmr.msra.gmra.mxu1 %vm790_vm3, %v932_v43  ;;  %v930_v49 = vmul.f32 %v5595_v47, %v5587_v28 }
 0x37b   : > { %5325 = vmatpush3.bf16.xpose.msra.mxu1 %v1032_v45  ;;  %5326 = vmatprep.mubr.msk.bf16.mxu1 %vm5676_vm2, %v5675_v19 }
 0x37c   : > { %5336 = vmatprep.subr.bf16.mxu1 %v5675_v19 }
 0x37d   : > { %v5597_v48 = vpop.eup %5596 }
 0x37e   : > { %v931_v50 = vmul.f32 %v5597_v48, %v5589_v30 }
 0x380   : > { %v933_v53 = vpack.c.bf16 %v931_v50, %v930_v49 }
 0x382   : > { %5321 = vmatmul.mubr.msk.bf16.vlgmr.msra.gmra.mxu0 %vm790_vm3, %v933_v53  ;;  %5327 = vmatmul.mubr.msk.bf16.vlgmr.msra.gmra.mxu1 %vm790_vm3, %v1025_v54 }
 0x383   : > { %5331 = vmatpush3.bf16.xpose.msra.mxu0 %v1083_v56  ;;  %5332 = vmatprep.mubr.msk.bf16.mxu0 %vm5676_vm2, %v5675_v19 }
 0x384   : > { %5342 = vmatprep.subr.bf16.mxu0 %v5675_v19  ;;  %5338 = vmatprep.mubr.msk.bf16.mxu1 %vm5676_vm2, %v5675_v19 }
 0x38a   : > { %5333 = vmatmul.mubr.msk.bf16.vlgmr.msra.gmra.mxu0 %vm790_vm3, %v1076_v57 }
 0x38b   : > { %5344 = vmatprep.mubr.msk.bf16.mxu0 %vm5676_vm2, %v5675_v19 }
 0x43a   : > { %v5974_v58 = vpop.f32.mrf.mxu1 }
 0x43c   : > { %v5316_v59 = vpop.f32.mrf.mxu1 }
 0x43d   : > { %v5450_v59 = vld [vmem:[%s5789_s1] sm:$0xff]  }
 0x43e   : > { %v5976_v61 = vpop.f32.mrf.mxu1 }
 0x43f   : > { %v1022_v62 = vpack.c.bf16 %v5976_v61, %v5974_v58  ;;  %v5451_v61 = vld [vmem:[%s5789_s1 + $0x8] sm:$0xff]  }
 0x440   : > { %v5317_v63 = vpop.f32.mrf.mxu1 }
 0x442   : > { %v5980_v0 = vpop.f32.mrf.mxu0  ;;  %v1068_v2 = vpop.f32.mrf.mxu1 }
 0x443   : > { %v1069_v3 = vadd.f32 %v1068_v2, %v5923_v51 }
 0x444   : > { %v5322_v4 = vpop.f32.mrf.mxu0  ;;  %v5328_v5 = vpop.f32.mrf.mxu1 }
 0x445   : > { %v1126_v7 = vsel %vm790_vm3, %v1069_v3, -inf }
 0x446   : > { %v5984_v8 = vpop.f32.mrf.mxu0  ;;  %1127 = vmax.xlane.f32.xlu1 %v1126_v7  ;;  %v1071_v9 = vpop.f32.mrf.mxu1 }
 0x447   : > { %v1023_v10 = vpack.c.bf16 %v5984_v8, %v5980_v0  ;;  %v1072_v11 = vadd.f32 %v1071_v9, %v5929_v55 }
 0x448   : > { %v5323_v12 = vpop.f32.mrf.mxu0  ;;  %v5329_v13 = vpop.f32.mrf.mxu1 }
 0x449   : > { %v1129_v14 = vsel %vm790_vm3, %v1072_v11, -inf }
 0x44a   : > { %v1119_v15 = vpop.f32.mrf.mxu0  ;;  %1130 = vmax.xlane.f32.xlu0 %v1129_v14 }
 0x44b   : > { %v1120_v16 = vadd.f32 %v1119_v15, %v5936_v60 }
 0x44c   : > { %v5334_v17 = vpop.f32.mrf.mxu0 }
 0x44d   : > { %v1132_v18 = vsel %vm790_vm3, %v1120_v16, -inf }
 0x44e   : > { %v1122_v20 = vpop.f32.mrf.mxu0  ;;  %1133 = vmax.xlane.f32.xlu1 %v1132_v18 }
 0x44f   : > { %v1123_v24 = vadd.f32 %v1122_v20, %v5943_v1 }
 0x450   : > { %v5335_v25 = vpop.f32.mrf.mxu0 }
 0x451   : > { %v1135_v26 = vsel %vm790_vm3, %v1123_v24, -inf }
 0x452   : > { %1136 = vmax.xlane.f32.xlu0 %v1135_v26 }
 0x4cf   : > { %v1128_v27 = vpop.xlane.xlu1 %1127 }
 0x4d0   : > { %v1138_v28 = vsub.f32 %v1069_v3, %v1128_v27 }
 0x4d2   : > { %v1142_v29 = vmul.f32 1.442695, %v1138_v28 }
 0x4d3   : > { %v1131_v30 = vpop.xlane.xlu0 %1130 }
 0x4d4   : > { %5598 = vpow2.f32 %v1142_v29  ;;  %v1139_v31 = vsub.f32 %v1072_v11, %v1131_v30 }
 0x4d6   : > { %v1144_v32 = vmul.f32 1.442695, %v1139_v31 }
 0x4d7   : > { %v1134_v33 = vpop.xlane.xlu1 %1133 }
 0x4d8   : > { %5600 = vpow2.f32 %v1144_v32  ;;  %v1140_v35 = vsub.f32 %v1120_v16, %v1134_v33 }
 0x4da   : > { %v1146_v36 = vmul.f32 1.442695, %v1140_v35 }
 0x4db   : > { %v1137_v38 = vpop.xlane.xlu0 %1136 }
 0x4dc   : > { %5602 = vpow2.f32 %v1146_v36  ;;  %v1141_v39 = vsub.f32 %v1123_v24, %v1137_v38 }
 0x4de   : > { %v1148_v40 = vmul.f32 1.442695, %v1141_v39 }
 0x4e0   : > { %5604 = vpow2.f32 %v1148_v40 }
 0x4e1   : > { %v5599_v41 = vpop.eup %5598 }
 0x4e2   : > { %v1150_v42 = vsel %vm790_vm3, %v5599_v41, 0.0 }
 0x4e3   : > { %1151 = vadd.xlane.f32.xlu1 %v1150_v42 }
 0x4e5   : > { %v5601_v43 = vpop.eup %5600 }
 0x4e6   : > { %v1153_v45 = vsel %vm790_vm3, %v5601_v43, 0.0 }
 0x4e7   : > { %1154 = vadd.xlane.f32.xlu0 %v1153_v45 }
 0x4e9   : > { %v5603_v47 = vpop.eup %5602 }
 0x4ea   : > { %v1156_v48 = vsel %vm790_vm3, %v5603_v47, 0.0 }
 0x4eb   : > { %1157 = vadd.xlane.f32.xlu1 %v1156_v48 }
 0x4ed   : > { %v5605_v49 = vpop.eup %5604 }
 0x4ee   : > { %v1159_v50 = vsel %vm790_vm3, %v5605_v49, 0.0 }
 0x4ef   : > { %1160 = vadd.xlane.f32.xlu0 %v1159_v50 }
 0x4fc   : > { %1173 = vrot.lane.b32.xlu1 %v5896_v37, %s5679_s22 }
 0x500   : > { %1394 = vrot.lane.b32.xlu1 %v5894_v34, %s5680_s25 }
 0x504   : > { %1445 = vrot.lane.b32.xlu1 %v5899_v44, %s5680_s25 }
 0x505   : > { %1221 = vrot.lane.b32.xlu0 %v5901_v46, %s5679_s22 }
 0x508   : > { %1443 = vrot.lane.b32.xlu1 %v5899_v44, %s5681_s20 }
 0x509   : > { %1392 = vrot.lane.b32.xlu0 %v5894_v34, %s5681_s20 }
 0x56c   : > { %v1152_v52 = vpop.xlane.xlu1 %1151 }
 0x56d   : > { %5606 = vrcp.f32 %v1152_v52 }
 0x570   : > { %v1155_v53 = vpop.xlane.xlu0 %1154 }
 0x571   : > { %5608 = vrcp.f32 %v1155_v53 }
 0x574   : > { %v1158_v54 = vpop.xlane.xlu1 %1157 }
 0x575   : > { %5610 = vrcp.f32 %v1158_v54 }
 0x578   : > { %v1174_v56 = vpop.permute.xlu1 %1173  ;;  %v1161_v57 = vpop.xlane.xlu0 %1160 }
 0x579   : > { %5612 = vrcp.f32 %v1161_v57  ;;  %5337 = vmatpush3.bf16.msra.mxu1 %v1174_v56 }
 0x57a   : > { %v5607_v63 = vpop.eup %5606  ;;  %5348 = vmatprep.subr.bf16.mxu1 %v5451_v61 }
 0x57b   : > { %v1166_v4 = vmul.f32 %v5607_v63, %v5599_v41 }
 0x57c   : > { %v1222_v2 = vpop.permute.xlu0 %1221  ;;  %v1395_v15 = vpop.permute.xlu1 %1394 }
 0x57d   : > { %5343 = vmatpush3.bf16.msra.mxu0 %v1222_v2  ;;  %v1400_v28 = vsel %vm790_vm3, %v1395_v15, 0 }
 0x57e   : > { %v5609_v3 = vpop.eup %5608  ;;  %5354 = vmatprep.subr.bf16.mxu0 %v5450_v59 }
 0x57f   : > { %v1167_v5 = vmul.f32 %v5609_v3, %v5601_v43 }
 0x580   : > { %v1446_v16 = vpop.permute.xlu1 %1445  ;;  %v1393_v32 = vpop.permute.xlu0 %1392 }
 0x581   : > { %v1170_v7 = vpack.c.bf16 %v1167_v5, %v1166_v4  ;;  %v1451_v17 = vsel %vm790_vm3, %v1446_v16, 0 }
 0x582   : > { %v5611_v9 = vpop.eup %5610 }
 0x583   : > { %5339 = vmatmul.mubr.msk.bf16.vlgmr.msra.gmra.mxu1 %vm790_vm3, %v1170_v7  ;;  %v1168_v12 = vmul.f32 %v5611_v9, %v5603_v47 }
 0x584   : > { %v1444_v58 = vpop.permute.xlu1 %1443  ;;  %5349 = vmatpush3.bf16.msra.mxu1 %v5451_v61 }
 0x585   : > { %5360 = vmatprep.subr.bf16.mxu1 %v5675_v19 }
 0x586   : > { %v5613_v11 = vpop.eup %5612 }
 0x587   : > { %v1169_v13 = vmul.f32 %v5613_v11, %v5605_v49 }
 0x589   : > { %v1171_v14 = vpack.c.bf16 %v1169_v13, %v1168_v12 }
 0x58b   : > { %5345 = vmatmul.mubr.msk.bf16.vlgmr.msra.gmra.mxu0 %vm790_vm3, %v1171_v14 }
 0x58c   : > { %5356 = vmatprep.mubr.msk.bf16.mxu0 %vm790_vm3, %v1022_v62  ;;  %5355 = vmatpush3.bf16.msra.mxu0 %v5450_v59 }
 0x58d   : > { %5366 = vmatprep.subr.bf16.mxu0 %v5675_v19 }
 0x593   : > { %5357 = vmatmul.mubr.msk.bf16.vlgmr.msra.gmra.mxu0 %vm790_vm3, %v1023_v10 }
 0x594   : > { %5367 = vmatpush3.bf16.xpose.msra.mxu0 %v1451_v17  ;;  %5368 = vmatprep.mubr.msk.bf16.mxu0 %vm5676_vm2, %v5675_v19 }
 0x595   : > { %5378 = vmatprep.subr.bf16.mxu0 %v5675_v19 }
 0x59b   : > { %5369 = vmatmul.mubr.msk.bf16.vlgmr.msra.gmra.mxu0 %vm790_vm3, %v1444_v58 }
 0x59c   : > { %5380 = vmatprep.mubr.msk.bf16.mxu0 %vm5676_vm2, %v5675_v19 }
 0x643   : > { %v1213_v62 = vpop.f32.mrf.mxu1 }
 0x645   : > { %v5340_v0 = vpop.f32.mrf.mxu1 }
 0x647   : > { %v1216_v8 = vpop.f32.mrf.mxu1 }
 0x648   : > { %v1268_v10 = vpack.c.bf16 %v1216_v8, %v1213_v62 }
 0x649   : > { %v5341_v18 = vpop.f32.mrf.mxu1 }
 0x64a   : > { %5350 = vmatprep.mubr.msk.bf16.mxu1 %vm790_vm3, %v1268_v10 }
 0x64b   : > { %v1261_v20 = vpop.f32.mrf.mxu0 }
 0x64d   : > { %v5346_v24 = vpop.f32.mrf.mxu0 }
 0x64f   : > { %v1264_v25 = vpop.f32.mrf.mxu0 }
 0x650   : > { %v1269_v26 = vpack.c.bf16 %v1264_v25, %v1261_v20 }
 0x651   : > { %v5347_v27 = vpop.f32.mrf.mxu0 }
 0x652   : > { %5351 = vmatmul.mubr.msk.bf16.vlgmr.msra.gmra.mxu1 %vm790_vm3, %v1269_v26 }
 0x653   : > { %5361 = vmatpush3.bf16.xpose.msra.mxu1 %v1400_v28  ;;  %v6032_v29 = vpop.f32.mrf.mxu0  ;;  %5362 = vmatprep.mubr.msk.bf16.mxu1 %vm5676_vm2, %v5675_v19 }
 0x654   : > { %5372 = vmatprep.subr.bf16.mxu1 %v5675_v19 }
 0x655   : > { %v6037_v30 = vpop.f32.mrf.mxu0 }
 0x657   : > { %v6039_v31 = vpop.f32.mrf.mxu0 }
 0x659   : > { %v6041_v33 = vpop.f32.mrf.mxu0 }
 0x65a   : > { %5363 = vmatmul.mubr.msk.bf16.vlgmr.msra.gmra.mxu1 %vm790_vm3, %v1393_v32 }
 0x65b   : > { %v1487_v35 = vpop.f32.mrf.mxu0  ;;  %5374 = vmatprep.mubr.msk.bf16.mxu1 %vm5676_vm2, %v5675_v19 }
 0x65c   : > { %v1488_v49 = vadd.f32 %v1487_v35, %v5936_v60 }
 0x65d   : > { %v5370_v36 = vpop.f32.mrf.mxu0 }
 0x65e   : > { %v1500_v57 = vsel %vm790_vm3, %v1488_v49, -inf }
 0x65f   : > { %v1490_v38 = vpop.f32.mrf.mxu0 }
 0x660   : > { %v1491_v56 = vadd.f32 %v1490_v38, %v5943_v1 }
 0x661   : > { %v5371_v39 = vpop.f32.mrf.mxu0 }
 0x662   : > { %v1503_v63 = vsel %vm790_vm3, %v1491_v56, -inf }
 0x712   : > { %v6046_v40 = vpop.f32.mrf.mxu1 }
 0x714   : > { %v6048_v41 = vpop.f32.mrf.mxu1 }
 0x716   : > { %v6050_v42 = vpop.f32.mrf.mxu1 }
 0x718   : > { %v6052_v43 = vpop.f32.mrf.mxu1 }
 0x71a   : > { %v1436_v45 = vpop.f32.mrf.mxu1 }
 0x71b   : > { %v1437_v47 = vadd.f32 %v1436_v45, %v5923_v51 }
 0x71c   : > { %v5364_v48 = vpop.f32.mrf.mxu1 }
 0x71d   : > { %v1494_v50 = vsel %vm790_vm3, %v1437_v47, -inf }
 0x71e   : > { %1495 = vmax.xlane.f32.xlu0 %v1494_v50  ;;  %v1439_v52 = vpop.f32.mrf.mxu1 }
 0x71f   : > { %v1440_v53 = vadd.f32 %v1439_v52, %v5929_v55 }
 0x720   : > { %v5365_v54 = vpop.f32.mrf.mxu1 }
 0x721   : > { %v1497_v59 = vsel %vm790_vm3, %v1440_v53, -inf }
 0x722   : > { %1501 = vmax.xlane.f32.xlu0 %v1500_v57  ;;  %1498 = vmax.xlane.f32.xlu1 %v1497_v59 }
 0x726   : > { %1504 = vmax.xlane.f32.xlu0 %v1503_v63 }
 0x7a7   : > { %v1496_v2 = vpop.xlane.xlu0 %1495 }
 0x7a8   : > { %v1506_v3 = vsub.f32 %v1437_v47, %v1496_v2 }
 0x7aa   : > { %v1510_v9 = vmul.f32 1.442695, %v1506_v3 }
 0x7ab   : > { %v1502_v4 = vpop.xlane.xlu0 %1501  ;;  %v1499_v5 = vpop.xlane.xlu1 %1498 }
 0x7ac   : > { %v1508_v7 = vsub.f32 %v1488_v49, %v1502_v4  ;;  %v1507_v12 = vsub.f32 %v1440_v53, %v1499_v5  ;;  %v5452_v53 = vld [vmem:[%s5789_s1 + $0x10] sm:$0xff]  }
 0x7ae   : > { %v1514_v11 = vmul.f32 1.442695, %v1508_v7  ;;  %v1512_v15 = vmul.f32 1.442695, %v1507_v12 }
 0x7af   : > { %v1505_v13 = vpop.xlane.xlu0 %1504 }
 0x7b0   : > { %5614 = vpow2.f32 %v1514_v11  ;;  %v1509_v14 = vsub.f32 %v1491_v56, %v1505_v13 }
 0x7b1   : > { %5616 = vpow2.f32 %v1510_v9 }
 0x7b2   : > { %v1516_v16 = vmul.f32 1.442695, %v1509_v14 }
 0x7b4   : > { %5618 = vpow2.f32 %v1516_v16 }
 0x7b5   : > { %5620 = vpow2.f32 %v1512_v15 }
 0x7bd   : > { %v5615_v17 = vpop.eup %5614 }
 0x7be   : > { %v1524_v58 = vsel %vm790_vm3, %v5615_v17, 0.0  ;;  %v5617_v61 = vpop.eup %5616 }
 0x7bf   : > { %1525 = vadd.xlane.f32.xlu1 %v1524_v58  ;;  %v1518_v8 = vsel %vm790_vm3, %v5617_v61, 0.0 }
 0x7c1   : > { %v5619_v62 = vpop.eup %5618 }
 0x7c2   : > { %v1527_v0 = vsel %vm790_vm3, %v5619_v62, 0.0  ;;  %v5621_v10 = vpop.eup %5620 }
 0x7c3   : > { %1528 = vadd.xlane.f32.xlu0 %v1527_v0  ;;  %1519 = vadd.xlane.f32.xlu1 %v1518_v8  ;;  %v1521_v18 = vsel %vm790_vm3, %v5621_v10, 0.0 }
 0x7c7   : > { %1522 = vadd.xlane.f32.xlu0 %v1521_v18 }
 0x7d4   : > { %1540 = vrot.lane.b32.xlu1 %v5896_v37, %s5681_s20 }
 0x7d8   : > { %1703 = vrot.lane.b32.xlu1 %v5894_v34, %s5682_s26 }
 0x7dc   : > { %1754 = vrot.lane.b32.xlu1 %v5899_v44, %s5682_s26 }
 0x7dd   : > { %1587 = vrot.lane.b32.xlu0 %v5901_v46, %s5681_s20 }
 0x7e0   : > { %1752 = vrot.lane.b32.xlu1 %v5899_v44, %s5683_s24 }
 0x7e1   : > { %1701 = vrot.lane.b32.xlu0 %v5894_v34, %s5683_s24 }
 0x848   : > { %v1526_v20 = vpop.xlane.xlu1 %1525 }
 0x849   : > { %5622 = vrcp.f32 %v1526_v20 }
 0x84c   : > { %v1529_v24 = vpop.xlane.xlu0 %1528  ;;  %v1520_v25 = vpop.xlane.xlu1 %1519 }
 0x84d   : > { %5624 = vrcp.f32 %v1529_v24  ;;  %v1386_v24 = vadd.f32 %v6032_v29, %v6046_v40 }
 0x84e   : > { %5626 = vrcp.f32 %v1520_v25 }
 0x850   : > { %v1523_v26 = vpop.xlane.xlu0 %1522  ;;  %v1541_v27 = vpop.permute.xlu1 %1540 }
 0x851   : > { %5628 = vrcp.f32 %v1523_v26  ;;  %5373 = vmatpush3.bf16.msra.mxu1 %v1541_v27  ;;  %v1378_v27 = vadd.f32 %v6037_v30, %v6048_v41 }
 0x852   : > { %5384 = vmatprep.subr.bf16.mxu1 %v5452_v53 }
 0x854   : > { %v1588_v28 = vpop.permute.xlu0 %1587  ;;  %v1704_v34 = vpop.permute.xlu1 %1703 }
 0x855   : > { %5379 = vmatpush3.bf16.msra.mxu0 %v1588_v28  ;;  %v1709_v47 = vsel %vm790_vm3, %v1704_v34, 0 }
 0x856   : > { %5390 = vmatprep.subr.bf16.mxu0 %v5675_v19  ;;  %v5623_v32 = vpop.eup %5622 }
 0x857   : > { %v1536_v44 = vmul.f32 %v5623_v32, %v5615_v17  ;;  %v1389_v32 = vadd.f32 %v6039_v31, %v6050_v42 }
 0x858   : > { %v1702_v52 = vpop.permute.xlu0 %1701  ;;  %v1755_v5 = vpop.permute.xlu1 %1754 }
 0x859   : > { %v1760_v15 = vsel %vm790_vm3, %v1755_v5, 0 }
 0x85a   : > { %v5625_v35 = vpop.eup %5624 }
 0x85b   : > { %v1537_v36 = vmul.f32 %v5625_v35, %v5619_v62  ;;  %v5627_v38 = vpop.eup %5626 }
 0x85c   : > { %v1534_v48 = vmul.f32 %v5627_v38, %v5617_v61  ;;  %v1753_v61 = vpop.permute.xlu1 %1752 }
 0x85d   : > { %v1539_v39 = vpack.c.bf16 %v1537_v36, %v1536_v44  ;;  %v1381_v36 = vadd.f32 %v6041_v33, %v6052_v43 }
 0x85e   : > { %v5629_v45 = vpop.eup %5628 }
 0x85f   : > { %5381 = vmatmul.mubr.msk.bf16.vlgmr.msra.gmra.mxu0 %vm790_vm3, %v1539_v39  ;;  %v1535_v49 = vmul.f32 %v5629_v45, %v5621_v10 }
 0x860   : > { %5391 = vmatpush3.bf16.xpose.msra.mxu0 %v1709_v47  ;;  %5392 = vmatprep.mubr.msk.bf16.mxu0 %vm5676_vm2, %v5675_v19 }
 0x861   : > { %v1538_v50 = vpack.c.bf16 %v1535_v49, %v1534_v48  ;;  %5402 = vmatprep.subr.bf16.mxu0 %v5675_v19 }
 0x863   : > { %5375 = vmatmul.mubr.msk.bf16.vlgmr.msra.gmra.mxu1 %vm790_vm3, %v1538_v50 }
 0x864   : > { %5385 = vmatpush3.bf16.msra.mxu1 %v5452_v53 }
 0x865   : > { %5396 = vmatprep.subr.bf16.mxu1 %v5675_v19 }
 0x867   : > { %5393 = vmatmul.mubr.msk.bf16.vlgmr.msra.gmra.mxu0 %vm790_vm3, %v1702_v52 }
 0x868   : > { %5404 = vmatprep.mubr.msk.bf16.mxu0 %vm5676_vm2, %v5675_v19 }
 0x91f   : > { %v1627_v54 = vpop.f32.mrf.mxu0 }
 0x921   : > { %v5382_v56 = vpop.f32.mrf.mxu0 }
 0x923   : > { %v1580_v57 = vpop.f32.mrf.mxu1  ;;  %v1630_v59 = vpop.f32.mrf.mxu0 }
 0x924   : > { %v1635_v11 = vpack.c.bf16 %v1630_v59, %v1627_v54 }
 0x925   : > { %v5376_v63 = vpop.f32.mrf.mxu1  ;;  %v5383_v2 = vpop.f32.mrf.mxu0 }
 0x927   : > { %v1583_v3 = vpop.f32.mrf.mxu1  ;;  %v1745_v4 = vpop.f32.mrf.mxu0 }
 0x928   : > { %v1634_v7 = vpack.c.bf16 %v1583_v3, %v1580_v57  ;;  %v1746_v9 = vadd.f32 %v1745_v4, %v5923_v51 }
 0x929   : > { %v5377_v12 = vpop.f32.mrf.mxu1  ;;  %v5394_v13 = vpop.f32.mrf.mxu0 }
 0x92a   : > { %5386 = vmatprep.mubr.msk.bf16.mxu1 %vm790_vm3, %v1634_v7  ;;  %v1803_v14 = vsel %vm790_vm3, %v1746_v9, -inf }
 0x92b   : > { %1804 = vmax.xlane.f32.xlu0 %v1803_v14  ;;  %5387 = vmatmul.mubr.msk.bf16.vlgmr.msra.gmra.mxu1 %vm790_vm3, %v1635_v11  ;;  %v1748_v16 = vpop.f32.mrf.mxu0 }
 0x92c   : > { %v1749_v17 = vadd.f32 %v1748_v16, %v5929_v55  ;;  %5397 = vmatpush3.bf16.xpose.msra.mxu1 %v1760_v15  ;;  %5398 = vmatprep.mubr.msk.bf16.mxu1 %vm5676_vm2, %v5675_v19 }
 0x92d   : > { %v5395_v51 = vpop.f32.mrf.mxu0  ;;  %5408 = vmatprep.subr.bf16.mxu1 %v5675_v19 }
 0x92e   : > { %v1806_v58 = vsel %vm790_vm3, %v1749_v17, -inf }
 0x92f   : > { %1807 = vmax.xlane.f32.xlu1 %v1806_v58 }
 0x933   : > { %5399 = vmatmul.mubr.msk.bf16.vlgmr.msra.gmra.mxu1 %vm790_vm3, %v1753_v61 }
 0x934   : > { %5410 = vmatprep.mubr.msk.bf16.mxu1 %vm5676_vm2, %v5675_v19 }
 0x9b4   : > { %v1805_v62 = vpop.xlane.xlu0 %1804 }
 0x9b5   : > { %v1815_v0 = vsub.f32 %v1746_v9, %v1805_v62 }
 0x9b7   : > { %v1819_v8 = vmul.f32 1.442695, %v1815_v0 }
 0x9b8   : > { %v1808_v18 = vpop.xlane.xlu1 %1807 }
 0x9b9   : > { %5630 = vpow2.f32 %v1819_v8  ;;  %v1816_v20 = vsub.f32 %v1749_v17, %v1808_v18  ;;  %v5453_v17 = vld [vmem:[%s5789_s1 + $0x18] sm:$0xff]   ;;  %s6664_s1 = scalar_lea.vmem %s6636_s6, %s5767_s15 }
 0x9bb   : > { %v1821_v25 = vmul.f32 1.442695, %v1816_v20 }
 0x9bd   : > { %5632 = vpow2.f32 %v1821_v25 }
 0x9c6   : > { %v5631_v55 = vpop.eup %5630 }
 0x9c7   : > { %v1827_v10 = vsel %vm790_vm3, %v5631_v55, 0.0 }
 0x9c8   : > { %1828 = vadd.xlane.f32.xlu1 %v1827_v10 }
 0x9ca   : > { %v5633_v48 = vpop.eup %5632 }
 0x9cb   : > { %v1830_v33 = vsel %vm790_vm3, %v5633_v48, 0.0 }
 0x9eb   : > { %v5388_v26 = vpop.f32.mrf.mxu1 }
 0x9ec   : > { %v6106_v28 = vadd.f32 %v5388_v26, %v1386_v24  ;;  %v4812_v26 = vld [vmem:[%s6663_s14] ss:$0 sm:$0xff] }
 0x9ed   : > { %v1682_v19 = vpop.f32.mrf.mxu1 }
 0x9ee   : > { %v6110_v35 = vadd.f32 %v1682_v19, %v1378_v27 }
 0x9ef   : > { %v5389_v44 = vpop.f32.mrf.mxu1 }
 0x9f0   : > { %v6114_v38 = vadd.f32 %v5389_v44, %v1389_v32 }
 0x9f1   : > { %v1685_v29 = vpop.f32.mrf.mxu1 }
 0x9f2   : > { %v6116_v40 = vadd.f32 %v1685_v29, %v1381_v36 }
 0x9f3   : > { %v1796_v34 = vpop.f32.mrf.mxu1 }
 0x9f4   : > { %v1797_v30 = vadd.f32 %v1796_v34, %v5936_v60 }
 0x9f5   : > { %v5400_v41 = vpop.f32.mrf.mxu1 }
 0x9f6   : > { %v1809_v39 = vsel %vm790_vm3, %v1797_v30, -inf }
 0x9f7   : > { %1810 = vmax.xlane.f32.xlu0 %v1809_v39  ;;  %v1799_v31 = vpop.f32.mrf.mxu1 }
 0x9f8   : > { %v1800_v42 = vadd.f32 %v1799_v31, %v5943_v1 }
 0x9f9   : > { %v5401_v45 = vpop.f32.mrf.mxu1 }
 0x9fa   : > { %v1812_v47 = vsel %vm790_vm3, %v1800_v42, -inf }
 0x9fb   : > { %1813 = vmax.xlane.f32.xlu0 %v1812_v47 }
 0x9ff   : > { %1831 = vadd.xlane.f32.xlu0 %v1830_v33  ;;  %v5665_v33 = vld [vmem:[%s6660_s2 + $0x18] sm:$0xff] }
 0xa51   : > { %v1829_v63 = vpop.xlane.xlu1 %1828 }
 0xa80   : > { %v1811_v43 = vpop.xlane.xlu0 %1810 }
 0xa81   : > { %v1817_v49 = vsub.f32 %v1797_v30, %v1811_v43 }
 0xa83   : > { %v1823_v50 = vmul.f32 1.442695, %v1817_v49 }
 0xa84   : > { %v1814_v52 = vpop.xlane.xlu0 %1813 }
 0xa85   : > { %5634 = vpow2.f32 %v1823_v50  ;;  %v1818_v60 = vsub.f32 %v1800_v42, %v1814_v52 }
 0xa87   : > { %v1825_v53 = vmul.f32 1.442695, %v1818_v60 }
 0xa88   : > { %v1832_v59 = vpop.xlane.xlu0 %1831 }
 0xa89   : > { %5636 = vpow2.f32 %v1825_v53 }
 0xa8a   : > { %5638 = vrcp.f32 %v1832_v59 }
 0xa8b   : > { %5640 = vrcp.f32 %v1829_v63 }
 0xa92   : > { %v5635_v54 = vpop.eup %5634 }
 0xa93   : > { %v1833_v56 = vsel %vm790_vm3, %v5635_v54, 0.0 }
 0xa94   : > { %1834 = vadd.xlane.f32.xlu1 %v1833_v56 }
 0xa96   : > { %v5637_v1 = vpop.eup %5636 }
 0xa97   : > { %v1836_v57 = vsel %vm790_vm3, %v5637_v1, 0.0  ;;  %v5639_v2 = vpop.eup %5638 }
 0xa98   : > { %1837 = vadd.xlane.f32.xlu0 %v1836_v57  ;;  %v5641_v4 = vpop.eup %5640  ;;  %v1844_v5 = vmul.f32 %v5639_v2, %v5633_v48 }
 0xa99   : > { %v1843_v11 = vmul.f32 %v5641_v4, %v5631_v55 }
 0xa9b   : > { %v1847_v12 = vpack.c.bf16 %v1844_v5, %v1843_v11 }
 0xaa5   : > { %1849 = vrot.lane.b32.xlu1 %v5896_v37, %s5683_s24 }
 0xaae   : > { %1896 = vrot.lane.b32.xlu0 %v5901_v46, %s5683_s24 }
 0xb1d   : > { %v1835_v3 = vpop.xlane.xlu1 %1834 }
 0xb1e   : > { %5642 = vrcp.f32 %v1835_v3 }
 0xb21   : > { %v1850_v7 = vpop.permute.xlu1 %1849  ;;  %v1838_v9 = vpop.xlane.xlu0 %1837 }
 0xb22   : > { %5644 = vrcp.f32 %v1838_v9  ;;  %5403 = vmatpush3.bf16.msra.mxu0 %v1850_v7 }
 0xb23   : > { %5414 = vmatprep.subr.bf16.mxu0 %v5453_v17 }
 0xb25   : > { %5405 = vmatmul.mubr.msk.bf16.vlgmr.msra.gmra.mxu0 %vm790_vm3, %v1847_v12  ;;  %v1897_v37 = vpop.permute.xlu0 %1896 }
 0xb26   : > { %5409 = vmatpush3.bf16.msra.mxu1 %v1897_v37  ;;  %5415 = vmatpush3.bf16.msra.mxu0 %v5453_v17  ;;  %v2117_v17 = vld [vmem:[%s5803_s23 + $0x1c8] sm:$0xff] }
 0xb2b   : > { %v5643_v46 = vpop.eup %5642 }
 0xb2c   : > { %v1845_v14 = vmul.f32 %v5643_v46, %v5635_v54 }
 0xb2f   : > { %v5645_v13 = vpop.eup %5644 }
 0xb30   : > { %v1846_v15 = vmul.f32 %v5645_v13, %v5637_v1  ;;  %v2114_v13 = vld [vmem:[%s5803_s23 + $0x180] sm:$0xff] }
 0xb32   : > { %v1848_v16 = vpack.c.bf16 %v1846_v15, %v1845_v14  ;;  %v2116_v14 = vld [vmem:[%s5803_s23 + $0x1c0] sm:$0xff]  ;;  %v2115_v15 = vld [vmem:[%s5803_s23 + $0x188] sm:$0xff] }
 0xb34   : > { %5411 = vmatmul.mubr.msk.bf16.vlgmr.msra.gmra.mxu1 %vm790_vm3, %v1848_v16  ;;  %v4828_v16 = vcombine.high %v2114_v13, %v2116_v14 }
 0xb35   : > { %2258 = vmatprep.mubr.bf16.mxu1 %v5674_v6 }
 0xb36   : > { %2234 = vmatprep.subr.bf16.mxu1 %v4828_v16  ;;  %v4814_v16 = vld [vmem:[%s6665_s16] ss:$0 sm:$0xff] }
 0xbe5   : > { %v1889_v51 = vpop.f32.mrf.mxu0 }
 0xbe7   : > { %v5406_v58 = vpop.f32.mrf.mxu0 }
 0xbe8   : > { %v4829_v58 = vcombine.low %v2115_v15, %v2117_v17 }
 0xbe9   : > { %v1892_v61 = vpop.f32.mrf.mxu0 }
 0xbea   : > { %v1943_v62 = vpack.c.bf16 %v1892_v61, %v1889_v51  ;;  %v4827_v51 = vcombine.low %v2114_v13, %v2116_v14  ;;  %v4830_v61 = vcombine.high %v2115_v15, %v2117_v17 }
 0xbeb   : > { %v5407_v0 = vpop.f32.mrf.mxu0 }
 0xbec   : > { %5416 = vmatprep.mubr.msk.bf16.mxu0 %vm790_vm3, %v1943_v62  ;;  %2287 = vmatprep.subr.bf16.mxu0 %v4830_v61  ;;  %v2110_v62 = vld [vmem:[%s5803_s23 + $0x100] sm:$0xff]  ;;  %v2430_v61 = vld [vmem:[%s5803_s23 + $0x150] sm:$0xff] }
 0xbed   : > { %2235 = vmatpush1.bf16.msra.mxu1 %v4827_v51  ;;  %v2112_v0 = vld [vmem:[%s5803_s23 + $0x140] sm:$0xff]  ;;  %v2428_v51 = vld [vmem:[%s5803_s23 + $0x110] sm:$0xff] }
 0xbf4   : > { %v1936_v8 = vpop.f32.mrf.mxu1 }
 0xbf6   : > { %v5412_v55 = vpop.f32.mrf.mxu1 }
 0xbf7   : > { %v4824_v55 = vcombine.high %v2110_v62, %v2112_v0 }
 0xbf8   : > { %v1939_v10 = vpop.f32.mrf.mxu1 }
 0xbf9   : > { %v1944_v18 = vpack.c.bf16 %v1939_v10, %v1936_v8  ;;  %v2111_v8 = vld [vmem:[%s5803_s23 + $0x108] sm:$0xff]  ;;  %2236 = vmatprep.subr.bf16.mxu1 %v4824_v55 }
 0xbfa   : > { %v5413_v20 = vpop.f32.mrf.mxu1  ;;  %v2113_v10 = vld [vmem:[%s5803_s23 + $0x148] sm:$0xff] }
 0xbfb   : > { %5417 = vmatmul.mubr.msk.bf16.vlgmr.msra.gmra.mxu0 %vm790_vm3, %v1944_v18  ;;  %v4823_v18 = vcombine.low %v2110_v62, %v2112_v0  ;;  %v4825_v20 = vcombine.low %v2111_v8, %v2113_v10  ;;  %v2429_v62 = vld [vmem:[%s5803_s23 + $0x118] sm:$0xff] }
 0xbfc   : > { %2311 = vmatprep.mubr.bf16.mxu0 %v5674_v6  ;;  %2288 = vmatpush1.bf16.msra.mxu0 %v4829_v58  ;;  %v2431_v0 = vld [vmem:[%s5803_s23 + $0x158] sm:$0xff] }
 0xbfd   : > { %2237 = vmatpush1.bf16.msra.mxu1 %v4823_v18 }
 0xcbb   : > { %v5418_v24 = vpop.f32.mrf.mxu0 }
 0xcbc   : > { %v2008_v25 = vadd.f32 %v5418_v24, %v6106_v28  ;;  %v5662_v28 = vld [vmem:[%s6660_s2] sm:$0xff]  ;;  %v4826_v24 = vcombine.high %v2111_v8, %v2113_v10 }
 0xcbd   : > { %v1991_v27 = vpop.f32.mrf.mxu0 }
 0xcbe   : > { %v2006_v19 = vadd.f32 %v1991_v27, %v6110_v35  ;;  %v2019_v44 = vadd.f32 %v4812_v26, %v2008_v25  ;;  %v5663_v35 = vld [vmem:[%s6660_s2 + $0x10] sm:$0xff]  ;;  %2289 = vmatprep.subr.bf16.mxu0 %v4826_v24  ;;  %v2106_v25 = vld [vmem:[%s5803_s23 + $0x80] sm:$0xff]  ;;  %v2107_v27 = vld [vmem:[%s5803_s23 + $0x88] sm:$0xff]  ;;  %v4846_v24 = vcombine.high %v2429_v62, %v2431_v0 }
 0xcbf   : > { %v5419_v32 = vpop.f32.mrf.mxu0  ;;  %2290 = vmatpush1.bf16.msra.mxu0 %v4825_v20  ;;  %v4844_v20 = vcombine.high %v2428_v51, %v2430_v61 }
 0xcc0   : > { %v2017_v36 = vadd.f32 %v4812_v26, %v2006_v19  ;;  %v2009_v29 = vadd.f32 %v5419_v32, %v6114_v38  ;;  %v2023_v45 = vadd.f32 %v5663_v35, %v2019_v44  ;;  %v5664_v38 = vld [vmem:[%s6660_s2 + $0x8] sm:$0xff] }
 0xcc1   : > { %v1994_v34 = vpop.f32.mrf.mxu0  ;;  %v2109_v32 = vld [vmem:[%s5803_s23 + $0xc8] sm:$0xff] }
 0xcc2   : > { %v2007_v30 = vadd.f32 %v1994_v34, %v6116_v40  ;;  %v2021_v41 = vadd.f32 %v5662_v28, %v2017_v36  ;;  %v2020_v39 = vadd.f32 %v4812_v26, %v2009_v29  ;;  %v2033_v47 = vsel %vm711_vm1, %v2023_v45, 0.0  ;;  %v2102_v34 = vld [vmem:[%s5803_s23] sm:$0xff]  ;;  %v2103_v28 = vld [vmem:[%s5803_s23 + $0x8] sm:$0xff] }
 0xcc3   : > { %v4821_v36 = vcombine.low %v2107_v27, %v2109_v32  ;;  %v4822_v29 = vcombine.high %v2107_v27, %v2109_v32  ;;  %v2427_v27 = vld [vmem:[%s5803_s23 + $0xd8] sm:$0xff]  ;;  %v4845_v32 = vcombine.low %v2429_v62, %v2431_v0  ;;  %v5483_v62 = vld [vmem:[%s5815_s18 + $0x1c0] sm:$0xff]  }
 0xcc4   : > { %v2018_v31 = vadd.f32 %v4812_v26, %v2007_v30  ;;  %v2027_v42 = vsel %vm711_vm1, %v2021_v41, 0.0  ;;  %v2024_v43 = vadd.f32 %v5665_v33, %v2020_v39  ;;  %v2108_v26 = vld [vmem:[%s5803_s23 + $0xc0] sm:$0xff]  ;;  %v2105_v39 = vld [vmem:[%s5803_s23 + $0x48] sm:$0xff] }
 0xcc5   : > { %2028 = vadd.xlane.f32.xlu1 %v2027_v42  ;;  %v4820_v19 = vcombine.high %v2106_v25, %v2108_v26  ;;  %v4819_v44 = vcombine.low %v2106_v25, %v2108_v26  ;;  %2291 = vmatprep.subr.bf16.mxu0 %v4822_v29  ;;  %v2104_v30 = vld [vmem:[%s5803_s23 + $0x40] sm:$0xff]  ;;  %v4817_v42 = vcombine.low %v2103_v28, %v2105_v39  ;;  %v2424_v25 = vld [vmem:[%s5803_s23 + $0x90] sm:$0xff] }
 0xcc6   : > { %v2022_v40 = vadd.f32 %v5664_v38, %v2018_v31  ;;  %v2036_v49 = vsel %vm711_vm1, %v2024_v43, 0.0  ;;  %2292 = vmatpush1.bf16.msra.mxu0 %v4821_v36  ;;  %v4815_v31 = vcombine.low %v2102_v34, %v2104_v30  ;;  %v4818_v35 = vcombine.high %v2103_v28, %v2105_v39  ;;  %v2434_v38 = vld [vmem:[%s5803_s23 + $0x1d0] sm:$0xff]  ;;  %v2421_v28 = vld [vmem:[%s5803_s23 + $0x18] sm:$0xff]  ;;  %v5484_v0 = vld [vmem:[%s5815_s18 + $0x100] sm:$0xff]  }
 0xcc7   : > { %2238 = vmatprep.subr.bf16.mxu1 %v4820_v19  ;;  %v2426_v26 = vld [vmem:[%s5803_s23 + $0xd0] sm:$0xff] }
 0xcc8   : > { %v2030_v48 = vsel %vm711_vm1, %v2022_v40, 0.0  ;;  %2239 = vmatpush1.bf16.msra.mxu1 %v4819_v44  ;;  %2293 = vmatprep.subr.bf16.mxu0 %v4818_v35  ;;  %v4840_v36 = vcombine.high %v2424_v25, %v2426_v26 }
 0xcc9   : > { %2034 = vadd.xlane.f32.xlu1 %v2033_v47  ;;  %2031 = vadd.xlane.f32.xlu0 %v2030_v48  ;;  %v2435_v48 = vld [vmem:[%s5803_s23 + $0x1d8] sm:$0xff] }
 0xcca   : > { %2294 = vmatpush1.bf16.msra.mxu0 %v4817_v42 }
 0xccd   : > { %2037 = vadd.xlane.f32.xlu0 %v2036_v49 }
 0xd4e   : > { %v2029_v50 = vpop.xlane.xlu1 %2028 }
 0xd4f   : > { %v2040_v52 = vmul.f32 0.015625, %v2029_v50 }
 0xd51   : > { %v6161_v60 = vsub.f32 %v2021_v41, %v2040_v52  ;;  %v4816_v41 = vcombine.high %v2102_v34, %v2104_v30  ;;  %v2420_v34 = vld [vmem:[%s5803_s23 + $0x10] sm:$0xff] }
 0xd52   : > { %v2035_v53 = vpop.xlane.xlu1 %2034  ;;  %v2032_v54 = vpop.xlane.xlu0 %2031  ;;  %v2422_v30 = vld [vmem:[%s5803_s23 + $0x50] sm:$0xff] }
 0xd53   : > { %v2042_v56 = vmul.f32 0.015625, %v2035_v53  ;;  %v2041_v1 = vmul.f32 0.015625, %v2032_v54  ;;  %v2048_v57 = vmul.f32 %v6161_v60, %v6161_v60  ;;  %2240 = vmatprep.subr.bf16.mxu1 %v4816_v41  ;;  %v2423_v41 = vld [vmem:[%s5803_s23 + $0x58] sm:$0xff] }
 0xd54   : > { %2241 = vmatpush1.bf16.msra.mxu1 %v4815_v31  ;;  %v4839_v31 = vcombine.low %v2424_v25, %v2426_v26 }
 0xd55   : > { %v6165_v59 = vsub.f32 %v2023_v45, %v2042_v56  ;;  %v6167_v63 = vsub.f32 %v2022_v40, %v2041_v1  ;;  %v2052_v2 = vsel %vm711_vm1, %v2048_v57, 0.0  ;;  %v2432_v45 = vld [vmem:[%s5803_s23 + $0x190] sm:$0xff]  ;;  %v2433_v40 = vld [vmem:[%s5803_s23 + $0x198] sm:$0xff] }
 0xd56   : > { %2053 = vadd.xlane.f32.xlu1 %v2052_v2  ;;  %v2038_v3 = vpop.xlane.xlu0 %2037  ;;  %v4848_v47 = vcombine.high %v2432_v45, %v2434_v38  ;;  %v4847_v33 = vcombine.low %v2432_v45, %v2434_v38  ;;  %v4850_v49 = vcombine.high %v2433_v40, %v2435_v48  ;;  %v4836_v45 = vcombine.high %v2420_v34, %v2422_v30 }
 0xd57   : > { %v2043_v4 = vmul.f32 0.015625, %v2038_v3  ;;  %v2050_v5 = vmul.f32 %v6165_v59, %v6165_v59  ;;  %v2049_v7 = vmul.f32 %v6167_v63, %v6167_v63  ;;  %v4838_v38 = vcombine.high %v2421_v28, %v2423_v41 }
 0xd58   : > { %2546 = vmatprep.subr.bf16.mxu1 %v4848_v47  ;;  %2599 = vmatprep.subr.bf16.mxu0 %v4850_v49  ;;  %v4837_v47 = vcombine.low %v2421_v28, %v2423_v41  ;;  %v5457_v49 = vld [vmem:[%s5815_s18 + $0x1b8] sm:$0xff]  }
 0xd59   : > { %v6174_v9 = vsub.f32 %v2024_v43, %v2043_v4  ;;  %v2058_v11 = vsel %vm711_vm1, %v2050_v5, 0.0  ;;  %v2055_v12 = vsel %vm711_vm1, %v2049_v7, 0.0  ;;  %v4849_v43 = vcombine.low %v2433_v40, %v2435_v48  ;;  %v5454_v48 = vld [vmem:[%s5815_s18 + $0x178] sm:$0xff]  }
 0xd5a   : > { %2059 = vadd.xlane.f32.xlu1 %v2058_v11  ;;  %2056 = vadd.xlane.f32.xlu0 %v2055_v12  ;;  %v4835_v40 = vcombine.low %v2420_v34, %v2422_v30 }
 0xd5b   : > { %v2051_v37 = vmul.f32 %v6174_v9, %v6174_v9 }
 0xd5d   : > { %v2061_v46 = vsel %vm711_vm1, %v2051_v37, 0.0  ;;  %v4813_v37 = vld [vmem:[%s6664_s1] ss:$0 sm:$0xff] }
 0xd5e   : > { %2062 = vadd.xlane.f32.xlu0 %v2061_v46 }
 0xddf   : > { %v2054_v50 = vpop.xlane.xlu1 %2053 }
 0xde0   : > { %v2064_v52 = vmul.f32 0.015625, %v2054_v50  ;;  %v5458_v50 = vld [vmem:[%s5815_s18 + $0x170] sm:$0xff]  }
 0xde2   : > { %v2068_v53 = vadd.f32 1e-05, %v2064_v52  ;;  %v5459_v52 = vld [vmem:[%s5815_s18 + $0x1f0] sm:$0xff]  }
 0xde3   : > { %v2060_v54 = vpop.xlane.xlu1 %2059  ;;  %v2057_v56 = vpop.xlane.xlu0 %2056 }
 0xde4   : > { %5646 = vrsqrt.f32 %v2068_v53  ;;  %v2066_v1 = vmul.f32 0.015625, %v2060_v54  ;;  %v2065_v57 = vmul.f32 0.015625, %v2057_v56  ;;  %v5460_v53 = vld [vmem:[%s5815_s18 + $0x130] sm:$0xff]   ;;  %v5462_v56 = vld [vmem:[%s5815_s18 + $0x168] sm:$0xff]  }
 0xde5   : > { %v5461_v54 = vld [vmem:[%s5815_s18 + $0x1b0] sm:$0xff]  }
 0xde6   : > { %v2069_v2 = vadd.f32 1e-05, %v2065_v57  ;;  %v2070_v3 = vadd.f32 1e-05, %v2066_v1  ;;  %v5463_v1 = vld [vmem:[%s5815_s18 + $0x1e8] sm:$0xff]  }
 0xde7   : > { %v2063_v4 = vpop.xlane.xlu0 %2062  ;;  %v5464_v57 = vld [vmem:[%s5815_s18 + $0x128] sm:$0xff]  }
 0xde8   : > { %v2067_v5 = vmul.f32 0.015625, %v2063_v4  ;;  %5648 = vrsqrt.f32 %v2069_v2  ;;  %v5465_v2 = vld [vmem:[%s5815_s18 + $0x1a8] sm:$0xff]   ;;  %v5467_v4 = vld [vmem:[%s5815_s18 + $0x1e0] sm:$0xff]  }
 0xde9   : > { %5650 = vrsqrt.f32 %v2070_v3  ;;  %v5466_v3 = vld [vmem:[%s5815_s18 + $0x160] sm:$0xff]  }
 0xdea   : > { %v2071_v7 = vadd.f32 1e-05, %v2067_v5  ;;  %v5468_v5 = vld [vmem:[%s5815_s18 + $0x120] sm:$0xff]  }
 0xdec   : > { %5652 = vrsqrt.f32 %v2071_v7  ;;  %v5469_v7 = vld [vmem:[%s5815_s18 + $0x1a0] sm:$0xff]  }
 0xdf1   : > { %v5647_v11 = vpop.eup %5646 }
 0xdf2   : > { %v2076_v12 = vmul.f32 %v5647_v11, %v6161_v60  ;;  %v5470_v11 = vld [vmem:[%s5815_s18 + $0x158] sm:$0xff]  }
 0xdf4   : > { %v2086_v13 = vmul.f32 %v4813_v37, %v2076_v12  ;;  %v5471_v12 = vld [vmem:[%s5815_s18 + $0x1d8] sm:$0xff]  }
 0xdf5   : > { %v5649_v46 = vpop.eup %5648 }
 0xdf6   : > { %v2077_v14 = vmul.f32 %v5649_v46, %v6167_v63  ;;  %v5651_v15 = vpop.eup %5650  ;;  %v6218_v8 = vadd.f32 %v4814_v16, %v2086_v13  ;;  %v5473_v46 = vld [vmem:[%s5815_s18 + $0x198] sm:$0xff]   ;;  %v5474_v13 = vld [vmem:[%s5815_s18 + $0x150] sm:$0xff]  }
 0xdf7   : > { %v2078_v63 = vmul.f32 %v5651_v15, %v6165_v59  ;;  %v4843_v59 = vcombine.low %v2428_v51, %v2430_v61  ;;  %v5476_v15 = vld [vmem:[%s5815_s18 + $0x110] sm:$0xff]   ;;  %v5480_v51 = vld [vmem:[%s5815_s18 + $0x108] sm:$0xff]   ;;  %v5482_v61 = vld [vmem:[%s5815_s18 + $0x140] sm:$0xff]  }
 0xdf8   : > { %v2087_v60 = vmul.f32 %v4813_v37, %v2077_v14  ;;  %v5475_v14 = vld [vmem:[%s5815_s18 + $0x1d0] sm:$0xff]  }
 0xdf9   : > { %v5653_v17 = vpop.eup %5652  ;;  %v2088_v19 = vmul.f32 %v4813_v37, %v2078_v63  ;;  %v5485_v63 = vld [vmem:[%s5815_s18 + $0x180] sm:$0xff]  }
 0xdfa   : > { %v2079_v58 = vmul.f32 %v5653_v17, %v6174_v9  ;;  %v6221_v55 = vadd.f32 %v4814_v16, %v2087_v60  ;;  %v2425_v9 = vld [vmem:[%s5803_s23 + $0x98] sm:$0xff]  ;;  %v5478_v17 = vld [vmem:[%s5815_s18 + $0x148] sm:$0xff]  }
 0xdfb   : > { %v4842_v29 = vcombine.high %v2425_v9, %v2427_v27  ;;  %v6243_v39 = vadd.f32 %v4814_v16, %v2088_v19  ;;  %v4841_v42 = vcombine.low %v2425_v9, %v2427_v27  ;;  %v5479_v60 = vld [vmem:[%s5815_s18 + $0x1c8] sm:$0xff]  }
 0xdfc   : > { %v6225_v10 = vpack.c.bf16 %v6221_v55, %v6218_v8  ;;  %v2089_v18 = vmul.f32 %v4813_v37, %v2079_v58  ;;  %v5472_v37 = vld [vmem:[%s5815_s18 + $0x118] sm:$0xff]   ;;  %v5481_v58 = vld [vmem:[%s5815_s18 + $0x188] sm:$0xff]  }
 0xdfe   : > { %4831 = vmatmul.mubr.msk.bf16.vlgmr.msra.gmra.mxu1 %vm711_vm1, %v6225_v10  ;;  %4833 = vmatmul.mubr.msk.bf16.vlgmr.msra.gmra.mxu0 %vm711_vm1, %v6225_v10  ;;  %v6235_v44 = vadd.f32 %v4814_v16, %v2089_v18  ;;  %v5477_v16 = vld [vmem:[%s5815_s18 + $0x190] sm:$0xff]   ;;  %v5486_v18 = vld [vmem:[%s5815_s18 + $0x78] sm:$0xff]  }
 0xdff   : > { %2547 = vmatpush1.bf16.msra.mxu1 %v4847_v33  ;;  %2600 = vmatpush1.bf16.msra.mxu0 %v4849_v43  ;;  %v5455_v33 = vld [vmem:[%s5815_s18 + $0x1f8] sm:$0xff]  }
 0xe00   : > { %2548 = vmatprep.subr.bf16.mxu1 %v4844_v20  ;;  %2601 = vmatprep.subr.bf16.mxu0 %v4846_v24  ;;  %v6247_v35 = vpack.c.bf16 %v6235_v44, %v6243_v39  ;;  %v5456_v43 = vld [vmem:[%s5815_s18 + $0x138] sm:$0xff]  }
 0xe01   : > { %2268 = vmatprep.mubr.bf16.mxu1 %v5674_v6  ;;  %2321 = vmatprep.mubr.bf16.mxu0 %v5674_v6  ;;  %v5487_v20 = vld [vmem:[%s5815_s18 + $0xf8] sm:$0xff]  }
 0xe03   : > { %2549 = vmatpush1.bf16.msra.mxu1 %v4843_v59  ;;  %2602 = vmatpush1.bf16.msra.mxu0 %v4845_v32 }
 0xe04   : > { %2550 = vmatprep.subr.bf16.mxu1 %v4840_v36  ;;  %2603 = vmatprep.subr.bf16.mxu0 %v4842_v29 }
 0xe06   : > { %4832 = vmatmul.mubr.msk.bf16.gmra.mxu1 %vm711_vm1, %v6247_v35  ;;  %4834 = vmatmul.mubr.msk.bf16.gmra.mxu0 %vm711_vm1, %v6247_v35 }
 0xe07   : > { %2551 = vmatpush1.bf16.msra.mxu1 %v4839_v31  ;;  %2604 = vmatpush1.bf16.msra.mxu0 %v4841_v42 }
 0xe08   : > { %2552 = vmatprep.subr.bf16.mxu1 %v4836_v45  ;;  %2605 = vmatprep.subr.bf16.mxu0 %v4838_v38  ;;  %v6330_v45 = vsub.s32 3, %v5879_v21  ;;  %v2436_v38 = vld [vmem:[%s5809_s29 + $0x4] sm:$0xf] }
 0xe09   : > { %2570 = vmatprep.mubr.bf16.mxu1 %v5674_v6  ;;  %2623 = vmatprep.mubr.bf16.mxu0 %v5674_v6 }
 0xe0b   : > { %2553 = vmatpush1.bf16.msra.mxu1 %v4835_v40  ;;  %2606 = vmatpush1.bf16.msra.mxu0 %v4837_v47  ;;  %v6334_v40 = vsub.s32 2, %v5879_v21 }
 0xe0c   : > { %5076 = vmatprep.subr.bf16.mxu1 %v5454_v48  ;;  %5104 = vmatprep.subr.bf16.mxu0 %v5455_v33  ;;  %v2445_v33 = vrot.slane %v2436_v38, %v5882_v22 }
 0xe0e   : > { %4851 = vmatmul.mubr.msk.bf16.vlgmr.msra.gmra.mxu1 %vm711_vm1, %v6225_v10  ;;  %4853 = vmatmul.mubr.msk.bf16.vlgmr.msra.gmra.mxu0 %vm711_vm1, %v6225_v10 }
 0xe0f   : > { %2580 = vmatprep.mubr.bf16.mxu1 %v5674_v6  ;;  %2633 = vmatprep.mubr.bf16.mxu0 %v5674_v6 }
 0xe10   : > { %5077 = vmatpush3.bf16.msra.mxu1 %v5456_v43  ;;  %5105 = vmatpush3.bf16.msra.mxu0 %v5457_v49  ;;  %v2453_v43 = vrot.slane %v2436_v38, %v6330_v45  ;;  %v2441_v49 = vrot.slane %v2436_v38, %v5885_v23 }
 0xe11   : > { %5078 = vmatprep.subr.bf16.mxu1 %v5458_v50  ;;  %5106 = vmatprep.subr.bf16.mxu0 %v5459_v52  ;;  %v2449_v50 = vrot.slane %v2436_v38, %v6334_v40 }
 0xe14   : > { %5079 = vmatpush3.bf16.msra.mxu1 %v5460_v53  ;;  %5107 = vmatpush3.bf16.msra.mxu0 %v5461_v54 }
 0xe15   : > { %5080 = vmatprep.subr.bf16.mxu1 %v5462_v56  ;;  %5108 = vmatprep.subr.bf16.mxu0 %v5463_v1 }
 0xe16   : > { %4852 = vmatmul.mubr.msk.bf16.gmra.mxu1 %vm711_vm1, %v6247_v35  ;;  %4854 = vmatmul.mubr.msk.bf16.gmra.mxu0 %vm711_vm1, %v6247_v35 }
 0xe18   : > { %5081 = vmatpush3.bf16.msra.mxu1 %v5464_v57  ;;  %5109 = vmatpush3.bf16.msra.mxu0 %v5465_v2 }
 0xe19   : > { %5082 = vmatprep.subr.bf16.mxu1 %v5466_v3  ;;  %5110 = vmatprep.subr.bf16.mxu0 %v5467_v4 }
 0xe1c   : > { %5083 = vmatpush3.bf16.msra.mxu1 %v5468_v5  ;;  %5111 = vmatpush3.bf16.msra.mxu0 %v5469_v7 }
 0xe1d   : > { %5084 = vmatprep.subr.bf16.mxu1 %v5470_v11  ;;  %5112 = vmatprep.subr.bf16.mxu0 %v5471_v12 }
 0xe20   : > { %5085 = vmatpush3.bf16.msra.mxu1 %v5472_v37  ;;  %5113 = vmatpush3.bf16.msra.mxu0 %v5473_v46 }
 0xe21   : > { %5086 = vmatprep.subr.bf16.mxu1 %v5474_v13  ;;  %5114 = vmatprep.subr.bf16.mxu0 %v5475_v14 }
 0xe24   : > { %5087 = vmatpush3.bf16.msra.mxu1 %v5476_v15  ;;  %5115 = vmatpush3.bf16.msra.mxu0 %v5477_v16  ;;  %v6341_v15 = vld [vmem:[%s5809_s29] sm:$0xf] }
 0xe25   : > { %5088 = vmatprep.subr.bf16.mxu1 %v5478_v17  ;;  %5116 = vmatprep.subr.bf16.mxu0 %v5479_v60 }
 0xe28   : > { %5089 = vmatpush3.bf16.msra.mxu1 %v5480_v51  ;;  %5117 = vmatpush3.bf16.msra.mxu0 %v5481_v58  ;;  %v6345_v58 = vrot.slane %v6341_v15, %v5882_v22 }
 0xe29   : > { %5090 = vmatprep.subr.bf16.mxu1 %v5482_v61  ;;  %5118 = vmatprep.subr.bf16.mxu0 %v5483_v62 }
 0xe2c   : > { %5091 = vmatpush3.bf16.msra.mxu1 %v5484_v0  ;;  %5119 = vmatpush3.bf16.msra.mxu0 %v5485_v63 }
 0xe2d   : > { %5132 = vmatprep.subr.bf16.mxu1 %v5486_v18  ;;  %5160 = vmatprep.subr.bf16.mxu0 %v5487_v20  ;;  %v6349_v18 = vrot.slane %v6341_v15, %v6330_v45 }
 0xebe   : > { %v6299_v24 = vpop.f32.mrf.mxu1  ;;  %v6301_v25 = vpop.f32.mrf.mxu0 }
 0xec0   : > { %v6303_v26 = vpop.f32.mrf.mxu1  ;;  %v6305_v9 = vpop.f32.mrf.mxu0 }
 0xec2   : > { %v6307_v27 = vpop.f32.mrf.mxu1  ;;  %v6309_v19 = vpop.f32.mrf.mxu0 }
 0xec4   : > { %v2266_v59 = vpop.f32.mrf.mxu1  ;;  %v6311_v32 = vpop.f32.mrf.mxu0 }
 0xec6   : > { %v6313_v36 = vpop.f32.mrf.mxu1  ;;  %v6315_v29 = vpop.f32.mrf.mxu0 }
 0xec8   : > { %v6317_v34 = vpop.f32.mrf.mxu1  ;;  %v6319_v30 = vpop.f32.mrf.mxu0 }
 0xeca   : > { %v6321_v28 = vpop.f32.mrf.mxu1  ;;  %v6323_v41 = vpop.f32.mrf.mxu0 }
 0xecc   : > { %v6325_v31 = vpop.f32.mrf.mxu1  ;;  %v6327_v42 = vpop.f32.mrf.mxu0 }
 0xece   : > { %v2572_v47 = vpop.f32.mrf.mxu1  ;;  %v2625_v48 = vpop.f32.mrf.mxu0 }
 0xecf   : > { %v2573_v3 = vadd.f32 %v2572_v47, %v2441_v49  ;;  %v2626_v4 = vadd.f32 %v2625_v48, %v2449_v50  ;;  %v5488_v47 = vld [vmem:[%s5815_s18 + $0x38] sm:$0xff]  }
 0xed0   : > { %v2574_v52 = vpop.f32.mrf.mxu1  ;;  %v2627_v53 = vpop.f32.mrf.mxu0  ;;  %v5489_v48 = vld [vmem:[%s5815_s18 + $0xb8] sm:$0xff]  }
 0xed1   : > { %v2575_v1 = vadd.f32 %v2574_v52, %v2445_v33  ;;  %v2628_v57 = vadd.f32 %v2627_v53, %v2453_v43  ;;  %v2644_v61 = vmax.f32 %v2573_v3, 0.0  ;;  %v2646_v62 = vmax.f32 %v2626_v4, 0.0 }
 0xed2   : > { %v2576_v54 = vpop.f32.mrf.mxu1  ;;  %v2629_v56 = vpop.f32.mrf.mxu0  ;;  %v2267_v52 = vadd.f32 %v2266_v59, %v6345_v58 }
 0xed3   : > { %v2577_v2 = vadd.f32 %v2576_v54, %v2441_v49  ;;  %v2630_v21 = vadd.f32 %v2629_v56, %v2449_v50  ;;  %v2645_v16 = vmax.f32 %v2575_v1, 0.0  ;;  %v2647_v17 = vmax.f32 %v2628_v57, 0.0 }
 0xed4   : > { %v2578_v5 = vpop.f32.mrf.mxu1  ;;  %v2631_v7 = vpop.f32.mrf.mxu0 }
 0xed5   : > { %v2579_v11 = vadd.f32 %v2578_v5, %v2445_v33  ;;  %v2632_v12 = vadd.f32 %v2631_v7, %v2453_v43  ;;  %v2648_v37 = vmax.f32 %v2577_v2, 0.0  ;;  %v2650_v46 = vmax.f32 %v2630_v21, 0.0  ;;  %v5490_v2 = vld [vmem:[%s5815_s18 + $0x70] sm:$0xff]  }
 0xed6   : > { %v2582_v13 = vpop.f32.mrf.mxu1  ;;  %v2635_v14 = vpop.f32.mrf.mxu0  ;;  %v5491_v21 = vld [vmem:[%s5815_s18 + $0xf0] sm:$0xff]   ;;  %v2320_v7 = vadd.f32 %v6311_v32, %v6349_v18  ;;  %v2316_v32 = vadd.f32 %v6305_v9, %v6349_v18 }
 0xed7   : > { %v2649_v60 = vmax.f32 %v2579_v11, 0.0  ;;  %v2651_v51 = vmax.f32 %v2632_v12, 0.0  ;;  %v2660_v53 = vpack.c.bf16 %v2648_v37, %v2644_v61  ;;  %v2662_v54 = vpack.c.bf16 %v2650_v46, %v2646_v62 }
 0xed8   : > { %v2584_v0 = vpop.f32.mrf.mxu1  ;;  %v2637_v63 = vpop.f32.mrf.mxu0  ;;  %v2583_v11 = vadd.f32 %v2582_v13, %v2441_v49  ;;  %v2636_v12 = vadd.f32 %v2635_v14, %v2449_v50  ;;  %v5494_v13 = vld [vmem:[%s5815_s18 + $0x68] sm:$0xff]  }
 0xed9   : > { %v2661_v20 = vpack.c.bf16 %v2649_v60, %v2645_v16  ;;  %v2663_v38 = vpack.c.bf16 %v2651_v51, %v2647_v17  ;;  %v2585_v56 = vadd.f32 %v2584_v0, %v2445_v33  ;;  %v2638_v3 = vadd.f32 %v2637_v63, %v2453_v43  ;;  %v5492_v17 = vld [vmem:[%s5815_s18 + $0x30] sm:$0xff]   ;;  %v5495_v14 = vld [vmem:[%s5815_s18 + $0xe8] sm:$0xff]  }
 0xeda   : > { %v2586_v1 = vpop.f32.mrf.mxu1  ;;  %v2639_v57 = vpop.f32.mrf.mxu0  ;;  %v5493_v60 = vld [vmem:[%s5815_s18 + $0xb0] sm:$0xff]   ;;  %v2263_v51 = vadd.f32 %v6303_v26, %v6345_v58  ;;  %v2337_v0 = vmax.f32 %v2267_v52, 0.0  ;;  %v2339_v63 = vmax.f32 %v2320_v7, 0.0  ;;  %v2654_v26 = vmax.f32 %v2636_v12, 0.0  ;;  %v5498_v52 = vld [vmem:[%s5815_s18 + $0x60] sm:$0xff]   ;;  %v5503_v7 = vld [vmem:[%s5815_s18 + $0xd8] sm:$0xff]  }
 0xedb   : > { %v2587_v4 = vadd.f32 %v2586_v1, %v2441_v49  ;;  %v2640_v5 = vadd.f32 %v2639_v57, %v2449_v50  ;;  %2956 = vmatprep.mubr.bf16.mxu1 %v2661_v20  ;;  %3005 = vmatprep.mubr.bf16.mxu0 %v2663_v38  ;;  %v2652_v20 = vmax.f32 %v2583_v11, 0.0  ;;  %v5499_v57 = vld [vmem:[%s5815_s18 + $0xe0] sm:$0xff]   ;;  %v5504_v11 = vld [vmem:[%s5815_s18 + $0x18] sm:$0xff]  }
 0xedc   : > { %v2588_v59 = vpop.f32.mrf.mxu1  ;;  %v2641_v37 = vpop.f32.mrf.mxu0  ;;  %2957 = vmatmul.mubr.bf16.vlgmr.msra.gmra.mxu1 %v2660_v53  ;;  %3006 = vmatmul.mubr.bf16.vlgmr.msra.gmra.mxu0 %v2662_v54  ;;  %v2333_v53 = vmax.f32 %v2263_v51, 0.0  ;;  %v2335_v54 = vmax.f32 %v2316_v32, 0.0  ;;  %v5505_v12 = vld [vmem:[%s5815_s18 + $0x98] sm:$0xff]   ;;  %v2123_v51 = vrot.slane %v6341_v15, %v5885_v23  ;;  %v2131_v32 = vrot.slane %v6341_v15, %v6334_v40 }
 0xedd   : > { %v2589_v46 = vadd.f32 %v2588_v59, %v2445_v33  ;;  %v2642_v16 = vadd.f32 %v2641_v37, %v2453_v43  ;;  %5133 = vmatpush3.bf16.msra.mxu1 %v5488_v47  ;;  %5161 = vmatpush3.bf16.msra.mxu0 %v5489_v48  ;;  %v2656_v49 = vmax.f32 %v2587_v4, 0.0  ;;  %v2658_v50 = vmax.f32 %v2640_v5, 0.0  ;;  %v5496_v47 = vld [vmem:[%s5815_s18 + $0x28] sm:$0xff]   ;;  %v5501_v4 = vld [vmem:[%s5815_s18 + $0xa0] sm:$0xff]   ;;  %v5502_v5 = vld [vmem:[%s5815_s18 + $0x58] sm:$0xff]  }
 0xede   : > { %5134 = vmatprep.subr.bf16.mxu1 %v5490_v2  ;;  %5162 = vmatprep.subr.bf16.mxu0 %v5491_v21  ;;  %v2653_v33 = vmax.f32 %v2585_v56, 0.0  ;;  %v2655_v43 = vmax.f32 %v2638_v3, 0.0  ;;  %v5497_v48 = vld [vmem:[%s5815_s18 + $0xa8] sm:$0xff]   ;;  %v2349_v2 = vpack.c.bf16 %v2337_v0, %v2333_v53  ;;  %v2351_v21 = vpack.c.bf16 %v2339_v63, %v2335_v54  ;;  %v5500_v3 = vld [vmem:[%s5815_s18 + $0x20] sm:$0xff]   ;;  %v5506_v59 = vld [vmem:[%s5815_s18 + $0x50] sm:$0xff]  }
 0xedf   : > { %v2657_v61 = vmax.f32 %v2589_v46, 0.0  ;;  %v2659_v62 = vmax.f32 %v2642_v16, 0.0  ;;  %v2664_v56 = vpack.c.bf16 %v2656_v49, %v2652_v20  ;;  %v2666_v1 = vpack.c.bf16 %v2658_v50, %v2654_v26  ;;  %v5507_v37 = vld [vmem:[%s5815_s18 + $0xd0] sm:$0xff]   ;;  %v5512_v50 = vld [vmem:[%s5815_s18 + $0x8] sm:$0xff]   ;;  %v3326_v0 = vld [vmem:[%s5803_s23 + $0x1e0] sm:$0xff] }
 0xee0   : > { %v5508_v46 = vld [vmem:[%s5815_s18 + $0x10] sm:$0xff]   ;;  %v2265_v49 = vadd.f32 %v6307_v27, %v2123_v51  ;;  %v2277_v15 = vadd.f32 %v6325_v31, %v6345_v58  ;;  %v2330_v27 = vadd.f32 %v6327_v42, %v6349_v18  ;;  %v3325_v63 = vld [vmem:[%s5803_s23 + $0x1a8] sm:$0xff]  ;;  %v5517_v31 = vld [vmem:[%s5815_s18 + $0x80] sm:$0xff]  }
 0xee1   : > { %v2665_v38 = vpack.c.bf16 %v2657_v61, %v2653_v33  ;;  %v2667_v9 = vpack.c.bf16 %v2659_v62, %v2655_v43  ;;  %5135 = vmatpush3.bf16.msra.mxu1 %v5492_v17  ;;  %5163 = vmatpush3.bf16.msra.mxu0 %v5493_v60  ;;  %v5509_v16 = vld [vmem:[%s5815_s18 + $0x90] sm:$0xff]   ;;  %v5510_v17 = vld [vmem:[%s5815_s18 + $0x48] sm:$0xff]   ;;  %v5514_v33 = vld [vmem:[%s5815_s18 + $0x40] sm:$0xff]   ;;  %v2261_v62 = vadd.f32 %v6299_v24, %v2123_v51 }
 0xee2   : > { %5136 = vmatprep.subr.bf16.mxu1 %v5494_v13  ;;  %5164 = vmatprep.subr.bf16.mxu0 %v5495_v14  ;;  %v5511_v60 = vld [vmem:[%s5815_s18 + $0xc8] sm:$0xff]   ;;  %v2318_v14 = vadd.f32 %v6309_v19, %v2131_v32  ;;  %v5515_v43 = vld [vmem:[%s5815_s18 + $0xc0] sm:$0xff]   ;;  %v2314_v19 = vadd.f32 %v6301_v25, %v2131_v32  ;;  %v2336_v26 = vmax.f32 %v2265_v49, 0.0  ;;  %v2345_v53 = vmax.f32 %v2277_v15, 0.0 }
 0xee3   : > { %2964 = vmatprep.mubr.bf16.mxu1 %v2665_v38  ;;  %3013 = vmatprep.mubr.bf16.mxu0 %v2667_v9  ;;  %v5513_v13 = vld [vmem:[%s5815_s18 + $0x88] sm:$0xff]   ;;  %v3324_v61 = vld [vmem:[%s5803_s23 + $0x1a0] sm:$0xff]  ;;  %v2273_v38 = vadd.f32 %v6317_v34, %v6345_v58  ;;  %v2326_v9 = vadd.f32 %v6319_v30, %v6349_v18  ;;  %v2347_v54 = vmax.f32 %v2330_v27, 0.0 }
 0xee4   : > { %2965 = vmatmul.mubr.bf16.gmra.mxu1 %v2664_v56  ;;  %3014 = vmatmul.mubr.bf16.gmra.mxu0 %v2666_v1  ;;  %v3327_v20 = vld [vmem:[%s5803_s23 + $0x1e8] sm:$0xff]  ;;  %v5516_v24 = vld [vmem:[%s5815_s18] sm:$0xff]   ;;  %v2338_v42 = vmax.f32 %v2318_v14, 0.0  ;;  %v2334_v34 = vmax.f32 %v2314_v19, 0.0  ;;  %v4931_v58 = vcombine.low %v3324_v61, %v3326_v0 }
 0xee5   : > { %5137 = vmatpush3.bf16.msra.mxu1 %v5496_v47  ;;  %5165 = vmatpush3.bf16.msra.mxu0 %v5497_v48  ;;  %v4932_v47 = vcombine.high %v3324_v61, %v3326_v0  ;;  %v4934_v25 = vcombine.high %v3325_v63, %v3327_v20  ;;  %v2332_v48 = vmax.f32 %v2261_v62, 0.0  ;;  %v3320_v56 = vld [vmem:[%s5803_s23 + $0x120] sm:$0xff]  ;;  %v3321_v30 = vld [vmem:[%s5803_s23 + $0x128] sm:$0xff] }
 0xee6   : > { %3246 = vmatprep.mubr.bf16.mxu1 %v2349_v2  ;;  %3295 = vmatprep.mubr.bf16.mxu0 %v2351_v21  ;;  %v3322_v1 = vld [vmem:[%s5803_s23 + $0x160] sm:$0xff]  ;;  %v3323_v18 = vld [vmem:[%s5803_s23 + $0x168] sm:$0xff]  ;;  %v2343_v2 = vmax.f32 %v2326_v9, 0.0  ;;  %v4933_v21 = vcombine.low %v3325_v63, %v3327_v20  ;;  %v5519_v9 = vld [vmem:[%s5815_s18 + $0x2f8] sm:$0xff]  }
 0xee7   : > { %5138 = vmatprep.subr.bf16.mxu1 %v5498_v52  ;;  %5166 = vmatprep.subr.bf16.mxu0 %v5499_v57  ;;  %v2348_v52 = vpack.c.bf16 %v2336_v26, %v2332_v48  ;;  %v2341_v57 = vmax.f32 %v2273_v38, 0.0  ;;  %v3319_v49 = vld [vmem:[%s5803_s23 + $0xe8] sm:$0xff]  ;;  %v5518_v38 = vld [vmem:[%s5815_s18 + $0x278] sm:$0xff]   ;;  %v5525_v48 = vld [vmem:[%s5815_s18 + $0x2b0] sm:$0xff]  }
 0xee8   : > { %v3315_v61 = vld [vmem:[%s5803_s23 + $0x68] sm:$0xff] }
 0xee9   : > { %5139 = vmatpush3.bf16.msra.mxu1 %v5500_v3  ;;  %5167 = vmatpush3.bf16.msra.mxu0 %v5501_v4  ;;  %v2350_v3 = vpack.c.bf16 %v2338_v42, %v2334_v34  ;;  %v2275_v4 = vadd.f32 %v6321_v28, %v2123_v51  ;;  %v5522_v42 = vld [vmem:[%s5815_s18 + $0x270] sm:$0xff]   ;;  %v5529_v34 = vld [vmem:[%s5815_s18 + $0x2a8] sm:$0xff]  }
 0xeea   : > { %5140 = vmatprep.subr.bf16.mxu1 %v5502_v5  ;;  %5168 = vmatprep.subr.bf16.mxu0 %v5503_v7  ;;  %v2328_v5 = vadd.f32 %v6323_v41, %v2131_v32  ;;  %v2353_v7 = vpack.c.bf16 %v2345_v53, %v2341_v57  ;;  %v5526_v53 = vld [vmem:[%s5815_s18 + $0x268] sm:$0xff]   ;;  %v5535_v57 = vld [vmem:[%s5815_s18 + $0x2d8] sm:$0xff]  }
 0xeeb   : > { %v2344_v28 = vmax.f32 %v2275_v4, 0.0  ;;  %v5539_v4 = vld [vmem:[%s5815_s18 + $0x2d0] sm:$0xff]  }
 0xeec   : > { %v2346_v41 = vmax.f32 %v2328_v5, 0.0  ;;  %v5540_v5 = vld [vmem:[%s5815_s18 + $0x210] sm:$0xff]  }
 0xeed   : > { %5141 = vmatpush3.bf16.msra.mxu1 %v5504_v11  ;;  %5169 = vmatpush3.bf16.msra.mxu0 %v5505_v12  ;;  %v2355_v11 = vpack.c.bf16 %v2347_v54, %v2343_v2  ;;  %v4928_v12 = vcombine.high %v3320_v56, %v3322_v1  ;;  %v5527_v54 = vld [vmem:[%s5815_s18 + $0x2e8] sm:$0xff]   ;;  %v5536_v2 = vld [vmem:[%s5815_s18 + $0x218] sm:$0xff]  }
 0xeee   : > { %5142 = vmatprep.subr.bf16.mxu1 %v5506_v59  ;;  %5170 = vmatprep.subr.bf16.mxu0 %v5507_v37  ;;  %v4930_v59 = vcombine.high %v3321_v30, %v3323_v18  ;;  %v3316_v37 = vld [vmem:[%s5803_s23 + $0xa0] sm:$0xff] }
 0xef1   : > { %5143 = vmatpush3.bf16.msra.mxu1 %v5508_v46  ;;  %5171 = vmatpush3.bf16.msra.mxu0 %v5509_v16  ;;  %v2271_v46 = vadd.f32 %v6313_v36, %v2123_v51  ;;  %v2324_v16 = vadd.f32 %v6315_v29, %v2131_v32  ;;  %v3312_v51 = vld [vmem:[%s5803_s23 + $0x20] sm:$0xff] }
 0xef2   : > { %5144 = vmatprep.subr.bf16.mxu1 %v5510_v17  ;;  %5172 = vmatprep.subr.bf16.mxu0 %v5511_v60  ;;  %v3318_v17 = vld [vmem:[%s5803_s23 + $0xe0] sm:$0xff]  ;;  %v3317_v60 = vld [vmem:[%s5803_s23 + $0xa8] sm:$0xff] }
 0xef3   : > { %v4924_v36 = vcombine.high %v3316_v37, %v3318_v17  ;;  %v4926_v29 = vcombine.high %v3317_v60, %v3319_v49  ;;  %v2340_v32 = vmax.f32 %v2271_v46, 0.0  ;;  %v2342_v14 = vmax.f32 %v2324_v16, 0.0  ;;  %v5546_v46 = vld [vmem:[%s5815_s18 + $0x240] sm:$0xff]  }
 0xef4   : > { %v4923_v62 = vcombine.low %v3316_v37, %v3318_v17  ;;  %v4925_v0 = vcombine.low %v3317_v60, %v3319_v49  ;;  %v5545_v37 = vld [vmem:[%s5815_s18 + $0x288] sm:$0xff]   ;;  %v5547_v16 = vld [vmem:[%s5815_s18 + $0x2c0] sm:$0xff]   ;;  %v6469_v49 = vld [vmem:[%s5803_s23 + $0x1b0] sm:$0xff] }
 0xef5   : > { %5145 = vmatpush3.bf16.msra.mxu1 %v5512_v50  ;;  %5173 = vmatpush3.bf16.msra.mxu0 %v5513_v13  ;;  %v4927_v50 = vcombine.low %v3320_v56, %v3322_v1  ;;  %v4929_v13 = vcombine.low %v3321_v30, %v3323_v18  ;;  %v2352_v15 = vpack.c.bf16 %v2344_v28, %v2340_v32  ;;  %v5528_v56 = vld [vmem:[%s5815_s18 + $0x228] sm:$0xff]   ;;  %v5531_v1 = vld [vmem:[%s5815_s18 + $0x2e0] sm:$0xff]   ;;  %v6472_v28 = vld [vmem:[%s5803_s23 + $0x1f0] sm:$0xff] }
 0xef6   : > { %5146 = vmatprep.subr.bf16.mxu1 %v5514_v33  ;;  %5174 = vmatprep.subr.bf16.mxu0 %v5515_v43  ;;  %v3314_v33 = vld [vmem:[%s5803_s23 + $0x60] sm:$0xff]  ;;  %v3313_v43 = vld [vmem:[%s5803_s23 + $0x28] sm:$0xff]  ;;  %v2354_v27 = vpack.c.bf16 %v2346_v41, %v2342_v14  ;;  %v6475_v41 = vld [vmem:[%s5803_s23 + $0x1b8] sm:$0xff] }
 0xef7   : > { %v4920_v63 = vcombine.high %v3312_v51, %v3314_v33  ;;  %v4922_v20 = vcombine.high %v3313_v43, %v3315_v61  ;;  %v4919_v19 = vcombine.low %v3312_v51, %v3314_v33  ;;  %v4921_v26 = vcombine.low %v3313_v43, %v3315_v61  ;;  %v5532_v30 = vld [vmem:[%s5815_s18 + $0x220] sm:$0xff]  }
 0xef8   : > { %v5533_v18 = vld [vmem:[%s5815_s18 + $0x2a0] sm:$0xff]  }
 0xef9   : > { %5147 = vmatpush3.bf16.msra.mxu1 %v5516_v24  ;;  %5175 = vmatpush3.bf16.msra.mxu0 %v5517_v31  ;;  %v5520_v24 = vld [vmem:[%s5815_s18 + $0x238] sm:$0xff]   ;;  %v5548_v17 = vld [vmem:[%s5815_s18 + $0x200] sm:$0xff]  }
 0xefa   : > { %3438 = vmatprep.subr.bf16.mxu1 %v4932_v47  ;;  %3491 = vmatprep.subr.bf16.mxu0 %v4934_v25  ;;  %v5521_v31 = vld [vmem:[%s5815_s18 + $0x2b8] sm:$0xff]   ;;  %v5523_v47 = vld [vmem:[%s5815_s18 + $0x2f0] sm:$0xff]   ;;  %v5549_v60 = vld [vmem:[%s5815_s18 + $0x280] sm:$0xff]  }
 0xefb   : > { %v5524_v25 = vld [vmem:[%s5815_s18 + $0x230] sm:$0xff]  }
 0xefc   : > { %3247 = vmatmul.mubr.bf16.vlgmr.msra.gmra.mxu1 %v2348_v52  ;;  %3296 = vmatmul.mubr.bf16.vlgmr.msra.gmra.mxu0 %v2350_v3  ;;  %v5534_v52 = vld [vmem:[%s5815_s18 + $0x258] sm:$0xff]   ;;  %v5538_v3 = vld [vmem:[%s5815_s18 + $0x250] sm:$0xff]  }
 0xefd   : > { %3254 = vmatprep.mubr.bf16.mxu1 %v2353_v7  ;;  %3303 = vmatprep.mubr.bf16.mxu0 %v2355_v11  ;;  %v5541_v7 = vld [vmem:[%s5815_s18 + $0x290] sm:$0xff]   ;;  %v5542_v11 = vld [vmem:[%s5815_s18 + $0x248] sm:$0xff]  }
 0xefe   : > { %3439 = vmatpush1.bf16.msra.mxu1 %v4931_v58  ;;  %3492 = vmatpush1.bf16.msra.mxu0 %v4933_v21  ;;  %v5530_v58 = vld [vmem:[%s5815_s18 + $0x260] sm:$0xff]   ;;  %v5537_v21 = vld [vmem:[%s5815_s18 + $0x298] sm:$0xff]  }
 0xeff   : > { %3440 = vmatprep.subr.bf16.mxu1 %v4928_v12  ;;  %3493 = vmatprep.subr.bf16.mxu0 %v4930_v59  ;;  %v5543_v12 = vld [vmem:[%s5815_s18 + $0x2c8] sm:$0xff]  }
 0xf00   : > { %v5544_v59 = vld [vmem:[%s5815_s18 + $0x208] sm:$0xff]  }
 0xf02   : > { %3441 = vmatpush1.bf16.msra.mxu1 %v4927_v50  ;;  %3494 = vmatpush1.bf16.msra.mxu0 %v4929_v13  ;;  %v4984_v50 = vcombine.high %v6469_v49, %v6472_v28  ;;  %v6480_v13 = vld [vmem:[%s5803_s23 + $0x1f8] sm:$0xff] }
 0xf03   : > { %3442 = vmatprep.subr.bf16.mxu1 %v4924_v36  ;;  %3495 = vmatprep.subr.bf16.mxu0 %v4926_v29  ;;  %v4983_v36 = vcombine.low %v6469_v49, %v6472_v28  ;;  %v4985_v29 = vcombine.low %v6475_v41, %v6480_v13  ;;  %v4986_v51 = vcombine.high %v6475_v41, %v6480_v13  ;;  %v3919_v28 = vld [vmem:[%s5803_s23 + $0x38] sm:$0xff] }
 0xf04   : > { %3255 = vmatmul.mubr.bf16.gmra.mxu1 %v2352_v15  ;;  %3304 = vmatmul.mubr.bf16.gmra.mxu0 %v2354_v27 }
 0xf05   : > { %3462 = vmatprep.mubr.bf16.mxu1 %v5674_v6  ;;  %3515 = vmatprep.mubr.bf16.mxu0 %v5674_v6 }
 0xf06   : > { %3443 = vmatpush1.bf16.msra.mxu1 %v4923_v62  ;;  %3496 = vmatpush1.bf16.msra.mxu0 %v4925_v0 }
 0xf07   : > { %3444 = vmatprep.subr.bf16.mxu1 %v4920_v63  ;;  %3497 = vmatprep.subr.bf16.mxu0 %v4922_v20 }
 0xf0a   : > { %3445 = vmatpush1.bf16.msra.mxu1 %v4919_v19  ;;  %3498 = vmatpush1.bf16.msra.mxu0 %v4921_v26 }
 0xf0b   : > { %5188 = vmatprep.subr.bf16.mxu1 %v5518_v38  ;;  %5216 = vmatprep.subr.bf16.mxu0 %v5519_v9 }
 0xf0d   : > { %4935 = vmatmul.mubr.msk.bf16.vlgmr.msra.gmra.mxu1 %vm711_vm1, %v6225_v10  ;;  %4937 = vmatmul.mubr.msk.bf16.vlgmr.msra.gmra.mxu0 %vm711_vm1, %v6225_v10 }
 0xf0e   : > { %3472 = vmatprep.mubr.bf16.mxu1 %v5674_v6  ;;  %3525 = vmatprep.mubr.bf16.mxu0 %v5674_v6 }
 0xf0f   : > { %5189 = vmatpush3.bf16.msra.mxu1 %v5520_v24  ;;  %5217 = vmatpush3.bf16.msra.mxu0 %v5521_v31 }
 0xf10   : > { %5190 = vmatprep.subr.bf16.mxu1 %v5522_v42  ;;  %5218 = vmatprep.subr.bf16.mxu0 %v5523_v47 }
 0xf13   : > { %5191 = vmatpush3.bf16.msra.mxu1 %v5524_v25  ;;  %5219 = vmatpush3.bf16.msra.mxu0 %v5525_v48 }
 0xf14   : > { %5192 = vmatprep.subr.bf16.mxu1 %v5526_v53  ;;  %5220 = vmatprep.subr.bf16.mxu0 %v5527_v54 }
 0xf15   : > { %4936 = vmatmul.mubr.msk.bf16.gmra.mxu1 %vm711_vm1, %v6247_v35  ;;  %4938 = vmatmul.mubr.msk.bf16.gmra.mxu0 %vm711_vm1, %v6247_v35 }
 0xf17   : > { %5193 = vmatpush3.bf16.msra.mxu1 %v5528_v56  ;;  %5221 = vmatpush3.bf16.msra.mxu0 %v5529_v34 }
 0xf18   : > { %5194 = vmatprep.subr.bf16.mxu1 %v5530_v58  ;;  %5222 = vmatprep.subr.bf16.mxu0 %v5531_v1 }
 0xf1b   : > { %5195 = vmatpush3.bf16.msra.mxu1 %v5532_v30  ;;  %5223 = vmatpush3.bf16.msra.mxu0 %v5533_v18 }
 0xf1c   : > { %5196 = vmatprep.subr.bf16.mxu1 %v5534_v52  ;;  %5224 = vmatprep.subr.bf16.mxu0 %v5535_v57 }
 0xf1f   : > { %5197 = vmatpush3.bf16.msra.mxu1 %v5536_v2  ;;  %5225 = vmatpush3.bf16.msra.mxu0 %v5537_v21 }
 0xf20   : > { %5198 = vmatprep.subr.bf16.mxu1 %v5538_v3  ;;  %5226 = vmatprep.subr.bf16.mxu0 %v5539_v4 }
 0xf23   : > { %5199 = vmatpush3.bf16.msra.mxu1 %v5540_v5  ;;  %5227 = vmatpush3.bf16.msra.mxu0 %v5541_v7 }
 0xf24   : > { %5200 = vmatprep.subr.bf16.mxu1 %v5542_v11  ;;  %5228 = vmatprep.subr.bf16.mxu0 %v5543_v12 }
 0xf27   : > { %5201 = vmatpush3.bf16.msra.mxu1 %v5544_v59  ;;  %5229 = vmatpush3.bf16.msra.mxu0 %v5545_v37 }
 0xf28   : > { %5202 = vmatprep.subr.bf16.mxu1 %v5546_v46  ;;  %5230 = vmatprep.subr.bf16.mxu0 %v5547_v16 }
 0xf2b   : > { %5203 = vmatpush3.bf16.msra.mxu1 %v5548_v17  ;;  %5231 = vmatpush3.bf16.msra.mxu0 %v5549_v60 }
 0xf2c   : > { %4044 = vmatprep.subr.bf16.mxu1 %v4984_v50  ;;  %4097 = vmatprep.subr.bf16.mxu0 %v4986_v51 }
 0xf9c   : > { %v5092_v32 = vpop.f32.mrf.mxu1  ;;  %v5120_v14 = vpop.f32.mrf.mxu0 }
 0xf9e   : > { %v5093_v33 = vpop.f32.mrf.mxu1  ;;  %v5121_v43 = vpop.f32.mrf.mxu0 }
 0xf9f   : > { %v5094_v61 = vadd.f32 %v5093_v33, %v5092_v32  ;;  %v5122_v62 = vadd.f32 %v5121_v43, %v5120_v14 }
 0xfa0   : > { %v5095_v15 = vpop.f32.mrf.mxu1  ;;  %v5123_v27 = vpop.f32.mrf.mxu0 }
 0xfa1   : > { %v3008_v0 = vadd.f32 %v5122_v62, %v5094_v61 }
 0xfa2   : > { %v5096_v63 = vpop.f32.mrf.mxu1  ;;  %v5124_v20 = vpop.f32.mrf.mxu0 }
 0xfa3   : > { %v5097_v19 = vadd.f32 %v5096_v63, %v5095_v15  ;;  %v5125_v26 = vadd.f32 %v5124_v20, %v5123_v27 }
 0xfa4   : > { %v5098_v38 = vpop.f32.mrf.mxu1  ;;  %v5126_v9 = vpop.f32.mrf.mxu0 }
 0xfa5   : > { %v3011_v24 = vadd.f32 %v5125_v26, %v5097_v19  ;;  %v3328_v19 = vld [vmem:[%s5809_s29 + $0x8] sm:$0xf] }
 0xfa6   : > { %v5099_v31 = vpop.f32.mrf.mxu1  ;;  %v5127_v42 = vpop.f32.mrf.mxu0 }
 0xfa7   : > { %v5100_v47 = vadd.f32 %v5099_v31, %v5098_v38  ;;  %v5128_v25 = vadd.f32 %v5127_v42, %v5126_v9  ;;  %v3345_v31 = vrot.slane %v3328_v19, %v6330_v45 }
 0xfa8   : > { %v5101_v48 = vpop.f32.mrf.mxu1  ;;  %v5129_v53 = vpop.f32.mrf.mxu0 }
 0xfa9   : > { %v3016_v54 = vadd.f32 %v5128_v25, %v5100_v47  ;;  %v3333_v47 = vrot.slane %v3328_v19, %v5885_v23  ;;  %v3341_v25 = vrot.slane %v3328_v19, %v6334_v40 }
 0xfaa   : > { %v5102_v56 = vpop.f32.mrf.mxu1  ;;  %v5130_v34 = vpop.f32.mrf.mxu0 }
 0xfab   : > { %v5103_v58 = vadd.f32 %v5102_v56, %v5101_v48  ;;  %v5131_v1 = vadd.f32 %v5130_v34, %v5129_v53 }
 0xfad   : > { %v3019_v30 = vadd.f32 %v5131_v1, %v5103_v58 }
 0xfbc   : > { %v5148_v18 = vpop.f32.mrf.mxu1  ;;  %v5176_v52 = vpop.f32.mrf.mxu0 }
 0xfbe   : > { %v5149_v57 = vpop.f32.mrf.mxu1  ;;  %v5177_v2 = vpop.f32.mrf.mxu0 }
 0xfbf   : > { %v5150_v21 = vadd.f32 %v5149_v57, %v5148_v18  ;;  %v5178_v3 = vadd.f32 %v5177_v2, %v5176_v52 }
 0xfc0   : > { %v5151_v4 = vpop.f32.mrf.mxu1  ;;  %v5179_v5 = vpop.f32.mrf.mxu0 }
 0xfc1   : > { %v3249_v7 = vadd.f32 %v5150_v21, %v3008_v0 }
 0xfc2   : > { %v5152_v11 = vpop.f32.mrf.mxu1  ;;  %v5180_v12 = vpop.f32.mrf.mxu0 }
 0xfc3   : > { %v6488_v59 = vadd.f32 %v5178_v3, %v3249_v7  ;;  %v5153_v37 = vadd.f32 %v5152_v11, %v5151_v4  ;;  %v5181_v46 = vadd.f32 %v5180_v12, %v5179_v5  ;;  %v3926_v12 = vld [vmem:[%s5803_s23 + $0x130] sm:$0xff] }
 0xfc4   : > { %v5154_v16 = vpop.f32.mrf.mxu1  ;;  %v5182_v17 = vpop.f32.mrf.mxu0 }
 0xfc5   : > { %v3252_v60 = vadd.f32 %v5153_v37, %v3011_v24  ;;  %v3337_v24 = vrot.slane %v3328_v19, %v5882_v22  ;;  %v3928_v37 = vld [vmem:[%s5803_s23 + $0x170] sm:$0xff] }
 0xfc6   : > { %v5155_v50 = vpop.f32.mrf.mxu1  ;;  %v5183_v51 = vpop.f32.mrf.mxu0 }
 0xfc7   : > { %v6490_v32 = vadd.f32 %v5181_v46, %v3252_v60  ;;  %v5156_v14 = vadd.f32 %v5155_v50, %v5154_v16  ;;  %v5184_v33 = vadd.f32 %v5183_v51, %v5182_v17  ;;  %v3927_v50 = vld [vmem:[%s5803_s23 + $0x138] sm:$0xff] }
 0xfc8   : > { %v5157_v43 = vpop.f32.mrf.mxu1  ;;  %v5185_v61 = vpop.f32.mrf.mxu0  ;;  %v3929_v51 = vld [vmem:[%s5803_s23 + $0x178] sm:$0xff] }
 0xfc9   : > { %v3257_v62 = vadd.f32 %v5156_v14, %v3016_v54 }
 0xfca   : > { %v5158_v15 = vpop.f32.mrf.mxu1  ;;  %v5186_v27 = vpop.f32.mrf.mxu0 }
 0xfcb   : > { %v6492_v0 = vadd.f32 %v5184_v33, %v3257_v62  ;;  %v5159_v63 = vadd.f32 %v5158_v15, %v5157_v43  ;;  %v5187_v20 = vadd.f32 %v5186_v27, %v5185_v61  ;;  %v4980_v27 = vcombine.high %v3926_v12, %v3928_v37 }
 0xfcd   : > { %v3260_v26 = vadd.f32 %v5159_v63, %v3019_v30  ;;  %v3464_v38 = vpop.f32.mrf.mxu1  ;;  %v3517_v9 = vpop.f32.mrf.mxu0 }
 0xfce   : > { %v3465_v18 = vadd.f32 %v3464_v38, %v3333_v47  ;;  %v3518_v52 = vadd.f32 %v3517_v9, %v3341_v25  ;;  %v4982_v9 = vcombine.high %v3927_v50, %v3929_v51 }
 0xfcf   : > { %v6497_v42 = vadd.f32 %v5187_v20, %v3260_v26  ;;  %v3466_v48 = vpop.f32.mrf.mxu1  ;;  %v3519_v53 = vpop.f32.mrf.mxu0 }
 0xfd0   : > { %v3467_v34 = vadd.f32 %v3466_v48, %v3337_v24  ;;  %v3520_v58 = vadd.f32 %v3519_v53, %v3345_v31  ;;  %v3536_v14 = vmax.f32 %v3465_v18, 0.0  ;;  %v3538_v33 = vmax.f32 %v3518_v52, 0.0  ;;  %v3922_v48 = vld [vmem:[%s5803_s23 + $0xb0] sm:$0xff] }
 0xfd1   : > { %v3468_v54 = vpop.f32.mrf.mxu1  ;;  %v3521_v56 = vpop.f32.mrf.mxu0 }
 0xfd2   : > { %v3469_v1 = vadd.f32 %v3468_v54, %v3333_v47  ;;  %v3522_v30 = vadd.f32 %v3521_v56, %v3341_v25  ;;  %v3537_v46 = vmax.f32 %v3467_v34, 0.0  ;;  %v3539_v16 = vmax.f32 %v3520_v58, 0.0  ;;  %v3924_v34 = vld [vmem:[%s5803_s23 + $0xf0] sm:$0xff]  ;;  %v3923_v58 = vld [vmem:[%s5803_s23 + $0xb8] sm:$0xff] }
 0xfd3   : > { %v3470_v57 = vpop.f32.mrf.mxu1  ;;  %v3523_v2 = vpop.f32.mrf.mxu0  ;;  %v4975_v41 = vcombine.low %v3922_v48, %v3924_v34 }
 0xfd4   : > { %v3471_v21 = vadd.f32 %v3470_v57, %v3337_v24  ;;  %v3524_v3 = vadd.f32 %v3523_v2, %v3345_v31  ;;  %v3540_v4 = vmax.f32 %v3469_v1, 0.0  ;;  %v3542_v5 = vmax.f32 %v3522_v30, 0.0  ;;  %v3925_v1 = vld [vmem:[%s5803_s23 + $0xf8] sm:$0xff] }
 0xfd5   : > { %v3474_v7 = vpop.f32.mrf.mxu1  ;;  %v3527_v11 = vpop.f32.mrf.mxu0  ;;  %v4979_v2 = vcombine.low %v3926_v12, %v3928_v37  ;;  %v4977_v13 = vcombine.low %v3923_v58, %v3925_v1 }
 0xfd6   : > { %v3541_v17 = vmax.f32 %v3471_v21, 0.0  ;;  %v3543_v60 = vmax.f32 %v3524_v3, 0.0  ;;  %v3552_v63 = vpack.c.bf16 %v3540_v4, %v3536_v14  ;;  %v3554_v20 = vpack.c.bf16 %v3542_v5, %v3538_v33 }
 0xfd7   : > { %v3476_v43 = vpop.f32.mrf.mxu1  ;;  %v3529_v61 = vpop.f32.mrf.mxu0  ;;  %v3475_v30 = vadd.f32 %v3474_v7, %v3333_v47  ;;  %v3528_v18 = vadd.f32 %v3527_v11, %v3341_v25  ;;  %v4976_v5 = vcombine.high %v3922_v48, %v3924_v34  ;;  %v4978_v7 = vcombine.high %v3923_v58, %v3925_v1  ;;  %v3918_v11 = vld [vmem:[%s5803_s23 + $0x30] sm:$0xff]  ;;  %v5563_v48 = vld [vmem:[%s5815_s18 + $0x3e0] sm:$0xff]   ;;  %v5567_v34 = vld [vmem:[%s5815_s18 + $0x3d8] sm:$0xff]  }
 0xfd8   : > { %v3553_v62 = vpack.c.bf16 %v3541_v17, %v3537_v46  ;;  %v3555_v15 = vpack.c.bf16 %v3543_v60, %v3539_v16  ;;  %v3477_v19 = vadd.f32 %v3476_v43, %v3337_v24  ;;  %v3530_v53 = vadd.f32 %v3529_v61, %v3345_v31  ;;  %v5550_v61 = vld [vmem:[%s5815_s18 + $0x378] sm:$0xff]  }
 0xfd9   : > { %v3478_v26 = vpop.f32.mrf.mxu1  ;;  %v3531_v38 = vpop.f32.mrf.mxu0  ;;  %v3544_v46 = vmax.f32 %v3475_v30, 0.0  ;;  %v3546_v16 = vmax.f32 %v3528_v18, 0.0  ;;  %v5568_v58 = vld [vmem:[%s5815_s18 + $0x318] sm:$0xff]   ;;  %v5570_v30 = vld [vmem:[%s5815_s18 + $0x350] sm:$0xff]  }
 0xfda   : > { %v3479_v54 = vadd.f32 %v3478_v26, %v3333_v47  ;;  %v3532_v56 = vadd.f32 %v3531_v38, %v3341_v25  ;;  %3848 = vmatprep.mubr.bf16.mxu1 %v3553_v62  ;;  %3897 = vmatprep.mubr.bf16.mxu0 %v3555_v15  ;;  %v4981_v47 = vcombine.low %v3927_v50, %v3929_v51  ;;  %v3547_v12 = vmax.f32 %v3530_v53, 0.0  ;;  %v5551_v62 = vld [vmem:[%s5815_s18 + $0x3f8] sm:$0xff]   ;;  %v5559_v26 = vld [vmem:[%s5815_s18 + $0x3e8] sm:$0xff]   ;;  %v5564_v53 = vld [vmem:[%s5815_s18 + $0x320] sm:$0xff]  }
 0xfdb   : > { %v3480_v52 = vpop.f32.mrf.mxu1  ;;  %v3533_v57 = vpop.f32.mrf.mxu0  ;;  %3849 = vmatmul.mubr.bf16.vlgmr.msra.gmra.mxu1 %v3552_v63  ;;  %3898 = vmatmul.mubr.bf16.vlgmr.msra.gmra.mxu0 %v3554_v20  ;;  %v5552_v15 = vld [vmem:[%s5815_s18 + $0x338] sm:$0xff]   ;;  %v5554_v63 = vld [vmem:[%s5815_s18 + $0x370] sm:$0xff]   ;;  %v5560_v38 = vld [vmem:[%s5815_s18 + $0x328] sm:$0xff]  }
 0xfdc   : > { %v3481_v21 = vadd.f32 %v3480_v52, %v3337_v24  ;;  %v3534_v3 = vadd.f32 %v3533_v57, %v3345_v31  ;;  %4045 = vmatpush1.bf16.msra.mxu1 %v4983_v36  ;;  %4098 = vmatpush1.bf16.msra.mxu0 %v4985_v29  ;;  %v3548_v25 = vmax.f32 %v3479_v54, 0.0  ;;  %v3550_v4 = vmax.f32 %v3532_v56, 0.0  ;;  %v3920_v24 = vld [vmem:[%s5803_s23 + $0x70] sm:$0xff]  ;;  %v3921_v36 = vld [vmem:[%s5803_s23 + $0x78] sm:$0xff]  ;;  %v5565_v54 = vld [vmem:[%s5815_s18 + $0x3a0] sm:$0xff]  }
 0xfdd   : > { %4046 = vmatprep.subr.bf16.mxu1 %v4980_v27  ;;  %4099 = vmatprep.subr.bf16.mxu0 %v4982_v9  ;;  %v3545_v31 = vmax.f32 %v3477_v19, 0.0  ;;  %v4972_v60 = vcombine.high %v3918_v11, %v3920_v24  ;;  %v4974_v14 = vcombine.high %v3919_v28, %v3921_v36  ;;  %v4971_v33 = vcombine.low %v3918_v11, %v3920_v24  ;;  %v5553_v27 = vld [vmem:[%s5815_s18 + $0x3b8] sm:$0xff]   ;;  %v5555_v20 = vld [vmem:[%s5815_s18 + $0x3f0] sm:$0xff]   ;;  %v5561_v9 = vld [vmem:[%s5815_s18 + $0x3a8] sm:$0xff]  }
 0xfde   : > { %v3549_v37 = vmax.f32 %v3481_v21, 0.0  ;;  %v3551_v49 = vmax.f32 %v3534_v3, 0.0  ;;  %v3556_v50 = vpack.c.bf16 %v3548_v25, %v3544_v46  ;;  %v3558_v51 = vpack.c.bf16 %v3550_v4, %v3546_v16  ;;  %v5557_v19 = vld [vmem:[%s5815_s18 + $0x3b0] sm:$0xff]   ;;  %v5566_v56 = vld [vmem:[%s5815_s18 + $0x358] sm:$0xff]   ;;  %v5575_v21 = vld [vmem:[%s5815_s18 + $0x3c8] sm:$0xff]  }
 0xfdf   : > { %v4973_v43 = vcombine.low %v3919_v28, %v3921_v36  ;;  %v5569_v1 = vld [vmem:[%s5815_s18 + $0x398] sm:$0xff]   ;;  %v5571_v18 = vld [vmem:[%s5815_s18 + $0x3d0] sm:$0xff]   ;;  %v5576_v3 = vld [vmem:[%s5815_s18 + $0x308] sm:$0xff]  }
 0xfe0   : > { %v3557_v29 = vpack.c.bf16 %v3549_v37, %v3545_v31  ;;  %v3559_v17 = vpack.c.bf16 %v3551_v49, %v3547_v12  ;;  %4047 = vmatpush1.bf16.msra.mxu1 %v4979_v2  ;;  %4100 = vmatpush1.bf16.msra.mxu0 %v4981_v47  ;;  %v5572_v52 = vld [vmem:[%s5815_s18 + $0x310] sm:$0xff]   ;;  %v5574_v2 = vld [vmem:[%s5815_s18 + $0x348] sm:$0xff]   ;;  %v5578_v25 = vld [vmem:[%s5815_s18 + $0x340] sm:$0xff]  }
 0xfe1   : > { %4048 = vmatprep.subr.bf16.mxu1 %v4976_v5  ;;  %4101 = vmatprep.subr.bf16.mxu0 %v4978_v7  ;;  %v5573_v57 = vld [vmem:[%s5815_s18 + $0x390] sm:$0xff]   ;;  %v5577_v47 = vld [vmem:[%s5815_s18 + $0x388] sm:$0xff]   ;;  %v5579_v4 = vld [vmem:[%s5815_s18 + $0x3c0] sm:$0xff]  }
 0xfe2   : > { %3856 = vmatprep.mubr.bf16.mxu1 %v3557_v29  ;;  %3905 = vmatprep.mubr.bf16.mxu0 %v3559_v17  ;;  %v5580_v5 = vld [vmem:[%s5815_s18 + $0x300] sm:$0xff]  }
 0xfe3   : > { %3857 = vmatmul.mubr.bf16.gmra.mxu1 %v3556_v50  ;;  %3906 = vmatmul.mubr.bf16.gmra.mxu0 %v3558_v51  ;;  %v5581_v7 = vld [vmem:[%s5815_s18 + $0x380] sm:$0xff]  }
 0xfe4   : > { %4049 = vmatpush1.bf16.msra.mxu1 %v4975_v41  ;;  %4102 = vmatpush1.bf16.msra.mxu0 %v4977_v13 }
 0xfe5   : > { %4050 = vmatprep.subr.bf16.mxu1 %v4972_v60  ;;  %4103 = vmatprep.subr.bf16.mxu0 %v4974_v14 }
 0xfe6   : > { %4068 = vmatprep.mubr.bf16.mxu1 %v5674_v6  ;;  %4121 = vmatprep.mubr.bf16.mxu0 %v5674_v6 }
 0xfe8   : > { %4051 = vmatpush1.bf16.msra.mxu1 %v4971_v33  ;;  %4104 = vmatpush1.bf16.msra.mxu0 %v4973_v43 }
 0xfe9   : > { %5244 = vmatprep.subr.bf16.mxu1 %v5550_v61  ;;  %5272 = vmatprep.subr.bf16.mxu0 %v5551_v62 }
 0xfeb   : > { %4987 = vmatmul.mubr.msk.bf16.vlgmr.msra.gmra.mxu1 %vm711_vm1, %v6225_v10  ;;  %4989 = vmatmul.mubr.msk.bf16.vlgmr.msra.gmra.mxu0 %vm711_vm1, %v6225_v10  ;;  %v5556_v10 = vld [vmem:[%s5815_s18 + $0x330] sm:$0xff]  }
 0xfec   : > { %4078 = vmatprep.mubr.bf16.mxu1 %v5674_v6  ;;  %4131 = vmatprep.mubr.bf16.mxu0 %v5674_v6  ;;  %v5558_v6 = vld [vmem:[%s5815_s18 + $0x368] sm:$0xff]  }
 0xfed   : > { %5245 = vmatpush3.bf16.msra.mxu1 %v5552_v15  ;;  %5273 = vmatpush3.bf16.msra.mxu0 %v5553_v27 }
 0xfee   : > { %5246 = vmatprep.subr.bf16.mxu1 %v5554_v63  ;;  %5274 = vmatprep.subr.bf16.mxu0 %v5555_v20 }
 0xff1   : > { %5247 = vmatpush3.bf16.msra.mxu1 %v5556_v10  ;;  %5275 = vmatpush3.bf16.msra.mxu0 %v5557_v19 }
 0xff2   : > { %5248 = vmatprep.subr.bf16.mxu1 %v5558_v6  ;;  %5276 = vmatprep.subr.bf16.mxu0 %v5559_v26  ;;  %v3934_v26 = vld [vmem:[%s5809_s29 + $0xc] sm:$0xf] }
 0xff3   : > { %4988 = vmatmul.mubr.msk.bf16.gmra.mxu1 %vm711_vm1, %v6247_v35  ;;  %4990 = vmatmul.mubr.msk.bf16.gmra.mxu0 %vm711_vm1, %v6247_v35  ;;  %v5562_v35 = vld [vmem:[%s5815_s18 + $0x360] sm:$0xff]  }
 0xff5   : > { %5249 = vmatpush3.bf16.msra.mxu1 %v5560_v38  ;;  %5277 = vmatpush3.bf16.msra.mxu0 %v5561_v9 }
 0xff6   : > { %5250 = vmatprep.subr.bf16.mxu1 %v5562_v35  ;;  %5278 = vmatprep.subr.bf16.mxu0 %v5563_v48  ;;  %v3943_v48 = vrot.slane %v3934_v26, %v5882_v22 }
 0xff9   : > { %5251 = vmatpush3.bf16.msra.mxu1 %v5564_v53  ;;  %5279 = vmatpush3.bf16.msra.mxu0 %v5565_v54  ;;  %v3939_v53 = vrot.slane %v3934_v26, %v5885_v23  ;;  %v3947_v54 = vrot.slane %v3934_v26, %v6334_v40 }
 0xffa   : > { %5252 = vmatprep.subr.bf16.mxu1 %v5566_v56  ;;  %5280 = vmatprep.subr.bf16.mxu0 %v5567_v34 }
 0xffd   : > { %5253 = vmatpush3.bf16.msra.mxu1 %v5568_v58  ;;  %5281 = vmatpush3.bf16.msra.mxu0 %v5569_v1 }
 0xffe   : > { %5254 = vmatprep.subr.bf16.mxu1 %v5570_v30  ;;  %5282 = vmatprep.subr.bf16.mxu0 %v5571_v18 }
0x1001   : > { %5255 = vmatpush3.bf16.msra.mxu1 %v5572_v52  ;;  %5283 = vmatpush3.bf16.msra.mxu0 %v5573_v57 }
0x1002   : > { %5256 = vmatprep.subr.bf16.mxu1 %v5574_v2  ;;  %5284 = vmatprep.subr.bf16.mxu0 %v5575_v21 }
0x1005   : > { %5257 = vmatpush3.bf16.msra.mxu1 %v5576_v3  ;;  %5285 = vmatpush3.bf16.msra.mxu0 %v5577_v47 }
0x1006   : > { %5258 = vmatprep.subr.bf16.mxu1 %v5578_v25  ;;  %5286 = vmatprep.subr.bf16.mxu0 %v5579_v4 }
0x1009   : > { %5259 = vmatpush3.bf16.msra.mxu1 %v5580_v5  ;;  %5287 = vmatpush3.bf16.msra.mxu0 %v5581_v7 }
0x109b   : > { %v5204_v11 = vpop.f32.mrf.mxu1  ;;  %v5232_v24 = vpop.f32.mrf.mxu0 }
0x109d   : > { %v5205_v31 = vpop.f32.mrf.mxu1  ;;  %v5233_v12 = vpop.f32.mrf.mxu0 }
0x109e   : > { %v5206_v37 = vadd.f32 %v5205_v31, %v5204_v11  ;;  %v5234_v49 = vadd.f32 %v5233_v12, %v5232_v24 }
0x109f   : > { %v5207_v28 = vpop.f32.mrf.mxu1  ;;  %v5235_v36 = vpop.f32.mrf.mxu0 }
0x10a0   : > { %v3900_v46 = vadd.f32 %v5234_v49, %v5206_v37 }
0x10a1   : > { %v5208_v16 = vpop.f32.mrf.mxu1  ;;  %v5236_v41 = vpop.f32.mrf.mxu0 }
0x10a2   : > { %v6564_v13 = vadd.f32 %v3900_v46, %v6488_v59  ;;  %v5209_v29 = vadd.f32 %v5208_v16, %v5207_v28  ;;  %v5237_v17 = vadd.f32 %v5236_v41, %v5235_v36 }
0x10a3   : > { %v5210_v60 = vpop.f32.mrf.mxu1  ;;  %v5238_v50 = vpop.f32.mrf.mxu0 }
0x10a4   : > { %v3903_v51 = vadd.f32 %v5237_v17, %v5209_v29 }
0x10a5   : > { %v5211_v14 = vpop.f32.mrf.mxu1  ;;  %v5239_v33 = vpop.f32.mrf.mxu0 }
0x10a6   : > { %v6567_v43 = vadd.f32 %v3903_v51, %v6490_v32  ;;  %v5212_v61 = vadd.f32 %v5211_v14, %v5210_v60  ;;  %v5240_v62 = vadd.f32 %v5239_v33, %v5238_v50  ;;  %v3951_v32 = vrot.slane %v3934_v26, %v6330_v45 }
0x10a7   : > { %v5213_v15 = vpop.f32.mrf.mxu1  ;;  %v5241_v27 = vpop.f32.mrf.mxu0 }
0x10a8   : > { %v3908_v63 = vadd.f32 %v5240_v62, %v5212_v61 }
0x10a9   : > { %v5214_v20 = vpop.f32.mrf.mxu1  ;;  %v5242_v10 = vpop.f32.mrf.mxu0 }
0x10aa   : > { %v6570_v59 = vadd.f32 %v3908_v63, %v6492_v0  ;;  %v5215_v19 = vadd.f32 %v5214_v20, %v5213_v15  ;;  %v5243_v6 = vadd.f32 %v5242_v10, %v5241_v27 }
0x10ab   : > { %v4070_v38 = vpop.f32.mrf.mxu1  ;;  %v4123_v9 = vpop.f32.mrf.mxu0 }
0x10ac   : > { %v3911_v35 = vadd.f32 %v5243_v6, %v5215_v19  ;;  %v4071_v2 = vadd.f32 %v4070_v38, %v3939_v53  ;;  %v4124_v21 = vadd.f32 %v4123_v9, %v3947_v54 }
0x10ad   : > { %v4072_v56 = vpop.f32.mrf.mxu1  ;;  %v4125_v34 = vpop.f32.mrf.mxu0 }
0x10ae   : > { %v6578_v58 = vadd.f32 %v3911_v35, %v6497_v42  ;;  %v4073_v30 = vadd.f32 %v4072_v56, %v3943_v48  ;;  %v4126_v18 = vadd.f32 %v4125_v34, %v3951_v32  ;;  %v4142_v24 = vmax.f32 %v4071_v2, 0.0 }
0x10af   : > { %v4074_v0 = vpop.f32.mrf.mxu1  ;;  %v4127_v1 = vpop.f32.mrf.mxu0  ;;  %v4144_v31 = vmax.f32 %v4124_v21, 0.0  ;;  %v5023_v21 = vld [vmem:[%s624_s21] ss:$0 sm:$0xff] }
0x10b0   : > { %v4075_v52 = vadd.f32 %v4074_v0, %v3939_v53  ;;  %v4128_v57 = vadd.f32 %v4127_v1, %v3947_v54  ;;  %v4143_v5 = vmax.f32 %v4073_v30, 0.0  ;;  %v4145_v7 = vmax.f32 %v4126_v18, 0.0 }
0x10b1   : > { %v4076_v22 = vpop.f32.mrf.mxu1  ;;  %v4129_v3 = vpop.f32.mrf.mxu0 }
0x10b2   : > { %v4077_v45 = vadd.f32 %v4076_v22, %v3943_v48  ;;  %v4130_v47 = vadd.f32 %v4129_v3, %v3951_v32  ;;  %v4146_v23 = vmax.f32 %v4075_v52, 0.0  ;;  %v4148_v25 = vmax.f32 %v4128_v57, 0.0 }
0x10b3   : > { %v4080_v40 = vpop.f32.mrf.mxu1  ;;  %v4133_v4 = vpop.f32.mrf.mxu0 }
0x10b4   : > { %v4147_v42 = vmax.f32 %v4077_v45, 0.0  ;;  %v4149_v11 = vmax.f32 %v4130_v47, 0.0  ;;  %v4158_v36 = vpack.c.bf16 %v4146_v23, %v4142_v24  ;;  %v4160_v46 = vpack.c.bf16 %v4148_v25, %v4144_v31 }
0x10b5   : > { %v4082_v12 = vpop.f32.mrf.mxu1  ;;  %v4135_v37 = vpop.f32.mrf.mxu0  ;;  %v4081_v51 = vadd.f32 %v4080_v40, %v3939_v53  ;;  %v4134_v14 = vadd.f32 %v4133_v4, %v3947_v54 }
0x10b6   : > { %v4159_v49 = vpack.c.bf16 %v4147_v42, %v4143_v5  ;;  %v4161_v28 = vpack.c.bf16 %v4149_v11, %v4145_v7  ;;  %v4083_v16 = vadd.f32 %v4082_v12, %v3943_v48  ;;  %v4136_v17 = vadd.f32 %v4135_v37, %v3951_v32 }
0x10b7   : > { %v4084_v41 = vpop.f32.mrf.mxu1  ;;  %v4137_v29 = vpop.f32.mrf.mxu0  ;;  %v4150_v26 = vmax.f32 %v4081_v51, 0.0  ;;  %v4152_v38 = vmax.f32 %v4134_v14, 0.0 }
0x10b8   : > { %v4085_v60 = vadd.f32 %v4084_v41, %v3939_v53  ;;  %v4138_v50 = vadd.f32 %v4137_v29, %v3947_v54  ;;  %4454 = vmatprep.mubr.bf16.mxu1 %v4159_v49  ;;  %4503 = vmatprep.mubr.bf16.mxu0 %v4161_v28  ;;  %v4151_v20 = vmax.f32 %v4083_v16, 0.0  ;;  %v4153_v10 = vmax.f32 %v4136_v17, 0.0 }
0x10b9   : > { %v4086_v33 = vpop.f32.mrf.mxu1  ;;  %v4139_v61 = vpop.f32.mrf.mxu0  ;;  %4455 = vmatmul.mubr.bf16.vlgmr.msra.gmra.mxu1 %v4158_v36  ;;  %4504 = vmatmul.mubr.bf16.vlgmr.msra.gmra.mxu0 %v4160_v46 }
0x10ba   : > { %v4087_v62 = vadd.f32 %v4086_v33, %v3943_v48  ;;  %v4140_v15 = vadd.f32 %v4139_v61, %v3951_v32  ;;  %v4154_v27 = vmax.f32 %v4085_v60, 0.0  ;;  %v4156_v63 = vmax.f32 %v4138_v50, 0.0 }
0x10bc   : > { %v4155_v19 = vmax.f32 %v4087_v62, 0.0  ;;  %v4157_v6 = vmax.f32 %v4140_v15, 0.0  ;;  %v4162_v56 = vpack.c.bf16 %v4154_v27, %v4150_v26  ;;  %v4164_v34 = vpack.c.bf16 %v4156_v63, %v4152_v38 }
0x10be   : > { %v4163_v9 = vpack.c.bf16 %v4155_v19, %v4151_v20  ;;  %v4165_v35 = vpack.c.bf16 %v4157_v6, %v4153_v10 }
0x10c0   : > { %4462 = vmatprep.mubr.bf16.mxu1 %v4163_v9  ;;  %4511 = vmatprep.mubr.bf16.mxu0 %v4165_v35 }
0x10c1   : > { %4463 = vmatmul.mubr.bf16.gmra.mxu1 %v4162_v56  ;;  %4512 = vmatmul.mubr.bf16.gmra.mxu0 %v4164_v34 }
0x1179   : > { %v5260_v53 = vpop.f32.mrf.mxu1  ;;  %v5288_v48 = vpop.f32.mrf.mxu0 }
0x117b   : > { %v5261_v32 = vpop.f32.mrf.mxu1  ;;  %v5289_v54 = vpop.f32.mrf.mxu0 }
0x117c   : > { %v5262_v0 = vadd.f32 %v5261_v32, %v5260_v53  ;;  %v5290_v1 = vadd.f32 %v5289_v54, %v5288_v48 }
0x117d   : > { %v5263_v30 = vpop.f32.mrf.mxu1  ;;  %v5291_v18 = vpop.f32.mrf.mxu0 }
0x117e   : > { %v4506_v52 = vadd.f32 %v5290_v1, %v5262_v0 }
0x117f   : > { %v5264_v57 = vpop.f32.mrf.mxu1  ;;  %v5292_v2 = vpop.f32.mrf.mxu0 }
0x1180   : > { %v4520_v22 = vadd.f32 %v4506_v52, %v6564_v13  ;;  %v5265_v3 = vadd.f32 %v5264_v57, %v5263_v30  ;;  %v5293_v45 = vadd.f32 %v5292_v2, %v5291_v18 }
0x1181   : > { %v5266_v47 = vpop.f32.mrf.mxu1  ;;  %v5294_v23 = vpop.f32.mrf.mxu0 }
0x1182   : > { %v4509_v25 = vadd.f32 %v5293_v45, %v5265_v3  ;;  %v4531_v40 = vadd.f32 %v5023_v21, %v4520_v22  ;;  %v5024_v45 = vld [vmem:[%s627_s17] ss:$0 sm:$0xff] }
0x1183   : > { %v5267_v4 = vpop.f32.mrf.mxu1  ;;  %v5295_v5 = vpop.f32.mrf.mxu0 }
0x1184   : > { %v4521_v7 = vadd.f32 %v4509_v25, %v6567_v43  ;;  %v5268_v42 = vadd.f32 %v5267_v4, %v5266_v47  ;;  %v5296_v11 = vadd.f32 %v5295_v5, %v5294_v23  ;;  %v4535_v24 = vadd.f32 %v4531_v40, %v6218_v8  ;;  %v5025_v23 = vld [vmem:[%s6666_s4] ss:$0 sm:$0xff] }
0x1185   : > { %v5269_v31 = vpop.f32.mrf.mxu1  ;;  %v5297_v12 = vpop.f32.mrf.mxu0 }
0x1186   : > { %v4514_v37 = vadd.f32 %v5296_v11, %v5268_v42  ;;  %v4541_v49 = vsel %vm711_vm1, %v4535_v24, 0.0  ;;  %v4532_v13 = vadd.f32 %v5023_v21, %v4521_v7 }
0x1187   : > { %v5270_v28 = vpop.f32.mrf.mxu1  ;;  %v5298_v36 = vpop.f32.mrf.mxu0  ;;  %4542 = vadd.xlane.f32.xlu1 %v4541_v49 }
0x1188   : > { %v4522_v46 = vadd.f32 %v4514_v37, %v6570_v59  ;;  %v5271_v16 = vadd.f32 %v5270_v28, %v5269_v31  ;;  %v5299_v41 = vadd.f32 %v5298_v36, %v5297_v12  ;;  %v4536_v29 = vadd.f32 %v4532_v13, %v6221_v55 }
0x118a   : > { %v4517_v43 = vadd.f32 %v5299_v41, %v5271_v16  ;;  %v4544_v17 = vsel %vm711_vm1, %v4536_v29, 0.0  ;;  %v4533_v60 = vadd.f32 %v5023_v21, %v4522_v46 }
0x118b   : > { %4545 = vadd.xlane.f32.xlu0 %v4544_v17 }
0x118c   : > { %v4523_v8 = vadd.f32 %v4517_v43, %v6578_v58  ;;  %v4537_v50 = vadd.f32 %v4533_v60, %v6243_v39 }
0x118e   : > { %v4547_v51 = vsel %vm711_vm1, %v4537_v50, 0.0  ;;  %v4534_v14 = vadd.f32 %v5023_v21, %v4523_v8 }
0x118f   : > { %4548 = vadd.xlane.f32.xlu1 %v4547_v51 }
0x1190   : > { %v4538_v33 = vadd.f32 %v4534_v14, %v6235_v44 }
0x1192   : > { %v4550_v59 = vsel %vm711_vm1, %v4538_v33, 0.0 }
0x1193   : > { %4551 = vadd.xlane.f32.xlu0 %v4550_v59 }
0x1210   : > { %v4543_v61 = vpop.xlane.xlu1 %4542 }
0x1211   : > { %v4553_v55 = vmul.f32 0.015625, %v4543_v61 }
0x1213   : > { %v4557_v62 = vsub.f32 %v4535_v24, %v4553_v55 }
0x1214   : > { %v4546_v15 = vpop.xlane.xlu0 %4545 }
0x1215   : > { %v4554_v27 = vmul.f32 0.015625, %v4546_v15  ;;  %v4561_v63 = vmul.f32 %v4557_v62, %v4557_v62 }
0x1217   : > { %v4558_v20 = vsub.f32 %v4536_v29, %v4554_v27  ;;  %v4565_v58 = vsel %vm711_vm1, %v4561_v63, 0.0 }
0x1218   : > { %4566 = vadd.xlane.f32.xlu1 %v4565_v58  ;;  %v4549_v39 = vpop.xlane.xlu1 %4548 }
0x1219   : > { %v4555_v10 = vmul.f32 0.015625, %v4549_v39  ;;  %v4562_v19 = vmul.f32 %v4558_v20, %v4558_v20 }
0x121b   : > { %v4559_v6 = vsub.f32 %v4537_v50, %v4555_v10  ;;  %v4568_v26 = vsel %vm711_vm1, %v4562_v19, 0.0 }
0x121c   : > { %4569 = vadd.xlane.f32.xlu0 %v4568_v26  ;;  %v4552_v44 = vpop.xlane.xlu0 %4551 }
0x121d   : > { %v4556_v38 = vmul.f32 0.015625, %v4552_v44  ;;  %v4563_v9 = vmul.f32 %v4559_v6, %v4559_v6 }
0x121f   : > { %v4560_v35 = vsub.f32 %v4538_v33, %v4556_v38  ;;  %v4571_v56 = vsel %vm711_vm1, %v4563_v9, 0.0 }
0x1220   : > { %4572 = vadd.xlane.f32.xlu1 %v4571_v56 }
0x1221   : > { %v4564_v34 = vmul.f32 %v4560_v35, %v4560_v35 }
0x1223   : > { %v4574_v53 = vsel %vm711_vm1, %v4564_v34, 0.0 }
0x1224   : > { %4575 = vadd.xlane.f32.xlu0 %v4574_v53 }
0x12a1   : > { %v4567_v48 = vpop.xlane.xlu1 %4566 }
0x12a2   : > { %v4577_v32 = vmul.f32 0.015625, %v4567_v48 }
0x12a4   : > { %v4581_v54 = vadd.f32 1e-05, %v4577_v32 }
0x12a5   : > { %v4570_v0 = vpop.xlane.xlu0 %4569 }
0x12a6   : > { %5654 = vrsqrt.f32 %v4581_v54  ;;  %v4578_v1 = vmul.f32 0.015625, %v4570_v0 }
0x12a8   : > { %v4582_v30 = vadd.f32 1e-05, %v4578_v1 }
0x12a9   : > { %v4573_v18 = vpop.xlane.xlu1 %4572 }
0x12aa   : > { %5656 = vrsqrt.f32 %v4582_v30  ;;  %v4579_v52 = vmul.f32 0.015625, %v4573_v18 }
0x12ac   : > { %v4583_v57 = vadd.f32 1e-05, %v4579_v52 }
0x12ad   : > { %v4576_v2 = vpop.xlane.xlu0 %4575 }
0x12ae   : > { %5658 = vrsqrt.f32 %v4583_v57  ;;  %v4580_v21 = vmul.f32 0.015625, %v4576_v2 }
0x12b0   : > { %v4584_v22 = vadd.f32 1e-05, %v4580_v21 }
0x12b2   : > { %5660 = vrsqrt.f32 %v4584_v22 }
0x12b3   : > { %v5655_v3 = vpop.eup %5654 }
0x12b4   : > { %v4589_v47 = vmul.f32 %v5655_v3, %v4557_v62 }
0x12b6   : > { %v4599_v25 = vmul.f32 %v5024_v45, %v4589_v47 }
0x12b7   : > { %v5657_v40 = vpop.eup %5656 }
0x12b8   : > { %v4609_v4 = vadd.f32 %v5025_v23, %v4599_v25  ;;  %v4590_v5 = vmul.f32 %v5657_v40, %v4558_v20 }
0x12ba   : > { %4613 = vst.msk [vmem:[%s6660_s2] sm:$0xff] %vm711_vm1, %v4609_v4  ;;  %v4600_v7 = vmul.f32 %v5024_v45, %v4590_v5 }
0x12bb   : > { %v5659_v42 = vpop.eup %5658 }
0x12bc   : > { %v4610_v11 = vadd.f32 %v5025_v23, %v4600_v7  ;;  %v4591_v24 = vmul.f32 %v5659_v42, %v4559_v6 }
0x12be   : > { %4614 = vst.msk [vmem:[%s6660_s2 + $0x8] sm:$0xff] %vm711_vm1, %v4610_v11  ;;  %v4601_v31 = vmul.f32 %v5024_v45, %v4591_v24 }
0x12bf   : > { %v5661_v12 = vpop.eup %5660 }
0x12c0   : > { %v4611_v37 = vadd.f32 %v5025_v23, %v4601_v31  ;;  %v4592_v49 = vmul.f32 %v5661_v12, %v4560_v35 }
0x12c2   : > { %4615 = vst.msk [vmem:[%s6660_s2 + $0x10] sm:$0xff] %vm711_vm1, %v4611_v37  ;;  %v4602_v13 = vmul.f32 %v5024_v45, %v4592_v49 }
0x12c4   : > { %v4612_v28 = vadd.f32 %v5025_v23, %v4602_v13 }
0x12c6   : > { %4616 = vst.msk [vmem:[%s6660_s2 + $0x18] sm:$0xff] %vm711_vm1, %v4612_v28 }
0x12c7 PF: > { %s6667_s1 = sld [smem:[#allocation2_spill]] }
0x12cd   : > { %s24_s29 = sadd.s32 1, %s6667_s1  }
0x12ce   : > { %p21_p5 = scmp.ge.s32.totalorder %s24_s29, 6  }
0x12d0   :  { %23 = sbr.rel (!%p21_p5) target bundleno = 6 (0x6), region = 139 }

// kernel: roomlayout_vqvae_forward.2
= control target key start
LH: loop header
LB: loop body
LE: loop exit
PB: predicated region body
PF: predicated region fallthrough
CT: control target
= control target key end

     0   :  { %s8789_s0 = inlined_call_operand.vmem [shape: f32[32,64], index: 0, kind: input, shape index: {}]   ;;  %s8790_s1 = inlined_call_operand.vmem [shape: f32[2,16,16], index: 1, kind: input, shape index: {}]   ;;  %s8791_s2 = inlined_call_operand.vmem [shape: bf16[4,64,192], index: 2, kind: input, shape index: {}]   ;;  %s8792_s3 = inlined_call_operand.vmem [shape: f32[4,1,192], index: 3, kind: input, shape index: {}]   ;;  %s8793_s4 = inlined_call_operand.vmem [shape: bf16[4,64,64], index: 4, kind: input, shape index: {}]   ;;  %s8794_s5 = inlined_call_operand.vmem [shape: f32[4,1,64], index: 5, kind: input, shape index: {}]   ;;  %s8795_s6 = inlined_call_operand.vmem [shape: f32[4,1,64], index: 6, kind: input, shape index: {}]   ;;  %s8796_s7 = inlined_call_operand.vmem [shape: f32[4,1,64], index: 7, kind: input, shape index: {}]   ;;  %s8797_s8 = inlined_call_operand.vmem [shape: bf16[4,64,2048], index: 8, kind: input, shape index: {}]   ;;  %s8798_s9 = inlined_call_operand.vmem [shape: f32[4,1,2048], index: 9, kind: input, shape index: {}]   ;;  %s8799_s10 = inlined_call_operand.vmem [shape: bf16[4,2048,64], index: 10, kind: input, shape index: {}]   ;;  %s8800_s11 = inlined_call_operand.vmem [shape: f32[4,1,64], index: 11, kind: input, shape index: {}]   ;;  %s8801_s12 = inlined_call_operand.vmem [shape: f32[4,1,64], index: 12, kind: input, shape index: {}]   ;;  %s8802_s13 = inlined_call_operand.vmem [shape: f32[4,1,64], index: 13, kind: input, shape index: {}]   ;;  %s8803_s14 = inlined_call_operand.vmem [shape: f32[512,64], index: 14, kind: input, shape index: {}]   ;;  %s8804_s15 = inlined_call_operand.vmem [shape: f32[1,512], index: 15, kind: input, shape index: {}]   ;;  %s8805_s16 = inlined_call_operand.vmem [shape: f32[32,1], index: 16, kind: input, shape index: {}]   ;;  %s8806_s17 = inlined_call_operand.vmem [shape: f32[32,64], index: 17, kind: output, shape index: {0}]   ;;  %s8807_s18 = inlined_call_operand.vmem [shape: f32[32,64], index: 18, kind: output, shape index: {1}]   ;;  %s8808_s19 = inlined_call_operand.vmem [shape: s32[32,1], index: 19, kind: output, shape index: {2}]   ;;  %s8809_s20 = inlined_call_operand.hbm [shape: f32[1,1], index: 20, kind: output, shape index: {3}]  }
   0x1   :  { %8826 = sst [smem:[#allocation15_spill]] %s8789_s0 }
   0x2   :  { %8827 = sst [smem:[#allocation16_spill]] %s8790_s1 }
   0x3   :  { %8828 = sst [smem:[#allocation17_spill]] %s8791_s2 }
   0x4   :  { %8829 = sst [smem:[#allocation18_spill]] %s8792_s3 }
   0x5   :  { %8830 = sst [smem:[#allocation19_spill]] %s8793_s4 }
   0x6   :  { %8831 = sst [smem:[#allocation20_spill]] %s8803_s14 }
   0x7   :  { %8832 = sst [smem:[#allocation21_spill]] %s8804_s15 }
   0x8   :  { %8833 = sst [smem:[#allocation22_spill]] %s8805_s16 }
   0x9   :  { %8834 = sst [smem:[#allocation23_spill]] %s8807_s18 }
   0xa   :  { %8835 = sst [smem:[#allocation24_spill]] %s8808_s19 }
   0xb   :  { %8836 = sst [smem:[#allocation25_spill]] %s8809_s20 }
   0xc   :  { %26 = vsyncpa [#allocation3], 0  ;;  %s7204_s1 = smov 0  }
   0xd LB: > { %8837 = sst [smem:[#allocation5_spill]] %s7085_s1  ;;  %s7210_s22 = sadd.s32 4294967295, %s7085_s1   ;;  %s7085_s1 = sphi %s7204_s1, %s32_s1  }
   0xe   : > { %p5864_p0 = scmp.ge.s32.totalorder %s7085_s1, 1  ;;  %p646_p1 = scmp.lt.s32.totalorder %s7085_s1, 5 }
  0x10   : > { %p647_p2 = pnand %p5864_p0, %p646_p1 }
  0x12   : > { %650 = sbr.rel (%p647_p2) target bundleno = 5920 (0x1720), region = 88 }
  0x17   : > { %p740_p3 = scmp.lt.s32.totalorder %s7210_s22, 3  ;;  %s8838_s26 = sld [smem:[#allocation17_spill]] }
  0x18   : > { %s8839_s29 = sld [smem:[#allocation18_spill]]  ;;  %p5875_p4 = scmp.ne.s32.totalorder %s7210_s22, 0 }
  0x19   : > { %s7216_s23 = scalar_select %p740_p3, %s7210_s22, 3 }
  0x1a   : > { %s8841_s19 = sld [smem:[#allocation19_spill]] }
  0x1b   : > { %s6237_s24 = sshll.u32 %s7216_s23, 6  ;;  %s5867_s2 = sshll.u32 %s7216_s23, 1 }
  0x1c   : > { %s6238_s0 = sshll.u32 %s7216_s23, 5  ;;  %s5872_s1 = sshll.u32 %s7216_s23, 4 }
  0x1d   : > { %s7223_s27 = scalar_lea.vmem %s8838_s26, %s6237_s24  ;;  %s7258_s16 = scalar_lea.vmem %s8798_s9, %s5872_s1 }
  0x1e   : > { %s7228_s30 = scalar_lea.vmem %s8839_s29, %s5867_s2  ;;  %s6239_s2 = sshll.u32 %s7216_s23, 9 }
  0x1f   : > { %8840 = sst [smem:[#allocation6_spill]] %s7228_s30  ;;  %s7252_s30 = scalar_lea.vmem %s8797_s8, %s6239_s2 }
  0x20   : > { %s7238_s15 = scalar_lea.vmem %s8841_s19, %s6238_s0  ;;  %s6240_s18 = sshll.u32 %s7216_s23, 10 }
  0x21   : > { %s7264_s0 = scalar_lea.vmem %s8799_s10, %s6240_s18  ;;  %s779_s26 = scalar_lea.vmem %s8800_s11, %s7216_s23 }
  0x22   : > { %790 = sbr.rel (%p5875_p4) target bundleno = 43 (0x2b), region = 92  ;;  %s8842_s19 = sld [smem:[#allocation15_spill]] (!%p5875_p4) }
  0x27   : > { %vm795_vm0 = vcmask 523264  }
  0x28   : > { %v791_v0 = vld [vmem:[%s8842_s19] sm:$0xff]  ;;  %v792_v1 = vld [vmem:[%s8842_s19 + $0x8] sm:$0xff]  ;;  %v793_v2 = vld [vmem:[%s8842_s19 + $0x10] sm:$0xff] }
  0x29   : > { %796 = vst.msk [vmem:[%s8806_s17] sm:$0xff] %vm795_vm0, %v791_v0  ;;  %797 = vst.msk [vmem:[%s8806_s17 + $0x8] sm:$0xff] %vm795_vm0, %v792_v1  ;;  %v794_v3 = vld [vmem:[%s8842_s19 + $0x18] sm:$0xff] }
  0x2a   : > { %798 = vst.msk [vmem:[%s8806_s17 + $0x10] sm:$0xff] %vm795_vm0, %v793_v2  ;;  %799 = vst.msk [vmem:[%s8806_s17 + $0x18] sm:$0xff] %vm795_vm0, %v794_v3 }
  0x2b PF: > { %v6823_v4 = vld [vmem:[%s7223_s27 + $0x34] ss:$8 sps:$4 sm:$0xff]   ;;  %v6825_v5 = vld [vmem:[%s7223_s27 + $0x30] ss:$8 sps:$4 sm:$0xff]   ;;  %v7087_v6 = vmov 0   ;;  %vm866_vm1 = vcmask 523264   ;;  %v8817_v20 = vlaneseq  ;;  %s8847_s20 = scalar_lea.vmem %s8794_s5, %s7216_s23  ;;  %s8849_s25 = scalar_lea.vmem %s8796_s7, %s7216_s23 }
  0x2c   : > { %905 = vmatprep.mubr.bf16.mxu0 %v7087_v6  ;;  %881 = vmatprep.subr.bf16.mxu0 %v6823_v4  ;;  %v6826_v7 = vld [vmem:[%s7223_s27 + $0x24] ss:$8 sps:$4 sm:$0xff]   ;;  %v6828_v8 = vld [vmem:[%s7223_s27 + $0x20] ss:$8 sps:$4 sm:$0xff]   ;;  %v6829_v9 = vld [vmem:[%s7223_s27 + $0x14] ss:$8 sps:$4 sm:$0xff]   ;;  %s8852_s3 = scalar_lea.vmem %s8801_s12, %s7216_s23 }
  0x2d   : > { %882 = vmatpush1.bf16.msra.mxu0 %v6825_v5  ;;  %v6831_v10 = vld [vmem:[%s7223_s27 + $0x10] ss:$8 sps:$4 sm:$0xff]   ;;  %v6832_v11 = vld [vmem:[%s7223_s27 + $0x4] ss:$8 sps:$4 sm:$0xff]   ;;  %v6834_v12 = vld [vmem:[%s7223_s27] ss:$8 sps:$4 sm:$0xff]  }
  0x2e   : > { %883 = vmatprep.subr.bf16.mxu0 %v6826_v7  ;;  %s8843_s28 = sld [smem:[#allocation6_spill]]  ;;  %v7088_v19 = vmov 0.0   ;;  %v7330_v21 = vshrl.u32 %v8817_v20, 7  ;;  %vm7089_vm2 = vmmov 0   ;;  %s7090_s27 = smov 64   ;;  %vm945_vm3 = vcmask 130048  }
  0x2f   : > { %6677 = vmatprep.subr.bf16.mxu1 %v7088_v19  ;;  %6679 = vmatprep.mubr.msk.bf16.mxu1 %vm7089_vm2, %v7088_v19  ;;  %s8846_s14 = sld [smem:[#allocation16_spill]]  ;;  %s7091_s24 = smov 48  }
  0x30   : > { %v800_v13 = vld [vmem:[%s8806_s17] sm:$0xff]  ;;  %v801_v14 = vld [vmem:[%s8806_s17 + $0x8] sm:$0xff]  ;;  %v7333_v22 = vsub.s32 1, %v7330_v21  ;;  %v7336_v23 = vsub.s32 0, %v7330_v21  ;;  %s7092_s29 = smov 112   ;;  %s7093_s1 = smov 32  }
  0x31   : > { %884 = vmatpush1.bf16.msra.mxu0 %v6828_v8  ;;  %v804_v15 = vpack.c.bf16 %v801_v14, %v800_v13  ;;  %v802_v16 = vld [vmem:[%s8806_s17 + $0x10] sm:$0xff]  ;;  %v803_v17 = vld [vmem:[%s8806_s17 + $0x18] sm:$0xff]  ;;  %s7095_s21 = smov 16   ;;  %s7096_s18 = smov 80  }
  0x32   : > { %885 = vmatprep.subr.bf16.mxu0 %v6829_v9  ;;  %v805_v18 = vpack.c.bf16 %v803_v17, %v802_v16  ;;  %8844 = vst [vmem:[#allocation7_spill] sm:$0xff] %v7333_v22  ;;  %8845 = vst [vmem:[#allocation8_spill] sm:$0xff] %v7336_v23  ;;  %p6128_p5 = scmp.ne.s32.totalorder %s7210_s22, 3 }
  0x34   : > { %v814_v24 = vld [vmem:[%s8843_s28] sm:$0x3] }
  0x35   : > { %886 = vmatpush1.bf16.msra.mxu0 %v6831_v10  ;;  %v823_v25 = vrot.slane %v814_v24, %v7333_v22  ;;  %v819_v27 = vrot.slane %v814_v24, %v7336_v23  ;;  %v7374_v51 = vld [vmem:[%s8846_s14] sm:$0xff]  ;;  %v7380_v55 = vld [vmem:[%s8846_s14 + $0x8] sm:$0xff]  ;;  %v7387_v60 = vld [vmem:[%s8846_s14 + $0x10] sm:$0xff] }
  0x36   : > { %887 = vmatprep.subr.bf16.mxu0 %v6832_v11  ;;  %v7394_v1 = vld [vmem:[%s8846_s14 + $0x18] sm:$0xff] }
  0x39   : > { %888 = vmatpush1.bf16.msra.mxu0 %v6834_v12 }
  0x3a   : > { %6695 = vmatprep.subr.bf16.mxu0 %v7088_v19 }
  0x3c   : > { %5884 = vmatmul.mubr.msk.bf16.vlgmr.msra.gmra.mxu0 %vm866_vm1, %v804_v15 }
  0x3d   : > { %915 = vmatprep.mubr.bf16.mxu0 %v7087_v6 }
  0x44   : > { %5885 = vmatmul.mubr.msk.bf16.gmra.mxu0 %vm866_vm1, %v805_v18 }
  0x45   : > { %6697 = vmatprep.mubr.msk.bf16.mxu0 %vm7089_vm2, %v7088_v19 }
  0xfc   : > { %v907_v26 = vpop.f32.mrf.mxu0 }
  0xfd   : > { %v908_v31 = vadd.f32 %v907_v26, %v819_v27 }
  0xfe   : > { %v909_v28 = vpop.f32.mrf.mxu0 }
  0xff   : > { %v910_v29 = vadd.f32 %v909_v28, %v823_v25 }
 0x100   : > { %v911_v30 = vpop.f32.mrf.mxu0 }
 0x101   : > { %v912_v32 = vadd.f32 %v911_v30, %v819_v27 }
 0x102   : > { %v913_v33 = vpop.f32.mrf.mxu0 }
 0x103   : > { %v7345_v34 = vpack.c.bf16 %v912_v32, %v908_v31  ;;  %v914_v35 = vadd.f32 %v913_v33, %v823_v25 }
 0x104   : > { %v917_v36 = vpop.f32.mrf.mxu0 }
 0x105   : > { %v7347_v37 = vpack.c.bf16 %v914_v35, %v910_v29  ;;  %943 = vrot.lane.b32.xlu0 %v7345_v34, %s7090_s27  ;;  %v918_v40 = vadd.f32 %v917_v36, %v819_v27 }
 0x106   : > { %v919_v38 = vpop.f32.mrf.mxu0 }
 0x107   : > { %v920_v43 = vadd.f32 %v919_v38, %v823_v25 }
 0x108   : > { %v921_v39 = vpop.f32.mrf.mxu0 }
 0x109   : > { %v922_v41 = vadd.f32 %v921_v39, %v819_v27 }
 0x10a   : > { %v923_v42 = vpop.f32.mrf.mxu0 }
 0x10b   : > { %v7350_v44 = vpack.c.bf16 %v922_v41, %v918_v40  ;;  %v924_v45 = vadd.f32 %v923_v42, %v823_v25 }
 0x10d   : > { %v7352_v46 = vpack.c.bf16 %v924_v45, %v920_v43  ;;  %994 = vrot.lane.b32.xlu0 %v7350_v44, %s7090_s27  ;;  %s7094_s27 = smov 96  }
 0x10f   : > { %6696 = vmatpush3.bf16.msra.mxu0 %v7352_v46 }
 0x110   : > { %6707 = vmatprep.subr.bf16.mxu0 %v7088_v19 }
 0x177   : > { %v944_v47 = vpop.permute.xlu0 %943 }
 0x178   : > { %v950_v48 = vsel %vm945_vm3, %v944_v47, 0 }
 0x179   : > { %6678 = vmatpush3.bf16.xpose.msra.mxu1 %v950_v48 }
 0x17a   : > { %6683 = vmatprep.subr.bf16.mxu1 %v7088_v19 }
 0x17f   : > { %v995_v49 = vpop.permute.xlu0 %994 }
 0x180   : > { %v1000_v50 = vsel %vm945_vm3, %v995_v49, 0  ;;  %6680 = vmatmul.mubr.msk.bf16.vlgmr.msra.gmra.mxu1 %vm945_vm3, %v7345_v34 }
 0x181   : > { %6684 = vmatpush3.bf16.xpose.msra.mxu1 %v1000_v50  ;;  %6685 = vmatprep.mubr.msk.bf16.mxu1 %vm7089_vm2, %v7088_v19 }
 0x182   : > { %6689 = vmatprep.subr.bf16.mxu1 %v7088_v19 }
 0x188   : > { %6686 = vmatmul.mubr.msk.bf16.vlgmr.msra.gmra.mxu1 %vm945_vm3, %v7350_v44 }
 0x189   : > { %6690 = vmatpush3.bf16.msra.mxu1 %v7347_v37  ;;  %6691 = vmatprep.mubr.msk.bf16.mxu1 %vm7089_vm2, %v7088_v19 }
 0x18a   : > { %6701 = vmatprep.subr.bf16.mxu1 %v7088_v19 }
 0x240   : > { %v986_v52 = vpop.f32.mrf.mxu1 }
 0x241   : > { %v987_v53 = vadd.f32 %v986_v52, %v7374_v51 }
 0x242   : > { %v6681_v54 = vpop.f32.mrf.mxu1 }
 0x243   : > { %v1043_v56 = vsel %vm945_vm3, %v987_v53, -inf }
 0x244   : > { %1044 = vmax.xlane.f32.xlu1 %v1043_v56  ;;  %v989_v57 = vpop.f32.mrf.mxu1 }
 0x245   : > { %v990_v58 = vadd.f32 %v989_v57, %v7380_v55 }
 0x246   : > { %v6682_v59 = vpop.f32.mrf.mxu1 }
 0x247   : > { %v1046_v61 = vsel %vm945_vm3, %v990_v58, -inf }
 0x248   : > { %1047 = vmax.xlane.f32.xlu1 %v1046_v61  ;;  %v1036_v62 = vpop.f32.mrf.mxu1 }
 0x249   : > { %v1037_v63 = vadd.f32 %v1036_v62, %v7387_v60 }
 0x24a   : > { %v6687_v0 = vpop.f32.mrf.mxu1 }
 0x24b   : > { %v1049_v2 = vsel %vm945_vm3, %v1037_v63, -inf }
 0x24c   : > { %1050 = vmax.xlane.f32.xlu0 %v1049_v2  ;;  %v1039_v3 = vpop.f32.mrf.mxu1 }
 0x24d   : > { %v1040_v4 = vadd.f32 %v1039_v3, %v7394_v1 }
 0x24e   : > { %v6688_v5 = vpop.f32.mrf.mxu1 }
 0x24f   : > { %v1052_v7 = vsel %vm945_vm3, %v1040_v4, -inf }
 0x250   : > { %1053 = vmax.xlane.f32.xlu1 %v1052_v7 }
 0x261   : > { %1181 = vrot.lane.b32.xlu1 %v7345_v34, %s7091_s24 }
 0x262   : > { %1232 = vrot.lane.b32.xlu0 %v7350_v44, %s7091_s24  ;;  %s8853_s24 = scalar_lea.vmem %s8802_s13, %s7216_s23 }
 0x2cd   : > { %v1045_v8 = vpop.xlane.xlu1 %1044 }
 0x2ce   : > { %v1055_v9 = vsub.f32 %v987_v53, %v1045_v8 }
 0x2d0   : > { %v1059_v10 = vmul.f32 1.442695, %v1055_v9 }
 0x2d1   : > { %v1048_v11 = vpop.xlane.xlu1 %1047 }
 0x2d2   : > { %6967 = vpow2.f32 %v1059_v10  ;;  %v1056_v12 = vsub.f32 %v990_v58, %v1048_v11 }
 0x2d4   : > { %v1061_v13 = vmul.f32 1.442695, %v1056_v12 }
 0x2d5   : > { %v1051_v14 = vpop.xlane.xlu0 %1050 }
 0x2d6   : > { %6969 = vpow2.f32 %v1061_v13  ;;  %v1057_v15 = vsub.f32 %v1037_v63, %v1051_v14 }
 0x2d8   : > { %v1063_v16 = vmul.f32 1.442695, %v1057_v15 }
 0x2d9   : > { %v1054_v17 = vpop.xlane.xlu1 %1053  ;;  %v1233_v53 = vpop.permute.xlu0 %1232 }
 0x2da   : > { %6971 = vpow2.f32 %v1063_v16  ;;  %v1058_v18 = vsub.f32 %v1040_v4, %v1054_v17  ;;  %v1238_v57 = vsel %vm945_vm3, %v1233_v53, 0 }
 0x2dc   : > { %v1065_v24 = vmul.f32 1.442695, %v1058_v18 }
 0x2dd   : > { %v1182_v33 = vpop.permute.xlu1 %1181 }
 0x2de   : > { %6973 = vpow2.f32 %v1065_v24  ;;  %v1187_v47 = vsel %vm945_vm3, %v1182_v33, 0 }
 0x2df   : > { %v6968_v25 = vpop.eup %6967 }
 0x2e0   : > { %v1067_v26 = vsel %vm945_vm3, %v6968_v25, 0.0 }
 0x2e1   : > { %1068 = vadd.xlane.f32.xlu1 %v1067_v26 }
 0x2e3   : > { %v6970_v27 = vpop.eup %6969 }
 0x2e4   : > { %v1070_v28 = vsel %vm945_vm3, %v6970_v27, 0.0 }
 0x2e5   : > { %1071 = vadd.xlane.f32.xlu1 %v1070_v28 }
 0x2e7   : > { %v6972_v29 = vpop.eup %6971 }
 0x2e8   : > { %v1073_v30 = vsel %vm945_vm3, %v6972_v29, 0.0 }
 0x2e9   : > { %1074 = vadd.xlane.f32.xlu1 %v1073_v30 }
 0x2eb   : > { %v6974_v31 = vpop.eup %6973 }
 0x2ec   : > { %v1076_v32 = vsel %vm945_vm3, %v6974_v31, 0.0 }
 0x2ed   : > { %1077 = vadd.xlane.f32.xlu1 %v1076_v32 }
 0x2fe   : > { %1179 = vrot.lane.b32.xlu1 %v7345_v34, %s7092_s29 }
 0x302   : > { %1230 = vrot.lane.b32.xlu1 %v7350_v44, %s7092_s29 }
 0x36a   : > { %v1069_v35 = vpop.xlane.xlu1 %1068 }
 0x36b   : > { %6975 = vrcp.f32 %v1069_v35 }
 0x36e   : > { %v1072_v36 = vpop.xlane.xlu1 %1071 }
 0x36f   : > { %6977 = vrcp.f32 %v1072_v36 }
 0x372   : > { %v1075_v38 = vpop.xlane.xlu1 %1074 }
 0x373   : > { %6979 = vrcp.f32 %v1075_v38 }
 0x376   : > { %v1078_v39 = vpop.xlane.xlu1 %1077 }
 0x377   : > { %6981 = vrcp.f32 %v1078_v39 }
 0x378   : > { %v6976_v40 = vpop.eup %6975 }
 0x379   : > { %v1083_v42 = vmul.f32 %v6976_v40, %v6968_v25 }
 0x37a   : > { %v1180_v56 = vpop.permute.xlu1 %1179 }
 0x37c   : > { %v6978_v41 = vpop.eup %6977 }
 0x37d   : > { %v1084_v43 = vmul.f32 %v6978_v41, %v6970_v27 }
 0x37e   : > { %v1231_v58 = vpop.permute.xlu1 %1230 }
 0x37f   : > { %v1087_v45 = vpack.c.bf16 %v1084_v43, %v1083_v42 }
 0x380   : > { %v6980_v48 = vpop.eup %6979 }
 0x381   : > { %6692 = vmatmul.mubr.msk.bf16.vlgmr.msra.gmra.mxu1 %vm945_vm3, %v1087_v45  ;;  %v1085_v50 = vmul.f32 %v6980_v48, %v6972_v29 }
 0x382   : > { %6702 = vmatpush3.bf16.xpose.msra.mxu1 %v1187_v47  ;;  %6703 = vmatprep.mubr.msk.bf16.mxu1 %vm7089_vm2, %v7088_v19 }
 0x383   : > { %6713 = vmatprep.subr.bf16.mxu1 %v7088_v19 }
 0x384   : > { %v6982_v49 = vpop.eup %6981 }
 0x385   : > { %v1086_v52 = vmul.f32 %v6982_v49, %v6974_v31 }
 0x387   : > { %v1088_v54 = vpack.c.bf16 %v1086_v52, %v1085_v50 }
 0x389   : > { %6698 = vmatmul.mubr.msk.bf16.vlgmr.msra.gmra.mxu0 %vm945_vm3, %v1088_v54  ;;  %6704 = vmatmul.mubr.msk.bf16.vlgmr.msra.gmra.mxu1 %vm945_vm3, %v1180_v56 }
 0x38a   : > { %6708 = vmatpush3.bf16.xpose.msra.mxu0 %v1238_v57  ;;  %6709 = vmatprep.mubr.msk.bf16.mxu0 %vm7089_vm2, %v7088_v19 }
 0x38b   : > { %6719 = vmatprep.subr.bf16.mxu0 %v7088_v19  ;;  %6715 = vmatprep.mubr.msk.bf16.mxu1 %vm7089_vm2, %v7088_v19 }
 0x391   : > { %6710 = vmatmul.mubr.msk.bf16.vlgmr.msra.gmra.mxu0 %vm945_vm3, %v1231_v58 }
 0x392   : > { %6721 = vmatprep.mubr.msk.bf16.mxu0 %vm7089_vm2, %v7088_v19 }
 0x441   : > { %v7425_v59 = vpop.f32.mrf.mxu1 }
 0x443   : > { %v6693_v61 = vpop.f32.mrf.mxu1 }
 0x445   : > { %v7427_v62 = vpop.f32.mrf.mxu1 }
 0x446   : > { %v1177_v63 = vpack.c.bf16 %v7427_v62, %v7425_v59  ;;  %v6836_v62 = vld [vmem:[%s7238_s15 + $0x8] sm:$0xff]  }
 0x447   : > { %v6694_v0 = vpop.f32.mrf.mxu1 }
 0x448   : > { %v6835_v0 = vld [vmem:[%s7238_s15] sm:$0xff]  }
 0x449   : > { %v7431_v2 = vpop.f32.mrf.mxu0  ;;  %v1223_v3 = vpop.f32.mrf.mxu1 }
 0x44a   : > { %v1224_v4 = vadd.f32 %v1223_v3, %v7374_v51 }
 0x44b   : > { %v6699_v5 = vpop.f32.mrf.mxu0  ;;  %v6705_v7 = vpop.f32.mrf.mxu1 }
 0x44c   : > { %v1281_v8 = vsel %vm945_vm3, %v1224_v4, -inf }
 0x44d   : > { %v7435_v9 = vpop.f32.mrf.mxu0  ;;  %1282 = vmax.xlane.f32.xlu1 %v1281_v8  ;;  %v1226_v10 = vpop.f32.mrf.mxu1 }
 0x44e   : > { %v1178_v11 = vpack.c.bf16 %v7435_v9, %v7431_v2  ;;  %v1227_v12 = vadd.f32 %v1226_v10, %v7380_v55 }
 0x44f   : > { %v6700_v13 = vpop.f32.mrf.mxu0  ;;  %v6706_v14 = vpop.f32.mrf.mxu1 }
 0x450   : > { %v1284_v15 = vsel %vm945_vm3, %v1227_v12, -inf }
 0x451   : > { %v1274_v16 = vpop.f32.mrf.mxu0  ;;  %1285 = vmax.xlane.f32.xlu0 %v1284_v15 }
 0x452   : > { %v1275_v17 = vadd.f32 %v1274_v16, %v7387_v60 }
 0x453   : > { %v6711_v18 = vpop.f32.mrf.mxu0 }
 0x454   : > { %v1287_v24 = vsel %vm945_vm3, %v1275_v17, -inf }
 0x455   : > { %v1277_v25 = vpop.f32.mrf.mxu0  ;;  %1288 = vmax.xlane.f32.xlu1 %v1287_v24 }
 0x456   : > { %v1278_v26 = vadd.f32 %v1277_v25, %v7394_v1 }
 0x457   : > { %v6712_v27 = vpop.f32.mrf.mxu0 }
 0x458   : > { %v1290_v28 = vsel %vm945_vm3, %v1278_v26, -inf }
 0x459   : > { %1291 = vmax.xlane.f32.xlu0 %v1290_v28 }
 0x4d6   : > { %v1283_v29 = vpop.xlane.xlu1 %1282 }
 0x4d7   : > { %v1293_v30 = vsub.f32 %v1224_v4, %v1283_v29 }
 0x4d9   : > { %v1297_v31 = vmul.f32 1.442695, %v1293_v30 }
 0x4da   : > { %v1286_v32 = vpop.xlane.xlu0 %1285 }
 0x4db   : > { %6983 = vpow2.f32 %v1297_v31  ;;  %v1294_v33 = vsub.f32 %v1227_v12, %v1286_v32 }
 0x4dd   : > { %v1299_v35 = vmul.f32 1.442695, %v1294_v33 }
 0x4de   : > { %v1289_v36 = vpop.xlane.xlu1 %1288 }
 0x4df   : > { %6985 = vpow2.f32 %v1299_v35  ;;  %v1295_v38 = vsub.f32 %v1275_v17, %v1289_v36 }
 0x4e1   : > { %v1301_v39 = vmul.f32 1.442695, %v1295_v38 }
 0x4e2   : > { %v1292_v40 = vpop.xlane.xlu0 %1291 }
 0x4e3   : > { %6987 = vpow2.f32 %v1301_v39  ;;  %v1296_v41 = vsub.f32 %v1278_v26, %v1292_v40 }
 0x4e5   : > { %v1303_v42 = vmul.f32 1.442695, %v1296_v41 }
 0x4e7   : > { %6989 = vpow2.f32 %v1303_v42 }
 0x4e8   : > { %v6984_v43 = vpop.eup %6983 }
 0x4e9   : > { %v1305_v45 = vsel %vm945_vm3, %v6984_v43, 0.0 }
 0x4ea   : > { %1306 = vadd.xlane.f32.xlu1 %v1305_v45 }
 0x4ec   : > { %v6986_v47 = vpop.eup %6985 }
 0x4ed   : > { %v1308_v48 = vsel %vm945_vm3, %v6986_v47, 0.0 }
 0x4ee   : > { %1309 = vadd.xlane.f32.xlu0 %v1308_v48 }
 0x4f0   : > { %v6988_v49 = vpop.eup %6987 }
 0x4f1   : > { %v1311_v50 = vsel %vm945_vm3, %v6988_v49, 0.0 }
 0x4f2   : > { %1312 = vadd.xlane.f32.xlu1 %v1311_v50 }
 0x4f4   : > { %v6990_v52 = vpop.eup %6989 }
 0x4f5   : > { %v1314_v53 = vsel %vm945_vm3, %v6990_v52, 0.0 }
 0x4f6   : > { %1315 = vadd.xlane.f32.xlu0 %v1314_v53 }
 0x503   : > { %1328 = vrot.lane.b32.xlu1 %v7347_v37, %s7092_s29 }
 0x507   : > { %1549 = vrot.lane.b32.xlu1 %v7345_v34, %s7093_s1 }
 0x50b   : > { %1600 = vrot.lane.b32.xlu1 %v7350_v44, %s7093_s1 }
 0x50c   : > { %1376 = vrot.lane.b32.xlu0 %v7352_v46, %s7092_s29 }
 0x50f   : > { %1598 = vrot.lane.b32.xlu1 %v7350_v44, %s7094_s27 }
 0x510   : > { %1547 = vrot.lane.b32.xlu0 %v7345_v34, %s7094_s27 }
 0x573   : > { %v1307_v54 = vpop.xlane.xlu1 %1306 }
 0x574   : > { %6991 = vrcp.f32 %v1307_v54 }
 0x577   : > { %v1310_v56 = vpop.xlane.xlu0 %1309 }
 0x578   : > { %6993 = vrcp.f32 %v1310_v56 }
 0x57b   : > { %v1313_v57 = vpop.xlane.xlu1 %1312 }
 0x57c   : > { %6995 = vrcp.f32 %v1313_v57 }
 0x57f   : > { %v1329_v58 = vpop.permute.xlu1 %1328  ;;  %v1316_v61 = vpop.xlane.xlu0 %1315 }
 0x580   : > { %6997 = vrcp.f32 %v1316_v61  ;;  %6714 = vmatpush3.bf16.msra.mxu1 %v1329_v58 }
 0x581   : > { %v6992_v3 = vpop.eup %6991  ;;  %6725 = vmatprep.subr.bf16.mxu1 %v6836_v62 }
 0x582   : > { %v1321_v7 = vmul.f32 %v6992_v3, %v6984_v43 }
 0x583   : > { %v1377_v4 = vpop.permute.xlu0 %1376  ;;  %v1550_v17 = vpop.permute.xlu1 %1549 }
 0x584   : > { %6720 = vmatpush3.bf16.msra.mxu0 %v1377_v4  ;;  %v1555_v31 = vsel %vm945_vm3, %v1550_v17, 0 }
 0x585   : > { %v6994_v5 = vpop.eup %6993  ;;  %6731 = vmatprep.subr.bf16.mxu0 %v6835_v0 }
 0x586   : > { %v1322_v8 = vmul.f32 %v6994_v5, %v6986_v47 }
 0x587   : > { %v1601_v18 = vpop.permute.xlu1 %1600  ;;  %v1548_v36 = vpop.permute.xlu0 %1547 }
 0x588   : > { %v1325_v10 = vpack.c.bf16 %v1322_v8, %v1321_v7  ;;  %v1606_v24 = vsel %vm945_vm3, %v1601_v18, 0 }
 0x589   : > { %v6996_v12 = vpop.eup %6995 }
 0x58a   : > { %6716 = vmatmul.mubr.msk.bf16.vlgmr.msra.gmra.mxu1 %vm945_vm3, %v1325_v10  ;;  %v1323_v14 = vmul.f32 %v6996_v12, %v6988_v49 }
 0x58b   : > { %v1599_v59 = vpop.permute.xlu1 %1598  ;;  %6726 = vmatpush3.bf16.msra.mxu1 %v6836_v62 }
 0x58c   : > { %6737 = vmatprep.subr.bf16.mxu1 %v7088_v19 }
 0x58d   : > { %v6998_v13 = vpop.eup %6997 }
 0x58e   : > { %v1324_v15 = vmul.f32 %v6998_v13, %v6990_v52 }
 0x590   : > { %v1326_v16 = vpack.c.bf16 %v1324_v15, %v1323_v14 }
 0x592   : > { %6722 = vmatmul.mubr.msk.bf16.vlgmr.msra.gmra.mxu0 %vm945_vm3, %v1326_v16 }
 0x593   : > { %6733 = vmatprep.mubr.msk.bf16.mxu0 %vm945_vm3, %v1177_v63  ;;  %6732 = vmatpush3.bf16.msra.mxu0 %v6835_v0 }
 0x594   : > { %6743 = vmatprep.subr.bf16.mxu0 %v7088_v19 }
 0x59a   : > { %6734 = vmatmul.mubr.msk.bf16.vlgmr.msra.gmra.mxu0 %vm945_vm3, %v1178_v11 }
 0x59b   : > { %6744 = vmatpush3.bf16.xpose.msra.mxu0 %v1606_v24  ;;  %6745 = vmatprep.mubr.msk.bf16.mxu0 %vm7089_vm2, %v7088_v19 }
 0x59c   : > { %6755 = vmatprep.subr.bf16.mxu0 %v7088_v19 }
 0x5a2   : > { %6746 = vmatmul.mubr.msk.bf16.vlgmr.msra.gmra.mxu0 %vm945_vm3, %v1599_v59 }
 0x5a3   : > { %6757 = vmatprep.mubr.msk.bf16.mxu0 %vm7089_vm2, %v7088_v19 }
 0x64a   : > { %v1368_v63 = vpop.f32.mrf.mxu1 }
 0x64c   : > { %v6717_v2 = vpop.f32.mrf.mxu1 }
 0x64e   : > { %v1371_v9 = vpop.f32.mrf.mxu1 }
 0x64f   : > { %v1423_v11 = vpack.c.bf16 %v1371_v9, %v1368_v63 }
 0x650   : > { %v6718_v25 = vpop.f32.mrf.mxu1 }
 0x651   : > { %6727 = vmatprep.mubr.msk.bf16.mxu1 %vm945_vm3, %v1423_v11 }
 0x652   : > { %v1416_v26 = vpop.f32.mrf.mxu0 }
 0x654   : > { %v6723_v27 = vpop.f32.mrf.mxu0 }
 0x656   : > { %v1419_v28 = vpop.f32.mrf.mxu0 }
 0x657   : > { %v1424_v29 = vpack.c.bf16 %v1419_v28, %v1416_v26 }
 0x658   : > { %v6724_v30 = vpop.f32.mrf.mxu0 }
 0x659   : > { %6728 = vmatmul.mubr.msk.bf16.vlgmr.msra.gmra.mxu1 %vm945_vm3, %v1424_v29 }
 0x65a   : > { %6738 = vmatpush3.bf16.xpose.msra.mxu1 %v1555_v31  ;;  %v7483_v32 = vpop.f32.mrf.mxu0  ;;  %6739 = vmatprep.mubr.msk.bf16.mxu1 %vm7089_vm2, %v7088_v19 }
 0x65b   : > { %6749 = vmatprep.subr.bf16.mxu1 %v7088_v19 }
 0x65c   : > { %v7488_v33 = vpop.f32.mrf.mxu0 }
 0x65e   : > { %v7490_v35 = vpop.f32.mrf.mxu0 }
 0x660   : > { %v7492_v38 = vpop.f32.mrf.mxu0 }
 0x661   : > { %6740 = vmatmul.mubr.msk.bf16.vlgmr.msra.gmra.mxu1 %vm945_vm3, %v1548_v36 }
 0x662   : > { %v1642_v39 = vpop.f32.mrf.mxu0  ;;  %6751 = vmatprep.mubr.msk.bf16.mxu1 %vm7089_vm2, %v7088_v19 }
 0x663   : > { %v1643_v53 = vadd.f32 %v1642_v39, %v7387_v60 }
 0x664   : > { %v6747_v40 = vpop.f32.mrf.mxu0 }
 0x665   : > { %v1655_v0 = vsel %vm945_vm3, %v1643_v53, -inf }
 0x666   : > { %v1645_v41 = vpop.f32.mrf.mxu0 }
 0x667   : > { %v1646_v61 = vadd.f32 %v1645_v41, %v7394_v1 }
 0x668   : > { %v6748_v42 = vpop.f32.mrf.mxu0 }
 0x669   : > { %v1658_v4 = vsel %vm945_vm3, %v1646_v61, -inf }
 0x719   : > { %v7497_v43 = vpop.f32.mrf.mxu1 }
 0x71b   : > { %v7499_v45 = vpop.f32.mrf.mxu1 }
 0x71d   : > { %v7501_v47 = vpop.f32.mrf.mxu1 }
 0x71f   : > { %v7503_v48 = vpop.f32.mrf.mxu1 }
 0x721   : > { %v1591_v49 = vpop.f32.mrf.mxu1 }
 0x722   : > { %v1592_v50 = vadd.f32 %v1591_v49, %v7374_v51 }
 0x723   : > { %v6741_v52 = vpop.f32.mrf.mxu1 }
 0x724   : > { %v1649_v54 = vsel %vm945_vm3, %v1592_v50, -inf }
 0x725   : > { %1650 = vmax.xlane.f32.xlu0 %v1649_v54  ;;  %v1594_v56 = vpop.f32.mrf.mxu1 }
 0x726   : > { %v1595_v57 = vadd.f32 %v1594_v56, %v7380_v55 }
 0x727   : > { %v6742_v58 = vpop.f32.mrf.mxu1 }
 0x728   : > { %v1652_v3 = vsel %vm945_vm3, %v1595_v57, -inf  ;;  %v6837_v58 = vld [vmem:[%s7238_s15 + $0x10] sm:$0xff]  }
 0x729   : > { %1656 = vmax.xlane.f32.xlu0 %v1655_v0  ;;  %1653 = vmax.xlane.f32.xlu1 %v1652_v3 }
 0x72d   : > { %1659 = vmax.xlane.f32.xlu0 %v1658_v4 }
 0x7ae   : > { %v1651_v5 = vpop.xlane.xlu0 %1650 }
 0x7af   : > { %v1661_v7 = vsub.f32 %v1592_v50, %v1651_v5 }
 0x7b1   : > { %v1665_v13 = vmul.f32 1.442695, %v1661_v7 }
 0x7b2   : > { %v1657_v8 = vpop.xlane.xlu0 %1656  ;;  %v1654_v10 = vpop.xlane.xlu1 %1653 }
 0x7b3   : > { %v1663_v12 = vsub.f32 %v1643_v53, %v1657_v8  ;;  %v1662_v15 = vsub.f32 %v1595_v57, %v1654_v10 }
 0x7b5   : > { %v1669_v14 = vmul.f32 1.442695, %v1663_v12  ;;  %v1667_v18 = vmul.f32 1.442695, %v1662_v15 }
 0x7b6   : > { %v1660_v16 = vpop.xlane.xlu0 %1659 }
 0x7b7   : > { %6999 = vpow2.f32 %v1669_v14  ;;  %v1664_v17 = vsub.f32 %v1646_v61, %v1660_v16 }
 0x7b8   : > { %7001 = vpow2.f32 %v1665_v13 }
 0x7b9   : > { %v1671_v24 = vmul.f32 1.442695, %v1664_v17 }
 0x7bb   : > { %7003 = vpow2.f32 %v1671_v24 }
 0x7bc   : > { %7005 = vpow2.f32 %v1667_v18 }
 0x7c4   : > { %v7000_v59 = vpop.eup %6999 }
 0x7c5   : > { %v1679_v62 = vsel %vm945_vm3, %v7000_v59, 0.0  ;;  %v7002_v63 = vpop.eup %7001 }
 0x7c6   : > { %1680 = vadd.xlane.f32.xlu1 %v1679_v62  ;;  %v1673_v11 = vsel %vm945_vm3, %v7002_v63, 0.0 }
 0x7c8   : > { %v7004_v2 = vpop.eup %7003 }
 0x7c9   : > { %v1682_v9 = vsel %vm945_vm3, %v7004_v2, 0.0  ;;  %v7006_v25 = vpop.eup %7005 }
 0x7ca   : > { %1683 = vadd.xlane.f32.xlu0 %v1682_v9  ;;  %1674 = vadd.xlane.f32.xlu1 %v1673_v11  ;;  %v1676_v26 = vsel %vm945_vm3, %v7006_v25, 0.0 }
 0x7ce   : > { %1677 = vadd.xlane.f32.xlu0 %v1676_v26 }
 0x7db   : > { %1695 = vrot.lane.b32.xlu1 %v7347_v37, %s7094_s27 }
 0x7df   : > { %1858 = vrot.lane.b32.xlu1 %v7345_v34, %s7095_s21 }
 0x7e3   : > { %1909 = vrot.lane.b32.xlu1 %v7350_v44, %s7095_s21 }
 0x7e4   : > { %1742 = vrot.lane.b32.xlu0 %v7352_v46, %s7094_s27 }
 0x7e7   : > { %1907 = vrot.lane.b32.xlu1 %v7350_v44, %s7096_s18 }
 0x7e8   : > { %1856 = vrot.lane.b32.xlu0 %v7345_v34, %s7096_s18 }
 0x84f   : > { %v1681_v27 = vpop.xlane.xlu1 %1680 }
 0x850   : > { %7007 = vrcp.f32 %v1681_v27 }
 0x853   : > { %v1684_v28 = vpop.xlane.xlu0 %1683  ;;  %v1675_v29 = vpop.xlane.xlu1 %1674 }
 0x854   : > { %7009 = vrcp.f32 %v1684_v28 }
 0x855   : > { %7011 = vrcp.f32 %v1675_v29  ;;  %v1541_v29 = vadd.f32 %v7483_v32, %v7497_v43 }
 0x857   : > { %v1678_v30 = vpop.xlane.xlu0 %1677  ;;  %v1696_v31 = vpop.permute.xlu1 %1695 }
 0x858   : > { %7013 = vrcp.f32 %v1678_v30  ;;  %6750 = vmatpush3.bf16.msra.mxu1 %v1696_v31 }
 0x859   : > { %6761 = vmatprep.subr.bf16.mxu1 %v6837_v58 }
 0x85b   : > { %v1743_v36 = vpop.permute.xlu0 %1742  ;;  %v1859_v34 = vpop.permute.xlu1 %1858 }
 0x85c   : > { %6756 = vmatpush3.bf16.msra.mxu0 %v1743_v36  ;;  %v1864_v52 = vsel %vm945_vm3, %v1859_v34, 0  ;;  %v1533_v36 = vadd.f32 %v7488_v33, %v7499_v45 }
 0x85d   : > { %6767 = vmatprep.subr.bf16.mxu0 %v7088_v19  ;;  %v7008_v39 = vpop.eup %7007 }
 0x85e   : > { %v1691_v44 = vmul.f32 %v7008_v39, %v7000_v59 }
 0x85f   : > { %v1857_v57 = vpop.permute.xlu0 %1856  ;;  %v1910_v12 = vpop.permute.xlu1 %1909 }
 0x860   : > { %v1915_v24 = vsel %vm945_vm3, %v1910_v12, 0 }
 0x861   : > { %v7010_v40 = vpop.eup %7009 }
 0x862   : > { %v1692_v41 = vmul.f32 %v7010_v40, %v7004_v2  ;;  %v7012_v42 = vpop.eup %7011  ;;  %v1544_v40 = vadd.f32 %v7490_v35, %v7501_v47 }
 0x863   : > { %v1689_v53 = vmul.f32 %v7012_v42, %v7002_v63  ;;  %v1908_v2 = vpop.permute.xlu1 %1907  ;;  %v1536_v42 = vadd.f32 %v7492_v38, %v7503_v48 }
 0x864   : > { %v1694_v49 = vpack.c.bf16 %v1692_v41, %v1691_v44 }
 0x865   : > { %v7014_v50 = vpop.eup %7013 }
 0x866   : > { %6758 = vmatmul.mubr.msk.bf16.vlgmr.msra.gmra.mxu0 %vm945_vm3, %v1694_v49  ;;  %v1690_v54 = vmul.f32 %v7014_v50, %v7006_v25 }
 0x867   : > { %6768 = vmatpush3.bf16.xpose.msra.mxu0 %v1864_v52  ;;  %6769 = vmatprep.mubr.msk.bf16.mxu0 %vm7089_vm2, %v7088_v19 }
 0x868   : > { %v1693_v56 = vpack.c.bf16 %v1690_v54, %v1689_v53  ;;  %6779 = vmatprep.subr.bf16.mxu0 %v7088_v19 }
 0x86a   : > { %6752 = vmatmul.mubr.msk.bf16.vlgmr.msra.gmra.mxu1 %vm945_vm3, %v1693_v56 }
 0x86b   : > { %6762 = vmatpush3.bf16.msra.mxu1 %v6837_v58 }
 0x86c   : > { %6773 = vmatprep.subr.bf16.mxu1 %v7088_v19 }
 0x86e   : > { %6770 = vmatmul.mubr.msk.bf16.vlgmr.msra.gmra.mxu0 %vm945_vm3, %v1857_v57 }
 0x86f   : > { %6781 = vmatprep.mubr.msk.bf16.mxu0 %vm7089_vm2, %v7088_v19 }
 0x926   : > { %v1782_v61 = vpop.f32.mrf.mxu0 }
 0x928   : > { %v6759_v0 = vpop.f32.mrf.mxu0 }
 0x92a   : > { %v1735_v3 = vpop.f32.mrf.mxu1  ;;  %v1785_v4 = vpop.f32.mrf.mxu0 }
 0x92b   : > { %v1790_v15 = vpack.c.bf16 %v1785_v4, %v1782_v61 }
 0x92c   : > { %v6753_v5 = vpop.f32.mrf.mxu1  ;;  %v6760_v7 = vpop.f32.mrf.mxu0 }
 0x92e   : > { %v1738_v8 = vpop.f32.mrf.mxu1  ;;  %v1900_v10 = vpop.f32.mrf.mxu0 }
 0x92f   : > { %v1789_v13 = vpack.c.bf16 %v1738_v8, %v1735_v3  ;;  %v1901_v14 = vadd.f32 %v1900_v10, %v7374_v51 }
 0x930   : > { %v6754_v16 = vpop.f32.mrf.mxu1  ;;  %v6771_v17 = vpop.f32.mrf.mxu0 }
 0x931   : > { %6763 = vmatprep.mubr.msk.bf16.mxu1 %vm945_vm3, %v1789_v13  ;;  %v1958_v18 = vsel %vm945_vm3, %v1901_v14, -inf }
 0x932   : > { %1959 = vmax.xlane.f32.xlu0 %v1958_v18  ;;  %6764 = vmatmul.mubr.msk.bf16.vlgmr.msra.gmra.mxu1 %vm945_vm3, %v1790_v15  ;;  %v1903_v59 = vpop.f32.mrf.mxu0 }
 0x933   : > { %v1904_v62 = vadd.f32 %v1903_v59, %v7380_v55  ;;  %6774 = vmatpush3.bf16.xpose.msra.mxu1 %v1915_v24  ;;  %6775 = vmatprep.mubr.msk.bf16.mxu1 %vm7089_vm2, %v7088_v19 }
 0x934   : > { %v6772_v51 = vpop.f32.mrf.mxu0  ;;  %6785 = vmatprep.subr.bf16.mxu1 %v7088_v19 }
 0x935   : > { %v1961_v63 = vsel %vm945_vm3, %v1904_v62, -inf  ;;  %v6838_v51 = vld [vmem:[%s7238_s15 + $0x18] sm:$0xff]   ;;  %s8848_s15 = scalar_lea.vmem %s8795_s6, %s7216_s23 }
 0x936   : > { %1962 = vmax.xlane.f32.xlu1 %v1961_v63 }
 0x93a   : > { %6776 = vmatmul.mubr.msk.bf16.vlgmr.msra.gmra.mxu1 %vm945_vm3, %v1908_v2 }
 0x93b   : > { %6787 = vmatprep.mubr.msk.bf16.mxu1 %vm7089_vm2, %v7088_v19 }
 0x9bb   : > { %v1960_v9 = vpop.xlane.xlu0 %1959 }
 0x9bc   : > { %v1970_v11 = vsub.f32 %v1901_v14, %v1960_v9 }
 0x9be   : > { %v1974_v25 = vmul.f32 1.442695, %v1970_v11 }
 0x9bf   : > { %v1963_v27 = vpop.xlane.xlu1 %1962 }
 0x9c0   : > { %7015 = vpow2.f32 %v1974_v25  ;;  %v1971_v28 = vsub.f32 %v1904_v62, %v1963_v27 }
 0x9c2   : > { %v1976_v30 = vmul.f32 1.442695, %v1971_v28 }
 0x9c4   : > { %7017 = vpow2.f32 %v1976_v30 }
 0x9cd   : > { %v7016_v55 = vpop.eup %7015 }
 0x9ce   : > { %v1982_v26 = vsel %vm945_vm3, %v7016_v55, 0.0 }
 0x9cf   : > { %1983 = vadd.xlane.f32.xlu1 %v1982_v26 }
 0x9d1   : > { %v7018_v54 = vpop.eup %7017 }
 0x9d2   : > { %v1985_v38 = vsel %vm945_vm3, %v7018_v54, 0.0 }
 0x9f2   : > { %v6765_v31 = vpop.f32.mrf.mxu1 }
 0x9f3   : > { %v7557_v39 = vadd.f32 %v6765_v31, %v1541_v29 }
 0x9f4   : > { %v1837_v19 = vpop.f32.mrf.mxu1 }
 0x9f5   : > { %v7561_v44 = vadd.f32 %v1837_v19, %v1533_v36  ;;  %v5914_v36 = vld [vmem:[%s8847_s20] ss:$0 sm:$0xff] }
 0x9f6   : > { %v6766_v41 = vpop.f32.mrf.mxu1 }
 0x9f7   : > { %v7565_v34 = vadd.f32 %v6766_v41, %v1544_v40 }
 0x9f8   : > { %v1840_v32 = vpop.f32.mrf.mxu1 }
 0x9f9   : > { %v7567_v43 = vadd.f32 %v1840_v32, %v1536_v42 }
 0x9fa   : > { %v1951_v49 = vpop.f32.mrf.mxu1 }
 0x9fb   : > { %v1952_v33 = vadd.f32 %v1951_v49, %v7387_v60 }
 0x9fc   : > { %v6777_v45 = vpop.f32.mrf.mxu1 }
 0x9fd   : > { %v1964_v50 = vsel %vm945_vm3, %v1952_v33, -inf }
 0x9fe   : > { %1965 = vmax.xlane.f32.xlu0 %v1964_v50  ;;  %v1954_v35 = vpop.f32.mrf.mxu1 }
 0x9ff   : > { %v1955_v47 = vadd.f32 %v1954_v35, %v7394_v1 }
 0xa00   : > { %v6778_v52 = vpop.f32.mrf.mxu1 }
 0xa01   : > { %v1967_v53 = vsel %vm945_vm3, %v1955_v47, -inf }
 0xa02   : > { %1968 = vmax.xlane.f32.xlu0 %v1967_v53 }
 0xa06   : > { %1986 = vadd.xlane.f32.xlu0 %v1985_v38 }
 0xa58   : > { %v1984_v7 = vpop.xlane.xlu1 %1983 }
 0xa87   : > { %v1966_v48 = vpop.xlane.xlu0 %1965 }
 0xa88   : > { %v1972_v56 = vsub.f32 %v1952_v33, %v1966_v48  ;;  %v7050_v48 = vld [vmem:[%s8806_s17 + $0x18] sm:$0xff] }
 0xa8a   : > { %v1978_v57 = vmul.f32 1.442695, %v1972_v56 }
 0xa8b   : > { %v1969_v58 = vpop.xlane.xlu0 %1968 }
 0xa8c   : > { %7019 = vpow2.f32 %v1978_v57  ;;  %v1973_v60 = vsub.f32 %v1955_v47, %v1969_v58 }
 0xa8e   : > { %v1980_v61 = vmul.f32 1.442695, %v1973_v60 }
 0xa8f   : > { %v1987_v5 = vpop.xlane.xlu0 %1986 }
 0xa90   : > { %7021 = vpow2.f32 %v1980_v61 }
 0xa91   : > { %7023 = vrcp.f32 %v1987_v5 }
 0xa92   : > { %7025 = vrcp.f32 %v1984_v7 }
 0xa99   : > { %v7020_v0 = vpop.eup %7019 }
 0xa9a   : > { %v1988_v3 = vsel %vm945_vm3, %v7020_v0, 0.0 }
 0xa9b   : > { %1989 = vadd.xlane.f32.xlu1 %v1988_v3 }
 0xa9d   : > { %v7022_v1 = vpop.eup %7021 }
 0xa9e   : > { %v1991_v4 = vsel %vm945_vm3, %v7022_v1, 0.0  ;;  %v7024_v8 = vpop.eup %7023 }
 0xa9f   : > { %1992 = vadd.xlane.f32.xlu0 %v1991_v4  ;;  %v7026_v12 = vpop.eup %7025  ;;  %v1999_v13 = vmul.f32 %v7024_v8, %v7018_v54 }
 0xaa0   : > { %v1998_v16 = vmul.f32 %v7026_v12, %v7016_v55 }
 0xaa2   : > { %v2002_v17 = vpack.c.bf16 %v1999_v13, %v1998_v16 }
 0xaac   : > { %2004 = vrot.lane.b32.xlu1 %v7347_v37, %s7096_s18 }
 0xab5   : > { %2051 = vrot.lane.b32.xlu0 %v7352_v46, %s7096_s18 }
 0xb24   : > { %v1990_v10 = vpop.xlane.xlu1 %1989 }
 0xb25   : > { %7027 = vrcp.f32 %v1990_v10 }
 0xb28   : > { %v2005_v14 = vpop.permute.xlu1 %2004  ;;  %v1993_v15 = vpop.xlane.xlu0 %1992 }
 0xb29   : > { %7029 = vrcp.f32 %v1993_v15  ;;  %6780 = vmatpush3.bf16.msra.mxu0 %v2005_v14 }
 0xb2a   : > { %6791 = vmatprep.subr.bf16.mxu0 %v6838_v51 }
 0xb2c   : > { %6782 = vmatmul.mubr.msk.bf16.vlgmr.msra.gmra.mxu0 %vm945_vm3, %v2002_v17  ;;  %v2052_v37 = vpop.permute.xlu0 %2051 }
 0xb2d   : > { %6786 = vmatpush3.bf16.msra.mxu1 %v2052_v37  ;;  %6792 = vmatpush3.bf16.msra.mxu0 %v6838_v51 }
 0xb32   : > { %v7028_v46 = vpop.eup %7027 }
 0xb33   : > { %v2000_v24 = vmul.f32 %v7028_v46, %v7020_v0 }
 0xb36   : > { %v7030_v18 = vpop.eup %7029 }
 0xb37   : > { %v2001_v59 = vmul.f32 %v7030_v18, %v7022_v1 }
 0xb39   : > { %v2003_v62 = vpack.c.bf16 %v2001_v59, %v2000_v24  ;;  %v2269_v24 = vld [vmem:[%s7252_s30 + $0x180] sm:$0xff] }
 0xb3a   : > { %v2271_v59 = vld [vmem:[%s7252_s30 + $0x1c0] sm:$0xff] }
 0xb3b   : > { %6788 = vmatmul.mubr.msk.bf16.vlgmr.msra.gmra.mxu1 %vm945_vm3, %v2003_v62  ;;  %v2270_v62 = vld [vmem:[%s7252_s30 + $0x188] sm:$0xff]  ;;  %v5930_v51 = vcombine.high %v2269_v24, %v2271_v59 }
 0xb3c   : > { %2413 = vmatprep.mubr.bf16.mxu1 %v7087_v6 }
 0xb3d   : > { %2389 = vmatprep.subr.bf16.mxu1 %v5930_v51 }
 0xbec   : > { %v2044_v63 = vpop.f32.mrf.mxu0 }
 0xbee   : > { %v6783_v2 = vpop.f32.mrf.mxu0 }
 0xbef   : > { %v5929_v2 = vcombine.low %v2269_v24, %v2271_v59 }
 0xbf0   : > { %v2047_v9 = vpop.f32.mrf.mxu0 }
 0xbf1   : > { %v2098_v11 = vpack.c.bf16 %v2047_v9, %v2044_v63  ;;  %v2272_v63 = vld [vmem:[%s7252_s30 + $0x1c8] sm:$0xff]  ;;  %2390 = vmatpush1.bf16.msra.mxu1 %v5929_v2 }
 0xbf2   : > { %v6784_v25 = vpop.f32.mrf.mxu0  ;;  %v5931_v9 = vcombine.low %v2270_v62, %v2272_v63 }
 0xbf3   : > { %6793 = vmatprep.mubr.msk.bf16.mxu0 %vm945_vm3, %v2098_v11  ;;  %v5932_v11 = vcombine.high %v2270_v62, %v2272_v63  ;;  %v2265_v25 = vld [vmem:[%s7252_s30 + $0x100] sm:$0xff] }
 0xbf4   : > { %v5916_v63 = vld [vmem:[%s8849_s25] ss:$0 sm:$0xff] }
 0xbf5   : > { %2442 = vmatprep.subr.bf16.mxu0 %v5932_v11 }
 0xbfb   : > { %v2091_v55 = vpop.f32.mrf.mxu1 }
 0xbfd   : > { %v6789_v26 = vpop.f32.mrf.mxu1 }
 0xbfe   : > { %v2266_v26 = vld [vmem:[%s7252_s30 + $0x108] sm:$0xff] }
 0xbff   : > { %v2094_v27 = vpop.f32.mrf.mxu1 }
 0xc00   : > { %v2099_v28 = vpack.c.bf16 %v2094_v27, %v2091_v55  ;;  %v2267_v55 = vld [vmem:[%s7252_s30 + $0x140] sm:$0xff] }
 0xc01   : > { %v6790_v29 = vpop.f32.mrf.mxu1  ;;  %v5926_v27 = vcombine.high %v2265_v25, %v2267_v55 }
 0xc02   : > { %6794 = vmatmul.mubr.msk.bf16.vlgmr.msra.gmra.mxu0 %vm945_vm3, %v2099_v28  ;;  %v2268_v28 = vld [vmem:[%s7252_s30 + $0x148] sm:$0xff]  ;;  %v5925_v29 = vcombine.low %v2265_v25, %v2267_v55  ;;  %v2585_v25 = vld [vmem:[%s7252_s30 + $0x150] sm:$0xff]  ;;  %v2584_v55 = vld [vmem:[%s7252_s30 + $0x118] sm:$0xff] }
 0xc03   : > { %2466 = vmatprep.mubr.bf16.mxu0 %v7087_v6  ;;  %2443 = vmatpush1.bf16.msra.mxu0 %v5931_v9  ;;  %v2583_v9 = vld [vmem:[%s7252_s30 + $0x110] sm:$0xff] }
 0xc04   : > { %2391 = vmatprep.subr.bf16.mxu1 %v5926_v27 }
 0xc05   : > { %2392 = vmatpush1.bf16.msra.mxu1 %v5925_v29 }
 0xcc2   : > { %v6795_v30 = vpop.f32.mrf.mxu0 }
 0xcc3   : > { %v2163_v31 = vadd.f32 %v6795_v30, %v7557_v39  ;;  %v7047_v39 = vld [vmem:[%s8806_s17] sm:$0xff]  ;;  %v5927_v30 = vcombine.low %v2266_v26, %v2268_v28 }
 0xcc4   : > { %v2146_v19 = vpop.f32.mrf.mxu0 }
 0xcc5   : > { %v2161_v40 = vadd.f32 %v2146_v19, %v7561_v44  ;;  %v2174_v42 = vadd.f32 %v5914_v36, %v2163_v31  ;;  %v7048_v44 = vld [vmem:[%s8806_s17 + $0x10] sm:$0xff]  ;;  %v5928_v31 = vcombine.high %v2266_v26, %v2268_v28  ;;  %v2263_v19 = vld [vmem:[%s7252_s30 + $0xc0] sm:$0xff]  ;;  %v2586_v26 = vld [vmem:[%s7252_s30 + $0x158] sm:$0xff] }
 0xcc6   : > { %v6796_v41 = vpop.f32.mrf.mxu0 }
 0xcc7   : > { %v2172_v32 = vadd.f32 %v5914_v36, %v2161_v40  ;;  %v2164_v49 = vadd.f32 %v6796_v41, %v7565_v34  ;;  %v2178_v53 = vadd.f32 %v7048_v44, %v2174_v42  ;;  %v7049_v34 = vld [vmem:[%s8806_s17 + $0x8] sm:$0xff]  ;;  %2444 = vmatprep.subr.bf16.mxu0 %v5928_v31  ;;  %v5946_v31 = vcombine.high %v2583_v9, %v2585_v25 }
 0xcc8   : > { %v2149_v33 = vpop.f32.mrf.mxu0  ;;  %v2262_v40 = vld [vmem:[%s7252_s30 + $0x88] sm:$0xff]  ;;  %2445 = vmatpush1.bf16.msra.mxu0 %v5927_v30 }
 0xcc9   : > { %v2162_v45 = vadd.f32 %v2149_v33, %v7567_v43  ;;  %v2176_v50 = vadd.f32 %v7047_v39, %v2172_v32  ;;  %v2175_v35 = vadd.f32 %v5914_v36, %v2164_v49  ;;  %v2188_v54 = vsel %vm866_vm1, %v2178_v53, 0.0  ;;  %v2264_v42 = vld [vmem:[%s7252_s30 + $0xc8] sm:$0xff]  ;;  %v2259_v39 = vld [vmem:[%s7252_s30 + $0x40] sm:$0xff] }
 0xcca   : > { %v5923_v49 = vcombine.low %v2262_v40, %v2264_v42  ;;  %v5924_v33 = vcombine.high %v2262_v40, %v2264_v42  ;;  %v2581_v40 = vld [vmem:[%s7252_s30 + $0xd0] sm:$0xff] }
 0xccb   : > { %v2173_v47 = vadd.f32 %v5914_v36, %v2162_v45  ;;  %v2182_v52 = vsel %vm866_vm1, %v2176_v50, 0.0  ;;  %v2179_v56 = vadd.f32 %v7050_v48, %v2175_v35  ;;  %v2261_v36 = vld [vmem:[%s7252_s30 + $0x80] sm:$0xff]  ;;  %v2590_v48 = vld [vmem:[%s7252_s30 + $0x1d8] sm:$0xff] }
 0xccc   : > { %2183 = vadd.xlane.f32.xlu1 %v2182_v52  ;;  %v5922_v41 = vcombine.high %v2261_v36, %v2263_v19  ;;  %v5921_v32 = vcombine.low %v2261_v36, %v2263_v19  ;;  %2446 = vmatprep.subr.bf16.mxu0 %v5924_v33  ;;  %v2257_v45 = vld [vmem:[%s7252_s30] sm:$0xff]  ;;  %v5948_v36 = vcombine.high %v2584_v55, %v2586_v26  ;;  %v2579_v19 = vld [vmem:[%s7252_s30 + $0x90] sm:$0xff] }
 0xccd   : > { %v2177_v43 = vadd.f32 %v7049_v34, %v2173_v47  ;;  %v2191_v57 = vsel %vm866_vm1, %v2179_v56, 0.0  ;;  %2447 = vmatpush1.bf16.msra.mxu0 %v5923_v49  ;;  %v5918_v35 = vcombine.high %v2257_v45, %v2259_v39  ;;  %v2260_v47 = vld [vmem:[%s7252_s30 + $0x48] sm:$0xff]  ;;  %v5917_v52 = vcombine.low %v2257_v45, %v2259_v39  ;;  %v2587_v34 = vld [vmem:[%s7252_s30 + $0x190] sm:$0xff] }
 0xcce   : > { %2393 = vmatprep.subr.bf16.mxu1 %v5922_v41  ;;  %v2582_v41 = vld [vmem:[%s7252_s30 + $0xd8] sm:$0xff]  ;;  %v5942_v33 = vcombine.high %v2579_v19, %v2581_v40  ;;  %v2575_v39 = vld [vmem:[%s7252_s30 + $0x10] sm:$0xff] }
 0xccf   : > { %v2185_v38 = vsel %vm866_vm1, %v2177_v43, 0.0  ;;  %2394 = vmatpush1.bf16.msra.mxu1 %v5921_v32  ;;  %v5947_v32 = vcombine.low %v2584_v55, %v2586_v26  ;;  %v6867_v55 = vld [vmem:[%s7264_s0 + $0x140] sm:$0xff]  }
 0xcd0   : > { %2189 = vadd.xlane.f32.xlu1 %v2188_v54  ;;  %2186 = vadd.xlane.f32.xlu0 %v2185_v38  ;;  %v2588_v54 = vld [vmem:[%s7252_s30 + $0x198] sm:$0xff]  ;;  %v6868_v26 = vld [vmem:[%s7264_s0 + $0x1c0] sm:$0xff]  }
 0xcd1   : > { %2395 = vmatprep.subr.bf16.mxu1 %v5918_v35  ;;  %v2576_v35 = vld [vmem:[%s7252_s30 + $0x18] sm:$0xff] }
 0xcd3   : > { %2396 = vmatpush1.bf16.msra.mxu1 %v5917_v52 }
 0xcd4   : > { %2192 = vadd.xlane.f32.xlu0 %v2191_v57  ;;  %v5951_v57 = vcombine.low %v2588_v54, %v2590_v48 }
 0xd55   : > { %v2184_v58 = vpop.xlane.xlu1 %2183 }
 0xd56   : > { %v2195_v60 = vmul.f32 0.015625, %v2184_v58  ;;  %v5952_v58 = vcombine.high %v2588_v54, %v2590_v48 }
 0xd58   : > { %v7612_v61 = vsub.f32 %v2176_v50, %v2195_v60  ;;  %v2258_v50 = vld [vmem:[%s7252_s30 + $0x8] sm:$0xff] }
 0xd59   : > { %v2190_v0 = vpop.xlane.xlu1 %2189  ;;  %v2187_v3 = vpop.xlane.xlu0 %2186  ;;  %v5919_v44 = vcombine.low %v2258_v50, %v2260_v47 }
 0xd5a   : > { %v2197_v1 = vmul.f32 0.015625, %v2190_v0  ;;  %v2196_v4 = vmul.f32 0.015625, %v2187_v3  ;;  %v2203_v5 = vmul.f32 %v7612_v61, %v7612_v61 }
 0xd5c   : > { %v7616_v7 = vsub.f32 %v2178_v53, %v2197_v1  ;;  %v7618_v8 = vsub.f32 %v2177_v43, %v2196_v4  ;;  %v2207_v10 = vsel %vm866_vm1, %v2203_v5, 0.0  ;;  %v5920_v53 = vcombine.high %v2258_v50, %v2260_v47  ;;  %v2589_v43 = vld [vmem:[%s7252_s30 + $0x1d0] sm:$0xff]  ;;  %v2578_v47 = vld [vmem:[%s7252_s30 + $0x58] sm:$0xff] }
 0xd5d   : > { %2208 = vadd.xlane.f32.xlu1 %v2207_v10  ;;  %v2193_v12 = vpop.xlane.xlu0 %2192  ;;  %v5950_v38 = vcombine.high %v2587_v34, %v2589_v43  ;;  %v2577_v50 = vld [vmem:[%s7252_s30 + $0x50] sm:$0xff]  ;;  %v5940_v54 = vcombine.high %v2576_v35, %v2578_v47  ;;  %v5939_v48 = vcombine.low %v2576_v35, %v2578_v47 }
 0xd5e   : > { %v2198_v13 = vmul.f32 0.015625, %v2193_v12  ;;  %v2205_v14 = vmul.f32 %v7616_v7, %v7616_v7  ;;  %v2204_v15 = vmul.f32 %v7618_v8, %v7618_v8  ;;  %2448 = vmatprep.subr.bf16.mxu0 %v5920_v53 }
 0xd5f   : > { %2449 = vmatpush1.bf16.msra.mxu0 %v5919_v44  ;;  %2701 = vmatprep.subr.bf16.mxu1 %v5950_v38  ;;  %v5941_v44 = vcombine.low %v2579_v19, %v2581_v40  ;;  %v5937_v38 = vcombine.low %v2575_v39, %v2577_v50 }
 0xd60   : > { %v7625_v16 = vsub.f32 %v2179_v56, %v2198_v13  ;;  %v2213_v17 = vsel %vm866_vm1, %v2205_v14, 0.0  ;;  %v2210_v37 = vsel %vm866_vm1, %v2204_v15, 0.0  ;;  %v5949_v56 = vcombine.low %v2587_v34, %v2589_v43  ;;  %2754 = vmatprep.subr.bf16.mxu0 %v5952_v58  ;;  %v6841_v58 = vld [vmem:[%s7264_s0 + $0x138] sm:$0xff]  }
 0xd61   : > { %2214 = vadd.xlane.f32.xlu1 %v2213_v17  ;;  %2211 = vadd.xlane.f32.xlu0 %v2210_v37  ;;  %v5938_v43 = vcombine.high %v2575_v39, %v2577_v50 }
 0xd62   : > { %v2206_v46 = vmul.f32 %v7625_v16, %v7625_v16 }
 0xd64   : > { %v2216_v18 = vsel %vm866_vm1, %v2206_v46, 0.0 }
 0xd65   : > { %2217 = vadd.xlane.f32.xlu0 %v2216_v18  ;;  %v5915_v18 = vld [vmem:[%s8848_s15] ss:$0 sm:$0xff] }
 0xde6   : > { %v2209_v60 = vpop.xlane.xlu1 %2208 }
 0xde7   : > { %v2219_v0 = vmul.f32 0.015625, %v2209_v60  ;;  %v6842_v60 = vld [vmem:[%s7264_s0 + $0x1b8] sm:$0xff]  }
 0xde9   : > { %v2223_v3 = vadd.f32 1e-05, %v2219_v0  ;;  %v6843_v0 = vld [vmem:[%s7264_s0 + $0x170] sm:$0xff]  }
 0xdea   : > { %v2215_v1 = vpop.xlane.xlu1 %2214  ;;  %v2212_v4 = vpop.xlane.xlu0 %2211 }
 0xdeb   : > { %7031 = vrsqrt.f32 %v2223_v3  ;;  %v2221_v5 = vmul.f32 0.015625, %v2215_v1  ;;  %v2220_v10 = vmul.f32 0.015625, %v2212_v4  ;;  %v6844_v3 = vld [vmem:[%s7264_s0 + $0x1f0] sm:$0xff]  }
 0xdec   : > { %v6845_v1 = vld [vmem:[%s7264_s0 + $0x130] sm:$0xff]  }
 0xded   : > { %v2224_v12 = vadd.f32 1e-05, %v2220_v10  ;;  %v2225_v13 = vadd.f32 1e-05, %v2221_v5  ;;  %v6846_v4 = vld [vmem:[%s7264_s0 + $0x1b0] sm:$0xff]   ;;  %v6847_v5 = vld [vmem:[%s7264_s0 + $0x168] sm:$0xff]  }
 0xdee   : > { %v2218_v14 = vpop.xlane.xlu0 %2217  ;;  %v6848_v10 = vld [vmem:[%s7264_s0 + $0x1e8] sm:$0xff]  }
 0xdef   : > { %v2222_v15 = vmul.f32 0.015625, %v2218_v14  ;;  %7033 = vrsqrt.f32 %v2224_v12  ;;  %v6849_v12 = vld [vmem:[%s7264_s0 + $0x128] sm:$0xff]   ;;  %v6851_v14 = vld [vmem:[%s7264_s0 + $0x160] sm:$0xff]  }
 0xdf0   : > { %7035 = vrsqrt.f32 %v2225_v13  ;;  %v6850_v13 = vld [vmem:[%s7264_s0 + $0x1a8] sm:$0xff]  }
 0xdf1   : > { %v2226_v17 = vadd.f32 1e-05, %v2222_v15  ;;  %v6852_v15 = vld [vmem:[%s7264_s0 + $0x1e0] sm:$0xff]  }
 0xdf3   : > { %7037 = vrsqrt.f32 %v2226_v17  ;;  %v6853_v17 = vld [vmem:[%s7264_s0 + $0x120] sm:$0xff]  }
 0xdf8   : > { %v7032_v37 = vpop.eup %7031 }
 0xdf9   : > { %v2231_v46 = vmul.f32 %v7032_v37, %v7612_v61  ;;  %v6854_v37 = vld [vmem:[%s7264_s0 + $0x1a0] sm:$0xff]  }
 0xdfb   : > { %v2241_v59 = vmul.f32 %v5915_v18, %v2231_v46  ;;  %v6855_v46 = vld [vmem:[%s7264_s0 + $0x158] sm:$0xff]  }
 0xdfc   : > { %v7034_v24 = vpop.eup %7033 }
 0xdfd   : > { %v2232_v62 = vmul.f32 %v7034_v24, %v7618_v8  ;;  %v7036_v51 = vpop.eup %7035  ;;  %v7669_v27 = vadd.f32 %v5916_v63, %v2241_v59  ;;  %v6857_v24 = vld [vmem:[%s7264_s0 + $0x118] sm:$0xff]  }
 0xdfe   : > { %v2233_v8 = vmul.f32 %v7036_v51, %v7616_v7  ;;  %v5945_v7 = vcombine.low %v2583_v9, %v2585_v25  ;;  %v6858_v59 = vld [vmem:[%s7264_s0 + $0x198] sm:$0xff]   ;;  %v6860_v51 = vld [vmem:[%s7264_s0 + $0x1d0] sm:$0xff]   ;;  %v6864_v9 = vld [vmem:[%s7264_s0 + $0x1c8] sm:$0xff]  }
 0xdff   : > { %v2242_v61 = vmul.f32 %v5915_v18, %v2232_v62  ;;  %v6859_v62 = vld [vmem:[%s7264_s0 + $0x150] sm:$0xff]   ;;  %v6866_v25 = vld [vmem:[%s7264_s0 + $0x188] sm:$0xff]  }
 0xe00   : > { %v7038_v2 = vpop.eup %7037  ;;  %v2243_v42 = vmul.f32 %v5915_v18, %v2233_v8  ;;  %v6869_v8 = vld [vmem:[%s7264_s0 + $0x100] sm:$0xff]  }
 0xe01   : > { %v2234_v11 = vmul.f32 %v7038_v2, %v7625_v16  ;;  %v7672_v28 = vadd.f32 %v5916_v63, %v2242_v61  ;;  %v2580_v16 = vld [vmem:[%s7252_s30 + $0x98] sm:$0xff]  ;;  %v6862_v2 = vld [vmem:[%s7264_s0 + $0x190] sm:$0xff]   ;;  %v6863_v61 = vld [vmem:[%s7264_s0 + $0x148] sm:$0xff]  }
 0xe02   : > { %v5944_v45 = vcombine.high %v2580_v16, %v2582_v41  ;;  %v7694_v52 = vadd.f32 %v5916_v63, %v2243_v42  ;;  %v5943_v53 = vcombine.low %v2580_v16, %v2582_v41 }
 0xe03   : > { %v7676_v29 = vpack.c.bf16 %v7672_v28, %v7669_v27  ;;  %v2244_v30 = vmul.f32 %v5915_v18, %v2234_v11  ;;  %v6856_v18 = vld [vmem:[%s7264_s0 + $0x1d8] sm:$0xff]   ;;  %v6865_v11 = vld [vmem:[%s7264_s0 + $0x108] sm:$0xff]  }
 0xe05   : > { %5933 = vmatmul.mubr.msk.bf16.vlgmr.msra.gmra.mxu1 %vm866_vm1, %v7676_v29  ;;  %5935 = vmatmul.mubr.msk.bf16.vlgmr.msra.gmra.mxu0 %vm866_vm1, %v7676_v29  ;;  %v7686_v49 = vadd.f32 %v5916_v63, %v2244_v30  ;;  %v6861_v63 = vld [vmem:[%s7264_s0 + $0x110] sm:$0xff]   ;;  %v6870_v30 = vld [vmem:[%s7264_s0 + $0x180] sm:$0xff]  }
 0xe06   : > { %2702 = vmatpush1.bf16.msra.mxu1 %v5949_v56  ;;  %2755 = vmatpush1.bf16.msra.mxu0 %v5951_v57  ;;  %v6839_v56 = vld [vmem:[%s7264_s0 + $0x178] sm:$0xff]  }
 0xe07   : > { %2703 = vmatprep.subr.bf16.mxu1 %v5946_v31  ;;  %2756 = vmatprep.subr.bf16.mxu0 %v5948_v36  ;;  %v7698_v34 = vpack.c.bf16 %v7686_v49, %v7694_v52  ;;  %v6840_v57 = vld [vmem:[%s7264_s0 + $0x1f8] sm:$0xff]  }
 0xe08   : > { %2423 = vmatprep.mubr.bf16.mxu1 %v7087_v6  ;;  %2476 = vmatprep.mubr.bf16.mxu0 %v7087_v6  ;;  %v6871_v31 = vld [vmem:[%s7264_s0 + $0x78] sm:$0xff]  }
 0xe09   : > { %v6872_v36 = vld [vmem:[%s7264_s0 + $0xf8] sm:$0xff]  }
 0xe0a   : > { %2704 = vmatpush1.bf16.msra.mxu1 %v5945_v7  ;;  %2757 = vmatpush1.bf16.msra.mxu0 %v5947_v32 }
 0xe0b   : > { %2705 = vmatprep.subr.bf16.mxu1 %v5942_v33  ;;  %2758 = vmatprep.subr.bf16.mxu0 %v5944_v45 }
 0xe0d   : > { %5934 = vmatmul.mubr.msk.bf16.gmra.mxu1 %vm866_vm1, %v7698_v34  ;;  %5936 = vmatmul.mubr.msk.bf16.gmra.mxu0 %vm866_vm1, %v7698_v34 }
 0xe0e   : > { %2706 = vmatpush1.bf16.msra.mxu1 %v5941_v44  ;;  %2759 = vmatpush1.bf16.msra.mxu0 %v5943_v53 }
 0xe0f   : > { %2707 = vmatprep.subr.bf16.mxu1 %v5938_v43  ;;  %2760 = vmatprep.subr.bf16.mxu0 %v5940_v54  ;;  %v7781_v54 = vsub.s32 3, %v7330_v21 }
 0xe10   : > { %2725 = vmatprep.mubr.bf16.mxu1 %v7087_v6  ;;  %2778 = vmatprep.mubr.bf16.mxu0 %v7087_v6 }
 0xe11   : > { %8850 = vst [vmem:[#allocation9_spill] sm:$0xff] %v7781_v54 }
 0xe12   : > { %2708 = vmatpush1.bf16.msra.mxu1 %v5937_v38  ;;  %2761 = vmatpush1.bf16.msra.mxu0 %v5939_v48  ;;  %v2591_v38 = vld [vmem:[%s7258_s16 + $0x4] sm:$0xf]  ;;  %v7785_v48 = vsub.s32 2, %v7330_v21 }
 0xe13   : > { %6285 = vmatprep.subr.bf16.mxu1 %v6839_v56  ;;  %6313 = vmatprep.subr.bf16.mxu0 %v6840_v57 }
 0xe14   : > { %8851 = vst [vmem:[#allocation10_spill] sm:$0xff] %v7785_v48 }
 0xe15   : > { %5953 = vmatmul.mubr.msk.bf16.vlgmr.msra.gmra.mxu1 %vm866_vm1, %v7676_v29  ;;  %5955 = vmatmul.mubr.msk.bf16.vlgmr.msra.gmra.mxu0 %vm866_vm1, %v7676_v29 }
 0xe16   : > { %2735 = vmatprep.mubr.bf16.mxu1 %v7087_v6  ;;  %2788 = vmatprep.mubr.bf16.mxu0 %v7087_v6 }
 0xe17   : > { %6286 = vmatpush3.bf16.msra.mxu1 %v6841_v58  ;;  %6314 = vmatpush3.bf16.msra.mxu0 %v6842_v60  ;;  %v2600_v58 = vrot.slane %v2591_v38, %v7333_v22  ;;  %v2608_v60 = vrot.slane %v2591_v38, %v7781_v54 }
 0xe18   : > { %6287 = vmatprep.subr.bf16.mxu1 %v6843_v0  ;;  %6315 = vmatprep.subr.bf16.mxu0 %v6844_v3  ;;  %v2596_v0 = vrot.slane %v2591_v38, %v7336_v23  ;;  %v2604_v3 = vrot.slane %v2591_v38, %v7785_v48 }
 0xe1b   : > { %6288 = vmatpush3.bf16.msra.mxu1 %v6845_v1  ;;  %6316 = vmatpush3.bf16.msra.mxu0 %v6846_v4 }
 0xe1c   : > { %6289 = vmatprep.subr.bf16.mxu1 %v6847_v5  ;;  %6317 = vmatprep.subr.bf16.mxu0 %v6848_v10 }
 0xe1d   : > { %5954 = vmatmul.mubr.msk.bf16.gmra.mxu1 %vm866_vm1, %v7698_v34  ;;  %5956 = vmatmul.mubr.msk.bf16.gmra.mxu0 %vm866_vm1, %v7698_v34 }
 0xe1f   : > { %6290 = vmatpush3.bf16.msra.mxu1 %v6849_v12  ;;  %6318 = vmatpush3.bf16.msra.mxu0 %v6850_v13 }
 0xe20   : > { %6291 = vmatprep.subr.bf16.mxu1 %v6851_v14  ;;  %6319 = vmatprep.subr.bf16.mxu0 %v6852_v15 }
 0xe23   : > { %6292 = vmatpush3.bf16.msra.mxu1 %v6853_v17  ;;  %6320 = vmatpush3.bf16.msra.mxu0 %v6854_v37 }
 0xe24   : > { %6293 = vmatprep.subr.bf16.mxu1 %v6855_v46  ;;  %6321 = vmatprep.subr.bf16.mxu0 %v6856_v18 }
 0xe27   : > { %6294 = vmatpush3.bf16.msra.mxu1 %v6857_v24  ;;  %6322 = vmatpush3.bf16.msra.mxu0 %v6858_v59 }
 0xe28   : > { %6295 = vmatprep.subr.bf16.mxu1 %v6859_v62  ;;  %6323 = vmatprep.subr.bf16.mxu0 %v6860_v51 }
 0xe2b   : > { %6296 = vmatpush3.bf16.msra.mxu1 %v6861_v63  ;;  %6324 = vmatpush3.bf16.msra.mxu0 %v6862_v2  ;;  %v7792_v2 = vld [vmem:[%s7258_s16] sm:$0xf] }
 0xe2c   : > { %6297 = vmatprep.subr.bf16.mxu1 %v6863_v61  ;;  %6325 = vmatprep.subr.bf16.mxu0 %v6864_v9 }
 0xe2f   : > { %6298 = vmatpush3.bf16.msra.mxu1 %v6865_v11  ;;  %6326 = vmatpush3.bf16.msra.mxu0 %v6866_v25 }
 0xe30   : > { %6299 = vmatprep.subr.bf16.mxu1 %v6867_v55  ;;  %6327 = vmatprep.subr.bf16.mxu0 %v6868_v26  ;;  %v7796_v55 = vrot.slane %v7792_v2, %v7333_v22 }
 0xe33   : > { %6300 = vmatpush3.bf16.msra.mxu1 %v6869_v8  ;;  %6328 = vmatpush3.bf16.msra.mxu0 %v6870_v30 }
 0xe34   : > { %6341 = vmatprep.subr.bf16.mxu1 %v6871_v31  ;;  %6369 = vmatprep.subr.bf16.mxu0 %v6872_v36  ;;  %v7800_v36 = vrot.slane %v7792_v2, %v7781_v54 }
 0xec5   : > { %v7750_v19 = vpop.f32.mrf.mxu1  ;;  %v7752_v40 = vpop.f32.mrf.mxu0 }
 0xec7   : > { %v7754_v16 = vpop.f32.mrf.mxu1  ;;  %v7756_v41 = vpop.f32.mrf.mxu0 }
 0xec9   : > { %v7758_v42 = vpop.f32.mrf.mxu1  ;;  %v7760_v7 = vpop.f32.mrf.mxu0 }
 0xecb   : > { %v2421_v32 = vpop.f32.mrf.mxu1  ;;  %v7762_v33 = vpop.f32.mrf.mxu0 }
 0xecd   : > { %v7764_v45 = vpop.f32.mrf.mxu1  ;;  %v7766_v39 = vpop.f32.mrf.mxu0 }
 0xecf   : > { %v7768_v50 = vpop.f32.mrf.mxu1  ;;  %v7770_v35 = vpop.f32.mrf.mxu0 }
 0xed1   : > { %v7772_v47 = vpop.f32.mrf.mxu1  ;;  %v7774_v44 = vpop.f32.mrf.mxu0 }
 0xed3   : > { %v7776_v53 = vpop.f32.mrf.mxu1  ;;  %v7778_v43 = vpop.f32.mrf.mxu0 }
 0xed5   : > { %v2727_v56 = vpop.f32.mrf.mxu1  ;;  %v2780_v57 = vpop.f32.mrf.mxu0 }
 0xed6   : > { %v2728_v15 = vadd.f32 %v2727_v56, %v2596_v0  ;;  %v2781_v17 = vadd.f32 %v2780_v57, %v2604_v3  ;;  %v6873_v57 = vld [vmem:[%s7264_s0 + $0x38] sm:$0xff]  }
 0xed7   : > { %v2729_v1 = vpop.f32.mrf.mxu1  ;;  %v2782_v4 = vpop.f32.mrf.mxu0 }
 0xed8   : > { %v2730_v12 = vadd.f32 %v2729_v1, %v2600_v58  ;;  %v2783_v13 = vadd.f32 %v2782_v4, %v2608_v60  ;;  %v2799_v26 = vmax.f32 %v2728_v15, 0.0  ;;  %v2801_v8 = vmax.f32 %v2781_v17, 0.0  ;;  %v6874_v1 = vld [vmem:[%s7264_s0 + $0xb8] sm:$0xff]   ;;  %v6876_v15 = vld [vmem:[%s7264_s0 + $0xf0] sm:$0xff]  }
 0xed9   : > { %v2731_v5 = vpop.f32.mrf.mxu1  ;;  %v2784_v10 = vpop.f32.mrf.mxu0  ;;  %v2422_v4 = vadd.f32 %v2421_v32, %v7796_v55 }
 0xeda   : > { %v2732_v14 = vadd.f32 %v2731_v5, %v2596_v0  ;;  %v2785_v21 = vadd.f32 %v2784_v10, %v2604_v3  ;;  %v2800_v61 = vmax.f32 %v2730_v12, 0.0  ;;  %v2802_v9 = vmax.f32 %v2783_v13, 0.0 }
 0xedb   : > { %v2733_v37 = vpop.f32.mrf.mxu1  ;;  %v2786_v46 = vpop.f32.mrf.mxu0 }
 0xedc   : > { %v2734_v18 = vadd.f32 %v2733_v37, %v2600_v58  ;;  %v2787_v24 = vadd.f32 %v2786_v46, %v2608_v60  ;;  %v2803_v59 = vmax.f32 %v2732_v14, 0.0  ;;  %v2805_v62 = vmax.f32 %v2785_v21, 0.0  ;;  %v6875_v21 = vld [vmem:[%s7264_s0 + $0x70] sm:$0xff]  }
 0xedd   : > { %v2737_v51 = vpop.f32.mrf.mxu1  ;;  %v2790_v63 = vpop.f32.mrf.mxu0 }
 0xede   : > { %v2804_v11 = vmax.f32 %v2734_v18, 0.0  ;;  %v2806_v25 = vmax.f32 %v2787_v24, 0.0  ;;  %v2815_v5 = vpack.c.bf16 %v2803_v59, %v2799_v26  ;;  %v2817_v10 = vpack.c.bf16 %v2805_v62, %v2801_v8 }
 0xedf   : > { %v2739_v30 = vpop.f32.mrf.mxu1  ;;  %v2792_v31 = vpop.f32.mrf.mxu0  ;;  %v2475_v18 = vadd.f32 %v7762_v33, %v7800_v36  ;;  %v2738_v24 = vadd.f32 %v2737_v51, %v2596_v0  ;;  %v2418_v26 = vadd.f32 %v7754_v16, %v7796_v55  ;;  %v2471_v33 = vadd.f32 %v7756_v41, %v7800_v36  ;;  %v6879_v51 = vld [vmem:[%s7264_s0 + $0x68] sm:$0xff]  }
 0xee0   : > { %v2816_v38 = vpack.c.bf16 %v2804_v11, %v2800_v61  ;;  %v2818_v56 = vpack.c.bf16 %v2806_v25, %v2802_v9  ;;  %v2740_v12 = vadd.f32 %v2739_v30, %v2600_v58  ;;  %v2793_v17 = vadd.f32 %v2792_v31, %v2608_v60  ;;  %v6877_v11 = vld [vmem:[%s7264_s0 + $0x30] sm:$0xff]  }
 0xee1   : > { %v2741_v13 = vpop.f32.mrf.mxu1  ;;  %v2794_v14 = vpop.f32.mrf.mxu0  ;;  %v2791_v61 = vadd.f32 %v2790_v63, %v2604_v3  ;;  %v6878_v25 = vld [vmem:[%s7264_s0 + $0xb0] sm:$0xff]   ;;  %v6880_v63 = vld [vmem:[%s7264_s0 + $0xe8] sm:$0xff]   ;;  %v2492_v31 = vmax.f32 %v2422_v4, 0.0  ;;  %v6883_v4 = vld [vmem:[%s7264_s0 + $0x60] sm:$0xff]  }
 0xee2   : > { %v2742_v37 = vadd.f32 %v2741_v13, %v2596_v0  ;;  %v2795_v46 = vadd.f32 %v2794_v14, %v2604_v3  ;;  %3111 = vmatprep.mubr.bf16.mxu1 %v2816_v38  ;;  %3160 = vmatprep.mubr.bf16.mxu0 %v2818_v56  ;;  %v2494_v38 = vmax.f32 %v2475_v18, 0.0  ;;  %v2807_v56 = vmax.f32 %v2738_v24, 0.0  ;;  %v6887_v18 = vld [vmem:[%s7264_s0 + $0x58] sm:$0xff]  }
 0xee3   : > { %v2743_v32 = vpop.f32.mrf.mxu1  ;;  %v2796_v59 = vpop.f32.mrf.mxu0  ;;  %3112 = vmatmul.mubr.bf16.vlgmr.msra.gmra.mxu1 %v2815_v5  ;;  %3161 = vmatmul.mubr.bf16.vlgmr.msra.gmra.mxu0 %v2817_v10  ;;  %v2809_v16 = vmax.f32 %v2791_v61, 0.0  ;;  %v6882_v5 = vld [vmem:[%s7264_s0 + $0xa8] sm:$0xff]   ;;  %v2488_v10 = vmax.f32 %v2418_v26, 0.0  ;;  %v2490_v13 = vmax.f32 %v2471_v33, 0.0  ;;  %v6888_v24 = vld [vmem:[%s7264_s0 + $0xd8] sm:$0xff]   ;;  %v2278_v33 = vrot.slane %v7792_v2, %v7336_v23 }
 0xee4   : > { %v2744_v62 = vadd.f32 %v2743_v32, %v2600_v58  ;;  %v2797_v9 = vadd.f32 %v2796_v59, %v2608_v60  ;;  %6342 = vmatpush3.bf16.msra.mxu1 %v6873_v57  ;;  %6370 = vmatpush3.bf16.msra.mxu0 %v6874_v1  ;;  %v2811_v0 = vmax.f32 %v2742_v37, 0.0  ;;  %v2813_v3 = vmax.f32 %v2795_v46, 0.0  ;;  %v6881_v1 = vld [vmem:[%s7264_s0 + $0x28] sm:$0xff]   ;;  %v6885_v37 = vld [vmem:[%s7264_s0 + $0x20] sm:$0xff]   ;;  %v6889_v61 = vld [vmem:[%s7264_s0 + $0x18] sm:$0xff]  }
 0xee5   : > { %6343 = vmatprep.subr.bf16.mxu1 %v6875_v21  ;;  %6371 = vmatprep.subr.bf16.mxu0 %v6876_v15  ;;  %v2808_v58 = vmax.f32 %v2740_v12, 0.0  ;;  %v2810_v60 = vmax.f32 %v2793_v17, 0.0  ;;  %v6884_v21 = vld [vmem:[%s7264_s0 + $0xe0] sm:$0xff]   ;;  %v2504_v15 = vpack.c.bf16 %v2492_v31, %v2488_v10  ;;  %v2506_v17 = vpack.c.bf16 %v2494_v38, %v2490_v13  ;;  %v6890_v32 = vld [vmem:[%s7264_s0 + $0x98] sm:$0xff]   ;;  %v6891_v59 = vld [vmem:[%s7264_s0 + $0x50] sm:$0xff]  }
 0xee6   : > { %v2812_v8 = vmax.f32 %v2744_v62, 0.0  ;;  %v2814_v30 = vmax.f32 %v2797_v9, 0.0  ;;  %v2819_v12 = vpack.c.bf16 %v2811_v0, %v2807_v56  ;;  %v2821_v14 = vpack.c.bf16 %v2813_v3, %v2809_v16  ;;  %v6886_v46 = vld [vmem:[%s7264_s0 + $0xa0] sm:$0xff]   ;;  %v6892_v62 = vld [vmem:[%s7264_s0 + $0xd0] sm:$0xff]   ;;  %v6896_v26 = vld [vmem:[%s7264_s0 + $0xc8] sm:$0xff]  }
 0xee7   : > { %v6893_v9 = vld [vmem:[%s7264_s0 + $0x10] sm:$0xff]   ;;  %v2286_v0 = vrot.slane %v7792_v2, %v7785_v48  ;;  %v2420_v3 = vadd.f32 %v7758_v42, %v2278_v33  ;;  %v2416_v31 = vadd.f32 %v7750_v19, %v2278_v33  ;;  %v2432_v2 = vadd.f32 %v7776_v53, %v7796_v55  ;;  %v3481_v38 = vld [vmem:[%s7252_s30 + $0x1e0] sm:$0xff]  ;;  %v3480_v56 = vld [vmem:[%s7252_s30 + $0x1a8] sm:$0xff] }
 0xee8   : > { %v2820_v57 = vpack.c.bf16 %v2812_v8, %v2808_v58  ;;  %v2822_v41 = vpack.c.bf16 %v2814_v30, %v2810_v60  ;;  %6344 = vmatpush3.bf16.msra.mxu1 %v6877_v11  ;;  %6372 = vmatpush3.bf16.msra.mxu0 %v6878_v25  ;;  %v6894_v11 = vld [vmem:[%s7264_s0 + $0x90] sm:$0xff]   ;;  %v6895_v25 = vld [vmem:[%s7264_s0 + $0x48] sm:$0xff]   ;;  %v6899_v60 = vld [vmem:[%s7264_s0 + $0x40] sm:$0xff]   ;;  %v2485_v42 = vadd.f32 %v7778_v43, %v7800_v36 }
 0xee9   : > { %6345 = vmatprep.subr.bf16.mxu1 %v6879_v51  ;;  %6373 = vmatprep.subr.bf16.mxu0 %v6880_v63  ;;  %v6897_v51 = vld [vmem:[%s7264_s0 + $0x8] sm:$0xff]   ;;  %v2473_v58 = vadd.f32 %v7760_v7, %v2286_v0  ;;  %v6900_v8 = vld [vmem:[%s7264_s0 + $0xc0] sm:$0xff]   ;;  %v2469_v7 = vadd.f32 %v7752_v40, %v2286_v0  ;;  %v2487_v10 = vmax.f32 %v2416_v31, 0.0  ;;  %v2500_v13 = vmax.f32 %v2432_v2, 0.0 }
 0xeea   : > { %3119 = vmatprep.mubr.bf16.mxu1 %v2820_v57  ;;  %3168 = vmatprep.mubr.bf16.mxu0 %v2822_v41  ;;  %v6898_v63 = vld [vmem:[%s7264_s0 + $0x88] sm:$0xff]   ;;  %v3479_v30 = vld [vmem:[%s7252_s30 + $0x1a0] sm:$0xff]  ;;  %v2491_v57 = vmax.f32 %v2420_v3, 0.0  ;;  %v2428_v41 = vadd.f32 %v7768_v50, %v7796_v55 }
 0xeeb   : > { %3120 = vmatmul.mubr.bf16.gmra.mxu1 %v2819_v12  ;;  %3169 = vmatmul.mubr.bf16.gmra.mxu0 %v2821_v14  ;;  %v3482_v16 = vld [vmem:[%s7252_s30 + $0x1e8] sm:$0xff]  ;;  %v6901_v19 = vld [vmem:[%s7264_s0] sm:$0xff]   ;;  %v2493_v43 = vmax.f32 %v2473_v58, 0.0  ;;  %v2502_v12 = vmax.f32 %v2485_v42, 0.0  ;;  %v2489_v50 = vmax.f32 %v2469_v7, 0.0  ;;  %v6033_v55 = vcombine.low %v3479_v30, %v3481_v38 }
 0xeec   : > { %6346 = vmatpush3.bf16.msra.mxu1 %v6881_v1  ;;  %6374 = vmatpush3.bf16.msra.mxu0 %v6882_v5  ;;  %v2481_v1 = vadd.f32 %v7770_v35, %v7800_v36  ;;  %v6902_v53 = vld [vmem:[%s7264_s0 + $0x80] sm:$0xff]   ;;  %v6034_v5 = vcombine.high %v3479_v30, %v3481_v38  ;;  %v6036_v40 = vcombine.high %v3480_v56, %v3482_v16  ;;  %v3476_v35 = vld [vmem:[%s7252_s30 + $0x128] sm:$0xff] }
 0xeed   : > { %3401 = vmatprep.mubr.bf16.mxu1 %v2504_v15  ;;  %3450 = vmatprep.mubr.bf16.mxu0 %v2506_v17  ;;  %v3475_v14 = vld [vmem:[%s7252_s30 + $0x120] sm:$0xff]  ;;  %v3478_v36 = vld [vmem:[%s7252_s30 + $0x168] sm:$0xff]  ;;  %v2496_v15 = vmax.f32 %v2428_v41, 0.0 }
 0xeee   : > { %6347 = vmatprep.subr.bf16.mxu1 %v6883_v4  ;;  %6375 = vmatprep.subr.bf16.mxu0 %v6884_v21  ;;  %v3477_v4 = vld [vmem:[%s7252_s30 + $0x160] sm:$0xff]  ;;  %v2503_v21 = vpack.c.bf16 %v2491_v57, %v2487_v10  ;;  %v2498_v17 = vmax.f32 %v2481_v1, 0.0  ;;  %v3472_v3 = vld [vmem:[%s7252_s30 + $0xa8] sm:$0xff]  ;;  %v6031_v58 = vcombine.low %v3476_v35, %v3478_v36  ;;  %v6903_v1 = vld [vmem:[%s7264_s0 + $0x278] sm:$0xff]  }
 0xeef   : > { %v3468_v30 = vld [vmem:[%s7252_s30 + $0x28] sm:$0xff]  ;;  %v6909_v10 = vld [vmem:[%s7264_s0 + $0x230] sm:$0xff]  }
 0xef0   : > { %6348 = vmatpush3.bf16.msra.mxu1 %v6885_v37  ;;  %6376 = vmatpush3.bf16.msra.mxu0 %v6886_v46  ;;  %v6035_v37 = vcombine.low %v3480_v56, %v3482_v16  ;;  %v2505_v46 = vpack.c.bf16 %v2493_v43, %v2489_v50  ;;  %v3470_v31 = vld [vmem:[%s7252_s30 + $0x68] sm:$0xff]  ;;  %v6906_v43 = vld [vmem:[%s7264_s0 + $0x2b8] sm:$0xff]  }
 0xef1   : > { %6349 = vmatprep.subr.bf16.mxu1 %v6887_v18  ;;  %6377 = vmatprep.subr.bf16.mxu0 %v6888_v24  ;;  %v2430_v18 = vadd.f32 %v7772_v47, %v2278_v33  ;;  %v2483_v24 = vadd.f32 %v7774_v44, %v2286_v0  ;;  %v6024_v7 = vcombine.high %v3468_v30, %v3470_v31  ;;  %v6913_v50 = vld [vmem:[%s7264_s0 + $0x228] sm:$0xff]  }
 0xef2   : > { %v6023_v41 = vcombine.low %v3468_v30, %v3470_v31 }
 0xef3   : > { %v2499_v47 = vmax.f32 %v2430_v18, 0.0  ;;  %v2501_v44 = vmax.f32 %v2483_v24, 0.0  ;;  %v6923_v18 = vld [vmem:[%s7264_s0 + $0x250] sm:$0xff]  }
 0xef4   : > { %6350 = vmatpush3.bf16.msra.mxu1 %v6889_v61  ;;  %6378 = vmatpush3.bf16.msra.mxu0 %v6890_v32  ;;  %v2508_v61 = vpack.c.bf16 %v2500_v13, %v2496_v15  ;;  %v2510_v32 = vpack.c.bf16 %v2502_v12, %v2498_v17  ;;  %v6910_v13 = vld [vmem:[%s7264_s0 + $0x2b0] sm:$0xff]   ;;  %v6911_v12 = vld [vmem:[%s7264_s0 + $0x268] sm:$0xff]   ;;  %v6919_v15 = vld [vmem:[%s7264_s0 + $0x258] sm:$0xff]  }
 0xef5   : > { %6351 = vmatprep.subr.bf16.mxu1 %v6891_v59  ;;  %6379 = vmatprep.subr.bf16.mxu0 %v6892_v62  ;;  %v6030_v59 = vcombine.high %v3475_v14, %v3477_v4  ;;  %v6032_v62 = vcombine.high %v3476_v35, %v3478_v36  ;;  %v6916_v35 = vld [vmem:[%s7264_s0 + $0x2e0] sm:$0xff]   ;;  %v6920_v17 = vld [vmem:[%s7264_s0 + $0x2d8] sm:$0xff]   ;;  %v6924_v24 = vld [vmem:[%s7264_s0 + $0x2d0] sm:$0xff]  }
 0xef6   : > { %v6917_v36 = vld [vmem:[%s7264_s0 + $0x220] sm:$0xff]  }
 0xef8   : > { %6352 = vmatpush3.bf16.msra.mxu1 %v6893_v9  ;;  %6380 = vmatpush3.bf16.msra.mxu0 %v6894_v11  ;;  %v3471_v9 = vld [vmem:[%s7252_s30 + $0xa0] sm:$0xff]  ;;  %v2426_v11 = vadd.f32 %v7764_v45, %v2278_v33 }
 0xef9   : > { %6353 = vmatprep.subr.bf16.mxu1 %v6895_v25  ;;  %6381 = vmatprep.subr.bf16.mxu0 %v6896_v26  ;;  %v2479_v25 = vadd.f32 %v7766_v39, %v2286_v0  ;;  %v3473_v26 = vld [vmem:[%s7252_s30 + $0xe0] sm:$0xff] }
 0xefa   : > { %v6026_v45 = vcombine.high %v3471_v9, %v3473_v26  ;;  %v3467_v33 = vld [vmem:[%s7252_s30 + $0x20] sm:$0xff]  ;;  %v2495_v0 = vmax.f32 %v2426_v11, 0.0  ;;  %v6025_v2 = vcombine.low %v3471_v9, %v3473_v26  ;;  %v6929_v9 = vld [vmem:[%s7264_s0 + $0x208] sm:$0xff]  }
 0xefb   : > { %v6930_v11 = vld [vmem:[%s7264_s0 + $0x288] sm:$0xff]   ;;  %v6932_v26 = vld [vmem:[%s7264_s0 + $0x2c0] sm:$0xff]  }
 0xefc   : > { %6354 = vmatpush3.bf16.msra.mxu1 %v6897_v51  ;;  %6382 = vmatpush3.bf16.msra.mxu0 %v6898_v63  ;;  %v3474_v51 = vld [vmem:[%s7252_s30 + $0xe8] sm:$0xff]  ;;  %v6029_v63 = vcombine.low %v3475_v14, %v3477_v4  ;;  %v2507_v42 = vpack.c.bf16 %v2499_v47, %v2495_v0  ;;  %v6915_v4 = vld [vmem:[%s7264_s0 + $0x260] sm:$0xff]   ;;  %v7920_v47 = vld [vmem:[%s7252_s30 + $0x1b0] sm:$0xff] }
 0xefd   : > { %6355 = vmatprep.subr.bf16.mxu1 %v6899_v60  ;;  %6383 = vmatprep.subr.bf16.mxu0 %v6900_v8  ;;  %v6028_v39 = vcombine.high %v3472_v3, %v3474_v51  ;;  %v2497_v60 = vmax.f32 %v2479_v25, 0.0  ;;  %v3469_v8 = vld [vmem:[%s7252_s30 + $0x60] sm:$0xff]  ;;  %v6027_v56 = vcombine.low %v3472_v3, %v3474_v51  ;;  %v6912_v14 = vld [vmem:[%s7264_s0 + $0x2e8] sm:$0xff]  }
 0xefe   : > { %v6022_v16 = vcombine.high %v3467_v33, %v3469_v8  ;;  %v6021_v57 = vcombine.low %v3467_v33, %v3469_v8  ;;  %v6931_v25 = vld [vmem:[%s7264_s0 + $0x240] sm:$0xff]  }
 0xeff   : > { %v2509_v38 = vpack.c.bf16 %v2501_v44, %v2497_v60  ;;  %v6933_v3 = vld [vmem:[%s7264_s0 + $0x200] sm:$0xff]   ;;  %v7923_v44 = vld [vmem:[%s7252_s30 + $0x1f0] sm:$0xff] }
 0xf00   : > { %6356 = vmatpush3.bf16.msra.mxu1 %v6901_v19  ;;  %6384 = vmatpush3.bf16.msra.mxu0 %v6902_v53  ;;  %v6904_v19 = vld [vmem:[%s7264_s0 + $0x2f8] sm:$0xff]   ;;  %v6934_v51 = vld [vmem:[%s7264_s0 + $0x280] sm:$0xff]  }
 0xf01   : > { %3593 = vmatprep.subr.bf16.mxu1 %v6034_v5  ;;  %3646 = vmatprep.subr.bf16.mxu0 %v6036_v40  ;;  %v6905_v53 = vld [vmem:[%s7264_s0 + $0x238] sm:$0xff]   ;;  %v6907_v5 = vld [vmem:[%s7264_s0 + $0x270] sm:$0xff]  }
 0xf02   : > { %v6908_v40 = vld [vmem:[%s7264_s0 + $0x2f0] sm:$0xff]  }
 0xf03   : > { %3402 = vmatmul.mubr.bf16.vlgmr.msra.gmra.mxu1 %v2503_v21  ;;  %3451 = vmatmul.mubr.bf16.vlgmr.msra.gmra.mxu0 %v2505_v46  ;;  %v6918_v21 = vld [vmem:[%s7264_s0 + $0x2a0] sm:$0xff]   ;;  %v6922_v46 = vld [vmem:[%s7264_s0 + $0x298] sm:$0xff]  }
 0xf04   : > { %3409 = vmatprep.mubr.bf16.mxu1 %v2508_v61  ;;  %3458 = vmatprep.mubr.bf16.mxu0 %v2510_v32  ;;  %v6925_v61 = vld [vmem:[%s7264_s0 + $0x210] sm:$0xff]  }
 0xf05   : > { %3594 = vmatpush1.bf16.msra.mxu1 %v6033_v55  ;;  %3647 = vmatpush1.bf16.msra.mxu0 %v6035_v37  ;;  %v6914_v55 = vld [vmem:[%s7264_s0 + $0x2a8] sm:$0xff]   ;;  %v6921_v37 = vld [vmem:[%s7264_s0 + $0x218] sm:$0xff]   ;;  %v6926_v32 = vld [vmem:[%s7264_s0 + $0x290] sm:$0xff]  }
 0xf06   : > { %3595 = vmatprep.subr.bf16.mxu1 %v6030_v59  ;;  %3648 = vmatprep.subr.bf16.mxu0 %v6032_v62  ;;  %v6927_v59 = vld [vmem:[%s7264_s0 + $0x248] sm:$0xff]  }
 0xf07   : > { %v6928_v62 = vld [vmem:[%s7264_s0 + $0x2c8] sm:$0xff]  }
 0xf09   : > { %3596 = vmatpush1.bf16.msra.mxu1 %v6029_v63  ;;  %3649 = vmatpush1.bf16.msra.mxu0 %v6031_v58  ;;  %v7926_v63 = vld [vmem:[%s7252_s30 + $0x1b8] sm:$0xff]  ;;  %v6086_v58 = vcombine.high %v7920_v47, %v7923_v44 }
 0xf0a   : > { %3597 = vmatprep.subr.bf16.mxu1 %v6026_v45  ;;  %3650 = vmatprep.subr.bf16.mxu0 %v6028_v39  ;;  %v7931_v45 = vld [vmem:[%s7252_s30 + $0x1f8] sm:$0xff]  ;;  %v6085_v39 = vcombine.low %v7920_v47, %v7923_v44 }
 0xf0b   : > { %3410 = vmatmul.mubr.bf16.gmra.mxu1 %v2507_v42  ;;  %3459 = vmatmul.mubr.bf16.gmra.mxu0 %v2509_v38  ;;  %v6087_v33 = vcombine.low %v7926_v63, %v7931_v45  ;;  %v6088_v0 = vcombine.high %v7926_v63, %v7931_v45  ;;  %v4074_v44 = vld [vmem:[%s7252_s30 + $0x38] sm:$0xff] }
 0xf0c   : > { %3617 = vmatprep.mubr.bf16.mxu1 %v7087_v6  ;;  %3670 = vmatprep.mubr.bf16.mxu0 %v7087_v6 }
 0xf0d   : > { %3598 = vmatpush1.bf16.msra.mxu1 %v6025_v2  ;;  %3651 = vmatpush1.bf16.msra.mxu0 %v6027_v56 }
 0xf0e   : > { %3599 = vmatprep.subr.bf16.mxu1 %v6022_v16  ;;  %3652 = vmatprep.subr.bf16.mxu0 %v6024_v7 }
 0xf11   : > { %3600 = vmatpush1.bf16.msra.mxu1 %v6021_v57  ;;  %3653 = vmatpush1.bf16.msra.mxu0 %v6023_v41 }
 0xf12   : > { %6397 = vmatprep.subr.bf16.mxu1 %v6903_v1  ;;  %6425 = vmatprep.subr.bf16.mxu0 %v6904_v19 }
 0xf14   : > { %6037 = vmatmul.mubr.msk.bf16.vlgmr.msra.gmra.mxu1 %vm866_vm1, %v7676_v29  ;;  %6039 = vmatmul.mubr.msk.bf16.vlgmr.msra.gmra.mxu0 %vm866_vm1, %v7676_v29 }
 0xf15   : > { %3627 = vmatprep.mubr.bf16.mxu1 %v7087_v6  ;;  %3680 = vmatprep.mubr.bf16.mxu0 %v7087_v6 }
 0xf16   : > { %6398 = vmatpush3.bf16.msra.mxu1 %v6905_v53  ;;  %6426 = vmatpush3.bf16.msra.mxu0 %v6906_v43 }
 0xf17   : > { %6399 = vmatprep.subr.bf16.mxu1 %v6907_v5  ;;  %6427 = vmatprep.subr.bf16.mxu0 %v6908_v40 }
 0xf1a   : > { %6400 = vmatpush3.bf16.msra.mxu1 %v6909_v10  ;;  %6428 = vmatpush3.bf16.msra.mxu0 %v6910_v13 }
 0xf1b   : > { %6401 = vmatprep.subr.bf16.mxu1 %v6911_v12  ;;  %6429 = vmatprep.subr.bf16.mxu0 %v6912_v14 }
 0xf1c   : > { %6038 = vmatmul.mubr.msk.bf16.gmra.mxu1 %vm866_vm1, %v7698_v34  ;;  %6040 = vmatmul.mubr.msk.bf16.gmra.mxu0 %vm866_vm1, %v7698_v34 }
 0xf1e   : > { %6402 = vmatpush3.bf16.msra.mxu1 %v6913_v50  ;;  %6430 = vmatpush3.bf16.msra.mxu0 %v6914_v55 }
 0xf1f   : > { %6403 = vmatprep.subr.bf16.mxu1 %v6915_v4  ;;  %6431 = vmatprep.subr.bf16.mxu0 %v6916_v35 }
 0xf22   : > { %6404 = vmatpush3.bf16.msra.mxu1 %v6917_v36  ;;  %6432 = vmatpush3.bf16.msra.mxu0 %v6918_v21 }
 0xf23   : > { %6405 = vmatprep.subr.bf16.mxu1 %v6919_v15  ;;  %6433 = vmatprep.subr.bf16.mxu0 %v6920_v17 }
 0xf26   : > { %6406 = vmatpush3.bf16.msra.mxu1 %v6921_v37  ;;  %6434 = vmatpush3.bf16.msra.mxu0 %v6922_v46 }
 0xf27   : > { %6407 = vmatprep.subr.bf16.mxu1 %v6923_v18  ;;  %6435 = vmatprep.subr.bf16.mxu0 %v6924_v24 }
 0xf2a   : > { %6408 = vmatpush3.bf16.msra.mxu1 %v6925_v61  ;;  %6436 = vmatpush3.bf16.msra.mxu0 %v6926_v32 }
 0xf2b   : > { %6409 = vmatprep.subr.bf16.mxu1 %v6927_v59  ;;  %6437 = vmatprep.subr.bf16.mxu0 %v6928_v62 }
 0xf2e   : > { %6410 = vmatpush3.bf16.msra.mxu1 %v6929_v9  ;;  %6438 = vmatpush3.bf16.msra.mxu0 %v6930_v11 }
 0xf2f   : > { %6411 = vmatprep.subr.bf16.mxu1 %v6931_v25  ;;  %6439 = vmatprep.subr.bf16.mxu0 %v6932_v26 }
 0xf32   : > { %6412 = vmatpush3.bf16.msra.mxu1 %v6933_v3  ;;  %6440 = vmatpush3.bf16.msra.mxu0 %v6934_v51 }
 0xf33   : > { %4199 = vmatprep.subr.bf16.mxu1 %v6086_v58  ;;  %4252 = vmatprep.subr.bf16.mxu0 %v6088_v0 }
 0xfa3   : > { %v6301_v60 = vpop.f32.mrf.mxu1  ;;  %v6329_v8 = vpop.f32.mrf.mxu0 }
 0xfa5   : > { %v6302_v30 = vpop.f32.mrf.mxu1  ;;  %v6330_v31 = vpop.f32.mrf.mxu0 }
 0xfa6   : > { %v6303_v2 = vadd.f32 %v6302_v30, %v6301_v60  ;;  %v6331_v42 = vadd.f32 %v6330_v31, %v6329_v8 }
 0xfa7   : > { %v6304_v38 = vpop.f32.mrf.mxu1  ;;  %v6332_v56 = vpop.f32.mrf.mxu0 }
 0xfa8   : > { %v3163_v16 = vadd.f32 %v6331_v42, %v6303_v2 }
 0xfa9   : > { %v6305_v7 = vpop.f32.mrf.mxu1  ;;  %v6333_v57 = vpop.f32.mrf.mxu0 }
 0xfaa   : > { %v6306_v41 = vadd.f32 %v6305_v7, %v6304_v38  ;;  %v6334_v1 = vadd.f32 %v6333_v57, %v6332_v56 }
 0xfab   : > { %v6307_v19 = vpop.f32.mrf.mxu1  ;;  %v6335_v53 = vpop.f32.mrf.mxu0 }
 0xfac   : > { %v3166_v43 = vadd.f32 %v6334_v1, %v6306_v41  ;;  %v3483_v1 = vld [vmem:[%s7258_s16 + $0x8] sm:$0xf] }
 0xfad   : > { %v6308_v5 = vpop.f32.mrf.mxu1  ;;  %v6336_v40 = vpop.f32.mrf.mxu0 }
 0xfae   : > { %v6309_v10 = vadd.f32 %v6308_v5, %v6307_v19  ;;  %v6337_v13 = vadd.f32 %v6336_v40, %v6335_v53  ;;  %v3500_v40 = vrot.slane %v3483_v1, %v7781_v54 }
 0xfaf   : > { %v6310_v12 = vpop.f32.mrf.mxu1  ;;  %v6338_v14 = vpop.f32.mrf.mxu0 }
 0xfb0   : > { %v3171_v50 = vadd.f32 %v6337_v13, %v6309_v10  ;;  %v3488_v13 = vrot.slane %v3483_v1, %v7336_v23 }
 0xfb1   : > { %v6311_v55 = vpop.f32.mrf.mxu1  ;;  %v6339_v4 = vpop.f32.mrf.mxu0 }
 0xfb2   : > { %v6312_v35 = vadd.f32 %v6311_v55, %v6310_v12  ;;  %v6340_v36 = vadd.f32 %v6339_v4, %v6338_v14  ;;  %v3496_v12 = vrot.slane %v3483_v1, %v7785_v48 }
 0xfb4   : > { %v3174_v21 = vadd.f32 %v6340_v36, %v6312_v35 }
 0xfc3   : > { %v6357_v15 = vpop.f32.mrf.mxu1  ;;  %v6385_v17 = vpop.f32.mrf.mxu0 }
 0xfc5   : > { %v6358_v37 = vpop.f32.mrf.mxu1  ;;  %v6386_v46 = vpop.f32.mrf.mxu0 }
 0xfc6   : > { %v6359_v18 = vadd.f32 %v6358_v37, %v6357_v15  ;;  %v6387_v24 = vadd.f32 %v6386_v46, %v6385_v17 }
 0xfc7   : > { %v6360_v61 = vpop.f32.mrf.mxu1  ;;  %v6388_v32 = vpop.f32.mrf.mxu0 }
 0xfc8   : > { %v3404_v59 = vadd.f32 %v6359_v18, %v3163_v16 }
 0xfc9   : > { %v6361_v62 = vpop.f32.mrf.mxu1  ;;  %v6389_v9 = vpop.f32.mrf.mxu0 }
 0xfca   : > { %v7939_v11 = vadd.f32 %v6387_v24, %v3404_v59  ;;  %v6362_v25 = vadd.f32 %v6361_v62, %v6360_v61  ;;  %v6390_v26 = vadd.f32 %v6389_v9, %v6388_v32 }
 0xfcb   : > { %v6363_v3 = vpop.f32.mrf.mxu1  ;;  %v6391_v51 = vpop.f32.mrf.mxu0 }
 0xfcc   : > { %v3407_v58 = vadd.f32 %v6362_v25, %v3166_v43  ;;  %v3492_v43 = vrot.slane %v3483_v1, %v7333_v22  ;;  %v4081_v25 = vld [vmem:[%s7252_s30 + $0x130] sm:$0xff] }
 0xfcd   : > { %v6364_v0 = vpop.f32.mrf.mxu1  ;;  %v6392_v60 = vpop.f32.mrf.mxu0 }
 0xfce   : > { %v7941_v8 = vadd.f32 %v6390_v26, %v3407_v58  ;;  %v6365_v30 = vadd.f32 %v6364_v0, %v6363_v3  ;;  %v6393_v31 = vadd.f32 %v6392_v60, %v6391_v51  ;;  %v4083_v26 = vld [vmem:[%s7252_s30 + $0x170] sm:$0xff]  ;;  %v4082_v60 = vld [vmem:[%s7252_s30 + $0x138] sm:$0xff] }
 0xfcf   : > { %v6366_v2 = vpop.f32.mrf.mxu1  ;;  %v6394_v42 = vpop.f32.mrf.mxu0 }
 0xfd0   : > { %v3412_v38 = vadd.f32 %v6365_v30, %v3171_v50  ;;  %v4084_v30 = vld [vmem:[%s7252_s30 + $0x178] sm:$0xff] }
 0xfd1   : > { %v6367_v56 = vpop.f32.mrf.mxu1  ;;  %v6395_v16 = vpop.f32.mrf.mxu0 }
 0xfd2   : > { %v7943_v7 = vadd.f32 %v6393_v31, %v3412_v38  ;;  %v6368_v57 = vadd.f32 %v6367_v56, %v6366_v2  ;;  %v6396_v41 = vadd.f32 %v6395_v16, %v6394_v42 }
 0xfd4   : > { %v3415_v19 = vadd.f32 %v6368_v57, %v3174_v21  ;;  %v3619_v53 = vpop.f32.mrf.mxu1  ;;  %v3672_v5 = vpop.f32.mrf.mxu0  ;;  %v6082_v57 = vcombine.high %v4081_v25, %v4083_v26 }
 0xfd5   : > { %v3620_v17 = vadd.f32 %v3619_v53, %v3488_v13  ;;  %v3673_v37 = vadd.f32 %v3672_v5, %v3496_v12 }
 0xfd6   : > { %v7948_v10 = vadd.f32 %v6396_v41, %v3415_v19  ;;  %v3621_v14 = vpop.f32.mrf.mxu1  ;;  %v3674_v50 = vpop.f32.mrf.mxu0 }
 0xfd7   : > { %v3622_v35 = vadd.f32 %v3621_v14, %v3492_v43  ;;  %v3675_v36 = vadd.f32 %v3674_v50, %v3500_v40  ;;  %v3691_v31 = vmax.f32 %v3620_v17, 0.0  ;;  %v3693_v2 = vmax.f32 %v3673_v37, 0.0  ;;  %v4077_v50 = vld [vmem:[%s7252_s30 + $0xb0] sm:$0xff] }
 0xfd8   : > { %v3623_v55 = vpop.f32.mrf.mxu1  ;;  %v3676_v4 = vpop.f32.mrf.mxu0  ;;  %v6084_v14 = vcombine.high %v4082_v60, %v4084_v30 }
 0xfd9   : > { %v3624_v21 = vadd.f32 %v3623_v55, %v3488_v13  ;;  %v3677_v15 = vadd.f32 %v3676_v4, %v3496_v12  ;;  %v3692_v3 = vmax.f32 %v3622_v35, 0.0  ;;  %v3694_v51 = vmax.f32 %v3675_v36, 0.0  ;;  %v4079_v36 = vld [vmem:[%s7252_s30 + $0xf0] sm:$0xff] }
 0xfda   : > { %v3625_v46 = vpop.f32.mrf.mxu1  ;;  %v3678_v18 = vpop.f32.mrf.mxu0  ;;  %v6077_v63 = vcombine.low %v4077_v50, %v4079_v36 }
 0xfdb   : > { %v3626_v24 = vadd.f32 %v3625_v46, %v3492_v43  ;;  %v3679_v61 = vadd.f32 %v3678_v18, %v3500_v40  ;;  %v3695_v32 = vmax.f32 %v3624_v21, 0.0  ;;  %v3697_v59 = vmax.f32 %v3677_v15, 0.0  ;;  %v4078_v21 = vld [vmem:[%s7252_s30 + $0xb8] sm:$0xff] }
 0xfdc   : > { %v3629_v62 = vpop.f32.mrf.mxu1  ;;  %v3682_v9 = vpop.f32.mrf.mxu0  ;;  %v4080_v15 = vld [vmem:[%s7252_s30 + $0xf8] sm:$0xff] }
 0xfdd   : > { %v3696_v58 = vmax.f32 %v3626_v24, 0.0  ;;  %v3698_v0 = vmax.f32 %v3679_v61, 0.0  ;;  %v3707_v41 = vpack.c.bf16 %v3695_v32, %v3691_v31  ;;  %v3709_v1 = vpack.c.bf16 %v3697_v59, %v3693_v2 }
 0xfde   : > { %v3631_v42 = vpop.f32.mrf.mxu1  ;;  %v3684_v38 = vpop.f32.mrf.mxu0  ;;  %v3630_v17 = vadd.f32 %v3629_v62, %v3488_v13  ;;  %v3683_v37 = vadd.f32 %v3682_v9, %v3496_v12  ;;  %v6081_v24 = vcombine.low %v4081_v25, %v4083_v26  ;;  %v6078_v62 = vcombine.high %v4077_v50, %v4079_v36  ;;  %v4073_v25 = vld [vmem:[%s7252_s30 + $0x30] sm:$0xff]  ;;  %v6946_v50 = vld [vmem:[%s7264_s0 + $0x3a8] sm:$0xff]   ;;  %v6951_v36 = vld [vmem:[%s7264_s0 + $0x358] sm:$0xff]  }
 0xfdf   : > { %v3708_v56 = vpack.c.bf16 %v3696_v58, %v3692_v3  ;;  %v3710_v16 = vpack.c.bf16 %v3698_v0, %v3694_v51  ;;  %v3632_v19 = vadd.f32 %v3631_v42, %v3492_v43  ;;  %v3685_v55 = vadd.f32 %v3684_v38, %v3500_v40 }
 0xfe0   : > { %v3633_v53 = vpop.f32.mrf.mxu1  ;;  %v3686_v5 = vpop.f32.mrf.mxu0  ;;  %v6080_v9 = vcombine.high %v4078_v21, %v4080_v15  ;;  %v3699_v51 = vmax.f32 %v3630_v17, 0.0  ;;  %v3701_v58 = vmax.f32 %v3683_v37, 0.0  ;;  %v6079_v45 = vcombine.low %v4078_v21, %v4080_v15  ;;  %v6952_v21 = vld [vmem:[%s7264_s0 + $0x3d8] sm:$0xff]   ;;  %v6955_v37 = vld [vmem:[%s7264_s0 + $0x350] sm:$0xff]  }
 0xfe1   : > { %v3634_v4 = vadd.f32 %v3633_v53, %v3488_v13  ;;  %v3687_v35 = vadd.f32 %v3686_v5, %v3496_v12  ;;  %4003 = vmatprep.mubr.bf16.mxu1 %v3708_v56  ;;  %4052 = vmatprep.mubr.bf16.mxu0 %v3710_v16  ;;  %v6083_v13 = vcombine.low %v4082_v60, %v4084_v30  ;;  %v3702_v26 = vmax.f32 %v3685_v55, 0.0  ;;  %v6935_v56 = vld [vmem:[%s7264_s0 + $0x378] sm:$0xff]   ;;  %v6942_v53 = vld [vmem:[%s7264_s0 + $0x3b0] sm:$0xff]   ;;  %v6944_v5 = vld [vmem:[%s7264_s0 + $0x3e8] sm:$0xff]  }
 0xfe2   : > { %v3635_v46 = vpop.f32.mrf.mxu1  ;;  %v3688_v18 = vpop.f32.mrf.mxu0  ;;  %4004 = vmatmul.mubr.bf16.vlgmr.msra.gmra.mxu1 %v3707_v41  ;;  %4053 = vmatmul.mubr.bf16.vlgmr.msra.gmra.mxu0 %v3709_v1  ;;  %v6936_v16 = vld [vmem:[%s7264_s0 + $0x3f8] sm:$0xff]   ;;  %v6939_v1 = vld [vmem:[%s7264_s0 + $0x370] sm:$0xff]   ;;  %v6948_v55 = vld [vmem:[%s7264_s0 + $0x3e0] sm:$0xff]  }
 0xfe3   : > { %v3636_v61 = vadd.f32 %v3635_v46, %v3492_v43  ;;  %v3689_v32 = vadd.f32 %v3688_v18, %v3500_v40  ;;  %4200 = vmatpush1.bf16.msra.mxu1 %v6085_v39  ;;  %4253 = vmatpush1.bf16.msra.mxu0 %v6087_v33  ;;  %v3703_v12 = vmax.f32 %v3634_v4, 0.0  ;;  %v3705_v59 = vmax.f32 %v3687_v35, 0.0  ;;  %v4075_v43 = vld [vmem:[%s7252_s30 + $0x70] sm:$0xff]  ;;  %v4076_v39 = vld [vmem:[%s7252_s30 + $0x78] sm:$0xff]  ;;  %v6949_v4 = vld [vmem:[%s7264_s0 + $0x320] sm:$0xff]  }
 0xfe4   : > { %4201 = vmatprep.subr.bf16.mxu1 %v6082_v57  ;;  %4254 = vmatprep.subr.bf16.mxu0 %v6084_v14  ;;  %v3700_v40 = vmax.f32 %v3632_v19, 0.0  ;;  %v6074_v60 = vcombine.high %v4073_v25, %v4075_v43  ;;  %v6076_v2 = vcombine.high %v4074_v44, %v4076_v39  ;;  %v6073_v42 = vcombine.low %v4073_v25, %v4075_v43  ;;  %v6937_v57 = vld [vmem:[%s7264_s0 + $0x338] sm:$0xff]   ;;  %v6940_v19 = vld [vmem:[%s7264_s0 + $0x3f0] sm:$0xff]   ;;  %v6945_v14 = vld [vmem:[%s7264_s0 + $0x328] sm:$0xff]  }
 0xfe5   : > { %v3704_v3 = vmax.f32 %v3636_v61, 0.0  ;;  %v3706_v47 = vmax.f32 %v3689_v32, 0.0  ;;  %v3711_v30 = vpack.c.bf16 %v3703_v12, %v3699_v51  ;;  %v3713_v31 = vpack.c.bf16 %v3705_v59, %v3701_v58  ;;  %v6938_v41 = vld [vmem:[%s7264_s0 + $0x3b8] sm:$0xff]   ;;  %v6950_v35 = vld [vmem:[%s7264_s0 + $0x3a0] sm:$0xff]   ;;  %v6956_v46 = vld [vmem:[%s7264_s0 + $0x3d0] sm:$0xff]  }
 0xfe6   : > { %v6075_v38 = vcombine.low %v4074_v44, %v4076_v39  ;;  %v6953_v15 = vld [vmem:[%s7264_s0 + $0x318] sm:$0xff]   ;;  %v6957_v18 = vld [vmem:[%s7264_s0 + $0x310] sm:$0xff]   ;;  %v6959_v61 = vld [vmem:[%s7264_s0 + $0x348] sm:$0xff]  }
 0xfe7   : > { %v3712_v33 = vpack.c.bf16 %v3704_v3, %v3700_v40  ;;  %v3714_v0 = vpack.c.bf16 %v3706_v47, %v3702_v26  ;;  %4202 = vmatpush1.bf16.msra.mxu1 %v6081_v24  ;;  %4255 = vmatpush1.bf16.msra.mxu0 %v6083_v13  ;;  %v6954_v17 = vld [vmem:[%s7264_s0 + $0x398] sm:$0xff]   ;;  %v6958_v24 = vld [vmem:[%s7264_s0 + $0x390] sm:$0xff]   ;;  %v6960_v32 = vld [vmem:[%s7264_s0 + $0x3c8] sm:$0xff]  }
 0xfe8   : > { %4203 = vmatprep.subr.bf16.mxu1 %v6078_v62  ;;  %4256 = vmatprep.subr.bf16.mxu0 %v6080_v9  ;;  %v6961_v13 = vld [vmem:[%s7264_s0 + $0x308] sm:$0xff]   ;;  %v6963_v59 = vld [vmem:[%s7264_s0 + $0x340] sm:$0xff]  }
 0xfe9   : > { %4011 = vmatprep.mubr.bf16.mxu1 %v3712_v33  ;;  %4060 = vmatprep.mubr.bf16.mxu0 %v3714_v0  ;;  %v6962_v12 = vld [vmem:[%s7264_s0 + $0x388] sm:$0xff]   ;;  %v6964_v62 = vld [vmem:[%s7264_s0 + $0x3c0] sm:$0xff]  }
 0xfea   : > { %4012 = vmatmul.mubr.bf16.gmra.mxu1 %v3711_v30  ;;  %4061 = vmatmul.mubr.bf16.gmra.mxu0 %v3713_v31  ;;  %v6965_v9 = vld [vmem:[%s7264_s0 + $0x300] sm:$0xff]  }
 0xfeb   : > { %4204 = vmatpush1.bf16.msra.mxu1 %v6077_v63  ;;  %4257 = vmatpush1.bf16.msra.mxu0 %v6079_v45  ;;  %v6966_v25 = vld [vmem:[%s7264_s0 + $0x380] sm:$0xff]  }
 0xfec   : > { %4205 = vmatprep.subr.bf16.mxu1 %v6074_v60  ;;  %4258 = vmatprep.subr.bf16.mxu0 %v6076_v2 }
 0xfed   : > { %4223 = vmatprep.mubr.bf16.mxu1 %v7087_v6  ;;  %4276 = vmatprep.mubr.bf16.mxu0 %v7087_v6 }
 0xfef   : > { %4206 = vmatpush1.bf16.msra.mxu1 %v6073_v42  ;;  %4259 = vmatpush1.bf16.msra.mxu0 %v6075_v38 }
 0xff0   : > { %6453 = vmatprep.subr.bf16.mxu1 %v6935_v56  ;;  %6481 = vmatprep.subr.bf16.mxu0 %v6936_v16 }
 0xff2   : > { %6089 = vmatmul.mubr.msk.bf16.vlgmr.msra.gmra.mxu1 %vm866_vm1, %v7676_v29  ;;  %6091 = vmatmul.mubr.msk.bf16.vlgmr.msra.gmra.mxu0 %vm866_vm1, %v7676_v29  ;;  %v6941_v29 = vld [vmem:[%s7264_s0 + $0x330] sm:$0xff]  }
 0xff3   : > { %4233 = vmatprep.mubr.bf16.mxu1 %v7087_v6  ;;  %4286 = vmatprep.mubr.bf16.mxu0 %v7087_v6  ;;  %v6943_v6 = vld [vmem:[%s7264_s0 + $0x368] sm:$0xff]  }
 0xff4   : > { %6454 = vmatpush3.bf16.msra.mxu1 %v6937_v57  ;;  %6482 = vmatpush3.bf16.msra.mxu0 %v6938_v41 }
 0xff5   : > { %6455 = vmatprep.subr.bf16.mxu1 %v6939_v1  ;;  %6483 = vmatprep.subr.bf16.mxu0 %v6940_v19 }
 0xff8   : > { %6456 = vmatpush3.bf16.msra.mxu1 %v6941_v29  ;;  %6484 = vmatpush3.bf16.msra.mxu0 %v6942_v53 }
 0xff9   : > { %6457 = vmatprep.subr.bf16.mxu1 %v6943_v6  ;;  %6485 = vmatprep.subr.bf16.mxu0 %v6944_v5 }
 0xffa   : > { %6090 = vmatmul.mubr.msk.bf16.gmra.mxu1 %vm866_vm1, %v7698_v34  ;;  %6092 = vmatmul.mubr.msk.bf16.gmra.mxu0 %vm866_vm1, %v7698_v34  ;;  %v6947_v34 = vld [vmem:[%s7264_s0 + $0x360] sm:$0xff]  }
 0xffc   : > { %6458 = vmatpush3.bf16.msra.mxu1 %v6945_v14  ;;  %6486 = vmatpush3.bf16.msra.mxu0 %v6946_v50  ;;  %v4089_v14 = vld [vmem:[%s7258_s16 + $0xc] sm:$0xf] }
 0xffd   : > { %6459 = vmatprep.subr.bf16.mxu1 %v6947_v34  ;;  %6487 = vmatprep.subr.bf16.mxu0 %v6948_v55 }
0x1000   : > { %6460 = vmatpush3.bf16.msra.mxu1 %v6949_v4  ;;  %6488 = vmatpush3.bf16.msra.mxu0 %v6950_v35  ;;  %v4098_v4 = vrot.slane %v4089_v14, %v7333_v22  ;;  %v4094_v35 = vrot.slane %v4089_v14, %v7336_v23 }
0x1001   : > { %6461 = vmatprep.subr.bf16.mxu1 %v6951_v36  ;;  %6489 = vmatprep.subr.bf16.mxu0 %v6952_v21  ;;  %v4102_v36 = vrot.slane %v4089_v14, %v7785_v48 }
0x1004   : > { %6462 = vmatpush3.bf16.msra.mxu1 %v6953_v15  ;;  %6490 = vmatpush3.bf16.msra.mxu0 %v6954_v17 }
0x1005   : > { %6463 = vmatprep.subr.bf16.mxu1 %v6955_v37  ;;  %6491 = vmatprep.subr.bf16.mxu0 %v6956_v46 }
0x1008   : > { %6464 = vmatpush3.bf16.msra.mxu1 %v6957_v18  ;;  %6492 = vmatpush3.bf16.msra.mxu0 %v6958_v24 }
0x1009   : > { %6465 = vmatprep.subr.bf16.mxu1 %v6959_v61  ;;  %6493 = vmatprep.subr.bf16.mxu0 %v6960_v32 }
0x100c   : > { %6466 = vmatpush3.bf16.msra.mxu1 %v6961_v13  ;;  %6494 = vmatpush3.bf16.msra.mxu0 %v6962_v12 }
0x100d   : > { %6467 = vmatprep.subr.bf16.mxu1 %v6963_v59  ;;  %6495 = vmatprep.subr.bf16.mxu0 %v6964_v62 }
0x1010   : > { %6468 = vmatpush3.bf16.msra.mxu1 %v6965_v9  ;;  %6496 = vmatpush3.bf16.msra.mxu0 %v6966_v25 }
0x10a2   : > { %v6413_v43 = vpop.f32.mrf.mxu1  ;;  %v6441_v40 = vpop.f32.mrf.mxu0 }
0x10a4   : > { %v6414_v26 = vpop.f32.mrf.mxu1  ;;  %v6442_v3 = vpop.f32.mrf.mxu0 }
0x10a5   : > { %v6415_v47 = vadd.f32 %v6414_v26, %v6413_v43  ;;  %v6443_v44 = vadd.f32 %v6442_v3, %v6441_v40 }
0x10a6   : > { %v6416_v39 = vpop.f32.mrf.mxu1  ;;  %v6444_v51 = vpop.f32.mrf.mxu0 }
0x10a7   : > { %v4055_v58 = vadd.f32 %v6443_v44, %v6415_v47 }
0x10a8   : > { %v6417_v63 = vpop.f32.mrf.mxu1  ;;  %v6445_v45 = vpop.f32.mrf.mxu0 }
0x10a9   : > { %v8015_v33 = vadd.f32 %v4055_v58, %v7939_v11  ;;  %v6418_v0 = vadd.f32 %v6417_v63, %v6416_v39  ;;  %v6446_v60 = vadd.f32 %v6445_v45, %v6444_v51 }
0x10aa   : > { %v6419_v30 = vpop.f32.mrf.mxu1  ;;  %v6447_v31 = vpop.f32.mrf.mxu0 }
0x10ab   : > { %v4058_v2 = vadd.f32 %v6446_v60, %v6418_v0 }
0x10ac   : > { %v6420_v42 = vpop.f32.mrf.mxu1  ;;  %v6448_v38 = vpop.f32.mrf.mxu0 }
0x10ad   : > { %v8018_v56 = vadd.f32 %v4058_v2, %v7941_v8  ;;  %v6421_v16 = vadd.f32 %v6420_v42, %v6419_v30  ;;  %v6449_v57 = vadd.f32 %v6448_v38, %v6447_v31  ;;  %v4106_v8 = vrot.slane %v4089_v14, %v7781_v54 }
0x10ae   : > { %v6422_v41 = vpop.f32.mrf.mxu1  ;;  %v6450_v1 = vpop.f32.mrf.mxu0 }
0x10af   : > { %v4063_v19 = vadd.f32 %v6449_v57, %v6421_v16 }
0x10b0   : > { %v6423_v29 = vpop.f32.mrf.mxu1  ;;  %v6451_v53 = vpop.f32.mrf.mxu0 }
0x10b1   : > { %v8021_v11 = vadd.f32 %v4063_v19, %v7943_v7  ;;  %v6424_v6 = vadd.f32 %v6423_v29, %v6422_v41  ;;  %v6452_v5 = vadd.f32 %v6451_v53, %v6450_v1 }
0x10b2   : > { %v4225_v50 = vpop.f32.mrf.mxu1  ;;  %v4278_v34 = vpop.f32.mrf.mxu0 }
0x10b3   : > { %v4066_v55 = vadd.f32 %v6452_v5, %v6424_v6  ;;  %v4226_v32 = vadd.f32 %v4225_v50, %v4094_v35  ;;  %v4279_v13 = vadd.f32 %v4278_v34, %v4102_v36 }
0x10b4   : > { %v4227_v21 = vpop.f32.mrf.mxu1  ;;  %v4280_v15 = vpop.f32.mrf.mxu0 }
0x10b5   : > { %v8029_v17 = vadd.f32 %v4066_v55, %v7948_v10  ;;  %v4228_v46 = vadd.f32 %v4227_v21, %v4098_v4  ;;  %v4281_v18 = vadd.f32 %v4280_v15, %v4106_v8  ;;  %v4297_v39 = vmax.f32 %v4226_v32, 0.0 }
0x10b6   : > { %v4229_v7 = vpop.f32.mrf.mxu1  ;;  %v4282_v37 = vpop.f32.mrf.mxu0  ;;  %v4299_v51 = vmax.f32 %v4279_v13, 0.0 }
0x10b7   : > { %v4230_v24 = vadd.f32 %v4229_v7, %v4094_v35  ;;  %v4283_v61 = vadd.f32 %v4282_v37, %v4102_v36  ;;  %v4298_v3 = vmax.f32 %v4228_v46, 0.0  ;;  %v4300_v47 = vmax.f32 %v4281_v18, 0.0 }
0x10b8   : > { %v4231_v12 = vpop.f32.mrf.mxu1  ;;  %v4284_v59 = vpop.f32.mrf.mxu0 }
0x10b9   : > { %v4232_v62 = vadd.f32 %v4231_v12, %v4098_v4  ;;  %v4285_v9 = vadd.f32 %v4284_v59, %v4106_v8  ;;  %v4301_v25 = vmax.f32 %v4230_v24, 0.0  ;;  %v4303_v43 = vmax.f32 %v4283_v61, 0.0 }
0x10ba   : > { %v4235_v40 = vpop.f32.mrf.mxu1  ;;  %v4288_v26 = vpop.f32.mrf.mxu0 }
0x10bb   : > { %v4302_v10 = vmax.f32 %v4232_v62, 0.0  ;;  %v4304_v44 = vmax.f32 %v4285_v9, 0.0  ;;  %v4313_v60 = vpack.c.bf16 %v4301_v25, %v4297_v39  ;;  %v4315_v30 = vpack.c.bf16 %v4303_v43, %v4299_v51  ;;  %v6125_v25 = vld [vmem:[%s779_s26] ss:$0 sm:$0xff] }
0x10bc   : > { %v4237_v58 = vpop.f32.mrf.mxu1  ;;  %v4290_v63 = vpop.f32.mrf.mxu0  ;;  %v4236_v41 = vadd.f32 %v4235_v40, %v4094_v35  ;;  %v4289_v1 = vadd.f32 %v4288_v26, %v4102_v36 }
0x10bd   : > { %v4314_v45 = vpack.c.bf16 %v4302_v10, %v4298_v3  ;;  %v4316_v0 = vpack.c.bf16 %v4304_v44, %v4300_v47  ;;  %v4238_v31 = vadd.f32 %v4237_v58, %v4098_v4  ;;  %v4291_v38 = vadd.f32 %v4290_v63, %v4106_v8 }
0x10be   : > { %v4239_v2 = vpop.f32.mrf.mxu1  ;;  %v4292_v42 = vpop.f32.mrf.mxu0  ;;  %v4305_v15 = vmax.f32 %v4236_v41, 0.0  ;;  %v4307_v7 = vmax.f32 %v4289_v1, 0.0 }
0x10bf   : > { %v4240_v16 = vadd.f32 %v4239_v2, %v4094_v35  ;;  %v4293_v57 = vadd.f32 %v4292_v42, %v4102_v36  ;;  %4609 = vmatprep.mubr.bf16.mxu1 %v4314_v45  ;;  %4658 = vmatprep.mubr.bf16.mxu0 %v4316_v0  ;;  %v4306_v50 = vmax.f32 %v4238_v31, 0.0  ;;  %v4308_v34 = vmax.f32 %v4291_v38, 0.0 }
0x10c0   : > { %v4241_v19 = vpop.f32.mrf.mxu1  ;;  %v4294_v29 = vpop.f32.mrf.mxu0  ;;  %4610 = vmatmul.mubr.bf16.vlgmr.msra.gmra.mxu1 %v4313_v60  ;;  %4659 = vmatmul.mubr.bf16.vlgmr.msra.gmra.mxu0 %v4315_v30 }
0x10c1   : > { %v4242_v53 = vadd.f32 %v4241_v19, %v4098_v4  ;;  %v4295_v6 = vadd.f32 %v4294_v29, %v4106_v8  ;;  %v4309_v5 = vmax.f32 %v4240_v16, 0.0  ;;  %v4311_v14 = vmax.f32 %v4293_v57, 0.0 }
0x10c3   : > { %v4310_v55 = vmax.f32 %v4242_v53, 0.0  ;;  %v4312_v21 = vmax.f32 %v4295_v6, 0.0  ;;  %v4317_v18 = vpack.c.bf16 %v4309_v5, %v4305_v15  ;;  %v4319_v24 = vpack.c.bf16 %v4311_v14, %v4307_v7 }
0x10c5   : > { %v4318_v37 = vpack.c.bf16 %v4310_v55, %v4306_v50  ;;  %v4320_v46 = vpack.c.bf16 %v4312_v21, %v4308_v34 }
0x10c7   : > { %4617 = vmatprep.mubr.bf16.mxu1 %v4318_v37  ;;  %4666 = vmatprep.mubr.bf16.mxu0 %v4320_v46 }
0x10c8   : > { %4618 = vmatmul.mubr.bf16.gmra.mxu1 %v4317_v18  ;;  %4667 = vmatmul.mubr.bf16.gmra.mxu0 %v4319_v24 }
0x1180   : > { %v6469_v35 = vpop.f32.mrf.mxu1  ;;  %v6497_v4 = vpop.f32.mrf.mxu0 }
0x1182   : > { %v6470_v8 = vpop.f32.mrf.mxu1  ;;  %v6498_v36 = vpop.f32.mrf.mxu0 }
0x1183   : > { %v6471_v61 = vadd.f32 %v6470_v8, %v6469_v35  ;;  %v6499_v32 = vadd.f32 %v6498_v36, %v6497_v4 }
0x1184   : > { %v6472_v13 = vpop.f32.mrf.mxu1  ;;  %v6500_v12 = vpop.f32.mrf.mxu0 }
0x1185   : > { %v4661_v59 = vadd.f32 %v6499_v32, %v6471_v61 }
0x1186   : > { %v6473_v62 = vpop.f32.mrf.mxu1  ;;  %v6501_v9 = vpop.f32.mrf.mxu0 }
0x1187   : > { %v4675_v43 = vadd.f32 %v4661_v59, %v8015_v33  ;;  %v6474_v40 = vadd.f32 %v6473_v62, %v6472_v13  ;;  %v6502_v26 = vadd.f32 %v6501_v9, %v6500_v12 }
0x1188   : > { %v6475_v3 = vpop.f32.mrf.mxu1  ;;  %v6503_v47 = vpop.f32.mrf.mxu0 }
0x1189   : > { %v4664_v10 = vadd.f32 %v6502_v26, %v6474_v40  ;;  %v4686_v44 = vadd.f32 %v6125_v25, %v4675_v43 }
0x118a   : > { %v6476_v39 = vpop.f32.mrf.mxu1  ;;  %v6504_v51 = vpop.f32.mrf.mxu0 }
0x118b   : > { %v4676_v58 = vadd.f32 %v4664_v10, %v8018_v56  ;;  %v6477_v63 = vadd.f32 %v6476_v39, %v6475_v3  ;;  %v6505_v45 = vadd.f32 %v6504_v51, %v6503_v47  ;;  %v4690_v0 = vadd.f32 %v4686_v44, %v7669_v27  ;;  %v6126_v39 = vld [vmem:[%s8852_s3] ss:$0 sm:$0xff] }
0x118c   : > { %v6478_v60 = vpop.f32.mrf.mxu1  ;;  %v6506_v30 = vpop.f32.mrf.mxu0 }
0x118d   : > { %v4669_v31 = vadd.f32 %v6505_v45, %v6477_v63  ;;  %v4696_v2 = vsel %vm866_vm1, %v4690_v0, 0.0  ;;  %v4687_v33 = vadd.f32 %v6125_v25, %v4676_v58  ;;  %v6127_v58 = vld [vmem:[%s8853_s24] ss:$0 sm:$0xff] }
0x118e   : > { %v6479_v42 = vpop.f32.mrf.mxu1  ;;  %v6507_v38 = vpop.f32.mrf.mxu0  ;;  %4697 = vadd.xlane.f32.xlu1 %v4696_v2 }
0x118f   : > { %v4677_v16 = vadd.f32 %v4669_v31, %v8021_v11  ;;  %v6480_v57 = vadd.f32 %v6479_v42, %v6478_v60  ;;  %v6508_v41 = vadd.f32 %v6507_v38, %v6506_v30  ;;  %v4691_v1 = vadd.f32 %v4687_v33, %v7672_v28 }
0x1191   : > { %v4672_v56 = vadd.f32 %v6508_v41, %v6480_v57  ;;  %v4699_v19 = vsel %vm866_vm1, %v4691_v1, 0.0  ;;  %v4688_v29 = vadd.f32 %v6125_v25, %v4677_v16 }
0x1192   : > { %4700 = vadd.xlane.f32.xlu0 %v4699_v19 }
0x1193   : > { %v4678_v27 = vadd.f32 %v4672_v56, %v8029_v17  ;;  %v4692_v53 = vadd.f32 %v4688_v29, %v7694_v52 }
0x1195   : > { %v4702_v6 = vsel %vm866_vm1, %v4692_v53, 0.0  ;;  %v4689_v5 = vadd.f32 %v6125_v25, %v4678_v27 }
0x1196   : > { %4703 = vadd.xlane.f32.xlu1 %v4702_v6 }
0x1197   : > { %v4693_v14 = vadd.f32 %v4689_v5, %v7686_v49 }
0x1199   : > { %v4705_v11 = vsel %vm866_vm1, %v4693_v14, 0.0 }
0x119a   : > { %4706 = vadd.xlane.f32.xlu0 %v4705_v11 }
0x1217   : > { %v4698_v50 = vpop.xlane.xlu1 %4697 }
0x1218   : > { %v4708_v28 = vmul.f32 0.015625, %v4698_v50 }
0x121a   : > { %v4712_v34 = vsub.f32 %v4690_v0, %v4708_v28 }
0x121b   : > { %v4701_v55 = vpop.xlane.xlu0 %4700 }
0x121c   : > { %v4709_v21 = vmul.f32 0.015625, %v4701_v55  ;;  %v4716_v15 = vmul.f32 %v4712_v34, %v4712_v34 }
0x121e   : > { %v4713_v7 = vsub.f32 %v4691_v1, %v4709_v21  ;;  %v4720_v17 = vsel %vm866_vm1, %v4716_v15, 0.0 }
0x121f   : > { %4721 = vadd.xlane.f32.xlu1 %v4720_v17  ;;  %v4704_v52 = vpop.xlane.xlu1 %4703 }
0x1220   : > { %v4710_v37 = vmul.f32 0.015625, %v4704_v52  ;;  %v4717_v46 = vmul.f32 %v4713_v7, %v4713_v7 }
0x1222   : > { %v4714_v18 = vsub.f32 %v4692_v53, %v4710_v37  ;;  %v4723_v24 = vsel %vm866_vm1, %v4717_v46, 0.0 }
0x1223   : > { %4724 = vadd.xlane.f32.xlu0 %v4723_v24  ;;  %v4707_v49 = vpop.xlane.xlu0 %4706 }
0x1224   : > { %v4711_v35 = vmul.f32 0.015625, %v4707_v49  ;;  %v4718_v4 = vmul.f32 %v4714_v18, %v4714_v18 }
0x1226   : > { %v4715_v8 = vsub.f32 %v4693_v14, %v4711_v35  ;;  %v4726_v36 = vsel %vm866_vm1, %v4718_v4, 0.0 }
0x1227   : > { %4727 = vadd.xlane.f32.xlu1 %v4726_v36 }
0x1228   : > { %v4719_v61 = vmul.f32 %v4715_v8, %v4715_v8 }
0x122a   : > { %v4729_v32 = vsel %vm866_vm1, %v4719_v61, 0.0 }
0x122b   : > { %4730 = vadd.xlane.f32.xlu0 %v4729_v32 }
0x12a8   : > { %v4722_v13 = vpop.xlane.xlu1 %4721 }
0x12a9   : > { %v4732_v12 = vmul.f32 0.015625, %v4722_v13 }
0x12ab   : > { %v4736_v59 = vadd.f32 1e-05, %v4732_v12 }
0x12ac   : > { %v4725_v62 = vpop.xlane.xlu0 %4724 }
0x12ad   : > { %7039 = vrsqrt.f32 %v4736_v59  ;;  %v4733_v9 = vmul.f32 0.015625, %v4725_v62 }
0x12af   : > { %v4737_v25 = vadd.f32 1e-05, %v4733_v9 }
0x12b0   : > { %v4728_v43 = vpop.xlane.xlu1 %4727 }
0x12b1   : > { %7041 = vrsqrt.f32 %v4737_v25  ;;  %v4734_v40 = vmul.f32 0.015625, %v4728_v43 }
0x12b3   : > { %v4738_v26 = vadd.f32 1e-05, %v4734_v40 }
0x12b4   : > { %v4731_v3 = vpop.xlane.xlu0 %4730 }
0x12b5   : > { %7043 = vrsqrt.f32 %v4738_v26  ;;  %v4735_v47 = vmul.f32 0.015625, %v4731_v3 }
0x12b7   : > { %v4739_v10 = vadd.f32 1e-05, %v4735_v47 }
0x12b9   : > { %7045 = vrsqrt.f32 %v4739_v10 }
0x12ba   : > { %v7040_v44 = vpop.eup %7039 }
0x12bb   : > { %v4744_v51 = vmul.f32 %v7040_v44, %v4712_v34 }
0x12bd   : > { %v4754_v63 = vmul.f32 %v6126_v39, %v4744_v51 }
0x12be   : > { %v7042_v45 = vpop.eup %7041 }
0x12bf   : > { %v8062_v0 = vadd.f32 %v6127_v58, %v4754_v63  ;;  %v4745_v60 = vmul.f32 %v7042_v45, %v4713_v7 }
0x12c1   : > { %4768 = vst.msk [vmem:[%s8806_s17] sm:$0xff] %vm866_vm1, %v8062_v0  ;;  %v4755_v30 = vmul.f32 %v6126_v39, %v4745_v60 }
0x12c2   : > { %v7044_v31 = vpop.eup %7043 }
0x12c3   : > { %v8069_v2 = vadd.f32 %v6127_v58, %v4755_v30  ;;  %v4746_v33 = vmul.f32 %v7044_v31, %v4714_v18 }
0x12c5   : > { %4769 = vst.msk [vmem:[%s8806_s17 + $0x8] sm:$0xff] %vm866_vm1, %v8069_v2  ;;  %v4756_v42 = vmul.f32 %v6126_v39, %v4746_v33 }
0x12c6   : > { %v7046_v38 = vpop.eup %7045 }
0x12c7   : > { %v8076_v16 = vadd.f32 %v6127_v58, %v4756_v42  ;;  %v4747_v57 = vmul.f32 %v7046_v38, %v4715_v8 }
0x12c9   : > { %4770 = vst.msk [vmem:[%s8806_s17 + $0x10] sm:$0xff] %vm866_vm1, %v8076_v16  ;;  %v4757_v41 = vmul.f32 %v6126_v39, %v4747_v57  ;;  %4775 = sbr.rel (%p6128_p5) target bundleno = 5899 (0x170b), region = 96 }
0x12cb   : > { %v8083_v1 = vadd.f32 %v6127_v58, %v4757_v41 }
0x12cd   : > { %4771 = vst.msk [vmem:[%s8806_s17 + $0x18] sm:$0xff] %vm866_vm1, %v8083_v1 }
0x12ce   : > { %s8854_s30 = sld [smem:[#allocation20_spill]]  ;;  %6541 = vmatprep.mubr.msk.f32.mxu0 %vm866_vm1, %v8062_v0  ;;  %6581 = vmatprep.mubr.msk.f32.mxu1 %vm866_vm1, %v8062_v0 }
0x12cf   : > { %s8863_s23 = sld [smem:[#allocation21_spill]] }
0x12d0   : > { %s8869_s18 = sld [smem:[#allocation24_spill]] }
0x12d1   : > { %s8870_s28 = sld [smem:[#allocation23_spill]] }
0x12d2   : > { %s8871_s2 = sld [smem:[#allocation22_spill]] }
0x12d4   : > { %v8094_v56 = vld [vmem:[%s8854_s30 + $0xf8] sm:$0xff]  ;;  %v8122_v53 = vld [vmem:[%s8854_s30 + $0xf0] sm:$0xff]  ;;  %v8150_v11 = vld [vmem:[%s8854_s30 + $0xe8] sm:$0xff] }
0x12d5   : > { %v8099_v19 = vld [vmem:[%s8854_s30 + $0x78] sm:$0xff]  ;;  %6509 = vmatprep.subr.msk.mxu0 %vm866_vm1, %v8094_v56  ;;  %v8131_v6 = vld [vmem:[%s8854_s30 + $0x1f0] sm:$0xff]  ;;  %v8155_v50 = vld [vmem:[%s8854_s30 + $0x1e8] sm:$0xff] }
0x12d6   : > { %v8104_v29 = vld [vmem:[%s8854_s30 + $0x1f8] sm:$0xff]  ;;  %6510 = vmatpush3.xpose.msk.msra.mxu0 %vm866_vm1, %v8099_v19  ;;  %v8138_v5 = vld [vmem:[%s8854_s30 + $0x70] sm:$0xff]  ;;  %v8166_v28 = vld [vmem:[%s8854_s30 + $0x68] sm:$0xff] }
0x12d7   : > { %6549 = vmatprep.subr.msk.mxu1 %vm866_vm1, %v8104_v29  ;;  %v8117_v27 = vld [vmem:[%s8854_s30 + $0x178] sm:$0xff]  ;;  %6511 = vmatprep.subr.msk.mxu0 %vm866_vm1, %v8122_v53  ;;  %v8145_v14 = vld [vmem:[%s8854_s30 + $0x170] sm:$0xff]  ;;  %v8173_v34 = vld [vmem:[%s8854_s30 + $0x168] sm:$0xff] }
0x12d8   : > { %6550 = vmatpush3.xpose.msk.msra.mxu1 %vm866_vm1, %v8117_v27  ;;  %v8178_v55 = vld [vmem:[%s8854_s30 + $0xe0] sm:$0xff]  ;;  %v8206_v17 = vld [vmem:[%s8854_s30 + $0xd8] sm:$0xff]  ;;  %v8234_v18 = vld [vmem:[%s8854_s30 + $0xd0] sm:$0xff] }
0x12d9   : > { %6551 = vmatprep.subr.msk.mxu1 %vm866_vm1, %v8131_v6  ;;  %v8183_v21 = vld [vmem:[%s8854_s30 + $0x1e0] sm:$0xff]  ;;  %v8211_v52 = vld [vmem:[%s8854_s30 + $0x1d8] sm:$0xff]  ;;  %v8239_v24 = vld [vmem:[%s8854_s30 + $0x1d0] sm:$0xff] }
0x12da   : > { %6512 = vmatpush3.xpose.msk.msra.mxu0 %vm866_vm1, %v8138_v5  ;;  %v8194_v15 = vld [vmem:[%s8854_s30 + $0x60] sm:$0xff]  ;;  %v8222_v37 = vld [vmem:[%s8854_s30 + $0x58] sm:$0xff]  ;;  %v8250_v49 = vld [vmem:[%s8854_s30 + $0x50] sm:$0xff] }
0x12db   : > { %6513 = vmatprep.subr.msk.mxu0 %vm866_vm1, %v8150_v11  ;;  %v8201_v7 = vld [vmem:[%s8854_s30 + $0x160] sm:$0xff]  ;;  %v8229_v46 = vld [vmem:[%s8854_s30 + $0x158] sm:$0xff]  ;;  %v8257_v35 = vld [vmem:[%s8854_s30 + $0x150] sm:$0xff] }
0x12dc   : > { %6552 = vmatpush3.xpose.msk.msra.mxu1 %vm866_vm1, %v8145_v14  ;;  %v8262_v4 = vld [vmem:[%s8854_s30 + $0xc8] sm:$0xff]  ;;  %v8290_v32 = vld [vmem:[%s8854_s30 + $0xc0] sm:$0xff]  ;;  %v8318_v62 = vld [vmem:[%s8854_s30 + $0xb8] sm:$0xff] }
0x12dd   : > { %6553 = vmatprep.subr.msk.mxu1 %vm866_vm1, %v8155_v50  ;;  %v8267_v8 = vld [vmem:[%s8854_s30 + $0x1c8] sm:$0xff]  ;;  %v8295_v13 = vld [vmem:[%s8854_s30 + $0x1c0] sm:$0xff]  ;;  %v8323_v9 = vld [vmem:[%s8854_s30 + $0x1b8] sm:$0xff] }
0x12de   : > { %6514 = vmatpush3.xpose.msk.msra.mxu0 %vm866_vm1, %v8166_v28  ;;  %v8278_v36 = vld [vmem:[%s8854_s30 + $0x48] sm:$0xff]  ;;  %v8306_v12 = vld [vmem:[%s8854_s30 + $0x40] sm:$0xff]  ;;  %v8334_v25 = vld [vmem:[%s8854_s30 + $0x38] sm:$0xff] }
0x12df   : > { %6515 = vmatprep.subr.msk.mxu0 %vm866_vm1, %v8178_v55  ;;  %v8285_v61 = vld [vmem:[%s8854_s30 + $0x148] sm:$0xff]  ;;  %v8313_v59 = vld [vmem:[%s8854_s30 + $0x140] sm:$0xff]  ;;  %v8341_v43 = vld [vmem:[%s8854_s30 + $0x138] sm:$0xff] }
0x12e0   : > { %6554 = vmatpush3.xpose.msk.msra.mxu1 %vm866_vm1, %v8173_v34  ;;  %v8346_v40 = vld [vmem:[%s8854_s30 + $0xb0] sm:$0xff]  ;;  %v8374_v10 = vld [vmem:[%s8854_s30 + $0xa8] sm:$0xff]  ;;  %v8402_v58 = vld [vmem:[%s8854_s30 + $0xa0] sm:$0xff] }
0x12e1   : > { %6555 = vmatprep.subr.msk.mxu1 %vm866_vm1, %v8183_v21  ;;  %v8351_v26 = vld [vmem:[%s8854_s30 + $0x1b0] sm:$0xff]  ;;  %v8379_v44 = vld [vmem:[%s8854_s30 + $0x1a8] sm:$0xff]  ;;  %v8407_v63 = vld [vmem:[%s8854_s30 + $0x1a0] sm:$0xff] }
0x12e2   : > { %6516 = vmatpush3.xpose.msk.msra.mxu0 %vm866_vm1, %v8194_v15  ;;  %v8362_v3 = vld [vmem:[%s8854_s30 + $0x30] sm:$0xff]  ;;  %v8390_v39 = vld [vmem:[%s8854_s30 + $0x28] sm:$0xff]  ;;  %v8418_v45 = vld [vmem:[%s8854_s30 + $0x20] sm:$0xff] }
0x12e3   : > { %6517 = vmatprep.subr.msk.mxu0 %vm866_vm1, %v8206_v17  ;;  %v8369_v47 = vld [vmem:[%s8854_s30 + $0x130] sm:$0xff]  ;;  %v8397_v51 = vld [vmem:[%s8854_s30 + $0x128] sm:$0xff]  ;;  %v8425_v60 = vld [vmem:[%s8854_s30 + $0x120] sm:$0xff] }
0x12e4   : > { %6556 = vmatpush3.xpose.msk.msra.mxu1 %vm866_vm1, %v8201_v7  ;;  %v8430_v30 = vld [vmem:[%s8854_s30 + $0x98] sm:$0xff]  ;;  %v8458_v38 = vld [vmem:[%s8854_s30 + $0x90] sm:$0xff]  ;;  %v8486_v54 = vld [vmem:[%s8854_s30 + $0x88] sm:$0xff] }
0x12e5   : > { %6557 = vmatprep.subr.msk.mxu1 %vm866_vm1, %v8211_v52  ;;  %v8435_v31 = vld [vmem:[%s8854_s30 + $0x198] sm:$0xff]  ;;  %v8463_v57 = vld [vmem:[%s8854_s30 + $0x190] sm:$0xff]  ;;  %8857 = vst [vmem:[#allocation13_spill] sm:$0xff] %v8486_v54  ;;  %v8491_v48 = vld [vmem:[%s8854_s30 + $0x188] sm:$0xff] }
0x12e6   : > { %6518 = vmatpush3.xpose.msk.msra.mxu0 %vm866_vm1, %v8222_v37  ;;  %v8446_v33 = vld [vmem:[%s8854_s30 + $0x18] sm:$0xff]  ;;  %v8474_v41 = vld [vmem:[%s8854_s30 + $0x10] sm:$0xff]  ;;  %8858 = vst [vmem:[#allocation14_spill] sm:$0xff] %v8491_v48  ;;  %v8502_v23 = vld [vmem:[%s8854_s30 + $0x8] sm:$0xff] }
0x12e7   : > { %6519 = vmatprep.subr.msk.mxu0 %vm866_vm1, %v8234_v18  ;;  %v8453_v42 = vld [vmem:[%s8854_s30 + $0x118] sm:$0xff]  ;;  %8855 = vst [vmem:[#allocation11_spill] sm:$0xff] %v8474_v41  ;;  %v8481_v20 = vld [vmem:[%s8854_s30 + $0x110] sm:$0xff]  ;;  %v8509_v22 = vld [vmem:[%s8854_s30 + $0x108] sm:$0xff] }
0x12e8   : > { %6558 = vmatpush3.xpose.msk.msra.mxu1 %vm866_vm1, %v8229_v46  ;;  %8856 = vst [vmem:[#allocation12_spill] sm:$0xff] %v8481_v20 }
0x12e9   : > { %6559 = vmatprep.subr.msk.mxu1 %vm866_vm1, %v8239_v24 }
0x12ea   : > { %6520 = vmatpush3.xpose.msk.msra.mxu0 %vm866_vm1, %v8250_v49 }
0x12eb   : > { %6521 = vmatprep.subr.msk.mxu0 %vm866_vm1, %v8262_v4 }
0x12ec   : > { %6560 = vmatpush3.xpose.msk.msra.mxu1 %vm866_vm1, %v8257_v35 }
0x12ed   : > { %6561 = vmatprep.subr.msk.mxu1 %vm866_vm1, %v8267_v8 }
0x12ee   : > { %6522 = vmatpush3.xpose.msk.msra.mxu0 %vm866_vm1, %v8278_v36 }
0x12ef   : > { %6523 = vmatprep.subr.msk.mxu0 %vm866_vm1, %v8290_v32 }
0x12f0   : > { %6562 = vmatpush3.xpose.msk.msra.mxu1 %vm866_vm1, %v8285_v61 }
0x12f1   : > { %6563 = vmatprep.subr.msk.mxu1 %vm866_vm1, %v8295_v13 }
0x12f2   : > { %6524 = vmatpush3.xpose.msk.msra.mxu0 %vm866_vm1, %v8306_v12 }
0x12f3   : > { %6525 = vmatprep.subr.msk.mxu0 %vm866_vm1, %v8318_v62 }
0x12f4   : > { %6564 = vmatpush3.xpose.msk.msra.mxu1 %vm866_vm1, %v8313_v59 }
0x12f5   : > { %6565 = vmatprep.subr.msk.mxu1 %vm866_vm1, %v8323_v9 }
0x12f6   : > { %6526 = vmatpush3.xpose.msk.msra.mxu0 %vm866_vm1, %v8334_v25 }
0x12f7   : > { %6527 = vmatprep.subr.msk.mxu0 %vm866_vm1, %v8346_v40 }
0x12f8   : > { %6566 = vmatpush3.xpose.msk.msra.mxu1 %vm866_vm1, %v8341_v43 }
0x12f9   : > { %6567 = vmatprep.subr.msk.mxu1 %vm866_vm1, %v8351_v26 }
0x12fa   : > { %6528 = vmatpush3.xpose.msk.msra.mxu0 %vm866_vm1, %v8362_v3 }
0x12fb   : > { %6529 = vmatprep.subr.msk.mxu0 %vm866_vm1, %v8374_v10 }
0x12fc   : > { %6568 = vmatpush3.xpose.msk.msra.mxu1 %vm866_vm1, %v8369_v47 }
0x12fd   : > { %6569 = vmatprep.subr.msk.mxu1 %vm866_vm1, %v8379_v44 }
0x12fe   : > { %6530 = vmatpush3.xpose.msk.msra.mxu0 %vm866_vm1, %v8390_v39 }
0x12ff   : > { %6531 = vmatprep.subr.msk.mxu0 %vm866_vm1, %v8402_v58 }
0x1300   : > { %6570 = vmatpush3.xpose.msk.msra.mxu1 %vm866_vm1, %v8397_v51 }
0x1301   : > { %6571 = vmatprep.subr.msk.mxu1 %vm866_vm1, %v8407_v63 }
0x1302   : > { %6532 = vmatpush3.xpose.msk.msra.mxu0 %vm866_vm1, %v8418_v45 }
0x1303   : > { %6533 = vmatprep.subr.msk.mxu0 %vm866_vm1, %v8430_v30 }
0x1304   : > { %6572 = vmatpush3.xpose.msk.msra.mxu1 %vm866_vm1, %v8425_v60 }
0x1305   : > { %6573 = vmatprep.subr.msk.mxu1 %vm866_vm1, %v8435_v31 }
0x1306   : > { %6534 = vmatpush3.xpose.msk.msra.mxu0 %vm866_vm1, %v8446_v33 }
0x1307   : > { %6535 = vmatprep.subr.msk.mxu0 %vm866_vm1, %v8458_v38 }
0x1308   : > { %6574 = vmatpush3.xpose.msk.msra.mxu1 %vm866_vm1, %v8453_v42 }
0x1309   : > { %6575 = vmatprep.subr.msk.mxu1 %vm866_vm1, %v8463_v57 }
0x130a   : > { %6536 = vmatpush3.xpose.msk.msra.mxu0 %vm866_vm1, %v8474_v41  ;;  %v8537_v41 = vld [vmem:[%s8854_s30 + $0x100] sm:$0xff] }
0x130b   : > { %6537 = vmatprep.subr.msk.mxu0 %vm866_vm1, %v8486_v54  ;;  %v8519_v54 = vld [vmem:[%s8854_s30 + $0x180] sm:$0xff] }
0x130c   : > { %6576 = vmatpush3.xpose.msk.msra.mxu1 %vm866_vm1, %v8481_v20  ;;  %v8514_v20 = vld [vmem:[%s8854_s30 + $0x80] sm:$0xff] }
0x130d   : > { %6577 = vmatprep.subr.msk.mxu1 %vm866_vm1, %v8491_v48  ;;  %v8530_v48 = vld [vmem:[%s8854_s30] sm:$0xff] }
0x130e   : > { %6538 = vmatpush3.xpose.msk.msra.mxu0 %vm866_vm1, %v8502_v23 }
0x130f   : > { %6539 = vmatprep.subr.msk.mxu0 %vm866_vm1, %v8514_v20 }
0x1310   : > { %6578 = vmatpush3.xpose.msk.msra.mxu1 %vm866_vm1, %v8509_v22 }
0x1311   : > { %6579 = vmatprep.subr.msk.mxu1 %vm866_vm1, %v8519_v54 }
0x1312   : > { %6540 = vmatpush3.xpose.msk.msra.mxu0 %vm866_vm1, %v8530_v48 }
0x1313   : > { %6589 = vmatprep.subr.mxu0 %v8094_v56  ;;  %v8859_v56 = vld [vmem:[#allocation11_spill] sm:$0xff] }
0x1314   : > { %6580 = vmatpush3.xpose.msk.msra.mxu1 %vm866_vm1, %v8537_v41 }
0x1315   : > { %6633 = vmatprep.subr.mxu1 %v8104_v29  ;;  %6542 = vmatmul.mubr.msk.f32.vlgmr.msra.gmra.mxu0 %vm866_vm1, %v8062_v0  ;;  %v8861_v29 = vld [vmem:[#allocation13_spill] sm:$0xff] }
0x1316   : > { %6543 = vmatprep.mubr.msk.f32.mxu0 %vm866_vm1, %v8069_v2  ;;  %6590 = vmatpush3.msra.mxu0 %v8099_v19  ;;  %v8860_v19 = vld [vmem:[#allocation12_spill] sm:$0xff] }
0x1317   : > { %6582 = vmatmul.mubr.msk.f32.vlgmr.msra.gmra.mxu1 %vm866_vm1, %v8062_v0  ;;  %6591 = vmatprep.subr.mxu0 %v8122_v53  ;;  %v4840_v53 = vld [vmem:[%s8863_s23] sm:$0xf] }
0x1318   : > { %6583 = vmatprep.mubr.msk.f32.mxu1 %vm866_vm1, %v8069_v2  ;;  %6634 = vmatpush3.msra.mxu1 %v8117_v27  ;;  %v8862_v27 = vld [vmem:[#allocation14_spill] sm:$0xff] }
0x1319   : > { %6635 = vmatprep.subr.mxu1 %v8131_v6  ;;  %6544 = vmatmul.mubr.msk.f32.gmra.mxu0 %vm866_vm1, %v8069_v2 }
0x131a   : > { %6545 = vmatprep.mubr.msk.f32.mxu0 %vm866_vm1, %v8076_v16  ;;  %6592 = vmatpush3.msra.mxu0 %v8138_v5 }
0x131b   : > { %6584 = vmatmul.mubr.msk.f32.gmra.mxu1 %vm866_vm1, %v8069_v2  ;;  %6593 = vmatprep.subr.mxu0 %v8150_v11 }
0x131c   : > { %6585 = vmatprep.mubr.msk.f32.mxu1 %vm866_vm1, %v8076_v16  ;;  %6636 = vmatpush3.msra.mxu1 %v8145_v14  ;;  %v8864_v14 = vld [vmem:[#allocation7_spill] sm:$0xff] }
0x131d   : > { %6637 = vmatprep.subr.mxu1 %v8155_v50  ;;  %6546 = vmatmul.mubr.msk.f32.gmra.mxu0 %vm866_vm1, %v8076_v16  ;;  %v5247_v11 = vrot.slane %v4840_v53, %v8864_v14 }
0x131e   : > { %6547 = vmatprep.mubr.msk.f32.mxu0 %vm866_vm1, %v8083_v1  ;;  %6594 = vmatpush3.msra.mxu0 %v8166_v28 }
0x131f   : > { %6586 = vmatmul.mubr.msk.f32.gmra.mxu1 %vm866_vm1, %v8076_v16  ;;  %6595 = vmatprep.subr.mxu0 %v8178_v55 }
0x1320   : > { %6587 = vmatprep.mubr.msk.f32.mxu1 %vm866_vm1, %v8083_v1  ;;  %6638 = vmatpush3.msra.mxu1 %v8173_v34 }
0x1321   : > { %6639 = vmatprep.subr.mxu1 %v8183_v21  ;;  %6548 = vmatmul.mubr.msk.f32.gmra.mxu0 %vm866_vm1, %v8083_v1 }
0x1322   : > { %6596 = vmatpush3.msra.mxu0 %v8194_v15  ;;  %6640 = vmatpush3.msra.mxu1 %v8201_v7  ;;  %v8867_v7 = vld [vmem:[#allocation9_spill] sm:$0xff] }
0x1323   : > { %6588 = vmatmul.mubr.msk.f32.gmra.mxu1 %vm866_vm1, %v8083_v1  ;;  %6597 = vmatprep.subr.mxu0 %v8206_v17  ;;  %v5255_v17 = vrot.slane %v4840_v53, %v8867_v7 }
0x1324   : > { %6641 = vmatprep.subr.mxu1 %v8211_v52  ;;  %6598 = vmatpush3.msra.mxu0 %v8222_v37 }
0x1325   : > { %6642 = vmatpush3.msra.mxu1 %v8229_v46  ;;  %6599 = vmatprep.subr.mxu0 %v8234_v18 }
0x1326   : > { %6643 = vmatprep.subr.mxu1 %v8239_v24  ;;  %6600 = vmatpush3.msra.mxu0 %v8250_v49 }
0x1327   : > { %6644 = vmatpush3.msra.mxu1 %v8257_v35  ;;  %6601 = vmatprep.subr.mxu0 %v8262_v4 }
0x1328   : > { %6645 = vmatprep.subr.mxu1 %v8267_v8  ;;  %6602 = vmatpush3.msra.mxu0 %v8278_v36 }
0x1329   : > { %6646 = vmatpush3.msra.mxu1 %v8285_v61  ;;  %6603 = vmatprep.subr.mxu0 %v8290_v32 }
0x132a   : > { %6647 = vmatprep.subr.mxu1 %v8295_v13  ;;  %6604 = vmatpush3.msra.mxu0 %v8306_v12 }
0x132b   : > { %6648 = vmatpush3.msra.mxu1 %v8313_v59  ;;  %6605 = vmatprep.subr.mxu0 %v8318_v62 }
0x132c   : > { %6649 = vmatprep.subr.mxu1 %v8323_v9  ;;  %6606 = vmatpush3.msra.mxu0 %v8334_v25 }
0x132d   : > { %6650 = vmatpush3.msra.mxu1 %v8341_v43  ;;  %6607 = vmatprep.subr.mxu0 %v8346_v40 }
0x132e   : > { %6651 = vmatprep.subr.mxu1 %v8351_v26  ;;  %6608 = vmatpush3.msra.mxu0 %v8362_v3 }
0x132f   : > { %6652 = vmatpush3.msra.mxu1 %v8369_v47  ;;  %6609 = vmatprep.subr.mxu0 %v8374_v10 }
0x1330   : > { %6653 = vmatprep.subr.mxu1 %v8379_v44  ;;  %6610 = vmatpush3.msra.mxu0 %v8390_v39 }
0x1331   : > { %6654 = vmatpush3.msra.mxu1 %v8397_v51  ;;  %6611 = vmatprep.subr.mxu0 %v8402_v58 }
0x1332   : > { %6655 = vmatprep.subr.mxu1 %v8407_v63  ;;  %6612 = vmatpush3.msra.mxu0 %v8418_v45 }
0x1333   : > { %6656 = vmatpush3.msra.mxu1 %v8425_v60  ;;  %6613 = vmatprep.subr.mxu0 %v8430_v30 }
0x1334   : > { %6657 = vmatprep.subr.mxu1 %v8435_v31  ;;  %6614 = vmatpush3.msra.mxu0 %v8446_v33 }
0x1335   : > { %6658 = vmatpush3.msra.mxu1 %v8453_v42  ;;  %6615 = vmatprep.subr.mxu0 %v8458_v38 }
0x1336   : > { %6659 = vmatprep.subr.mxu1 %v8463_v57  ;;  %6616 = vmatpush3.msra.mxu0 %v8859_v56 }
0x1337   : > { %6660 = vmatpush3.msra.mxu1 %v8860_v19  ;;  %6617 = vmatprep.subr.mxu0 %v8861_v29 }
0x1338   : > { %6661 = vmatprep.subr.mxu1 %v8862_v27  ;;  %6618 = vmatpush3.msra.mxu0 %v8502_v23  ;;  %v8865_v23 = vld [vmem:[#allocation8_spill] sm:$0xff] }
0x1339   : > { %6662 = vmatpush3.msra.mxu1 %v8509_v22  ;;  %6619 = vmatprep.subr.mxu0 %v8514_v20  ;;  %v5243_v28 = vrot.slane %v4840_v53, %v8865_v23  ;;  %v8866_v20 = vld [vmem:[#allocation10_spill] sm:$0xff] }
0x133a   : > { %6663 = vmatprep.subr.mxu1 %v8519_v54  ;;  %6620 = vmatpush3.msra.mxu0 %v8530_v48  ;;  %v5251_v55 = vrot.slane %v4840_v53, %v8866_v20 }
0x133b   : > { %6664 = vmatpush3.msra.mxu1 %v8537_v41 }
0x13d5   : > { %v5111_v6 = vpop.f32.mrf.mxu0 }
0x13d6   : > { %v5223_v50 = vmul.f32 2.0, %v5111_v6 }
0x13d7   : > { %v5200_v5 = vpop.f32.mrf.mxu1  ;;  %v5113_v22 = vpop.f32.mrf.mxu0 }
0x13d8   : > { %v5225_v34 = vmul.f32 2.0, %v5200_v5  ;;  %v5224_v21 = vmul.f32 2.0, %v5113_v22  ;;  %v5260_v24 = vsub.f32 %v5243_v28, %v5223_v50 }
0x13d9   : > { %v5202_v54 = vpop.f32.mrf.mxu1  ;;  %v5117_v48 = vpop.f32.mrf.mxu0 }
0x13da   : > { %v8642_v52 = vsub.f32 %v5247_v11, %v5224_v21  ;;  %v5227_v37 = vmul.f32 2.0, %v5117_v48  ;;  %v5226_v46 = vmul.f32 2.0, %v5202_v54  ;;  %v8644_v49 = vsub.f32 %v5251_v55, %v5225_v34 }
0x13db   : > { %v5206_v15 = vpop.f32.mrf.mxu1  ;;  %v5119_v35 = vpop.f32.mrf.mxu0  ;;  %v8868_v54 = vlaneseq }
0x13dc   : > { %v5229_v18 = vmul.f32 2.0, %v5206_v15  ;;  %v5228_v8 = vmul.f32 2.0, %v5119_v35  ;;  %v5276_v32 = vmin.f32 %v5260_v24, %v8642_v52  ;;  %v5264_v13 = vsub.f32 %v5243_v28, %v5227_v37 }
0x13dd   : > { %v5208_v4 = vpop.f32.mrf.mxu1  ;;  %v5123_v36 = vpop.f32.mrf.mxu0  ;;  %v8649_v62 = vsub.f32 %v5255_v17, %v5226_v46 }
0x13de   : > { %v5265_v12 = vsub.f32 %v5247_v11, %v5228_v8  ;;  %v8647_v59 = vsub.f32 %v5251_v55, %v5229_v18  ;;  %v5231_v9 = vmul.f32 2.0, %v5123_v36  ;;  %v5230_v25 = vmul.f32 2.0, %v5208_v4 }
0x13df   : > { %v5212_v61 = vpop.f32.mrf.mxu1  ;;  %v5125_v43 = vpop.f32.mrf.mxu0  ;;  %v5277_v3 = vmin.f32 %v5276_v32, %v8644_v49 }
0x13e0   : > { %v5233_v40 = vmul.f32 2.0, %v5212_v61  ;;  %v5281_v47 = vmin.f32 %v5264_v13, %v5265_v12  ;;  %v5232_v10 = vmul.f32 2.0, %v5125_v43  ;;  %v5268_v30 = vsub.f32 %v5243_v28, %v5231_v9 }
0x13e1   : > { %v5214_v26 = vpop.f32.mrf.mxu1  ;;  %v5129_v44 = vpop.f32.mrf.mxu0  ;;  %v5278_v39 = vmin.f32 %v5277_v3, %v8649_v62  ;;  %v8654_v31 = vsub.f32 %v5255_v17, %v5230_v25 }
0x13e2   : > { %v5269_v58 = vsub.f32 %v5247_v11, %v5232_v10  ;;  %v5235_v63 = vmul.f32 2.0, %v5129_v44  ;;  %v5282_v60 = vmin.f32 %v5281_v47, %v8647_v59  ;;  %v8656_v33 = vsub.f32 %v5251_v55, %v5233_v40 }
0x13e3   : > { %v5218_v51 = vpop.f32.mrf.mxu1  ;;  %v5234_v42 = vmul.f32 2.0, %v5214_v26  ;;  %5279 = vmin.xlane.f32.xlu0 %v5278_v39  ;;  %v5131_v38 = vpop.f32.mrf.mxu0 }
0x13e4   : > { %v5237_v45 = vmul.f32 2.0, %v5218_v51  ;;  %v5236_v41 = vmul.f32 2.0, %v5131_v38  ;;  %v5283_v56 = vmin.f32 %v5282_v60, %v8654_v31  ;;  %v5286_v19 = vmin.f32 %v5268_v30, %v5269_v58 }
0x13e5   : > { %v5220_v57 = vpop.f32.mrf.mxu1  ;;  %v5272_v29 = vsub.f32 %v5243_v28, %v5235_v63  ;;  %v5271_v5 = vsub.f32 %v5255_v17, %v5234_v42  ;;  %v8667_v28 = vand.u32 127, %v8868_v54 }
0x13e6   : > { %v5273_v27 = vsub.f32 %v5247_v11, %v5236_v41  ;;  %v8659_v53 = vsub.f32 %v5251_v55, %v5237_v45  ;;  %v5238_v6 = vmul.f32 2.0, %v5220_v57  ;;  %v5287_v14 = vmin.f32 %v5286_v19, %v8656_v33 }
0x13e7   : > { %5284 = vmin.xlane.f32.xlu0 %v5283_v56  ;;  %v8670_v11 = vadd.s32 128, %v8667_v28  ;;  %v8673_v21 = vadd.s32 256, %v8667_v28  ;;  %v8680_v7 = vadd.s32 384, %v8667_v28 }
0x13e8   : > { %v5291_v50 = vmin.f32 %v5272_v29, %v5273_v27  ;;  %v5288_v23 = vmin.f32 %v5287_v14, %v5271_v5  ;;  %v8662_v22 = vsub.f32 %v5255_v17, %v5238_v6 }
0x13ea   : > { %v5292_v34 = vmin.f32 %v5291_v50, %v8659_v53  ;;  %5289 = vmin.xlane.f32.xlu1 %v5288_v23 }
0x13ec   : > { %v5293_v20 = vmin.f32 %v5292_v34, %v8662_v22 }
0x13ee   : > { %5294 = vmin.xlane.f32.xlu1 %v5293_v20 }
0x146c   : > { %v5280_v55 = vpop.xlane.xlu0 %5279 }
0x146d   : > { %vm5301_vm4 = vcmp.le.f32.partialorder %v5260_v24, %v5280_v55  ;;  %vm5302_vm5 = vcmp.le.f32.partialorder %v8642_v52, %v5280_v55  ;;  %vm5303_vm6 = vcmp.le.f32.partialorder %v8644_v49, %v5280_v55  ;;  %vm5304_vm8 = vcmp.le.f32.partialorder %v8649_v62, %v5280_v55 }
0x146e   : > { %v5317_v48 = vsel %vm5301_vm4, %v8667_v28, 512  ;;  %v5318_v15 = vsel %vm5302_vm5, %v8670_v11, 512  ;;  %v5319_v46 = vsel %vm5303_vm6, %v8673_v21, 512  ;;  %v5320_v24 = vsel %vm5304_vm8, %v8680_v7, 512 }
0x146f   : > { %vm5333_vm7 = vcmp.lt.s32.totalorder %v5317_v48, %v5318_v15 }
0x1470   : > { %v5285_v17 = vpop.xlane.xlu0 %5284  ;;  %v5334_v37 = vsel %vm5333_vm7, %v5317_v48, %v5318_v15 }
0x1471   : > { %vm5305_vm9 = vcmp.le.f32.partialorder %v5264_v13, %v5285_v17  ;;  %vm5306_vm10 = vcmp.le.f32.partialorder %v5265_v12, %v5285_v17  ;;  %vm5307_vm11 = vcmp.le.f32.partialorder %v8647_v59, %v5285_v17  ;;  %vm5335_vm12 = vcmp.lt.s32.totalorder %v5334_v37, %v5319_v46 }
0x1472   : > { %v5321_v52 = vsel %vm5305_vm9, %v8667_v28, 512  ;;  %v5322_v18 = vsel %vm5306_vm10, %v8670_v11, 512  ;;  %v5336_v49 = vsel %vm5335_vm12, %v5334_v37, %v5319_v46  ;;  %vm5308_vm15 = vcmp.le.f32.partialorder %v8654_v31, %v5285_v17 }
0x1473   : > { %vm5353_vm13 = vcmp.lt.s32.totalorder %v5321_v52, %v5322_v18  ;;  %v5290_v35 = vpop.xlane.xlu1 %5289  ;;  %vm5337_vm14 = vcmp.lt.s32.totalorder %v5336_v49, %v5320_v24  ;;  %v5323_v8 = vsel %vm5307_vm11, %v8673_v21, 512  ;;  %v5324_v59 = vsel %vm5308_vm15, %v8680_v7, 512 }
0x1474   : > { %v5354_v4 = vsel %vm5353_vm13, %v5321_v52, %v5322_v18  ;;  %vm5309_vm0 = vcmp.le.f32.partialorder %v5268_v30, %v5290_v35  ;;  %vm5310_vm2 = vcmp.le.f32.partialorder %v5269_v58, %v5290_v35  ;;  %vm5311_vm3 = vcmp.le.f32.partialorder %v8656_v33, %v5290_v35 }
0x1475   : > { %v5325_v36 = vsel %vm5309_vm0, %v8667_v28, 512  ;;  %v5326_v61 = vsel %vm5310_vm2, %v8670_v11, 512  ;;  %v5338_v32 = vsel %vm5337_vm14, %v5336_v49, %v5320_v24  ;;  %vm5312_vm4 = vcmp.le.f32.partialorder %v5271_v5, %v5290_v35 }
0x1476   : > { %vm5373_vm5 = vcmp.lt.s32.totalorder %v5325_v36, %v5326_v61  ;;  %v5340_v13 = vshra.s32 %v5338_v32, 16  ;;  %vm5355_vm6 = vcmp.lt.s32.totalorder %v5354_v4, %v5323_v8  ;;  %v5327_v25 = vsel %vm5311_vm3, %v8673_v21, 512 }
0x1477   : > { %v5295_v12 = vpop.xlane.xlu1 %5294  ;;  %v5356_v62 = vsel %vm5355_vm6, %v5354_v4, %v5323_v8  ;;  %v5374_v9 = vsel %vm5373_vm5, %v5325_v36, %v5326_v61  ;;  %v5328_v3 = vsel %vm5312_vm4, %v8680_v7, 512  ;;  %v5339_v57 = vand.u32 65535, %v5338_v32 }
0x1478   : > { %vm5313_vm7 = vcmp.le.f32.partialorder %v5272_v29, %v5295_v12  ;;  %vm5314_vm8 = vcmp.le.f32.partialorder %v5273_v27, %v5295_v12  ;;  %vm5315_vm9 = vcmp.le.f32.partialorder %v8659_v53, %v5295_v12  ;;  %v5342_v26 = vcvt.s32.f32 %v5340_v13 }
0x1479   : > { %v5329_v43 = vsel %vm5313_vm7, %v8667_v28, 512  ;;  %v5330_v40 = vsel %vm5314_vm8, %v8670_v11, 512  ;;  %vm5316_vm10 = vcmp.le.f32.partialorder %v8662_v22, %v5295_v12  ;;  %vm5357_vm12 = vcmp.lt.s32.totalorder %v5356_v62, %v5324_v59 }
0x147a   : > { %vm5393_vm11 = vcmp.lt.s32.totalorder %v5329_v43, %v5330_v40  ;;  %vm5375_vm13 = vcmp.lt.s32.totalorder %v5374_v9, %v5327_v25  ;;  %v5331_v47 = vsel %vm5315_vm9, %v8673_v21, 512  ;;  %5343 = vmin.xlane.f32.xlu0 %v5342_v26  ;;  %v5358_v10 = vsel %vm5357_vm12, %v5356_v62, %v5324_v59 }
0x147b   : > { %v5376_v44 = vsel %vm5375_vm13, %v5374_v9, %v5327_v25  ;;  %v5394_v39 = vsel %vm5393_vm11, %v5329_v43, %v5330_v40  ;;  %v5360_v51 = vshra.s32 %v5358_v10, 16  ;;  %v5332_v63 = vsel %vm5316_vm10, %v8680_v7, 512 }
0x147c   : > { %vm5377_vm14 = vcmp.lt.s32.totalorder %v5376_v44, %v5328_v3  ;;  %vm5395_vm15 = vcmp.lt.s32.totalorder %v5394_v39, %v5331_v47  ;;  %v5341_v56 = vcvt.s32.f32 %v5339_v57  ;;  %v5359_v19 = vand.u32 65535, %v5358_v10 }
0x147d   : > { %v5378_v58 = vsel %vm5377_vm14, %v5376_v44, %v5328_v3  ;;  %v5396_v45 = vsel %vm5395_vm15, %v5394_v39, %v5331_v47  ;;  %v5362_v60 = vcvt.s32.f32 %v5360_v51  ;;  %vm5635_vm6 = vcmask 7168  }
0x147e   : > { %v5380_v30 = vshra.s32 %v5378_v58, 16  ;;  %vm5397_vm0 = vcmp.lt.s32.totalorder %v5396_v45, %v5332_v63  ;;  %v5379_v27 = vand.u32 65535, %v5378_v58  ;;  %v5361_v6 = vcvt.s32.f32 %v5359_v19 }
0x147f   : > { %v5398_v31 = vsel %vm5397_vm0, %v5396_v45, %v5332_v63  ;;  %5363 = vmin.xlane.f32.xlu1 %v5362_v60  ;;  %v7097_v35 = vmov 1.0  }
0x1480   : > { %v5382_v33 = vcvt.s32.f32 %v5380_v30  ;;  %v5400_v42 = vshra.s32 %v5398_v31, 16  ;;  %v5399_v5 = vand.u32 65535, %v5398_v31  ;;  %v5381_v23 = vcvt.s32.f32 %v5379_v27 }
0x1482   : > { %5383 = vmin.xlane.f32.xlu0 %v5382_v33  ;;  %v5402_v38 = vcvt.s32.f32 %v5400_v42  ;;  %v5401_v20 = vcvt.s32.f32 %v5399_v5 }
0x1484   : > { %5403 = vmin.xlane.f32.xlu1 %v5402_v38 }
0x1503   : > { %v5344_v41 = vpop.xlane.xlu0 %5343 }
0x1504   : > { %vm5345_vm2 = vcmp.eq.f32.partialorder %v5342_v26, %v5344_v41  ;;  %v5350_v55 = vcvt.f32.s32 %v5344_v41 }
0x1505   : > { %v5346_v29 = vsel %vm5345_vm2, %v5341_v56, inf }
0x1506   : > { %5347 = vmin.xlane.f32.xlu0 %v5346_v29  ;;  %v5351_v15 = vshll.u32 %v5350_v55, 16 }
0x1508   : > { %v5364_v53 = vpop.xlane.xlu1 %5363 }
0x1509   : > { %vm5365_vm3 = vcmp.eq.f32.partialorder %v5362_v60, %v5364_v53  ;;  %v5370_v37 = vcvt.f32.s32 %v5364_v53 }
0x150a   : > { %v5366_v14 = vsel %vm5365_vm3, %v5361_v6, inf }
0x150b   : > { %v5384_v50 = vpop.xlane.xlu0 %5383  ;;  %5367 = vmin.xlane.f32.xlu1 %v5366_v14  ;;  %v5371_v24 = vshll.u32 %v5370_v37, 16 }
0x150c   : > { %vm5385_vm4 = vcmp.eq.f32.partialorder %v5382_v33, %v5384_v50  ;;  %v5390_v52 = vcvt.f32.s32 %v5384_v50 }
0x150d   : > { %v5386_v22 = vsel %vm5385_vm4, %v5381_v23, inf  ;;  %v5404_v34 = vpop.xlane.xlu1 %5403 }
0x150e   : > { %5387 = vmin.xlane.f32.xlu0 %v5386_v22  ;;  %vm5405_vm5 = vcmp.eq.f32.partialorder %v5402_v38, %v5404_v34  ;;  %v5410_v4 = vcvt.f32.s32 %v5404_v34  ;;  %v5391_v36 = vshll.u32 %v5390_v52, 16 }
0x150f   : > { %v5406_v54 = vsel %vm5405_vm5, %v5401_v20, inf }
0x1510   : > { %5407 = vmin.xlane.f32.xlu1 %v5406_v54  ;;  %v5411_v59 = vshll.u32 %v5410_v4, 16  ;;  %v5660_v54 = vld [vmem:[%s8871_s2] sm:$0xff] }
0x158f   : > { %v5348_v48 = vpop.xlane.xlu0 %5347 }
0x1590   : > { %v5349_v17 = vcvt.f32.s32 %v5348_v48 }
0x1592   : > { %v5352_v46 = vadd.s32 %v5351_v15, %v5349_v17 }
0x1594   : > { %5636 = vst.msk [vmem:[%s8869_s18] sm:$0xff] %vm5635_vm6, %v5352_v46  ;;  %v5368_v18 = vpop.xlane.xlu1 %5367  ;;  %vm5414_vm7 = vcmp.eq.s32.totalorder %v8670_v11, %v5352_v46  ;;  %vm5416_vm8 = vcmp.eq.s32.totalorder %v8680_v7, %v5352_v46  ;;  %vm5413_vm9 = vcmp.eq.s32.totalorder %v8667_v28, %v5352_v46  ;;  %vm5415_vm10 = vcmp.eq.s32.totalorder %v8673_v21, %v5352_v46 }
0x1595   : > { %v5369_v49 = vcvt.f32.s32 %v5368_v18  ;;  %6217 = vmatprep.mubr.msk.f32.mxu0 %vm5414_vm7, %v7097_v35  ;;  %6225 = vmatprep.mubr.msk.f32.mxu1 %vm5416_vm8, %v7097_v35  ;;  %v5663_v18 = vld [vmem:[%s8871_s2 + $0x18] sm:$0xff] }
0x1596   : > { %6218 = vmatmul.mubr.msk.f32.vlgmr.msra.gmra.mxu0 %vm5413_vm9, %v7097_v35  ;;  %6226 = vmatmul.mubr.msk.f32.vlgmr.msra.gmra.mxu1 %vm5415_vm10, %v7097_v35 }
0x1597   : > { %v5388_v8 = vpop.xlane.xlu0 %5387  ;;  %v5372_v61 = vadd.s32 %v5371_v24, %v5369_v49 }
0x1598   : > { %v5389_v32 = vcvt.f32.s32 %v5388_v8 }
0x1599   : > { %v5408_v13 = vpop.xlane.xlu1 %5407  ;;  %5637 = vst.msk [vmem:[%s8869_s18 + $0x8] sm:$0xff] %vm5635_vm6, %v5372_v61  ;;  %vm5418_vm11 = vcmp.eq.s32.totalorder %v8670_v11, %v5372_v61  ;;  %vm5420_vm12 = vcmp.eq.s32.totalorder %v8680_v7, %v5372_v61  ;;  %vm5417_vm13 = vcmp.eq.s32.totalorder %v8667_v28, %v5372_v61  ;;  %vm5419_vm14 = vcmp.eq.s32.totalorder %v8673_v21, %v5372_v61 }
0x159a   : > { %v5392_v12 = vadd.s32 %v5391_v36, %v5389_v32  ;;  %6219 = vmatprep.mubr.msk.f32.mxu0 %vm5418_vm11, %v7097_v35  ;;  %6227 = vmatprep.mubr.msk.f32.mxu1 %vm5420_vm12, %v7097_v35  ;;  %v5409_v62 = vcvt.f32.s32 %v5408_v13 }
0x159b   : > { %6220 = vmatmul.mubr.msk.f32.gmra.mxu0 %vm5417_vm13, %v7097_v35  ;;  %6228 = vmatmul.mubr.msk.f32.gmra.mxu1 %vm5419_vm14, %v7097_v35 }
0x159c   : > { %5638 = vst.msk [vmem:[%s8869_s18 + $0x10] sm:$0xff] %vm5635_vm6, %v5392_v12  ;;  %vm5422_vm15 = vcmp.eq.s32.totalorder %v8670_v11, %v5392_v12  ;;  %vm5424_vm0 = vcmp.eq.s32.totalorder %v8680_v7, %v5392_v12  ;;  %v5412_v9 = vadd.s32 %v5411_v59, %v5409_v62  ;;  %vm5421_vm2 = vcmp.eq.s32.totalorder %v8667_v28, %v5392_v12 }
0x159d   : > { %6221 = vmatprep.mubr.msk.f32.mxu0 %vm5422_vm15, %v7097_v35  ;;  %6229 = vmatprep.mubr.msk.f32.mxu1 %vm5424_vm0, %v7097_v35  ;;  %vm5423_vm3 = vcmp.eq.s32.totalorder %v8673_v21, %v5392_v12 }
0x159e   : > { %5639 = vst.msk [vmem:[%s8869_s18 + $0x18] sm:$0xff] %vm5635_vm6, %v5412_v9  ;;  %vm5426_vm4 = vcmp.eq.s32.totalorder %v8670_v11, %v5412_v9  ;;  %vm5428_vm5 = vcmp.eq.s32.totalorder %v8680_v7, %v5412_v9  ;;  %vm5425_vm7 = vcmp.eq.s32.totalorder %v8667_v28, %v5412_v9  ;;  %vm5427_vm8 = vcmp.eq.s32.totalorder %v8673_v21, %v5412_v9 }
0x159f   : > { %6222 = vmatmul.mubr.msk.f32.gmra.mxu0 %vm5421_vm2, %v7097_v35  ;;  %6230 = vmatmul.mubr.msk.f32.gmra.mxu1 %vm5423_vm3, %v7097_v35 }
0x15a0   : > { %6223 = vmatprep.mubr.msk.f32.mxu0 %vm5426_vm4, %v7097_v35  ;;  %6231 = vmatprep.mubr.msk.f32.mxu1 %vm5428_vm5, %v7097_v35 }
0x15a3   : > { %6224 = vmatmul.mubr.msk.f32.gmra.mxu0 %vm5425_vm7, %v7097_v35  ;;  %6232 = vmatmul.mubr.msk.f32.gmra.mxu1 %vm5427_vm8, %v7097_v35 }
0x1656   : > { %v6621_v25 = vpop.f32.mrf.mxu0  ;;  %v6665_v43 = vpop.f32.mrf.mxu1 }
0x1658   : > { %v6622_v40 = vpop.f32.mrf.mxu0  ;;  %v6666_v26 = vpop.f32.mrf.mxu1 }
0x1659   : > { %v6623_v3 = vadd.f32 %v6622_v40, %v6621_v25  ;;  %v6667_v47 = vadd.f32 %v6666_v26, %v6665_v43 }
0x165b   : > { %v5613_v10 = vadd.f32 %v6667_v47, %v6623_v3  ;;  %v6624_v11 = vpop.f32.mrf.mxu0  ;;  %v6668_v44 = vpop.f32.mrf.mxu1 }
0x165d   : > { %5631 = vst.msk [vmem:[%s8870_s28] sm:$0xff] %vm866_vm1, %v5613_v10  ;;  %v6625_v7 = vpop.f32.mrf.mxu0  ;;  %v6669_v28 = vpop.f32.mrf.mxu1  ;;  %v5640_v21 = vsub.f32 %v5613_v10, %v8062_v0 }
0x165e   : > { %v6626_v39 = vadd.f32 %v6625_v7, %v6624_v11  ;;  %v6670_v51 = vadd.f32 %v6669_v28, %v6668_v44 }
0x165f   : > { %v6627_v58 = vpop.f32.mrf.mxu0  ;;  %v6671_v63 = vpop.f32.mrf.mxu1  ;;  %v5644_v45 = vmul.f32 %v5640_v21, %v5640_v21 }
0x1660   : > { %v5618_v60 = vadd.f32 %v6670_v51, %v6626_v39 }
0x1661   : > { %v6628_v30 = vpop.f32.mrf.mxu0  ;;  %v6672_v31 = vpop.f32.mrf.mxu1  ;;  %v5648_v33 = vsel %vm866_vm1, %v5644_v45, 0.0 }
0x1662   : > { %5632 = vst.msk [vmem:[%s8870_s28 + $0x8] sm:$0xff] %vm866_vm1, %v5618_v60  ;;  %v6629_v42 = vadd.f32 %v6628_v30, %v6627_v58  ;;  %v6673_v38 = vadd.f32 %v6672_v31, %v6671_v63  ;;  %5649 = vadd.xlane.f32.xlu0 %v5648_v33  ;;  %v5641_v0 = vsub.f32 %v5618_v60, %v8069_v2 }
0x1663   : > { %v6630_v57 = vpop.f32.mrf.mxu0  ;;  %v6674_v41 = vpop.f32.mrf.mxu1 }
0x1664   : > { %v5623_v56 = vadd.f32 %v6673_v38, %v6629_v42  ;;  %v5645_v19 = vmul.f32 %v5641_v0, %v5641_v0 }
0x1665   : > { %v6631_v29 = vpop.f32.mrf.mxu0  ;;  %v6675_v27 = vpop.f32.mrf.mxu1 }
0x1666   : > { %5633 = vst.msk [vmem:[%s8870_s28 + $0x10] sm:$0xff] %vm866_vm1, %v5623_v56  ;;  %v6632_v53 = vadd.f32 %v6631_v29, %v6630_v57  ;;  %v6676_v6 = vadd.f32 %v6675_v27, %v6674_v41  ;;  %v5651_v5 = vsel %vm866_vm1, %v5645_v19, 0.0  ;;  %v5642_v14 = vsub.f32 %v5623_v56, %v8076_v16  ;;  %v5661_v16 = vld [vmem:[%s8871_s2 + $0x8] sm:$0xff] }
0x1667   : > { %5652 = vadd.xlane.f32.xlu1 %v5651_v5 }
0x1668   : > { %v5628_v50 = vadd.f32 %v6676_v6, %v6632_v53  ;;  %v5646_v2 = vmul.f32 %v5642_v14, %v5642_v14 }
0x166a   : > { %5634 = vst.msk [vmem:[%s8870_s28 + $0x18] sm:$0xff] %vm866_vm1, %v5628_v50  ;;  %v5654_v23 = vsel %vm866_vm1, %v5646_v2, 0.0  ;;  %v5643_v22 = vsub.f32 %v5628_v50, %v8083_v1  ;;  %v5662_v1 = vld [vmem:[%s8871_s2 + $0x10] sm:$0xff] }
0x166b   : > { %5655 = vadd.xlane.f32.xlu0 %v5654_v23 }
0x166c   : > { %v5647_v34 = vmul.f32 %v5643_v22, %v5643_v22 }
0x166e   : > { %v5657_v20 = vsel %vm866_vm1, %v5647_v34, 0.0  ;;  %vm5681_vm1 = vcmask 0  }
0x166f   : > { %5658 = vadd.xlane.f32.xlu1 %v5657_v20 }
0x16eb   : > { %v5650_v55 = vpop.xlane.xlu0 %5649 }
0x16ec   : > { %v5664_v17 = vmul.f32 %v5660_v54, %v5650_v55 }
0x16ee   : > { %v5668_v24 = vsel %vm5635_vm6, %v5664_v17, 0.0 }
0x16f0   : > { %v5653_v48 = vpop.xlane.xlu1 %5652 }
0x16f1   : > { %v5665_v15 = vmul.f32 %v5661_v16, %v5653_v48 }
0x16f3   : > { %v5669_v46 = vsel %vm5635_vm6, %v5665_v15, 0.0 }
0x16f4   : > { %v5656_v37 = vpop.xlane.xlu0 %5655  ;;  %v5670_v35 = vadd.f32 %v5669_v46, %v5668_v24 }
0x16f5   : > { %v5666_v52 = vmul.f32 %v5662_v1, %v5656_v37 }
0x16f7   : > { %v5671_v49 = vsel %vm5635_vm6, %v5666_v52, 0.0 }
0x16f8   : > { %v5659_v4 = vpop.xlane.xlu1 %5658  ;;  %v5672_v36 = vadd.f32 %v5671_v49, %v5670_v35 }
0x16f9   : > { %v5667_v8 = vmul.f32 %v5663_v18, %v5659_v4 }
0x16fb   : > { %v5673_v61 = vsel %vm5635_vm6, %v5667_v8, 0.0 }
0x16fc   : > { %v5674_v32 = vadd.f32 %v5673_v61, %v5672_v36 }
0x16fe   : > { %v5675_v13 = vrot.slane %v5674_v32, 4 }
0x1700   : > { %v5676_v12 = vadd.f32 %v5675_v13, %v5674_v32 }
0x1702   : > { %v5677_v59 = vrot.slane %v5676_v12, 2 }
0x1704   : > { %v5678_v62 = vadd.f32 %v5677_v59, %v5676_v12 }
0x1706   : > { %v5679_v9 = vrot.slane %v5678_v62, 1 }
0x1708   : > { %v5680_v25 = vadd.f32 %v5679_v9, %v5678_v62 }
0x170a   : > { %5682 = vst.msk [vmem:[#allocation2] sm:$0x1] %vm5681_vm1, %v5680_v25 }
0x170b PF: > { %p6801_p6 = scmp.eq.s32.totalorder %s7210_s22, 3  ;;  %s7098_s4 = smov [#allocation2]  }
0x170c   : > { %s5699_s24 = sshll.u32 %s7098_s4, 4  ;;  %s5700_s24 = int_to_ptr.vmem [resolvable:$true] %s5699_s24 }
0x170d   : > { %s7051_s29 = scalar_lea.vmem %s5700_s24, 16  ;;  %s7057_s1 = scalar_lea.vmem %s5700_s24, 32 }
0x170e   : > { %p7052_p7 = scmp.ne.s32.totalorder %s5700_s24, %s7051_s29  ;;  %p7058_p10 = scmp.lt.s32.totalorder %s5700_s24, %s5700_s24 }
0x170f   : > { %p7059_p11 = scmp.lt.s32.totalorder %s7057_s1, %s7051_s29 }
0x1710   : > { %p7053_p8 = pnand %p7052_p7, %p6801_p6 }
0x1711   : > { %p7060_p12 = por %p7059_p11, %p7058_p10 }
0x1712   : > { %p7054_p9 = pneg %p7053_p8 }
0x1714   : > { %p7061_p13 = pnand %p7060_p12, %p7054_p9 }
0x1716   : > { %7064 = shalt.err (!%p7061_p13)
}
0x1717   : > { %s8872_s21 = sld [smem:[#allocation25_spill]] }
0x171d   : > { %6798 = dma.vmem_to_hbm [thread:$0]  (%p6801_p6), %s5700_s24, 16, %s8872_s21, [#allocation3]  }
0x171e   : > { %7080 = dma.done.wait (%p6801_p6), [#allocation3], 16  }
0x171f   : > { %7082 = vsyncadd (%p6801_p6), [#allocation3], 4294967280 }
0x1720 PF: > { %s8873_s15 = sld [smem:[#allocation5_spill]] }
0x1726   : > { %s32_s1 = sadd.s32 1, %s8873_s15  }
0x1727   : > { %p29_p0 = scmp.ge.s32.totalorder %s32_s1, 6  }
0x1729   :  { %31 = sbr.rel (!%p29_p0) target bundleno = 13 (0xd), region = 180 }
0x172e   :  { %5721 = vsyncpa [#allocation3], 1 }
0x172f   :  { %5723 = vsyncpa [#allocation3 + $0x1], 1 }

</bundles_post_ra>
